<compile_context>
chip_gen: v7x
topology: tpu7x:2x2x1
jax: 0.10.0
libtpu: 0.0.40
codegen_flags: <defaults>
</compile_context>

<pallas_src>
import numpy as np

import jax
import jax.numpy as jnp
from jax.experimental import pallas as pl
from jax.experimental.pallas import tpu as pltpu

EPS = 1e-5          # MinkowskiBatchNorm default eps
NEG_SLOPE = 0.01    # MinkowskiLeakyReLU default negative slope


# ------------------------------ kernel helpers -------------------------------

def _bn(y, g, b):
    # BatchNorm1d over the point axis (training-mode batch stats, biased var),
    # applied per column; packing several BNs side-by-side column-wise is exact.
    mean = jnp.mean(y, axis=0, keepdims=True)
    var = jnp.mean((y - mean) ** 2, axis=0, keepdims=True)
    return (y - mean) * jax.lax.rsqrt(var + EPS) * g + b


def _lrelu(z):
    return jnp.where(z >= 0, z, NEG_SLOPE * z)


# -------------------------------- fused kernel -------------------------------

def fused_attention_kernel(s_win_ref, l_win_ref, m_ref, g_ref,
                           s_w_ref, l_w_ref, cg_ref, cb_ref,
                           w1d_ref, g6_ref, b6_ref, w2_ref, g2_ref, b2_ref,
                           o_ref):
    n = m_ref.shape[0]
    cat = s_w_ref.shape[1] // 27

    # ---- MinkowskiMaxPooling (stride == kernel): window max, layout from wrapper ----
    s_pool = jnp.max(s_win_ref[...], axis=1)       # [N, s_ch]
    l_pool = jnp.max(l_win_ref[...], axis=1)       # [N, l_ch]

    # ---- 3x3x3 zero-padded conv: one weight matmul + 27 one-hot gather matmuls ----
    def conv3(pooled, w_flat):
        # pooled: [N, Cin], w_flat: [Cin, 27*cat] laid out as [c, k*cat + o]
        pw = jnp.dot(pooled, w_flat, preferred_element_type=jnp.float32)  # [N, 27*cat]
        acc = jnp.zeros((n, cat), jnp.float32)
        for k in range(27):
            acc = acc + jnp.dot(g_ref[k], pw[:, k * cat:(k + 1) * cat],
                                preferred_element_type=jnp.float32)
        return acc

    ys = conv3(s_pool, s_w_ref[...])               # s_conv pre-BN
    yl = conv3(l_pool, l_w_ref[...])               # l_conv pre-BN

    # ---- BN + LeakyReLU of both convs packed into 2*cat live lanes ----
    y2 = _lrelu(_bn(jnp.concatenate([ys, yl], axis=1), cg_ref[...], cb_ref[...]))
    s_c = y2[:, :cat]
    l_c = y2[:, cat:2 * cat]
    m = m_ref[...]

    # ---- three ConvBnReLURes(k=1, planes=1, downsample=True) squeezes, packed ----
    # T columns: [s.conv1, s.down, l.conv1, l.down, m.conv1, m.down]
    x = jnp.concatenate([s_c, l_c, m], axis=1)
    t = _bn(jnp.dot(x, w1d_ref[...], preferred_element_type=jnp.float32),
            g6_ref[...], b6_ref[...])                                       # [N, 6]
    h = _lrelu(jnp.concatenate([t[:, 0:1], t[:, 2:3], t[:, 4:5]], axis=1))  # conv1 branch
    res = jnp.concatenate([t[:, 1:2], t[:, 3:4], t[:, 5:6]], axis=1)        # downsample branch
    a = _lrelu(_bn(h * w2_ref[...], g2_ref[...], b2_ref[...]) + res)        # cols: _s, _l, _m

    att_sum = jax.nn.sigmoid(a[:, 2:3] + a[:, 1:2])    # sigmoid(_m + _l)
    att_mul = jax.nn.sigmoid(a[:, 2:3] + a[:, 0:1])    # sigmoid(_m + _s)

    o_ref[...] = jnp.concatenate([m, l_c * att_sum, s_c * att_mul], axis=1)


# ---------------------------------- wrapper -----------------------------------

def _pool_windows(x, k):
    # Layout-only prep for the in-kernel window max (tiny one-time XLA copy).
    B, D, H, W, C = x.shape
    xw = x.reshape(B, D // k, k, H // k, k, W // k, k, C)
    xw = xw.transpose(0, 1, 3, 5, 2, 4, 6, 7)
    return xw.reshape(B * (D // k) * (H // k) * (W // k), k ** 3, C)


def _build_gather(batch, g):
    # One-hot neighbor maps for a 3x3x3 zero-padded conv on a dense B x g^3 grid.
    n = batch * g * g * g
    mats = np.zeros((27, n, n), np.float32)
    k = 0
    for dz in (-1, 0, 1):
        for dy in (-1, 0, 1):
            for dx in (-1, 0, 1):
                for b in range(batch):
                    for z in range(g):
                        zz = z + dz
                        if not (0 <= zz < g):
                            continue
                        for y in range(g):
                            yy = y + dy
                            if not (0 <= yy < g):
                                continue
                            for xx_i in range(g):
                                xx = xx_i + dx
                                if not (0 <= xx < g):
                                    continue
                                p = ((b * g + z) * g + y) * g + xx_i
                                q = ((b * g + zz) * g + yy) * g + xx
                                mats[k, p, q] = 1.0
                k += 1
    return jnp.asarray(mats)


def _pack_params(params, s_ch, l_ch, m_ch, cat_ch):
    # Conv weights: [27, Cin, Cout] -> [Cin, 27*Cout], layout [c, k*Cout + o].
    s_wf = params["s_conv_w"].transpose(1, 0, 2).reshape(s_ch, 27 * cat_ch)
    l_wf = params["l_conv_w"].transpose(1, 0, 2).reshape(l_ch, 27 * cat_ch)
    cg = jnp.concatenate([params["s_conv_g"], params["l_conv_g"]]).reshape(1, -1)
    cb = jnp.concatenate([params["s_conv_b"], params["l_conv_b"]]).reshape(1, -1)

    sqs = [params["s_squeeze"], params["l_squeeze"], params["m_squeeze"]]
    offs = [0, cat_ch, 2 * cat_ch]
    cins = [cat_ch, cat_ch, m_ch]
    w1d = jnp.zeros((2 * cat_ch + m_ch, 6), jnp.float32)   # block-diag [w1 | wd] x3
    g6, b6, w23, g23, b23 = [], [], [], [], []
    for i, (sq, off, cin) in enumerate(zip(sqs, offs, cins)):
        w1d = w1d.at[off:off + cin, 2 * i].set(sq["w1"][:, 0])
        w1d = w1d.at[off:off + cin, 2 * i + 1].set(sq["wd"][:, 0])
        g6 += [sq["g1"][0], sq["gd"][0]]
        b6 += [sq["b1"][0], sq["bd"][0]]
        w23.append(sq["w2"][0, 0])
        g23.append(sq["g2"][0])
        b23.append(sq["b2"][0])
    g6 = jnp.stack(g6).reshape(1, 6)
    b6 = jnp.stack(b6).reshape(1, 6)
    w23 = jnp.stack(w23).reshape(1, 3)
    g23 = jnp.stack(g23).reshape(1, 3)
    b23 = jnp.stack(b23).reshape(1, 3)
    return s_wf, l_wf, cg, cb, w1d, g6, b6, w23, g23, b23


def attention_func_forward(s_feats, l_feats, m_feats, params):
    # s_feats: [B, 2g, 2g, 2g, s_ch], l_feats: [B, 4g, 4g, 4g, l_ch],
    # m_feats: [B, g, g, g, m_ch] -- all aligned to the same coarse lattice.
    B, g = m_feats.shape[0], m_feats.shape[1]
    s_ch, l_ch, m_ch = s_feats.shape[-1], l_feats.shape[-1], m_feats.shape[-1]
    cat_ch = params["s_conv_w"].shape[-1]
    n = B * g * g * g

    s_win = _pool_windows(s_feats, 2)          # [N, 8,  s_ch]
    l_win = _pool_windows(l_feats, 4)          # [N, 64, l_ch]
    m_flat = m_feats.reshape(n, m_ch)
    gather = _build_gather(B, g)               # [27, N, N] one-hot neighbor maps

    packed = _pack_params(params, s_ch, l_ch, m_ch, cat_ch)

    vmem = pl.BlockSpec(memory_space=pltpu.MemorySpace.VMEM)
    # TODO(synk): whole-array residency is required for training-mode batch-norm
    # statistics; an N-tiled grid (for realistic sizes / v7x dual-TC) would need a
    # separate reduction pass for the BN stats.
    return pl.pallas_call(
        fused_attention_kernel,
        out_shape=jax.ShapeDtypeStruct((n, m_ch + 2 * cat_ch), jnp.float32),
        in_specs=[vmem] * (4 + len(packed)),
        out_specs=vmem,
    )(s_win, l_win, m_flat, gather, *packed)


# ----------------------------- parameter init --------------------------------

def init_params(key, l_ch, s_ch, m_ch, cat_ch):
    keys = iter(jax.random.split(key, 64))

    def nrm(shape, scale=0.1):
        return scale * jax.random.normal(next(keys), shape, jnp.float32)

    def squeeze_params(cin):
        return dict(
            w1=nrm((cin, 1)), g1=1.0 + nrm((1,)), b1=nrm((1,)),
            w2=nrm((1, 1)),   g2=1.0 + nrm((1,)), b2=nrm((1,)),
            wd=nrm((cin, 1)), gd=1.0 + nrm((1,)), bd=nrm((1,)),
        )

    return dict(
        l_conv_w=nrm((27, l_ch, cat_ch)),
        l_conv_g=1.0 + nrm((cat_ch,)), l_conv_b=nrm((cat_ch,)),
        s_conv_w=nrm((27, s_ch, cat_ch)),
        s_conv_g=1.0 + nrm((cat_ch,)), s_conv_b=nrm((cat_ch,)),
        l_squeeze=squeeze_params(cat_ch),
        s_squeeze=squeeze_params(cat_ch),
        m_squeeze=squeeze_params(m_ch),
    )


# ---------------------------------- main --------------------------------------

if __name__ == "__main__":
    key = jax.random.PRNGKey(0)
    k1, k2, k3, kp = jax.random.split(key, 4)

    B = 1
    l_ch, s_ch, m_ch, cat_ch = 4, 8, 8, 16
    l_feats = jax.random.normal(k1, (B, 16, 16, 16, l_ch), jnp.float32)
    s_feats = jax.random.normal(k2, (B, 8, 8, 8, s_ch), jnp.float32)
    m_feats = jax.random.normal(k3, (B, 4, 4, 4, m_ch), jnp.float32)

    params = init_params(kp, l_ch, s_ch, m_ch, cat_ch)

    fwd = jax.jit(attention_func_forward)
    out = fwd(s_feats, l_feats, m_feats, params)
    jax.block_until_ready(out)

    assert out.shape == (B * 4 * 4 * 4, m_ch + 2 * cat_ch), out.shape
    assert bool(jnp.all(jnp.isfinite(out)))
    print("KERNEL_OK")
</pallas_src>

<mosaic_0001>
module attributes {stable_mosaic.version = 11 : i64} {
  func.func @fused_attention_kernel(%arg0: memref<64x8x8xf32, #tpu.memory_space<vmem>>, %arg1: memref<64x64x4xf32, #tpu.memory_space<vmem>>, %arg2: memref<64x8xf32, #tpu.memory_space<vmem>>, %arg3: memref<27x64x64xf32, #tpu.memory_space<vmem>>, %arg4: memref<8x432xf32, #tpu.memory_space<vmem>>, %arg5: memref<4x432xf32, #tpu.memory_space<vmem>>, %arg6: memref<1x32xf32, #tpu.memory_space<vmem>>, %arg7: memref<1x32xf32, #tpu.memory_space<vmem>>, %arg8: memref<40x6xf32, #tpu.memory_space<vmem>>, %arg9: memref<1x6xf32, #tpu.memory_space<vmem>>, %arg10: memref<1x6xf32, #tpu.memory_space<vmem>>, %arg11: memref<1x3xf32, #tpu.memory_space<vmem>>, %arg12: memref<1x3xf32, #tpu.memory_space<vmem>>, %arg13: memref<1x3xf32, #tpu.memory_space<vmem>>, %arg14: memref<64x40xf32, #tpu.memory_space<vmem>>) attributes {dimension_semantics = [], scalar_prefetch = 0 : i64, scratch_operands = 0 : i64, tpu.core_type = #tpu.core_type<tc>} {
    %c0 = arith.constant 0 : index
    %c0_0 = arith.constant 0 : index
    %c0_1 = arith.constant 0 : index
    %0 = vector.load %arg0[%c0, %c0_0, %c0_1] : memref<64x8x8xf32, #tpu.memory_space<vmem>>, vector<64x8x8xf32>
    %cst = arith.constant dense<0xFF800000> : vector<64x8xf32>
    %1 = vector.multi_reduction <maximumf>, %0, %cst [1] : vector<64x8x8xf32> to vector<64x8xf32>
    %c0_2 = arith.constant 0 : index
    %c0_3 = arith.constant 0 : index
    %c0_4 = arith.constant 0 : index
    %2 = vector.load %arg1[%c0_2, %c0_3, %c0_4] : memref<64x64x4xf32, #tpu.memory_space<vmem>>, vector<64x64x4xf32>
    %cst_5 = arith.constant dense<0xFF800000> : vector<64x4xf32>
    %3 = vector.multi_reduction <maximumf>, %2, %cst_5 [1] : vector<64x64x4xf32> to vector<64x4xf32>
    %c0_6 = arith.constant 0 : index
    %c0_7 = arith.constant 0 : index
    %4 = vector.load %arg4[%c0_6, %c0_7] : memref<8x432xf32, #tpu.memory_space<vmem>>, vector<8x432xf32>
    %cst_8 = arith.constant dense<0.000000e+00> : vector<64x432xf32>
    %5 = tpu.matmul %1, %4, %cst_8 {dimension_numbers = #tpu.dot_dimension_numbers<[1], [0], [0], [1], [0, 0, 1, 1], [], []>} : vector<64x8xf32>, vector<8x432xf32>, vector<64x432xf32> -> vector<64x432xf32>
    %cst_9 = arith.constant 0.000000e+00 : f32
    %6 = vector.broadcast %cst_9 : f32 to vector<64x16xf32>
    %c0_10 = arith.constant 0 : index
    %c0_11 = arith.constant 0 : index
    %c0_12 = arith.constant 0 : index
    %7 = vector.load %arg3[%c0_10, %c0_11, %c0_12] : memref<27x64x64xf32, #tpu.memory_space<vmem>>, vector<1x64x64xf32>
    %8 = vector.shape_cast %7 : vector<1x64x64xf32> to vector<64x64xf32>
    %9 = vector.extract_strided_slice %5 {offsets = [0, 0], sizes = [64, 16], strides = [1, 1]} : vector<64x432xf32> to vector<64x16xf32>
    %cst_13 = arith.constant dense<0.000000e+00> : vector<64x16xf32>
    %10 = tpu.matmul %8, %9, %cst_13 {dimension_numbers = #tpu.dot_dimension_numbers<[1], [0], [0], [1], [0, 0, 1, 1], [], []>} : vector<64x64xf32>, vector<64x16xf32>, vector<64x16xf32> -> vector<64x16xf32>
    %11 = arith.addf %6, %10 : vector<64x16xf32>
    %c1 = arith.constant 1 : index
    %c0_14 = arith.constant 0 : index
    %c0_15 = arith.constant 0 : index
    %12 = vector.load %arg3[%c1, %c0_14, %c0_15] : memref<27x64x64xf32, #tpu.memory_space<vmem>>, vector<1x64x64xf32>
    %13 = vector.shape_cast %12 : vector<1x64x64xf32> to vector<64x64xf32>
    %14 = vector.extract_strided_slice %5 {offsets = [0, 16], sizes = [64, 16], strides = [1, 1]} : vector<64x432xf32> to vector<64x16xf32>
    %cst_16 = arith.constant dense<0.000000e+00> : vector<64x16xf32>
    %15 = tpu.matmul %13, %14, %cst_16 {dimension_numbers = #tpu.dot_dimension_numbers<[1], [0], [0], [1], [0, 0, 1, 1], [], []>} : vector<64x64xf32>, vector<64x16xf32>, vector<64x16xf32> -> vector<64x16xf32>
    %16 = arith.addf %11, %15 : vector<64x16xf32>
    %c2 = arith.constant 2 : index
    %c0_17 = arith.constant 0 : index
    %c0_18 = arith.constant 0 : index
    %17 = vector.load %arg3[%c2, %c0_17, %c0_18] : memref<27x64x64xf32, #tpu.memory_space<vmem>>, vector<1x64x64xf32>
    %18 = vector.shape_cast %17 : vector<1x64x64xf32> to vector<64x64xf32>
    %19 = vector.extract_strided_slice %5 {offsets = [0, 32], sizes = [64, 16], strides = [1, 1]} : vector<64x432xf32> to vector<64x16xf32>
    %cst_19 = arith.constant dense<0.000000e+00> : vector<64x16xf32>
    %20 = tpu.matmul %18, %19, %cst_19 {dimension_numbers = #tpu.dot_dimension_numbers<[1], [0], [0], [1], [0, 0, 1, 1], [], []>} : vector<64x64xf32>, vector<64x16xf32>, vector<64x16xf32> -> vector<64x16xf32>
    %21 = arith.addf %16, %20 : vector<64x16xf32>
    %c3 = arith.constant 3 : index
    %c0_20 = arith.constant 0 : index
    %c0_21 = arith.constant 0 : index
    %22 = vector.load %arg3[%c3, %c0_20, %c0_21] : memref<27x64x64xf32, #tpu.memory_space<vmem>>, vector<1x64x64xf32>
    %23 = vector.shape_cast %22 : vector<1x64x64xf32> to vector<64x64xf32>
    %24 = vector.extract_strided_slice %5 {offsets = [0, 48], sizes = [64, 16], strides = [1, 1]} : vector<64x432xf32> to vector<64x16xf32>
    %cst_22 = arith.constant dense<0.000000e+00> : vector<64x16xf32>
    %25 = tpu.matmul %23, %24, %cst_22 {dimension_numbers = #tpu.dot_dimension_numbers<[1], [0], [0], [1], [0, 0, 1, 1], [], []>} : vector<64x64xf32>, vector<64x16xf32>, vector<64x16xf32> -> vector<64x16xf32>
    %26 = arith.addf %21, %25 : vector<64x16xf32>
    %c4 = arith.constant 4 : index
    %c0_23 = arith.constant 0 : index
    %c0_24 = arith.constant 0 : index
    %27 = vector.load %arg3[%c4, %c0_23, %c0_24] : memref<27x64x64xf32, #tpu.memory_space<vmem>>, vector<1x64x64xf32>
    %28 = vector.shape_cast %27 : vector<1x64x64xf32> to vector<64x64xf32>
    %29 = vector.extract_strided_slice %5 {offsets = [0, 64], sizes = [64, 16], strides = [1, 1]} : vector<64x432xf32> to vector<64x16xf32>
    %cst_25 = arith.constant dense<0.000000e+00> : vector<64x16xf32>
    %30 = tpu.matmul %28, %29, %cst_25 {dimension_numbers = #tpu.dot_dimension_numbers<[1], [0], [0], [1], [0, 0, 1, 1], [], []>} : vector<64x64xf32>, vector<64x16xf32>, vector<64x16xf32> -> vector<64x16xf32>
    %31 = arith.addf %26, %30 : vector<64x16xf32>
    %c5 = arith.constant 5 : index
    %c0_26 = arith.constant 0 : index
    %c0_27 = arith.constant 0 : index
    %32 = vector.load %arg3[%c5, %c0_26, %c0_27] : memref<27x64x64xf32, #tpu.memory_space<vmem>>, vector<1x64x64xf32>
    %33 = vector.shape_cast %32 : vector<1x64x64xf32> to vector<64x64xf32>
    %34 = vector.extract_strided_slice %5 {offsets = [0, 80], sizes = [64, 16], strides = [1, 1]} : vector<64x432xf32> to vector<64x16xf32>
    %cst_28 = arith.constant dense<0.000000e+00> : vector<64x16xf32>
    %35 = tpu.matmul %33, %34, %cst_28 {dimension_numbers = #tpu.dot_dimension_numbers<[1], [0], [0], [1], [0, 0, 1, 1], [], []>} : vector<64x64xf32>, vector<64x16xf32>, vector<64x16xf32> -> vector<64x16xf32>
    %36 = arith.addf %31, %35 : vector<64x16xf32>
    %c6 = arith.constant 6 : index
    %c0_29 = arith.constant 0 : index
    %c0_30 = arith.constant 0 : index
    %37 = vector.load %arg3[%c6, %c0_29, %c0_30] : memref<27x64x64xf32, #tpu.memory_space<vmem>>, vector<1x64x64xf32>
    %38 = vector.shape_cast %37 : vector<1x64x64xf32> to vector<64x64xf32>
    %39 = vector.extract_strided_slice %5 {offsets = [0, 96], sizes = [64, 16], strides = [1, 1]} : vector<64x432xf32> to vector<64x16xf32>
    %cst_31 = arith.constant dense<0.000000e+00> : vector<64x16xf32>
    %40 = tpu.matmul %38, %39, %cst_31 {dimension_numbers = #tpu.dot_dimension_numbers<[1], [0], [0], [1], [0, 0, 1, 1], [], []>} : vector<64x64xf32>, vector<64x16xf32>, vector<64x16xf32> -> vector<64x16xf32>
    %41 = arith.addf %36, %40 : vector<64x16xf32>
    %c7 = arith.constant 7 : index
    %c0_32 = arith.constant 0 : index
    %c0_33 = arith.constant 0 : index
    %42 = vector.load %arg3[%c7, %c0_32, %c0_33] : memref<27x64x64xf32, #tpu.memory_space<vmem>>, vector<1x64x64xf32>
    %43 = vector.shape_cast %42 : vector<1x64x64xf32> to vector<64x64xf32>
    %44 = vector.extract_strided_slice %5 {offsets = [0, 112], sizes = [64, 16], strides = [1, 1]} : vector<64x432xf32> to vector<64x16xf32>
    %cst_34 = arith.constant dense<0.000000e+00> : vector<64x16xf32>
    %45 = tpu.matmul %43, %44, %cst_34 {dimension_numbers = #tpu.dot_dimension_numbers<[1], [0], [0], [1], [0, 0, 1, 1], [], []>} : vector<64x64xf32>, vector<64x16xf32>, vector<64x16xf32> -> vector<64x16xf32>
    %46 = arith.addf %41, %45 : vector<64x16xf32>
    %c8 = arith.constant 8 : index
    %c0_35 = arith.constant 0 : index
    %c0_36 = arith.constant 0 : index
    %47 = vector.load %arg3[%c8, %c0_35, %c0_36] : memref<27x64x64xf32, #tpu.memory_space<vmem>>, vector<1x64x64xf32>
    %48 = vector.shape_cast %47 : vector<1x64x64xf32> to vector<64x64xf32>
    %49 = vector.extract_strided_slice %5 {offsets = [0, 128], sizes = [64, 16], strides = [1, 1]} : vector<64x432xf32> to vector<64x16xf32>
    %cst_37 = arith.constant dense<0.000000e+00> : vector<64x16xf32>
    %50 = tpu.matmul %48, %49, %cst_37 {dimension_numbers = #tpu.dot_dimension_numbers<[1], [0], [0], [1], [0, 0, 1, 1], [], []>} : vector<64x64xf32>, vector<64x16xf32>, vector<64x16xf32> -> vector<64x16xf32>
    %51 = arith.addf %46, %50 : vector<64x16xf32>
    %c9 = arith.constant 9 : index
    %c0_38 = arith.constant 0 : index
    %c0_39 = arith.constant 0 : index
    %52 = vector.load %arg3[%c9, %c0_38, %c0_39] : memref<27x64x64xf32, #tpu.memory_space<vmem>>, vector<1x64x64xf32>
    %53 = vector.shape_cast %52 : vector<1x64x64xf32> to vector<64x64xf32>
    %54 = vector.extract_strided_slice %5 {offsets = [0, 144], sizes = [64, 16], strides = [1, 1]} : vector<64x432xf32> to vector<64x16xf32>
    %cst_40 = arith.constant dense<0.000000e+00> : vector<64x16xf32>
    %55 = tpu.matmul %53, %54, %cst_40 {dimension_numbers = #tpu.dot_dimension_numbers<[1], [0], [0], [1], [0, 0, 1, 1], [], []>} : vector<64x64xf32>, vector<64x16xf32>, vector<64x16xf32> -> vector<64x16xf32>
    %56 = arith.addf %51, %55 : vector<64x16xf32>
    %c10 = arith.constant 10 : index
    %c0_41 = arith.constant 0 : index
    %c0_42 = arith.constant 0 : index
    %57 = vector.load %arg3[%c10, %c0_41, %c0_42] : memref<27x64x64xf32, #tpu.memory_space<vmem>>, vector<1x64x64xf32>
    %58 = vector.shape_cast %57 : vector<1x64x64xf32> to vector<64x64xf32>
    %59 = vector.extract_strided_slice %5 {offsets = [0, 160], sizes = [64, 16], strides = [1, 1]} : vector<64x432xf32> to vector<64x16xf32>
    %cst_43 = arith.constant dense<0.000000e+00> : vector<64x16xf32>
    %60 = tpu.matmul %58, %59, %cst_43 {dimension_numbers = #tpu.dot_dimension_numbers<[1], [0], [0], [1], [0, 0, 1, 1], [], []>} : vector<64x64xf32>, vector<64x16xf32>, vector<64x16xf32> -> vector<64x16xf32>
    %61 = arith.addf %56, %60 : vector<64x16xf32>
    %c11 = arith.constant 11 : index
    %c0_44 = arith.constant 0 : index
    %c0_45 = arith.constant 0 : index
    %62 = vector.load %arg3[%c11, %c0_44, %c0_45] : memref<27x64x64xf32, #tpu.memory_space<vmem>>, vector<1x64x64xf32>
    %63 = vector.shape_cast %62 : vector<1x64x64xf32> to vector<64x64xf32>
    %64 = vector.extract_strided_slice %5 {offsets = [0, 176], sizes = [64, 16], strides = [1, 1]} : vector<64x432xf32> to vector<64x16xf32>
    %cst_46 = arith.constant dense<0.000000e+00> : vector<64x16xf32>
    %65 = tpu.matmul %63, %64, %cst_46 {dimension_numbers = #tpu.dot_dimension_numbers<[1], [0], [0], [1], [0, 0, 1, 1], [], []>} : vector<64x64xf32>, vector<64x16xf32>, vector<64x16xf32> -> vector<64x16xf32>
    %66 = arith.addf %61, %65 : vector<64x16xf32>
    %c12 = arith.constant 12 : index
    %c0_47 = arith.constant 0 : index
    %c0_48 = arith.constant 0 : index
    %67 = vector.load %arg3[%c12, %c0_47, %c0_48] : memref<27x64x64xf32, #tpu.memory_space<vmem>>, vector<1x64x64xf32>
    %68 = vector.shape_cast %67 : vector<1x64x64xf32> to vector<64x64xf32>
    %69 = vector.extract_strided_slice %5 {offsets = [0, 192], sizes = [64, 16], strides = [1, 1]} : vector<64x432xf32> to vector<64x16xf32>
    %cst_49 = arith.constant dense<0.000000e+00> : vector<64x16xf32>
    %70 = tpu.matmul %68, %69, %cst_49 {dimension_numbers = #tpu.dot_dimension_numbers<[1], [0], [0], [1], [0, 0, 1, 1], [], []>} : vector<64x64xf32>, vector<64x16xf32>, vector<64x16xf32> -> vector<64x16xf32>
    %71 = arith.addf %66, %70 : vector<64x16xf32>
    %c13 = arith.constant 13 : index
    %c0_50 = arith.constant 0 : index
    %c0_51 = arith.constant 0 : index
    %72 = vector.load %arg3[%c13, %c0_50, %c0_51] : memref<27x64x64xf32, #tpu.memory_space<vmem>>, vector<1x64x64xf32>
    %73 = vector.shape_cast %72 : vector<1x64x64xf32> to vector<64x64xf32>
    %74 = vector.extract_strided_slice %5 {offsets = [0, 208], sizes = [64, 16], strides = [1, 1]} : vector<64x432xf32> to vector<64x16xf32>
    %cst_52 = arith.constant dense<0.000000e+00> : vector<64x16xf32>
    %75 = tpu.matmul %73, %74, %cst_52 {dimension_numbers = #tpu.dot_dimension_numbers<[1], [0], [0], [1], [0, 0, 1, 1], [], []>} : vector<64x64xf32>, vector<64x16xf32>, vector<64x16xf32> -> vector<64x16xf32>
    %76 = arith.addf %71, %75 : vector<64x16xf32>
    %c14 = arith.constant 14 : index
    %c0_53 = arith.constant 0 : index
    %c0_54 = arith.constant 0 : index
    %77 = vector.load %arg3[%c14, %c0_53, %c0_54] : memref<27x64x64xf32, #tpu.memory_space<vmem>>, vector<1x64x64xf32>
    %78 = vector.shape_cast %77 : vector<1x64x64xf32> to vector<64x64xf32>
    %79 = vector.extract_strided_slice %5 {offsets = [0, 224], sizes = [64, 16], strides = [1, 1]} : vector<64x432xf32> to vector<64x16xf32>
    %cst_55 = arith.constant dense<0.000000e+00> : vector<64x16xf32>
    %80 = tpu.matmul %78, %79, %cst_55 {dimension_numbers = #tpu.dot_dimension_numbers<[1], [0], [0], [1], [0, 0, 1, 1], [], []>} : vector<64x64xf32>, vector<64x16xf32>, vector<64x16xf32> -> vector<64x16xf32>
    %81 = arith.addf %76, %80 : vector<64x16xf32>
    %c15 = arith.constant 15 : index
    %c0_56 = arith.constant 0 : index
    %c0_57 = arith.constant 0 : index
    %82 = vector.load %arg3[%c15, %c0_56, %c0_57] : memref<27x64x64xf32, #tpu.memory_space<vmem>>, vector<1x64x64xf32>
    %83 = vector.shape_cast %82 : vector<1x64x64xf32> to vector<64x64xf32>
    %84 = vector.extract_strided_slice %5 {offsets = [0, 240], sizes = [64, 16], strides = [1, 1]} : vector<64x432xf32> to vector<64x16xf32>
    %cst_58 = arith.constant dense<0.000000e+00> : vector<64x16xf32>
    %85 = tpu.matmul %83, %84, %cst_58 {dimension_numbers = #tpu.dot_dimension_numbers<[1], [0], [0], [1], [0, 0, 1, 1], [], []>} : vector<64x64xf32>, vector<64x16xf32>, vector<64x16xf32> -> vector<64x16xf32>
    %86 = arith.addf %81, %85 : vector<64x16xf32>
    %c16 = arith.constant 16 : index
    %c0_59 = arith.constant 0 : index
    %c0_60 = arith.constant 0 : index
    %87 = vector.load %arg3[%c16, %c0_59, %c0_60] : memref<27x64x64xf32, #tpu.memory_space<vmem>>, vector<1x64x64xf32>
    %88 = vector.shape_cast %87 : vector<1x64x64xf32> to vector<64x64xf32>
    %89 = vector.extract_strided_slice %5 {offsets = [0, 256], sizes = [64, 16], strides = [1, 1]} : vector<64x432xf32> to vector<64x16xf32>
    %cst_61 = arith.constant dense<0.000000e+00> : vector<64x16xf32>
    %90 = tpu.matmul %88, %89, %cst_61 {dimension_numbers = #tpu.dot_dimension_numbers<[1], [0], [0], [1], [0, 0, 1, 1], [], []>} : vector<64x64xf32>, vector<64x16xf32>, vector<64x16xf32> -> vector<64x16xf32>
    %91 = arith.addf %86, %90 : vector<64x16xf32>
    %c17 = arith.constant 17 : index
    %c0_62 = arith.constant 0 : index
    %c0_63 = arith.constant 0 : index
    %92 = vector.load %arg3[%c17, %c0_62, %c0_63] : memref<27x64x64xf32, #tpu.memory_space<vmem>>, vector<1x64x64xf32>
    %93 = vector.shape_cast %92 : vector<1x64x64xf32> to vector<64x64xf32>
    %94 = vector.extract_strided_slice %5 {offsets = [0, 272], sizes = [64, 16], strides = [1, 1]} : vector<64x432xf32> to vector<64x16xf32>
    %cst_64 = arith.constant dense<0.000000e+00> : vector<64x16xf32>
    %95 = tpu.matmul %93, %94, %cst_64 {dimension_numbers = #tpu.dot_dimension_numbers<[1], [0], [0], [1], [0, 0, 1, 1], [], []>} : vector<64x64xf32>, vector<64x16xf32>, vector<64x16xf32> -> vector<64x16xf32>
    %96 = arith.addf %91, %95 : vector<64x16xf32>
    %c18 = arith.constant 18 : index
    %c0_65 = arith.constant 0 : index
    %c0_66 = arith.constant 0 : index
    %97 = vector.load %arg3[%c18, %c0_65, %c0_66] : memref<27x64x64xf32, #tpu.memory_space<vmem>>, vector<1x64x64xf32>
    %98 = vector.shape_cast %97 : vector<1x64x64xf32> to vector<64x64xf32>
    %99 = vector.extract_strided_slice %5 {offsets = [0, 288], sizes = [64, 16], strides = [1, 1]} : vector<64x432xf32> to vector<64x16xf32>
    %cst_67 = arith.constant dense<0.000000e+00> : vector<64x16xf32>
    %100 = tpu.matmul %98, %99, %cst_67 {dimension_numbers = #tpu.dot_dimension_numbers<[1], [0], [0], [1], [0, 0, 1, 1], [], []>} : vector<64x64xf32>, vector<64x16xf32>, vector<64x16xf32> -> vector<64x16xf32>
    %101 = arith.addf %96, %100 : vector<64x16xf32>
    %c19 = arith.constant 19 : index
    %c0_68 = arith.constant 0 : index
    %c0_69 = arith.constant 0 : index
    %102 = vector.load %arg3[%c19, %c0_68, %c0_69] : memref<27x64x64xf32, #tpu.memory_space<vmem>>, vector<1x64x64xf32>
    %103 = vector.shape_cast %102 : vector<1x64x64xf32> to vector<64x64xf32>
    %104 = vector.extract_strided_slice %5 {offsets = [0, 304], sizes = [64, 16], strides = [1, 1]} : vector<64x432xf32> to vector<64x16xf32>
    %cst_70 = arith.constant dense<0.000000e+00> : vector<64x16xf32>
    %105 = tpu.matmul %103, %104, %cst_70 {dimension_numbers = #tpu.dot_dimension_numbers<[1], [0], [0], [1], [0, 0, 1, 1], [], []>} : vector<64x64xf32>, vector<64x16xf32>, vector<64x16xf32> -> vector<64x16xf32>
    %106 = arith.addf %101, %105 : vector<64x16xf32>
    %c20 = arith.constant 20 : index
    %c0_71 = arith.constant 0 : index
    %c0_72 = arith.constant 0 : index
    %107 = vector.load %arg3[%c20, %c0_71, %c0_72] : memref<27x64x64xf32, #tpu.memory_space<vmem>>, vector<1x64x64xf32>
    %108 = vector.shape_cast %107 : vector<1x64x64xf32> to vector<64x64xf32>
    %109 = vector.extract_strided_slice %5 {offsets = [0, 320], sizes = [64, 16], strides = [1, 1]} : vector<64x432xf32> to vector<64x16xf32>
    %cst_73 = arith.constant dense<0.000000e+00> : vector<64x16xf32>
    %110 = tpu.matmul %108, %109, %cst_73 {dimension_numbers = #tpu.dot_dimension_numbers<[1], [0], [0], [1], [0, 0, 1, 1], [], []>} : vector<64x64xf32>, vector<64x16xf32>, vector<64x16xf32> -> vector<64x16xf32>
    %111 = arith.addf %106, %110 : vector<64x16xf32>
    %c21 = arith.constant 21 : index
    %c0_74 = arith.constant 0 : index
    %c0_75 = arith.constant 0 : index
    %112 = vector.load %arg3[%c21, %c0_74, %c0_75] : memref<27x64x64xf32, #tpu.memory_space<vmem>>, vector<1x64x64xf32>
    %113 = vector.shape_cast %112 : vector<1x64x64xf32> to vector<64x64xf32>
    %114 = vector.extract_strided_slice %5 {offsets = [0, 336], sizes = [64, 16], strides = [1, 1]} : vector<64x432xf32> to vector<64x16xf32>
    %cst_76 = arith.constant dense<0.000000e+00> : vector<64x16xf32>
    %115 = tpu.matmul %113, %114, %cst_76 {dimension_numbers = #tpu.dot_dimension_numbers<[1], [0], [0], [1], [0, 0, 1, 1], [], []>} : vector<64x64xf32>, vector<64x16xf32>, vector<64x16xf32> -> vector<64x16xf32>
    %116 = arith.addf %111, %115 : vector<64x16xf32>
    %c22 = arith.constant 22 : index
    %c0_77 = arith.constant 0 : index
    %c0_78 = arith.constant 0 : index
    %117 = vector.load %arg3[%c22, %c0_77, %c0_78] : memref<27x64x64xf32, #tpu.memory_space<vmem>>, vector<1x64x64xf32>
    %118 = vector.shape_cast %117 : vector<1x64x64xf32> to vector<64x64xf32>
    %119 = vector.extract_strided_slice %5 {offsets = [0, 352], sizes = [64, 16], strides = [1, 1]} : vector<64x432xf32> to vector<64x16xf32>
    %cst_79 = arith.constant dense<0.000000e+00> : vector<64x16xf32>
    %120 = tpu.matmul %118, %119, %cst_79 {dimension_numbers = #tpu.dot_dimension_numbers<[1], [0], [0], [1], [0, 0, 1, 1], [], []>} : vector<64x64xf32>, vector<64x16xf32>, vector<64x16xf32> -> vector<64x16xf32>
    %121 = arith.addf %116, %120 : vector<64x16xf32>
    %c23 = arith.constant 23 : index
    %c0_80 = arith.constant 0 : index
    %c0_81 = arith.constant 0 : index
    %122 = vector.load %arg3[%c23, %c0_80, %c0_81] : memref<27x64x64xf32, #tpu.memory_space<vmem>>, vector<1x64x64xf32>
    %123 = vector.shape_cast %122 : vector<1x64x64xf32> to vector<64x64xf32>
    %124 = vector.extract_strided_slice %5 {offsets = [0, 368], sizes = [64, 16], strides = [1, 1]} : vector<64x432xf32> to vector<64x16xf32>
    %cst_82 = arith.constant dense<0.000000e+00> : vector<64x16xf32>
    %125 = tpu.matmul %123, %124, %cst_82 {dimension_numbers = #tpu.dot_dimension_numbers<[1], [0], [0], [1], [0, 0, 1, 1], [], []>} : vector<64x64xf32>, vector<64x16xf32>, vector<64x16xf32> -> vector<64x16xf32>
    %126 = arith.addf %121, %125 : vector<64x16xf32>
    %c24 = arith.constant 24 : index
    %c0_83 = arith.constant 0 : index
    %c0_84 = arith.constant 0 : index
    %127 = vector.load %arg3[%c24, %c0_83, %c0_84] : memref<27x64x64xf32, #tpu.memory_space<vmem>>, vector<1x64x64xf32>
    %128 = vector.shape_cast %127 : vector<1x64x64xf32> to vector<64x64xf32>
    %129 = vector.extract_strided_slice %5 {offsets = [0, 384], sizes = [64, 16], strides = [1, 1]} : vector<64x432xf32> to vector<64x16xf32>
    %cst_85 = arith.constant dense<0.000000e+00> : vector<64x16xf32>
    %130 = tpu.matmul %128, %129, %cst_85 {dimension_numbers = #tpu.dot_dimension_numbers<[1], [0], [0], [1], [0, 0, 1, 1], [], []>} : vector<64x64xf32>, vector<64x16xf32>, vector<64x16xf32> -> vector<64x16xf32>
    %131 = arith.addf %126, %130 : vector<64x16xf32>
    %c25 = arith.constant 25 : index
    %c0_86 = arith.constant 0 : index
    %c0_87 = arith.constant 0 : index
    %132 = vector.load %arg3[%c25, %c0_86, %c0_87] : memref<27x64x64xf32, #tpu.memory_space<vmem>>, vector<1x64x64xf32>
    %133 = vector.shape_cast %132 : vector<1x64x64xf32> to vector<64x64xf32>
    %134 = vector.extract_strided_slice %5 {offsets = [0, 400], sizes = [64, 16], strides = [1, 1]} : vector<64x432xf32> to vector<64x16xf32>
    %cst_88 = arith.constant dense<0.000000e+00> : vector<64x16xf32>
    %135 = tpu.matmul %133, %134, %cst_88 {dimension_numbers = #tpu.dot_dimension_numbers<[1], [0], [0], [1], [0, 0, 1, 1], [], []>} : vector<64x64xf32>, vector<64x16xf32>, vector<64x16xf32> -> vector<64x16xf32>
    %136 = arith.addf %131, %135 : vector<64x16xf32>
    %c26 = arith.constant 26 : index
    %c0_89 = arith.constant 0 : index
    %c0_90 = arith.constant 0 : index
    %137 = vector.load %arg3[%c26, %c0_89, %c0_90] : memref<27x64x64xf32, #tpu.memory_space<vmem>>, vector<1x64x64xf32>
    %138 = vector.shape_cast %137 : vector<1x64x64xf32> to vector<64x64xf32>
    %139 = vector.extract_strided_slice %5 {offsets = [0, 416], sizes = [64, 16], strides = [1, 1]} : vector<64x432xf32> to vector<64x16xf32>
    %cst_91 = arith.constant dense<0.000000e+00> : vector<64x16xf32>
    %140 = tpu.matmul %138, %139, %cst_91 {dimension_numbers = #tpu.dot_dimension_numbers<[1], [0], [0], [1], [0, 0, 1, 1], [], []>} : vector<64x64xf32>, vector<64x16xf32>, vector<64x16xf32> -> vector<64x16xf32>
    %141 = arith.addf %136, %140 : vector<64x16xf32>
    %c0_92 = arith.constant 0 : index
    %c0_93 = arith.constant 0 : index
    %142 = vector.load %arg5[%c0_92, %c0_93] : memref<4x432xf32, #tpu.memory_space<vmem>>, vector<4x432xf32>
    %cst_94 = arith.constant dense<0.000000e+00> : vector<64x432xf32>
    %143 = tpu.matmul %3, %142, %cst_94 {dimension_numbers = #tpu.dot_dimension_numbers<[1], [0], [0], [1], [0, 0, 1, 1], [], []>} : vector<64x4xf32>, vector<4x432xf32>, vector<64x432xf32> -> vector<64x432xf32>
    %cst_95 = arith.constant 0.000000e+00 : f32
    %144 = vector.broadcast %cst_95 : f32 to vector<64x16xf32>
    %c0_96 = arith.constant 0 : index
    %c0_97 = arith.constant 0 : index
    %c0_98 = arith.constant 0 : index
    %145 = vector.load %arg3[%c0_96, %c0_97, %c0_98] : memref<27x64x64xf32, #tpu.memory_space<vmem>>, vector<1x64x64xf32>
    %146 = vector.shape_cast %145 : vector<1x64x64xf32> to vector<64x64xf32>
    %147 = vector.extract_strided_slice %143 {offsets = [0, 0], sizes = [64, 16], strides = [1, 1]} : vector<64x432xf32> to vector<64x16xf32>
    %cst_99 = arith.constant dense<0.000000e+00> : vector<64x16xf32>
    %148 = tpu.matmul %146, %147, %cst_99 {dimension_numbers = #tpu.dot_dimension_numbers<[1], [0], [0], [1], [0, 0, 1, 1], [], []>} : vector<64x64xf32>, vector<64x16xf32>, vector<64x16xf32> -> vector<64x16xf32>
    %149 = arith.addf %144, %148 : vector<64x16xf32>
    %c1_100 = arith.constant 1 : index
    %c0_101 = arith.constant 0 : index
    %c0_102 = arith.constant 0 : index
    %150 = vector.load %arg3[%c1_100, %c0_101, %c0_102] : memref<27x64x64xf32, #tpu.memory_space<vmem>>, vector<1x64x64xf32>
    %151 = vector.shape_cast %150 : vector<1x64x64xf32> to vector<64x64xf32>
    %152 = vector.extract_strided_slice %143 {offsets = [0, 16], sizes = [64, 16], strides = [1, 1]} : vector<64x432xf32> to vector<64x16xf32>
    %cst_103 = arith.constant dense<0.000000e+00> : vector<64x16xf32>
    %153 = tpu.matmul %151, %152, %cst_103 {dimension_numbers = #tpu.dot_dimension_numbers<[1], [0], [0], [1], [0, 0, 1, 1], [], []>} : vector<64x64xf32>, vector<64x16xf32>, vector<64x16xf32> -> vector<64x16xf32>
    %154 = arith.addf %149, %153 : vector<64x16xf32>
    %c2_104 = arith.constant 2 : index
    %c0_105 = arith.constant 0 : index
    %c0_106 = arith.constant 0 : index
    %155 = vector.load %arg3[%c2_104, %c0_105, %c0_106] : memref<27x64x64xf32, #tpu.memory_space<vmem>>, vector<1x64x64xf32>
    %156 = vector.shape_cast %155 : vector<1x64x64xf32> to vector<64x64xf32>
    %157 = vector.extract_strided_slice %143 {offsets = [0, 32], sizes = [64, 16], strides = [1, 1]} : vector<64x432xf32> to vector<64x16xf32>
    %cst_107 = arith.constant dense<0.000000e+00> : vector<64x16xf32>
    %158 = tpu.matmul %156, %157, %cst_107 {dimension_numbers = #tpu.dot_dimension_numbers<[1], [0], [0], [1], [0, 0, 1, 1], [], []>} : vector<64x64xf32>, vector<64x16xf32>, vector<64x16xf32> -> vector<64x16xf32>
    %159 = arith.addf %154, %158 : vector<64x16xf32>
    %c3_108 = arith.constant 3 : index
    %c0_109 = arith.constant 0 : index
    %c0_110 = arith.constant 0 : index
    %160 = vector.load %arg3[%c3_108, %c0_109, %c0_110] : memref<27x64x64xf32, #tpu.memory_space<vmem>>, vector<1x64x64xf32>
    %161 = vector.shape_cast %160 : vector<1x64x64xf32> to vector<64x64xf32>
    %162 = vector.extract_strided_slice %143 {offsets = [0, 48], sizes = [64, 16], strides = [1, 1]} : vector<64x432xf32> to vector<64x16xf32>
    %cst_111 = arith.constant dense<0.000000e+00> : vector<64x16xf32>
    %163 = tpu.matmul %161, %162, %cst_111 {dimension_numbers = #tpu.dot_dimension_numbers<[1], [0], [0], [1], [0, 0, 1, 1], [], []>} : vector<64x64xf32>, vector<64x16xf32>, vector<64x16xf32> -> vector<64x16xf32>
    %164 = arith.addf %159, %163 : vector<64x16xf32>
    %c4_112 = arith.constant 4 : index
    %c0_113 = arith.constant 0 : index
    %c0_114 = arith.constant 0 : index
    %165 = vector.load %arg3[%c4_112, %c0_113, %c0_114] : memref<27x64x64xf32, #tpu.memory_space<vmem>>, vector<1x64x64xf32>
    %166 = vector.shape_cast %165 : vector<1x64x64xf32> to vector<64x64xf32>
    %167 = vector.extract_strided_slice %143 {offsets = [0, 64], sizes = [64, 16], strides = [1, 1]} : vector<64x432xf32> to vector<64x16xf32>
    %cst_115 = arith.constant dense<0.000000e+00> : vector<64x16xf32>
    %168 = tpu.matmul %166, %167, %cst_115 {dimension_numbers = #tpu.dot_dimension_numbers<[1], [0], [0], [1], [0, 0, 1, 1], [], []>} : vector<64x64xf32>, vector<64x16xf32>, vector<64x16xf32> -> vector<64x16xf32>
    %169 = arith.addf %164, %168 : vector<64x16xf32>
    %c5_116 = arith.constant 5 : index
    %c0_117 = arith.constant 0 : index
    %c0_118 = arith.constant 0 : index
    %170 = vector.load %arg3[%c5_116, %c0_117, %c0_118] : memref<27x64x64xf32, #tpu.memory_space<vmem>>, vector<1x64x64xf32>
    %171 = vector.shape_cast %170 : vector<1x64x64xf32> to vector<64x64xf32>
    %172 = vector.extract_strided_slice %143 {offsets = [0, 80], sizes = [64, 16], strides = [1, 1]} : vector<64x432xf32> to vector<64x16xf32>
    %cst_119 = arith.constant dense<0.000000e+00> : vector<64x16xf32>
    %173 = tpu.matmul %171, %172, %cst_119 {dimension_numbers = #tpu.dot_dimension_numbers<[1], [0], [0], [1], [0, 0, 1, 1], [], []>} : vector<64x64xf32>, vector<64x16xf32>, vector<64x16xf32> -> vector<64x16xf32>
    %174 = arith.addf %169, %173 : vector<64x16xf32>
    %c6_120 = arith.constant 6 : index
    %c0_121 = arith.constant 0 : index
    %c0_122 = arith.constant 0 : index
    %175 = vector.load %arg3[%c6_120, %c0_121, %c0_122] : memref<27x64x64xf32, #tpu.memory_space<vmem>>, vector<1x64x64xf32>
    %176 = vector.shape_cast %175 : vector<1x64x64xf32> to vector<64x64xf32>
    %177 = vector.extract_strided_slice %143 {offsets = [0, 96], sizes = [64, 16], strides = [1, 1]} : vector<64x432xf32> to vector<64x16xf32>
    %cst_123 = arith.constant dense<0.000000e+00> : vector<64x16xf32>
    %178 = tpu.matmul %176, %177, %cst_123 {dimension_numbers = #tpu.dot_dimension_numbers<[1], [0], [0], [1], [0, 0, 1, 1], [], []>} : vector<64x64xf32>, vector<64x16xf32>, vector<64x16xf32> -> vector<64x16xf32>
    %179 = arith.addf %174, %178 : vector<64x16xf32>
    %c7_124 = arith.constant 7 : index
    %c0_125 = arith.constant 0 : index
    %c0_126 = arith.constant 0 : index
    %180 = vector.load %arg3[%c7_124, %c0_125, %c0_126] : memref<27x64x64xf32, #tpu.memory_space<vmem>>, vector<1x64x64xf32>
    %181 = vector.shape_cast %180 : vector<1x64x64xf32> to vector<64x64xf32>
    %182 = vector.extract_strided_slice %143 {offsets = [0, 112], sizes = [64, 16], strides = [1, 1]} : vector<64x432xf32> to vector<64x16xf32>
    %cst_127 = arith.constant dense<0.000000e+00> : vector<64x16xf32>
    %183 = tpu.matmul %181, %182, %cst_127 {dimension_numbers = #tpu.dot_dimension_numbers<[1], [0], [0], [1], [0, 0, 1, 1], [], []>} : vector<64x64xf32>, vector<64x16xf32>, vector<64x16xf32> -> vector<64x16xf32>
    %184 = arith.addf %179, %183 : vector<64x16xf32>
    %c8_128 = arith.constant 8 : index
    %c0_129 = arith.constant 0 : index
    %c0_130 = arith.constant 0 : index
    %185 = vector.load %arg3[%c8_128, %c0_129, %c0_130] : memref<27x64x64xf32, #tpu.memory_space<vmem>>, vector<1x64x64xf32>
    %186 = vector.shape_cast %185 : vector<1x64x64xf32> to vector<64x64xf32>
    %187 = vector.extract_strided_slice %143 {offsets = [0, 128], sizes = [64, 16], strides = [1, 1]} : vector<64x432xf32> to vector<64x16xf32>
    %cst_131 = arith.constant dense<0.000000e+00> : vector<64x16xf32>
    %188 = tpu.matmul %186, %187, %cst_131 {dimension_numbers = #tpu.dot_dimension_numbers<[1], [0], [0], [1], [0, 0, 1, 1], [], []>} : vector<64x64xf32>, vector<64x16xf32>, vector<64x16xf32> -> vector<64x16xf32>
    %189 = arith.addf %184, %188 : vector<64x16xf32>
    %c9_132 = arith.constant 9 : index
    %c0_133 = arith.constant 0 : index
    %c0_134 = arith.constant 0 : index
    %190 = vector.load %arg3[%c9_132, %c0_133, %c0_134] : memref<27x64x64xf32, #tpu.memory_space<vmem>>, vector<1x64x64xf32>
    %191 = vector.shape_cast %190 : vector<1x64x64xf32> to vector<64x64xf32>
    %192 = vector.extract_strided_slice %143 {offsets = [0, 144], sizes = [64, 16], strides = [1, 1]} : vector<64x432xf32> to vector<64x16xf32>
    %cst_135 = arith.constant dense<0.000000e+00> : vector<64x16xf32>
    %193 = tpu.matmul %191, %192, %cst_135 {dimension_numbers = #tpu.dot_dimension_numbers<[1], [0], [0], [1], [0, 0, 1, 1], [], []>} : vector<64x64xf32>, vector<64x16xf32>, vector<64x16xf32> -> vector<64x16xf32>
    %194 = arith.addf %189, %193 : vector<64x16xf32>
    %c10_136 = arith.constant 10 : index
    %c0_137 = arith.constant 0 : index
    %c0_138 = arith.constant 0 : index
    %195 = vector.load %arg3[%c10_136, %c0_137, %c0_138] : memref<27x64x64xf32, #tpu.memory_space<vmem>>, vector<1x64x64xf32>
    %196 = vector.shape_cast %195 : vector<1x64x64xf32> to vector<64x64xf32>
    %197 = vector.extract_strided_slice %143 {offsets = [0, 160], sizes = [64, 16], strides = [1, 1]} : vector<64x432xf32> to vector<64x16xf32>
    %cst_139 = arith.constant dense<0.000000e+00> : vector<64x16xf32>
    %198 = tpu.matmul %196, %197, %cst_139 {dimension_numbers = #tpu.dot_dimension_numbers<[1], [0], [0], [1], [0, 0, 1, 1], [], []>} : vector<64x64xf32>, vector<64x16xf32>, vector<64x16xf32> -> vector<64x16xf32>
    %199 = arith.addf %194, %198 : vector<64x16xf32>
    %c11_140 = arith.constant 11 : index
    %c0_141 = arith.constant 0 : index
    %c0_142 = arith.constant 0 : index
    %200 = vector.load %arg3[%c11_140, %c0_141, %c0_142] : memref<27x64x64xf32, #tpu.memory_space<vmem>>, vector<1x64x64xf32>
    %201 = vector.shape_cast %200 : vector<1x64x64xf32> to vector<64x64xf32>
    %202 = vector.extract_strided_slice %143 {offsets = [0, 176], sizes = [64, 16], strides = [1, 1]} : vector<64x432xf32> to vector<64x16xf32>
    %cst_143 = arith.constant dense<0.000000e+00> : vector<64x16xf32>
    %203 = tpu.matmul %201, %202, %cst_143 {dimension_numbers = #tpu.dot_dimension_numbers<[1], [0], [0], [1], [0, 0, 1, 1], [], []>} : vector<64x64xf32>, vector<64x16xf32>, vector<64x16xf32> -> vector<64x16xf32>
    %204 = arith.addf %199, %203 : vector<64x16xf32>
    %c12_144 = arith.constant 12 : index
    %c0_145 = arith.constant 0 : index
    %c0_146 = arith.constant 0 : index
    %205 = vector.load %arg3[%c12_144, %c0_145, %c0_146] : memref<27x64x64xf32, #tpu.memory_space<vmem>>, vector<1x64x64xf32>
    %206 = vector.shape_cast %205 : vector<1x64x64xf32> to vector<64x64xf32>
    %207 = vector.extract_strided_slice %143 {offsets = [0, 192], sizes = [64, 16], strides = [1, 1]} : vector<64x432xf32> to vector<64x16xf32>
    %cst_147 = arith.constant dense<0.000000e+00> : vector<64x16xf32>
    %208 = tpu.matmul %206, %207, %cst_147 {dimension_numbers = #tpu.dot_dimension_numbers<[1], [0], [0], [1], [0, 0, 1, 1], [], []>} : vector<64x64xf32>, vector<64x16xf32>, vector<64x16xf32> -> vector<64x16xf32>
    %209 = arith.addf %204, %208 : vector<64x16xf32>
    %c13_148 = arith.constant 13 : index
    %c0_149 = arith.constant 0 : index
    %c0_150 = arith.constant 0 : index
    %210 = vector.load %arg3[%c13_148, %c0_149, %c0_150] : memref<27x64x64xf32, #tpu.memory_space<vmem>>, vector<1x64x64xf32>
    %211 = vector.shape_cast %210 : vector<1x64x64xf32> to vector<64x64xf32>
    %212 = vector.extract_strided_slice %143 {offsets = [0, 208], sizes = [64, 16], strides = [1, 1]} : vector<64x432xf32> to vector<64x16xf32>
    %cst_151 = arith.constant dense<0.000000e+00> : vector<64x16xf32>
    %213 = tpu.matmul %211, %212, %cst_151 {dimension_numbers = #tpu.dot_dimension_numbers<[1], [0], [0], [1], [0, 0, 1, 1], [], []>} : vector<64x64xf32>, vector<64x16xf32>, vector<64x16xf32> -> vector<64x16xf32>
    %214 = arith.addf %209, %213 : vector<64x16xf32>
    %c14_152 = arith.constant 14 : index
    %c0_153 = arith.constant 0 : index
    %c0_154 = arith.constant 0 : index
    %215 = vector.load %arg3[%c14_152, %c0_153, %c0_154] : memref<27x64x64xf32, #tpu.memory_space<vmem>>, vector<1x64x64xf32>
    %216 = vector.shape_cast %215 : vector<1x64x64xf32> to vector<64x64xf32>
    %217 = vector.extract_strided_slice %143 {offsets = [0, 224], sizes = [64, 16], strides = [1, 1]} : vector<64x432xf32> to vector<64x16xf32>
    %cst_155 = arith.constant dense<0.000000e+00> : vector<64x16xf32>
    %218 = tpu.matmul %216, %217, %cst_155 {dimension_numbers = #tpu.dot_dimension_numbers<[1], [0], [0], [1], [0, 0, 1, 1], [], []>} : vector<64x64xf32>, vector<64x16xf32>, vector<64x16xf32> -> vector<64x16xf32>
    %219 = arith.addf %214, %218 : vector<64x16xf32>
    %c15_156 = arith.constant 15 : index
    %c0_157 = arith.constant 0 : index
    %c0_158 = arith.constant 0 : index
    %220 = vector.load %arg3[%c15_156, %c0_157, %c0_158] : memref<27x64x64xf32, #tpu.memory_space<vmem>>, vector<1x64x64xf32>
    %221 = vector.shape_cast %220 : vector<1x64x64xf32> to vector<64x64xf32>
    %222 = vector.extract_strided_slice %143 {offsets = [0, 240], sizes = [64, 16], strides = [1, 1]} : vector<64x432xf32> to vector<64x16xf32>
    %cst_159 = arith.constant dense<0.000000e+00> : vector<64x16xf32>
    %223 = tpu.matmul %221, %222, %cst_159 {dimension_numbers = #tpu.dot_dimension_numbers<[1], [0], [0], [1], [0, 0, 1, 1], [], []>} : vector<64x64xf32>, vector<64x16xf32>, vector<64x16xf32> -> vector<64x16xf32>
    %224 = arith.addf %219, %223 : vector<64x16xf32>
    %c16_160 = arith.constant 16 : index
    %c0_161 = arith.constant 0 : index
    %c0_162 = arith.constant 0 : index
    %225 = vector.load %arg3[%c16_160, %c0_161, %c0_162] : memref<27x64x64xf32, #tpu.memory_space<vmem>>, vector<1x64x64xf32>
    %226 = vector.shape_cast %225 : vector<1x64x64xf32> to vector<64x64xf32>
    %227 = vector.extract_strided_slice %143 {offsets = [0, 256], sizes = [64, 16], strides = [1, 1]} : vector<64x432xf32> to vector<64x16xf32>
    %cst_163 = arith.constant dense<0.000000e+00> : vector<64x16xf32>
    %228 = tpu.matmul %226, %227, %cst_163 {dimension_numbers = #tpu.dot_dimension_numbers<[1], [0], [0], [1], [0, 0, 1, 1], [], []>} : vector<64x64xf32>, vector<64x16xf32>, vector<64x16xf32> -> vector<64x16xf32>
    %229 = arith.addf %224, %228 : vector<64x16xf32>
    %c17_164 = arith.constant 17 : index
    %c0_165 = arith.constant 0 : index
    %c0_166 = arith.constant 0 : index
    %230 = vector.load %arg3[%c17_164, %c0_165, %c0_166] : memref<27x64x64xf32, #tpu.memory_space<vmem>>, vector<1x64x64xf32>
    %231 = vector.shape_cast %230 : vector<1x64x64xf32> to vector<64x64xf32>
    %232 = vector.extract_strided_slice %143 {offsets = [0, 272], sizes = [64, 16], strides = [1, 1]} : vector<64x432xf32> to vector<64x16xf32>
    %cst_167 = arith.constant dense<0.000000e+00> : vector<64x16xf32>
    %233 = tpu.matmul %231, %232, %cst_167 {dimension_numbers = #tpu.dot_dimension_numbers<[1], [0], [0], [1], [0, 0, 1, 1], [], []>} : vector<64x64xf32>, vector<64x16xf32>, vector<64x16xf32> -> vector<64x16xf32>
    %234 = arith.addf %229, %233 : vector<64x16xf32>
    %c18_168 = arith.constant 18 : index
    %c0_169 = arith.constant 0 : index
    %c0_170 = arith.constant 0 : index
    %235 = vector.load %arg3[%c18_168, %c0_169, %c0_170] : memref<27x64x64xf32, #tpu.memory_space<vmem>>, vector<1x64x64xf32>
    %236 = vector.shape_cast %235 : vector<1x64x64xf32> to vector<64x64xf32>
    %237 = vector.extract_strided_slice %143 {offsets = [0, 288], sizes = [64, 16], strides = [1, 1]} : vector<64x432xf32> to vector<64x16xf32>
    %cst_171 = arith.constant dense<0.000000e+00> : vector<64x16xf32>
    %238 = tpu.matmul %236, %237, %cst_171 {dimension_numbers = #tpu.dot_dimension_numbers<[1], [0], [0], [1], [0, 0, 1, 1], [], []>} : vector<64x64xf32>, vector<64x16xf32>, vector<64x16xf32> -> vector<64x16xf32>
    %239 = arith.addf %234, %238 : vector<64x16xf32>
    %c19_172 = arith.constant 19 : index
    %c0_173 = arith.constant 0 : index
    %c0_174 = arith.constant 0 : index
    %240 = vector.load %arg3[%c19_172, %c0_173, %c0_174] : memref<27x64x64xf32, #tpu.memory_space<vmem>>, vector<1x64x64xf32>
    %241 = vector.shape_cast %240 : vector<1x64x64xf32> to vector<64x64xf32>
    %242 = vector.extract_strided_slice %143 {offsets = [0, 304], sizes = [64, 16], strides = [1, 1]} : vector<64x432xf32> to vector<64x16xf32>
    %cst_175 = arith.constant dense<0.000000e+00> : vector<64x16xf32>
    %243 = tpu.matmul %241, %242, %cst_175 {dimension_numbers = #tpu.dot_dimension_numbers<[1], [0], [0], [1], [0, 0, 1, 1], [], []>} : vector<64x64xf32>, vector<64x16xf32>, vector<64x16xf32> -> vector<64x16xf32>
    %244 = arith.addf %239, %243 : vector<64x16xf32>
    %c20_176 = arith.constant 20 : index
    %c0_177 = arith.constant 0 : index
    %c0_178 = arith.constant 0 : index
    %245 = vector.load %arg3[%c20_176, %c0_177, %c0_178] : memref<27x64x64xf32, #tpu.memory_space<vmem>>, vector<1x64x64xf32>
    %246 = vector.shape_cast %245 : vector<1x64x64xf32> to vector<64x64xf32>
    %247 = vector.extract_strided_slice %143 {offsets = [0, 320], sizes = [64, 16], strides = [1, 1]} : vector<64x432xf32> to vector<64x16xf32>
    %cst_179 = arith.constant dense<0.000000e+00> : vector<64x16xf32>
    %248 = tpu.matmul %246, %247, %cst_179 {dimension_numbers = #tpu.dot_dimension_numbers<[1], [0], [0], [1], [0, 0, 1, 1], [], []>} : vector<64x64xf32>, vector<64x16xf32>, vector<64x16xf32> -> vector<64x16xf32>
    %249 = arith.addf %244, %248 : vector<64x16xf32>
    %c21_180 = arith.constant 21 : index
    %c0_181 = arith.constant 0 : index
    %c0_182 = arith.constant 0 : index
    %250 = vector.load %arg3[%c21_180, %c0_181, %c0_182] : memref<27x64x64xf32, #tpu.memory_space<vmem>>, vector<1x64x64xf32>
    %251 = vector.shape_cast %250 : vector<1x64x64xf32> to vector<64x64xf32>
    %252 = vector.extract_strided_slice %143 {offsets = [0, 336], sizes = [64, 16], strides = [1, 1]} : vector<64x432xf32> to vector<64x16xf32>
    %cst_183 = arith.constant dense<0.000000e+00> : vector<64x16xf32>
    %253 = tpu.matmul %251, %252, %cst_183 {dimension_numbers = #tpu.dot_dimension_numbers<[1], [0], [0], [1], [0, 0, 1, 1], [], []>} : vector<64x64xf32>, vector<64x16xf32>, vector<64x16xf32> -> vector<64x16xf32>
    %254 = arith.addf %249, %253 : vector<64x16xf32>
    %c22_184 = arith.constant 22 : index
    %c0_185 = arith.constant 0 : index
    %c0_186 = arith.constant 0 : index
    %255 = vector.load %arg3[%c22_184, %c0_185, %c0_186] : memref<27x64x64xf32, #tpu.memory_space<vmem>>, vector<1x64x64xf32>
    %256 = vector.shape_cast %255 : vector<1x64x64xf32> to vector<64x64xf32>
    %257 = vector.extract_strided_slice %143 {offsets = [0, 352], sizes = [64, 16], strides = [1, 1]} : vector<64x432xf32> to vector<64x16xf32>
    %cst_187 = arith.constant dense<0.000000e+00> : vector<64x16xf32>
    %258 = tpu.matmul %256, %257, %cst_187 {dimension_numbers = #tpu.dot_dimension_numbers<[1], [0], [0], [1], [0, 0, 1, 1], [], []>} : vector<64x64xf32>, vector<64x16xf32>, vector<64x16xf32> -> vector<64x16xf32>
    %259 = arith.addf %254, %258 : vector<64x16xf32>
    %c23_188 = arith.constant 23 : index
    %c0_189 = arith.constant 0 : index
    %c0_190 = arith.constant 0 : index
    %260 = vector.load %arg3[%c23_188, %c0_189, %c0_190] : memref<27x64x64xf32, #tpu.memory_space<vmem>>, vector<1x64x64xf32>
    %261 = vector.shape_cast %260 : vector<1x64x64xf32> to vector<64x64xf32>
    %262 = vector.extract_strided_slice %143 {offsets = [0, 368], sizes = [64, 16], strides = [1, 1]} : vector<64x432xf32> to vector<64x16xf32>
    %cst_191 = arith.constant dense<0.000000e+00> : vector<64x16xf32>
    %263 = tpu.matmul %261, %262, %cst_191 {dimension_numbers = #tpu.dot_dimension_numbers<[1], [0], [0], [1], [0, 0, 1, 1], [], []>} : vector<64x64xf32>, vector<64x16xf32>, vector<64x16xf32> -> vector<64x16xf32>
    %264 = arith.addf %259, %263 : vector<64x16xf32>
    %c24_192 = arith.constant 24 : index
    %c0_193 = arith.constant 0 : index
    %c0_194 = arith.constant 0 : index
    %265 = vector.load %arg3[%c24_192, %c0_193, %c0_194] : memref<27x64x64xf32, #tpu.memory_space<vmem>>, vector<1x64x64xf32>
    %266 = vector.shape_cast %265 : vector<1x64x64xf32> to vector<64x64xf32>
    %267 = vector.extract_strided_slice %143 {offsets = [0, 384], sizes = [64, 16], strides = [1, 1]} : vector<64x432xf32> to vector<64x16xf32>
    %cst_195 = arith.constant dense<0.000000e+00> : vector<64x16xf32>
    %268 = tpu.matmul %266, %267, %cst_195 {dimension_numbers = #tpu.dot_dimension_numbers<[1], [0], [0], [1], [0, 0, 1, 1], [], []>} : vector<64x64xf32>, vector<64x16xf32>, vector<64x16xf32> -> vector<64x16xf32>
    %269 = arith.addf %264, %268 : vector<64x16xf32>
    %c25_196 = arith.constant 25 : index
    %c0_197 = arith.constant 0 : index
    %c0_198 = arith.constant 0 : index
    %270 = vector.load %arg3[%c25_196, %c0_197, %c0_198] : memref<27x64x64xf32, #tpu.memory_space<vmem>>, vector<1x64x64xf32>
    %271 = vector.shape_cast %270 : vector<1x64x64xf32> to vector<64x64xf32>
    %272 = vector.extract_strided_slice %143 {offsets = [0, 400], sizes = [64, 16], strides = [1, 1]} : vector<64x432xf32> to vector<64x16xf32>
    %cst_199 = arith.constant dense<0.000000e+00> : vector<64x16xf32>
    %273 = tpu.matmul %271, %272, %cst_199 {dimension_numbers = #tpu.dot_dimension_numbers<[1], [0], [0], [1], [0, 0, 1, 1], [], []>} : vector<64x64xf32>, vector<64x16xf32>, vector<64x16xf32> -> vector<64x16xf32>
    %274 = arith.addf %269, %273 : vector<64x16xf32>
    %c26_200 = arith.constant 26 : index
    %c0_201 = arith.constant 0 : index
    %c0_202 = arith.constant 0 : index
    %275 = vector.load %arg3[%c26_200, %c0_201, %c0_202] : memref<27x64x64xf32, #tpu.memory_space<vmem>>, vector<1x64x64xf32>
    %276 = vector.shape_cast %275 : vector<1x64x64xf32> to vector<64x64xf32>
    %277 = vector.extract_strided_slice %143 {offsets = [0, 416], sizes = [64, 16], strides = [1, 1]} : vector<64x432xf32> to vector<64x16xf32>
    %cst_203 = arith.constant dense<0.000000e+00> : vector<64x16xf32>
    %278 = tpu.matmul %276, %277, %cst_203 {dimension_numbers = #tpu.dot_dimension_numbers<[1], [0], [0], [1], [0, 0, 1, 1], [], []>} : vector<64x64xf32>, vector<64x16xf32>, vector<64x16xf32> -> vector<64x16xf32>
    %279 = arith.addf %274, %278 : vector<64x16xf32>
    %280 = tpu.concatenate %141, %279 in 1 : vector<64x16xf32>, vector<64x16xf32> -> vector<64x32xf32>
    %c0_204 = arith.constant 0 : index
    %c0_205 = arith.constant 0 : index
    %281 = vector.load %arg6[%c0_204, %c0_205] : memref<1x32xf32, #tpu.memory_space<vmem>>, vector<1x32xf32>
    %c0_206 = arith.constant 0 : index
    %c0_207 = arith.constant 0 : index
    %282 = vector.load %arg7[%c0_206, %c0_207] : memref<1x32xf32, #tpu.memory_space<vmem>>, vector<1x32xf32>
    %cst_208 = arith.constant dense<0.000000e+00> : vector<32xf32>
    %283 = vector.multi_reduction <add>, %280, %cst_208 [0] : vector<64x32xf32> to vector<32xf32>
    %284 = vector.shape_cast %283 : vector<32xf32> to vector<1x32xf32>
    %cst_209 = arith.constant 6.400000e+01 : f32
    %285 = vector.broadcast %cst_209 : f32 to vector<1x32xf32>
    %286 = arith.divf %284, %285 : vector<1x32xf32>
    %287 = vector.broadcast %286 : vector<1x32xf32> to vector<64x32xf32>
    %288 = arith.subf %280, %287 : vector<64x32xf32>
    %289 = arith.mulf %288, %288 : vector<64x32xf32>
    %cst_210 = arith.constant dense<0.000000e+00> : vector<32xf32>
    %290 = vector.multi_reduction <add>, %289, %cst_210 [0] : vector<64x32xf32> to vector<32xf32>
    %291 = vector.shape_cast %290 : vector<32xf32> to vector<1x32xf32>
    %cst_211 = arith.constant 6.400000e+01 : f32
    %292 = vector.broadcast %cst_211 : f32 to vector<1x32xf32>
    %293 = arith.divf %291, %292 : vector<1x32xf32>
    %294 = vector.broadcast %286 : vector<1x32xf32> to vector<64x32xf32>
    %295 = arith.subf %280, %294 : vector<64x32xf32>
    %cst_212 = arith.constant 9.99999974E-6 : f32
    %296 = vector.broadcast %cst_212 : f32 to vector<1x32xf32>
    %297 = arith.addf %293, %296 : vector<1x32xf32>
    %298 = math.rsqrt %297 : vector<1x32xf32>
    %299 = vector.broadcast %298 : vector<1x32xf32> to vector<64x32xf32>
    %300 = arith.mulf %295, %299 : vector<64x32xf32>
    %301 = vector.broadcast %281 : vector<1x32xf32> to vector<64x32xf32>
    %302 = arith.mulf %300, %301 : vector<64x32xf32>
    %303 = vector.broadcast %282 : vector<1x32xf32> to vector<64x32xf32>
    %304 = arith.addf %302, %303 : vector<64x32xf32>
    %cst_213 = arith.constant 0.000000e+00 : f32
    %305 = vector.broadcast %cst_213 : f32 to vector<64x32xf32>
    %306 = arith.cmpf oge, %304, %305 : vector<64x32xf32>
    %cst_214 = arith.constant 0.00999999977 : f32
    %307 = vector.broadcast %cst_214 : f32 to vector<64x32xf32>
    %308 = arith.mulf %307, %304 : vector<64x32xf32>
    %309 = arith.select %306, %304, %308 : vector<64x32xi1>, vector<64x32xf32>
    %310 = vector.extract_strided_slice %309 {offsets = [0, 0], sizes = [64, 16], strides = [1, 1]} : vector<64x32xf32> to vector<64x16xf32>
    %311 = vector.extract_strided_slice %309 {offsets = [0, 16], sizes = [64, 16], strides = [1, 1]} : vector<64x32xf32> to vector<64x16xf32>
    %c0_215 = arith.constant 0 : index
    %c0_216 = arith.constant 0 : index
    %312 = vector.load %arg2[%c0_215, %c0_216] : memref<64x8xf32, #tpu.memory_space<vmem>>, vector<64x8xf32>
    %313 = tpu.concatenate %310, %311, %312 in 1 : vector<64x16xf32>, vector<64x16xf32>, vector<64x8xf32> -> vector<64x40xf32>
    %c0_217 = arith.constant 0 : index
    %c0_218 = arith.constant 0 : index
    %314 = vector.load %arg8[%c0_217, %c0_218] : memref<40x6xf32, #tpu.memory_space<vmem>>, vector<40x6xf32>
    %cst_219 = arith.constant dense<0.000000e+00> : vector<64x6xf32>
    %315 = tpu.matmul %313, %314, %cst_219 {dimension_numbers = #tpu.dot_dimension_numbers<[1], [0], [0], [1], [0, 0, 1, 1], [], []>} : vector<64x40xf32>, vector<40x6xf32>, vector<64x6xf32> -> vector<64x6xf32>
    %c0_220 = arith.constant 0 : index
    %c0_221 = arith.constant 0 : index
    %316 = vector.load %arg9[%c0_220, %c0_221] : memref<1x6xf32, #tpu.memory_space<vmem>>, vector<1x6xf32>
    %c0_222 = arith.constant 0 : index
    %c0_223 = arith.constant 0 : index
    %317 = vector.load %arg10[%c0_222, %c0_223] : memref<1x6xf32, #tpu.memory_space<vmem>>, vector<1x6xf32>
    %cst_224 = arith.constant dense<0.000000e+00> : vector<6xf32>
    %318 = vector.multi_reduction <add>, %315, %cst_224 [0] : vector<64x6xf32> to vector<6xf32>
    %319 = vector.shape_cast %318 : vector<6xf32> to vector<1x6xf32>
    %cst_225 = arith.constant 6.400000e+01 : f32
    %320 = vector.broadcast %cst_225 : f32 to vector<1x6xf32>
    %321 = arith.divf %319, %320 : vector<1x6xf32>
    %322 = vector.broadcast %321 : vector<1x6xf32> to vector<64x6xf32>
    %323 = arith.subf %315, %322 : vector<64x6xf32>
    %324 = arith.mulf %323, %323 : vector<64x6xf32>
    %cst_226 = arith.constant dense<0.000000e+00> : vector<6xf32>
    %325 = vector.multi_reduction <add>, %324, %cst_226 [0] : vector<64x6xf32> to vector<6xf32>
    %326 = vector.shape_cast %325 : vector<6xf32> to vector<1x6xf32>
    %cst_227 = arith.constant 6.400000e+01 : f32
    %327 = vector.broadcast %cst_227 : f32 to vector<1x6xf32>
    %328 = arith.divf %326, %327 : vector<1x6xf32>
    %329 = vector.broadcast %321 : vector<1x6xf32> to vector<64x6xf32>
    %330 = arith.subf %315, %329 : vector<64x6xf32>
    %cst_228 = arith.constant 9.99999974E-6 : f32
    %331 = vector.broadcast %cst_228 : f32 to vector<1x6xf32>
    %332 = arith.addf %328, %331 : vector<1x6xf32>
    %333 = math.rsqrt %332 : vector<1x6xf32>
    %334 = vector.broadcast %333 : vector<1x6xf32> to vector<64x6xf32>
    %335 = arith.mulf %330, %334 : vector<64x6xf32>
    %336 = vector.broadcast %316 : vector<1x6xf32> to vector<64x6xf32>
    %337 = arith.mulf %335, %336 : vector<64x6xf32>
    %338 = vector.broadcast %317 : vector<1x6xf32> to vector<64x6xf32>
    %339 = arith.addf %337, %338 : vector<64x6xf32>
    %340 = vector.extract_strided_slice %339 {offsets = [0, 0], sizes = [64, 1], strides = [1, 1]} : vector<64x6xf32> to vector<64x1xf32>
    %341 = vector.extract_strided_slice %339 {offsets = [0, 2], sizes = [64, 1], strides = [1, 1]} : vector<64x6xf32> to vector<64x1xf32>
    %342 = vector.extract_strided_slice %339 {offsets = [0, 4], sizes = [64, 1], strides = [1, 1]} : vector<64x6xf32> to vector<64x1xf32>
    %343 = tpu.concatenate %340, %341, %342 in 1 : vector<64x1xf32>, vector<64x1xf32>, vector<64x1xf32> -> vector<64x3xf32>
    %cst_229 = arith.constant 0.000000e+00 : f32
    %344 = vector.broadcast %cst_229 : f32 to vector<64x3xf32>
    %345 = arith.cmpf oge, %343, %344 : vector<64x3xf32>
    %cst_230 = arith.constant 0.00999999977 : f32
    %346 = vector.broadcast %cst_230 : f32 to vector<64x3xf32>
    %347 = arith.mulf %346, %343 : vector<64x3xf32>
    %348 = arith.select %345, %343, %347 : vector<64x3xi1>, vector<64x3xf32>
    %349 = vector.extract_strided_slice %339 {offsets = [0, 1], sizes = [64, 1], strides = [1, 1]} : vector<64x6xf32> to vector<64x1xf32>
    %350 = vector.extract_strided_slice %339 {offsets = [0, 3], sizes = [64, 1], strides = [1, 1]} : vector<64x6xf32> to vector<64x1xf32>
    %351 = vector.extract_strided_slice %339 {offsets = [0, 5], sizes = [64, 1], strides = [1, 1]} : vector<64x6xf32> to vector<64x1xf32>
    %352 = tpu.concatenate %349, %350, %351 in 1 : vector<64x1xf32>, vector<64x1xf32>, vector<64x1xf32> -> vector<64x3xf32>
    %c0_231 = arith.constant 0 : index
    %c0_232 = arith.constant 0 : index
    %353 = vector.load %arg11[%c0_231, %c0_232] : memref<1x3xf32, #tpu.memory_space<vmem>>, vector<1x3xf32>
    %354 = vector.broadcast %353 : vector<1x3xf32> to vector<64x3xf32>
    %355 = arith.mulf %348, %354 : vector<64x3xf32>
    %c0_233 = arith.constant 0 : index
    %c0_234 = arith.constant 0 : index
    %356 = vector.load %arg12[%c0_233, %c0_234] : memref<1x3xf32, #tpu.memory_space<vmem>>, vector<1x3xf32>
    %c0_235 = arith.constant 0 : index
    %c0_236 = arith.constant 0 : index
    %357 = vector.load %arg13[%c0_235, %c0_236] : memref<1x3xf32, #tpu.memory_space<vmem>>, vector<1x3xf32>
    %cst_237 = arith.constant dense<0.000000e+00> : vector<3xf32>
    %358 = vector.multi_reduction <add>, %355, %cst_237 [0] : vector<64x3xf32> to vector<3xf32>
    %359 = vector.shape_cast %358 : vector<3xf32> to vector<1x3xf32>
    %cst_238 = arith.constant 6.400000e+01 : f32
    %360 = vector.broadcast %cst_238 : f32 to vector<1x3xf32>
    %361 = arith.divf %359, %360 : vector<1x3xf32>
    %362 = vector.broadcast %361 : vector<1x3xf32> to vector<64x3xf32>
    %363 = arith.subf %355, %362 : vector<64x3xf32>
    %364 = arith.mulf %363, %363 : vector<64x3xf32>
    %cst_239 = arith.constant dense<0.000000e+00> : vector<3xf32>
    %365 = vector.multi_reduction <add>, %364, %cst_239 [0] : vector<64x3xf32> to vector<3xf32>
    %366 = vector.shape_cast %365 : vector<3xf32> to vector<1x3xf32>
    %cst_240 = arith.constant 6.400000e+01 : f32
    %367 = vector.broadcast %cst_240 : f32 to vector<1x3xf32>
    %368 = arith.divf %366, %367 : vector<1x3xf32>
    %369 = vector.broadcast %361 : vector<1x3xf32> to vector<64x3xf32>
    %370 = arith.subf %355, %369 : vector<64x3xf32>
    %cst_241 = arith.constant 9.99999974E-6 : f32
    %371 = vector.broadcast %cst_241 : f32 to vector<1x3xf32>
    %372 = arith.addf %368, %371 : vector<1x3xf32>
    %373 = math.rsqrt %372 : vector<1x3xf32>
    %374 = vector.broadcast %373 : vector<1x3xf32> to vector<64x3xf32>
    %375 = arith.mulf %370, %374 : vector<64x3xf32>
    %376 = vector.broadcast %356 : vector<1x3xf32> to vector<64x3xf32>
    %377 = arith.mulf %375, %376 : vector<64x3xf32>
    %378 = vector.broadcast %357 : vector<1x3xf32> to vector<64x3xf32>
    %379 = arith.addf %377, %378 : vector<64x3xf32>
    %380 = arith.addf %379, %352 : vector<64x3xf32>
    %cst_242 = arith.constant 0.000000e+00 : f32
    %381 = vector.broadcast %cst_242 : f32 to vector<64x3xf32>
    %382 = arith.cmpf oge, %380, %381 : vector<64x3xf32>
    %cst_243 = arith.constant 0.00999999977 : f32
    %383 = vector.broadcast %cst_243 : f32 to vector<64x3xf32>
    %384 = arith.mulf %383, %380 : vector<64x3xf32>
    %385 = arith.select %382, %380, %384 : vector<64x3xi1>, vector<64x3xf32>
    %386 = vector.extract_strided_slice %385 {offsets = [0, 2], sizes = [64, 1], strides = [1, 1]} : vector<64x3xf32> to vector<64x1xf32>
    %387 = vector.extract_strided_slice %385 {offsets = [0, 1], sizes = [64, 1], strides = [1, 1]} : vector<64x3xf32> to vector<64x1xf32>
    %388 = arith.addf %386, %387 : vector<64x1xf32>
    %389 = arith.negf %388 : vector<64x1xf32>
    %390 = math.exp %389 : vector<64x1xf32>
    %cst_244 = arith.constant 1.000000e+00 : f32
    %391 = vector.broadcast %cst_244 : f32 to vector<64x1xf32>
    %392 = arith.addf %391, %390 : vector<64x1xf32>
    %393 = arith.divf %391, %392 : vector<64x1xf32>
    %394 = vector.extract_strided_slice %385 {offsets = [0, 2], sizes = [64, 1], strides = [1, 1]} : vector<64x3xf32> to vector<64x1xf32>
    %395 = vector.extract_strided_slice %385 {offsets = [0, 0], sizes = [64, 1], strides = [1, 1]} : vector<64x3xf32> to vector<64x1xf32>
    %396 = arith.addf %394, %395 : vector<64x1xf32>
    %397 = arith.negf %396 : vector<64x1xf32>
    %398 = math.exp %397 : vector<64x1xf32>
    %cst_245 = arith.constant 1.000000e+00 : f32
    %399 = vector.broadcast %cst_245 : f32 to vector<64x1xf32>
    %400 = arith.addf %399, %398 : vector<64x1xf32>
    %401 = arith.divf %399, %400 : vector<64x1xf32>
    %402 = vector.broadcast %393 : vector<64x1xf32> to vector<64x16xf32>
    %403 = arith.mulf %311, %402 : vector<64x16xf32>
    %404 = vector.broadcast %401 : vector<64x1xf32> to vector<64x16xf32>
    %405 = arith.mulf %310, %404 : vector<64x16xf32>
    %406 = tpu.concatenate %312, %403, %405 in 1 : vector<64x8xf32>, vector<64x16xf32>, vector<64x16xf32> -> vector<64x40xf32>
    %c0_246 = arith.constant 0 : index
    %c0_247 = arith.constant 0 : index
    %407 = vector.load %arg14[%c0_246, %c0_247] : memref<64x40xf32, #tpu.memory_space<vmem>>, vector<64x40xf32>
    tpu.vector_store %arg14[%c0_246, %c0_247], %406 {strides = array<i32>} : memref<64x40xf32, #tpu.memory_space<vmem>>, vector<64x40xf32>,
    return
  }
}

</mosaic_0001>

<bundles_post_ra>
// kernel: attention_func_forward.1
= control target key start
LH: loop header
LB: loop body
LE: loop exit
PB: predicated region body
PF: predicated region fallthrough
CT: control target
= control target key end

     0   :  { %vm111_vm0 = vcmask 64512   ;;  %v17818_v2 = vmov 0.0   ;;  %vm2485_vm1 = vcmask 1041409   ;;  %vm2487_vm2 = vcmask 1042434   ;;  %s17820_s30 = smov 96   ;;  %s17821_s15 = smov 80   ;;  %s24114_s4 = inlined_call_operand.vmem [shape: f32[8,432], index: 4, kind: input, shape index: {}]   ;;  %s24115_s0 = inlined_call_operand.vmem [shape: f32[64,8,8], index: 0, kind: input, shape index: {}]   ;;  %s24116_s5 = inlined_call_operand.vmem [shape: f32[4,432], index: 5, kind: input, shape index: {}]   ;;  %s24117_s1 = inlined_call_operand.vmem [shape: f32[64,64,4], index: 1, kind: input, shape index: {}]   ;;  %s24118_s3 = inlined_call_operand.vmem [shape: f32[27,64,64], index: 3, kind: input, shape index: {}]   ;;  %s24119_s2 = inlined_call_operand.vmem [shape: f32[64,8], index: 2, kind: input, shape index: {}]   ;;  %s24120_s8 = inlined_call_operand.vmem [shape: f32[40,6], index: 8, kind: input, shape index: {}]   ;;  %s24121_s6 = inlined_call_operand.vmem [shape: f32[1,32], index: 6, kind: input, shape index: {}]   ;;  %s24122_s7 = inlined_call_operand.vmem [shape: f32[1,32], index: 7, kind: input, shape index: {}]   ;;  %s24123_s9 = inlined_call_operand.vmem [shape: f32[1,6], index: 9, kind: input, shape index: {}]   ;;  %s24124_s10 = inlined_call_operand.vmem [shape: f32[1,6], index: 10, kind: input, shape index: {}]   ;;  %s24125_s11 = inlined_call_operand.vmem [shape: f32[1,3], index: 11, kind: input, shape index: {}]   ;;  %s24126_s12 = inlined_call_operand.vmem [shape: f32[1,3], index: 12, kind: input, shape index: {}]   ;;  %s24127_s13 = inlined_call_operand.vmem [shape: f32[1,3], index: 13, kind: input, shape index: {}]   ;;  %s24128_s14 = inlined_call_operand.vmem [shape: f32[64,40], index: 14, kind: output, shape index: {}]  }
   0x1   :  { %v2420_v0 = vld [vmem:[%s24114_s4 + $0x18] sm:$0xff]  ;;  %v2419_v1 = vld [vmem:[%s24114_s4 + $0x10] sm:$0xff]  ;;  %2777 = vmatprep.mubr.f32.mxu1 %v17818_v2  ;;  %v95_v3 = vld [vmem:[%s24115_s0 + $0x180] sm:$0xff]  ;;  %2628 = vmatprep.mubr.f32.mxu0 %v17818_v2  ;;  %vm2489_vm3 = vcmask 1043459   ;;  %vm2491_vm4 = vcmask 1044484   ;;  %vm2493_vm5 = vcmask 1045509  }
   0x2   :  { %16380 = vmatprep.subr.mxu1 %v2420_v0  ;;  %v96_v4 = vld [vmem:[%s24115_s0 + $0x188] sm:$0xff]  ;;  %v97_v5 = vld [vmem:[%s24115_s0 + $0x190] sm:$0xff]  ;;  %v98_v6 = vld [vmem:[%s24115_s0 + $0x198] sm:$0xff]  ;;  %v448_v7 = vsel %vm111_vm0, %v95_v3, -inf  ;;  %vm2495_vm6 = vcmask 1046534   ;;  %vm2497_vm7 = vcmask 1047559  }
   0x3   :  { %16381 = vmatpush1.msra.mxu1 %v2419_v1  ;;  %v99_v8 = vld [vmem:[%s24115_s0 + $0x1a0] sm:$0xff]  ;;  %v100_v9 = vld [vmem:[%s24115_s0 + $0x1a8] sm:$0xff]  ;;  %v101_v10 = vld [vmem:[%s24115_s0 + $0x1b0] sm:$0xff]  ;;  %v449_v11 = vrot.slane %v448_v7, 4  ;;  %v455_v12 = vsel %vm111_vm0, %v96_v4, -inf  ;;  %v462_v13 = vsel %vm111_vm0, %v97_v5, -inf }
   0x4   :  { %v456_v14 = vrot.slane %v455_v12, 4  ;;  %v463_v15 = vrot.slane %v462_v13, 4  ;;  %v469_v16 = vsel %vm111_vm0, %v98_v6, -inf  ;;  %v476_v17 = vsel %vm111_vm0, %v99_v8, -inf  ;;  %v102_v18 = vld [vmem:[%s24115_s0 + $0x1b8] sm:$0xff]  ;;  %v103_v51 = vld [vmem:[%s24115_s0 + $0x1c0] sm:$0xff] }
   0x5   :  { %v450_v19 = vmax.f32 %v448_v7, %v449_v11  ;;  %v470_v20 = vrot.slane %v469_v16, 4  ;;  %v477_v21 = vrot.slane %v476_v17, 4  ;;  %v483_v22 = vsel %vm111_vm0, %v100_v9, -inf  ;;  %v104_v60 = vld [vmem:[%s24115_s0 + $0x1c8] sm:$0xff]  ;;  %v105_v61 = vld [vmem:[%s24115_s0 + $0x1d0] sm:$0xff]  ;;  %v106_v6 = vld [vmem:[%s24115_s0 + $0x1d8] sm:$0xff] }
   0x6   :  { %v457_v23 = vmax.f32 %v455_v12, %v456_v14  ;;  %v464_v24 = vmax.f32 %v462_v13, %v463_v15  ;;  %v484_v25 = vrot.slane %v483_v22, 4  ;;  %v490_v26 = vsel %vm111_vm0, %v101_v10, -inf  ;;  %v107_v7 = vld [vmem:[%s24115_s0 + $0x1e0] sm:$0xff]  ;;  %s17822_s16 = smov 64   ;;  %s17823_s17 = smov 48  }
   0x7   :  { %v451_v27 = vrot.slane %v450_v19, 2  ;;  %v471_v28 = vmax.f32 %v469_v16, %v470_v20  ;;  %v478_v29 = vmax.f32 %v476_v17, %v477_v21  ;;  %v491_v30 = vrot.slane %v490_v26, 4  ;;  %s17824_s18 = smov 32   ;;  %s17825_s21 = smov 16  }
   0x8   :  { %v458_v31 = vrot.slane %v457_v23, 2  ;;  %v465_v32 = vrot.slane %v464_v24, 2  ;;  %v485_v33 = vmax.f32 %v483_v22, %v484_v25  ;;  %v497_v34 = vsel %vm111_vm0, %v102_v18, -inf  ;;  %v108_v18 = vld [vmem:[%s24115_s0 + $0x1e8] sm:$0xff]  ;;  %s17832_s20 = smov 120  }
   0x9   :  { %v452_v35 = vmax.f32 %v450_v19, %v451_v27  ;;  %v472_v36 = vrot.slane %v471_v28, 2  ;;  %v479_v37 = vrot.slane %v478_v29, 2  ;;  %v492_v38 = vmax.f32 %v490_v26, %v491_v30  ;;  %v109_v27 = vld [vmem:[%s24115_s0 + $0x1f0] sm:$0xff] }
   0xa   :  { %v459_v39 = vmax.f32 %v457_v23, %v458_v31  ;;  %v466_v40 = vmax.f32 %v464_v24, %v465_v32  ;;  %v486_v41 = vrot.slane %v485_v33, 2  ;;  %v498_v42 = vrot.slane %v497_v34, 4 }
   0xb   :  { %v453_v43 = vrot.slane %v452_v35, 1  ;;  %v473_v44 = vmax.f32 %v471_v28, %v472_v36  ;;  %v480_v45 = vmax.f32 %v478_v29, %v479_v37  ;;  %v493_v46 = vrot.slane %v492_v38, 2  ;;  %v110_v28 = vld [vmem:[%s24115_s0 + $0x1f8] sm:$0xff] }
   0xc   :  { %v460_v47 = vrot.slane %v459_v39, 1  ;;  %v467_v48 = vrot.slane %v466_v40, 1  ;;  %v487_v49 = vmax.f32 %v485_v33, %v486_v41  ;;  %v499_v50 = vmax.f32 %v497_v34, %v498_v42 }
   0xd   :  { %v454_v52 = vmax.f32 %v452_v35, %v453_v43  ;;  %v474_v53 = vrot.slane %v473_v44, 1  ;;  %v481_v54 = vrot.slane %v480_v45, 1  ;;  %v494_v55 = vmax.f32 %v492_v38, %v493_v46 }
   0xe   :  { %v461_v56 = vmax.f32 %v459_v39, %v460_v47  ;;  %v468_v57 = vmax.f32 %v466_v40, %v467_v48  ;;  %v488_v58 = vrot.slane %v487_v49, 1  ;;  %v500_v59 = vrot.slane %v499_v50, 2  ;;  %v7300_v48 = vld [vmem:[%s24116_s5] sm:$0xff] }
   0xf   :  { %v475_v62 = vmax.f32 %v473_v44, %v474_v53  ;;  %v482_v63 = vmax.f32 %v480_v45, %v481_v54  ;;  %v495_v0 = vrot.slane %v494_v55, 1  ;;  %v504_v1 = vsel %vm111_vm0, %v103_v51, -inf }
  0x10   :  { %v489_v3 = vmax.f32 %v487_v49, %v488_v58  ;;  %v501_v4 = vmax.f32 %v499_v50, %v500_v59  ;;  %v2534_v5 = vsel %vm2485_vm1, %v461_v56, %v454_v52  ;;  %v505_v8 = vrot.slane %v504_v1, 4 }
  0x11   :  { %v496_v9 = vmax.f32 %v494_v55, %v495_v0  ;;  %v2535_v10 = vsel %vm2487_vm2, %v468_v57, %v2534_v5  ;;  %v511_v11 = vsel %vm111_vm0, %v104_v60, -inf  ;;  %v518_v12 = vsel %vm111_vm0, %v105_v61, -inf  ;;  %v560_v5 = vld [vmem:[%s24117_s1] sm:$0xff] }
  0x12   :  { %v502_v13 = vrot.slane %v501_v4, 1  ;;  %v2536_v14 = vsel %vm2489_vm3, %v475_v62, %v2535_v10  ;;  %v506_v15 = vmax.f32 %v504_v1, %v505_v8  ;;  %v512_v16 = vrot.slane %v511_v11, 4 }
  0x13   :  { %v2537_v17 = vsel %vm2491_vm4, %v482_v63, %v2536_v14  ;;  %v519_v19 = vrot.slane %v518_v12, 4  ;;  %v525_v20 = vsel %vm111_vm0, %v106_v6, -inf  ;;  %v532_v21 = vsel %vm111_vm0, %v107_v7, -inf  ;;  %v561_v6 = vld [vmem:[%s24117_s1 + $0x8] sm:$0xff]  ;;  %v563_v14 = vld [vmem:[%s24117_s1 + $0x18] sm:$0xff] }
  0x14   :  { %v503_v22 = vmax.f32 %v501_v4, %v502_v13  ;;  %v2538_v23 = vsel %vm2493_vm5, %v489_v3, %v2537_v17  ;;  %v507_v24 = vrot.slane %v506_v15, 2  ;;  %v513_v25 = vmax.f32 %v511_v11, %v512_v16  ;;  %v562_v13 = vld [vmem:[%s24117_s1 + $0x10] sm:$0xff] }
  0x15   :  { %v2539_v26 = vsel %vm2495_vm6, %v496_v9, %v2538_v23  ;;  %v520_v29 = vmax.f32 %v518_v12, %v519_v19  ;;  %v526_v30 = vrot.slane %v525_v20, 4  ;;  %v533_v31 = vrot.slane %v532_v21, 4  ;;  %v566_v19 = vld [vmem:[%s24117_s1 + $0x30] sm:$0xff] }
  0x16   :  { %v17985_v32 = vsel %vm2497_vm7, %v503_v22, %v2539_v26  ;;  %v508_v33 = vmax.f32 %v506_v15, %v507_v24  ;;  %v514_v34 = vrot.slane %v513_v25, 2  ;;  %v539_v35 = vsel %vm111_vm0, %v108_v18, -inf  ;;  %v564_v15 = vld [vmem:[%s24117_s1 + $0x20] sm:$0xff]  ;;  %v565_v18 = vld [vmem:[%s24117_s1 + $0x28] sm:$0xff] }
  0x17   :  { %12404 = vmatmul.mubr.msk.f32.vlgmr.msra.gmra.mrb[0].mxu1 %vm111_vm0, %v17985_v32  ;;  %v521_v36 = vrot.slane %v520_v29, 2  ;;  %v527_v37 = vmax.f32 %v525_v20, %v526_v30  ;;  %v534_v38 = vmax.f32 %v532_v21, %v533_v31  ;;  %v540_v39 = vrot.slane %v539_v35, 4  ;;  %v568_v26 = vld [vmem:[%s24117_s1 + $0x40] sm:$0xff]  ;;  %v570_v30 = vld [vmem:[%s24117_s1 + $0x50] sm:$0xff]  ;;  %v571_v31 = vld [vmem:[%s24117_s1 + $0x58] sm:$0xff] }
  0x18   :  { %2783 = vmatprep.mubr.f32.mxu1 %v17818_v2  ;;  %v509_v40 = vrot.slane %v508_v33, 1  ;;  %v515_v41 = vmax.f32 %v513_v25, %v514_v34  ;;  %v546_v42 = vsel %vm111_vm0, %v109_v27, -inf  ;;  %v553_v43 = vsel %vm111_vm0, %v110_v28, -inf  ;;  %v567_v25 = vld [vmem:[%s24117_s1 + $0x38] sm:$0xff]  ;;  %v569_v27 = vld [vmem:[%s24117_s1 + $0x48] sm:$0xff] }
  0x19   :  { %v522_v44 = vmax.f32 %v520_v29, %v521_v36  ;;  %v528_v45 = vrot.slane %v527_v37, 2  ;;  %v535_v46 = vrot.slane %v534_v38, 2  ;;  %v541_v47 = vmax.f32 %v539_v35, %v540_v39  ;;  %v573_v39 = vld [vmem:[%s24117_s1 + $0x68] sm:$0xff] }
  0x1a   :  { %v510_v49 = vmax.f32 %v508_v33, %v509_v40  ;;  %v516_v50 = vrot.slane %v515_v41, 1  ;;  %v547_v51 = vrot.slane %v546_v42, 4  ;;  %v554_v52 = vrot.slane %v553_v43, 4  ;;  %v574_v40 = vld [vmem:[%s24117_s1 + $0x70] sm:$0xff] }
  0x1b   :  { %v523_v53 = vrot.slane %v522_v44, 1  ;;  %v529_v54 = vmax.f32 %v527_v37, %v528_v45  ;;  %v536_v55 = vmax.f32 %v534_v38, %v535_v46  ;;  %v542_v56 = vrot.slane %v541_v47, 2  ;;  %v572_v38 = vld [vmem:[%s24117_s1 + $0x60] sm:$0xff] }
  0x1c   :  { %v517_v57 = vmax.f32 %v515_v41, %v516_v50  ;;  %v548_v58 = vmax.f32 %v546_v42, %v547_v51  ;;  %v555_v59 = vmax.f32 %v553_v43, %v554_v52  ;;  %v7424_v60 = vcombine.high %v7300_v48, %v7300_v48  ;;  %v575_v43 = vld [vmem:[%s24117_s1 + $0x78] sm:$0xff]  ;;  %v577_v50 = vld [vmem:[%s24117_s1 + $0x88] sm:$0xff]  ;;  %v578_v51 = vld [vmem:[%s24117_s1 + $0x90] sm:$0xff] }
  0x1d   :  { %v524_v61 = vmax.f32 %v522_v44, %v523_v53  ;;  %v530_v62 = vrot.slane %v529_v54, 1  ;;  %v537_v63 = vrot.slane %v536_v55, 1  ;;  %v543_v0 = vmax.f32 %v541_v47, %v542_v56  ;;  %v576_v44 = vld [vmem:[%s24117_s1 + $0x80] sm:$0xff]  ;;  %v579_v52 = vld [vmem:[%s24117_s1 + $0x98] sm:$0xff] }
  0x1e   :  { %v549_v1 = vrot.slane %v548_v58, 2  ;;  %v556_v3 = vrot.slane %v555_v59, 2  ;;  %v2541_v4 = vsel %vm2485_vm1, %v517_v57, %v510_v49  ;;  %vm7442_vm8 = vcmask 1043456   ;;  %v580_v57 = vld [vmem:[%s24117_s1 + $0xa0] sm:$0xff] }
  0x1f   :  { %v531_v7 = vmax.f32 %v529_v54, %v530_v62  ;;  %v538_v8 = vmax.f32 %v536_v55, %v537_v63  ;;  %v544_v9 = vrot.slane %v543_v0, 1  ;;  %v2542_v10 = vsel %vm2487_vm2, %v524_v61, %v2541_v4  ;;  %12830 = vmatprep.subr.msk.mxu1 %vm7442_vm8, %v7424_v60  ;;  %v582_v62 = vld [vmem:[%s24117_s1 + $0xb0] sm:$0xff]  ;;  %v583_v63 = vld [vmem:[%s24117_s1 + $0xb8] sm:$0xff] }
  0x20   :  { %v550_v11 = vmax.f32 %v548_v58, %v549_v1  ;;  %v557_v12 = vmax.f32 %v555_v59, %v556_v3  ;;  %12831 = vmatpush1.msk.msra.mxu1 %vm7442_vm8, %v7300_v48  ;;  %vm1072_vm9 = vcmask 31744   ;;  %v581_v58 = vld [vmem:[%s24117_s1 + $0xa8] sm:$0xff]  ;;  %vm2839_vm10 = vcmask 523264  }
  0x21   :  { %v545_v16 = vmax.f32 %v543_v0, %v544_v9  ;;  %v2543_v17 = vsel %vm2489_vm3, %v531_v7, %v2542_v10  ;;  %v1073_v20 = vsel %vm1072_vm9, %v560_v5, -inf  ;;  %v1074_v21 = vsel %vm1072_vm9, %v561_v6, -inf  ;;  %v584_v0 = vld [vmem:[%s24117_s1 + $0xc0] sm:$0xff]  ;;  %v585_v6 = vld [vmem:[%s24117_s1 + $0xc8] sm:$0xff] }
  0x22   :  { %v551_v22 = vrot.slane %v550_v11, 1  ;;  %v558_v23 = vrot.slane %v557_v12, 1  ;;  %v2544_v24 = vsel %vm2491_vm4, %v538_v8, %v2543_v17  ;;  %v1075_v28 = vmax.f32 %v1073_v20, %v1074_v21 }
  0x23   :  { %v2545_v29 = vsel %vm2493_vm5, %v545_v16, %v2544_v24  ;;  %v1076_v33 = vsel %vm1072_vm9, %v562_v13, -inf  ;;  %v1078_v34 = vsel %vm1072_vm9, %v563_v14, -inf  ;;  %v1080_v35 = vsel %vm1072_vm9, %v564_v15, -inf  ;;  %v588_v13 = vld [vmem:[%s24117_s1 + $0xe0] sm:$0xff]  ;;  %v591_v24 = vld [vmem:[%s24117_s1 + $0xf8] sm:$0xff] }
  0x24   :  { %v552_v36 = vmax.f32 %v550_v11, %v551_v22  ;;  %v559_v37 = vmax.f32 %v557_v12, %v558_v23  ;;  %v1077_v41 = vmax.f32 %v1075_v28, %v1076_v33  ;;  %v1082_v42 = vsel %vm1072_vm9, %v565_v18, -inf  ;;  %v586_v11 = vld [vmem:[%s24117_s1 + $0xd0] sm:$0xff]  ;;  %v587_v12 = vld [vmem:[%s24117_s1 + $0xd8] sm:$0xff]  ;;  %v589_v18 = vld [vmem:[%s24117_s1 + $0xe8] sm:$0xff] }
  0x25   :  { %v1084_v45 = vsel %vm1072_vm9, %v566_v19, -inf  ;;  %v1086_v46 = vsel %vm1072_vm9, %v567_v25, -inf  ;;  %v1094_v47 = vsel %vm1072_vm9, %v568_v26, -inf  ;;  %v1095_v48 = vsel %vm1072_vm9, %v569_v27, -inf  ;;  %v590_v23 = vld [vmem:[%s24117_s1 + $0xf0] sm:$0xff]  ;;  %v592_v25 = vld [vmem:[%s24117_s1 + $0x100] sm:$0xff] }
  0x26   :  { %v2546_v49 = vsel %vm2495_vm6, %v552_v36, %v2545_v29  ;;  %v1079_v53 = vmax.f32 %v1077_v41, %v1078_v34  ;;  %v1096_v54 = vmax.f32 %v1094_v47, %v1095_v48  ;;  %v1097_v55 = vsel %vm1072_vm9, %v570_v30, -inf  ;;  %v593_v30 = vld [vmem:[%s24117_s1 + $0x108] sm:$0xff]  ;;  %v594_v36 = vld [vmem:[%s24117_s1 + $0x110] sm:$0xff] }
  0x27   :  { %v18076_v56 = vsel %vm2497_vm7, %v559_v37, %v2546_v49  ;;  %v1099_v59 = vsel %vm1072_vm9, %v571_v31, -inf  ;;  %v1101_v60 = vsel %vm1072_vm9, %v572_v38, -inf  ;;  %v1103_v61 = vsel %vm1072_vm9, %v573_v39, -inf  ;;  %v595_v37 = vld [vmem:[%s24117_s1 + $0x118] sm:$0xff]  ;;  %v597_v48 = vld [vmem:[%s24117_s1 + $0x128] sm:$0xff] }
  0x28   :  { %12405 = vmatmul.mubr.msk.f32.gmra.mrb[2].mxu1 %vm111_vm0, %v18076_v56  ;;  %v1081_v1 = vmax.f32 %v1079_v53, %v1080_v35  ;;  %v1098_v3 = vmax.f32 %v1096_v54, %v1097_v55  ;;  %v1105_v4 = vsel %vm1072_vm9, %v574_v40, -inf  ;;  %v1107_v5 = vsel %vm1072_vm9, %v575_v43, -inf  ;;  %v599_v53 = vld [vmem:[%s24117_s1 + $0x138] sm:$0xff] }
  0x29   :  { %7515 = vmatprep.mubr.f32.mxu1 %v17818_v2  ;;  %v1115_v7 = vsel %vm1072_vm9, %v576_v44, -inf  ;;  %v1116_v8 = vsel %vm1072_vm9, %v577_v50, -inf  ;;  %v1118_v9 = vsel %vm1072_vm9, %v578_v51, -inf  ;;  %v1120_v10 = vsel %vm1072_vm9, %v579_v52, -inf }
  0x2a   :  { %v1083_v14 = vmax.f32 %v1081_v1, %v1082_v42  ;;  %v1100_v15 = vmax.f32 %v1098_v3, %v1099_v59  ;;  %v1117_v16 = vmax.f32 %v1115_v7, %v1116_v8  ;;  %v1122_v17 = vsel %vm1072_vm9, %v580_v57, -inf  ;;  %v596_v42 = vld [vmem:[%s24117_s1 + $0x120] sm:$0xff]  ;;  %v602_v7 = vld [vmem:[%s24117_s1 + $0x150] sm:$0xff]  ;;  %v603_v8 = vld [vmem:[%s24117_s1 + $0x158] sm:$0xff] }
  0x2b   :  { %v1124_v19 = vsel %vm1072_vm9, %v581_v58, -inf  ;;  %v1126_v20 = vsel %vm1072_vm9, %v582_v62, -inf  ;;  %v1128_v21 = vsel %vm1072_vm9, %v583_v63, -inf  ;;  %v1136_v22 = vsel %vm1072_vm9, %v584_v0, -inf  ;;  %v600_v59 = vld [vmem:[%s24117_s1 + $0x140] sm:$0xff] }
  0x2c   :  { %v1085_v26 = vmax.f32 %v1083_v14, %v1084_v45  ;;  %v1102_v27 = vmax.f32 %v1100_v15, %v1101_v60  ;;  %v1119_v28 = vmax.f32 %v1117_v16, %v1118_v9  ;;  %v1137_v29 = vsel %vm1072_vm9, %v585_v6, -inf  ;;  %v601_v60 = vld [vmem:[%s24117_s1 + $0x148] sm:$0xff]  ;;  %v604_v16 = vld [vmem:[%s24117_s1 + $0x160] sm:$0xff] }
  0x2d   :  { %v1138_v31 = vmax.f32 %v1136_v22, %v1137_v29  ;;  %v1139_v33 = vsel %vm1072_vm9, %v586_v11, -inf  ;;  %v1141_v34 = vsel %vm1072_vm9, %v587_v12, -inf  ;;  %v1143_v35 = vsel %vm1072_vm9, %v588_v13, -inf }
  0x2e   :  { %v1087_v38 = vmax.f32 %v1085_v26, %v1086_v46  ;;  %v1104_v39 = vmax.f32 %v1102_v27, %v1103_v61  ;;  %v1121_v40 = vmax.f32 %v1119_v28, %v1120_v10  ;;  %v1145_v41 = vsel %vm1072_vm9, %v589_v18, -inf  ;;  %v598_v46 = vld [vmem:[%s24117_s1 + $0x130] sm:$0xff]  ;;  %v607_v28 = vld [vmem:[%s24117_s1 + $0x178] sm:$0xff] }
  0x2f   :  { %v1140_v43 = vmax.f32 %v1138_v31, %v1139_v33  ;;  %v1147_v44 = vsel %vm1072_vm9, %v590_v23, -inf  ;;  %v1149_v45 = vsel %vm1072_vm9, %v591_v24, -inf  ;;  %v1157_v47 = vsel %vm1072_vm9, %v592_v25, -inf  ;;  %v606_v27 = vld [vmem:[%s24117_s1 + $0x170] sm:$0xff] }
  0x30   :  { %v1088_v49 = vrot.slane %v1087_v38, 4  ;;  %v1106_v50 = vmax.f32 %v1104_v39, %v1105_v4  ;;  %v1123_v51 = vmax.f32 %v1121_v40, %v1122_v17  ;;  %v1158_v52 = vsel %vm1072_vm9, %v593_v30, -inf  ;;  %v605_v17 = vld [vmem:[%s24117_s1 + $0x168] sm:$0xff]  ;;  %v610_v39 = vld [vmem:[%s24117_s1 + $0x190] sm:$0xff] }
  0x31   :  { %v1142_v54 = vmax.f32 %v1140_v43, %v1141_v34  ;;  %v1159_v55 = vmax.f32 %v1157_v47, %v1158_v52  ;;  %v1160_v57 = vsel %vm1072_vm9, %v594_v36, -inf  ;;  %v1162_v58 = vsel %vm1072_vm9, %v595_v37, -inf }
  0x32   :  { %v1089_v61 = vmax.f32 %v1087_v38, %v1088_v49  ;;  %v1108_v62 = vmax.f32 %v1106_v50, %v1107_v5  ;;  %v1125_v63 = vmax.f32 %v1123_v51, %v1124_v19  ;;  %v1164_v0 = vsel %vm1072_vm9, %v596_v42, -inf  ;;  %v609_v38 = vld [vmem:[%s24117_s1 + $0x188] sm:$0xff]  ;;  %v612_v49 = vld [vmem:[%s24117_s1 + $0x1a0] sm:$0xff] }
  0x33   :  { %v1144_v1 = vmax.f32 %v1142_v54, %v1143_v35  ;;  %v1161_v3 = vmax.f32 %v1159_v55, %v1160_v57  ;;  %v1166_v4 = vsel %vm1072_vm9, %v597_v48, -inf  ;;  %v1168_v6 = vsel %vm1072_vm9, %v598_v46, -inf  ;;  %v611_v46 = vld [vmem:[%s24117_s1 + $0x198] sm:$0xff]  ;;  %v613_v54 = vld [vmem:[%s24117_s1 + $0x1a8] sm:$0xff] }
  0x34   :  { %v1090_v9 = vrot.slane %v1089_v61, 2  ;;  %v1109_v10 = vrot.slane %v1108_v62, 4  ;;  %v1127_v5 = vmax.f32 %v1125_v63, %v1126_v20  ;;  %v1170_v11 = vsel %vm1072_vm9, %v599_v53, -inf }
  0x35   :  { %v1146_v12 = vmax.f32 %v1144_v1, %v1145_v41  ;;  %v1163_v13 = vmax.f32 %v1161_v3, %v1162_v58  ;;  %v1178_v14 = vsel %vm1072_vm9, %v600_v59, -inf  ;;  %v1179_v15 = vsel %vm1072_vm9, %v601_v60, -inf  ;;  %v614_v60 = vld [vmem:[%s24117_s1 + $0x1b0] sm:$0xff]  ;;  %v616_v3 = vld [vmem:[%s24117_s1 + $0x1c0] sm:$0xff] }
  0x36   :  { %v1091_v18 = vmax.f32 %v1089_v61, %v1090_v9  ;;  %v1110_v19 = vmax.f32 %v1108_v62, %v1109_v10  ;;  %v1129_v22 = vmax.f32 %v1127_v5, %v1128_v21  ;;  %v1180_v20 = vmax.f32 %v1178_v14, %v1179_v15  ;;  %v608_v21 = vld [vmem:[%s24117_s1 + $0x180] sm:$0xff]  ;;  %v615_v61 = vld [vmem:[%s24117_s1 + $0x1b8] sm:$0xff]  ;;  %v617_v9 = vld [vmem:[%s24117_s1 + $0x1c8] sm:$0xff] }
  0x37   :  { %v1148_v23 = vmax.f32 %v1146_v12, %v1147_v44  ;;  %v1165_v24 = vmax.f32 %v1163_v13, %v1164_v0  ;;  %v1181_v25 = vsel %vm1072_vm9, %v602_v7, -inf  ;;  %v1183_v26 = vsel %vm1072_vm9, %v603_v8, -inf  ;;  %v618_v10 = vld [vmem:[%s24117_s1 + $0x1d0] sm:$0xff]  ;;  %v619_v14 = vld [vmem:[%s24117_s1 + $0x1d8] sm:$0xff] }
  0x38   :  { %v1092_v29 = vrot.slane %v1091_v18, 1  ;;  %v1111_v30 = vrot.slane %v1110_v19, 2  ;;  %v1130_v31 = vrot.slane %v1129_v22, 4  ;;  %v1182_v33 = vmax.f32 %v1180_v20, %v1181_v25 }
  0x39   :  { %v1150_v34 = vmax.f32 %v1148_v23, %v1149_v45  ;;  %v1167_v35 = vmax.f32 %v1165_v24, %v1166_v4  ;;  %v1185_v36 = vsel %vm1072_vm9, %v604_v16, -inf  ;;  %v1187_v37 = vsel %vm1072_vm9, %v605_v17, -inf }
  0x3a   :  { %v18209_v40 = vmax.f32 %v1091_v18, %v1092_v29  ;;  %v1112_v41 = vmax.f32 %v1110_v19, %v1111_v30  ;;  %v1131_v42 = vmax.f32 %v1129_v22, %v1130_v31  ;;  %v1184_v43 = vmax.f32 %v1182_v33, %v1183_v26  ;;  %v620_v19 = vld [vmem:[%s24117_s1 + $0x1e0] sm:$0xff]  ;;  %v621_v22 = vld [vmem:[%s24117_s1 + $0x1e8] sm:$0xff]  ;;  %v622_v26 = vld [vmem:[%s24117_s1 + $0x1f0] sm:$0xff] }
  0x3b   :  { %v1151_v44 = vrot.slane %v1150_v34, 4  ;;  %v1169_v45 = vmax.f32 %v1167_v35, %v1168_v6  ;;  %v1189_v47 = vsel %vm1072_vm9, %v606_v27, -inf  ;;  %v1191_v48 = vsel %vm1072_vm9, %v607_v28, -inf  ;;  %v623_v31 = vld [vmem:[%s24117_s1 + $0x1f8] sm:$0xff] }
  0x3c   :  { %v1113_v50 = vrot.slane %v1112_v41, 1  ;;  %v1132_v51 = vrot.slane %v1131_v42, 2  ;;  %v1186_v52 = vmax.f32 %v1184_v43, %v1185_v36  ;;  %v1199_v53 = vsel %vm1072_vm9, %v608_v21, -inf  ;;  %v624_v36 = vld [vmem:[%s24117_s1 + $0x200] sm:$0xff] }
  0x3d   :  { %v1152_v55 = vmax.f32 %v1150_v34, %v1151_v44  ;;  %v1171_v57 = vmax.f32 %v1169_v45, %v1170_v11  ;;  %v1200_v58 = vsel %vm1072_vm9, %v609_v38, -inf  ;;  %v1202_v59 = vsel %vm1072_vm9, %v610_v39, -inf }
  0x3e   :  { %v1114_v62 = vmax.f32 %v1112_v41, %v1113_v50  ;;  %v1133_v63 = vmax.f32 %v1131_v42, %v1132_v51  ;;  %v1188_v0 = vmax.f32 %v1186_v52, %v1187_v37  ;;  %v1201_v1 = vmax.f32 %v1199_v53, %v1200_v58  ;;  %v628_v58 = vld [vmem:[%s24117_s1 + $0x220] sm:$0xff] }
  0x3f   :  { %v1153_v4 = vrot.slane %v1152_v55, 2  ;;  %v1172_v6 = vrot.slane %v1171_v57, 4  ;;  %v1204_v7 = vsel %vm1072_vm9, %v611_v46, -inf  ;;  %v1206_v8 = vsel %vm1072_vm9, %v612_v49, -inf }
  0x40   :  { %v1134_v5 = vrot.slane %v1133_v63, 1  ;;  %v1190_v11 = vmax.f32 %v1188_v0, %v1189_v47  ;;  %v1203_v12 = vmax.f32 %v1201_v1, %v1202_v59  ;;  %v1208_v13 = vsel %vm1072_vm9, %v613_v54, -inf  ;;  %v625_v47 = vld [vmem:[%s24117_s1 + $0x208] sm:$0xff] }
  0x41   :  { %v1154_v15 = vmax.f32 %v1152_v55, %v1153_v4  ;;  %v1173_v16 = vmax.f32 %v1171_v57, %v1172_v6  ;;  %v1210_v17 = vsel %vm1072_vm9, %v614_v60, -inf  ;;  %v1212_v18 = vsel %vm1072_vm9, %v615_v61, -inf  ;;  %v627_v57 = vld [vmem:[%s24117_s1 + $0x218] sm:$0xff]  ;;  %v629_v59 = vld [vmem:[%s24117_s1 + $0x228] sm:$0xff]  ;;  %v630_v61 = vld [vmem:[%s24117_s1 + $0x230] sm:$0xff] }
  0x42   :  { %v1135_v20 = vmax.f32 %v1133_v63, %v1134_v5  ;;  %v1192_v23 = vmax.f32 %v1190_v11, %v1191_v48  ;;  %v1205_v24 = vmax.f32 %v1203_v12, %v1204_v7  ;;  %v1220_v25 = vsel %vm1072_vm9, %v616_v3, -inf  ;;  %v626_v48 = vld [vmem:[%s24117_s1 + $0x210] sm:$0xff]  ;;  %v631_v4 = vld [vmem:[%s24117_s1 + $0x238] sm:$0xff]  ;;  %v632_v6 = vld [vmem:[%s24117_s1 + $0x240] sm:$0xff] }
  0x43   :  { %v1155_v27 = vrot.slane %v1154_v15, 1  ;;  %v1174_v28 = vrot.slane %v1173_v16, 2  ;;  %v1221_v29 = vsel %vm1072_vm9, %v617_v9, -inf  ;;  %v1223_v30 = vsel %vm1072_vm9, %v618_v10, -inf  ;;  %v633_v7 = vld [vmem:[%s24117_s1 + $0x248] sm:$0xff] }
  0x44   :  { %v1193_v33 = vrot.slane %v1192_v23, 4  ;;  %v1207_v21 = vmax.f32 %v1205_v24, %v1206_v8  ;;  %v1222_v34 = vmax.f32 %v1220_v25, %v1221_v29  ;;  %v1225_v35 = vsel %vm1072_vm9, %v619_v14, -inf  ;;  %v639_v29 = vld [vmem:[%s24117_s1 + $0x278] sm:$0xff] }
  0x45   :  { %v1156_v37 = vmax.f32 %v1154_v15, %v1155_v27  ;;  %v1175_v38 = vmax.f32 %v1173_v16, %v1174_v28  ;;  %v1227_v39 = vsel %vm1072_vm9, %v620_v19, -inf  ;;  %v1229_v41 = vsel %vm1072_vm9, %v621_v22, -inf  ;;  %v634_v15 = vld [vmem:[%s24117_s1 + $0x250] sm:$0xff]  ;;  %v635_v16 = vld [vmem:[%s24117_s1 + $0x258] sm:$0xff]  ;;  %v637_v27 = vld [vmem:[%s24117_s1 + $0x268] sm:$0xff] }
  0x46   :  { %v1194_v42 = vmax.f32 %v1192_v23, %v1193_v33  ;;  %v1209_v43 = vmax.f32 %v1207_v21, %v1208_v13  ;;  %v1224_v44 = vmax.f32 %v1222_v34, %v1223_v30  ;;  %v1231_v45 = vsel %vm1072_vm9, %v622_v26, -inf  ;;  %v638_v28 = vld [vmem:[%s24117_s1 + $0x270] sm:$0xff] }
  0x47   :  { %v1176_v46 = vrot.slane %v1175_v38, 1  ;;  %v1233_v49 = vsel %vm1072_vm9, %v623_v31, -inf  ;;  %v7366_v50 = vsel %vm2485_vm1, %v1114_v62, %v18209_v40  ;;  %v1241_v51 = vsel %vm1072_vm9, %v624_v36, -inf  ;;  %v640_v31 = vld [vmem:[%s24117_s1 + $0x280] sm:$0xff] }
  0x48   :  { %v1195_v52 = vrot.slane %v1194_v42, 2  ;;  %v1211_v53 = vmax.f32 %v1209_v43, %v1210_v17  ;;  %v1226_v54 = vmax.f32 %v1224_v44, %v1225_v35  ;;  %v7367_v55 = vsel %vm2487_vm2, %v1135_v20, %v7366_v50  ;;  %v636_v17 = vld [vmem:[%s24117_s1 + $0x260] sm:$0xff] }
  0x49   :  { %v1177_v40 = vmax.f32 %v1175_v38, %v1176_v46  ;;  %v7368_v60 = vsel %vm2489_vm3, %v1156_v37, %v7367_v55  ;;  %v1242_v62 = vsel %vm1072_vm9, %v625_v47, -inf  ;;  %v1244_v63 = vsel %vm1072_vm9, %v626_v48, -inf  ;;  %v644_v50 = vld [vmem:[%s24117_s1 + $0x2a0] sm:$0xff] }
  0x4a   :  { %v1196_v0 = vmax.f32 %v1194_v42, %v1195_v52  ;;  %v1213_v1 = vmax.f32 %v1211_v53, %v1212_v18  ;;  %v1228_v3 = vmax.f32 %v1226_v54, %v1227_v39  ;;  %v1243_v8 = vmax.f32 %v1241_v51, %v1242_v62  ;;  %v641_v39 = vld [vmem:[%s24117_s1 + $0x288] sm:$0xff]  ;;  %v643_v42 = vld [vmem:[%s24117_s1 + $0x298] sm:$0xff]  ;;  %v646_v52 = vld [vmem:[%s24117_s1 + $0x2b0] sm:$0xff] }
  0x4b   :  { %v7369_v9 = vsel %vm2491_vm4, %v1177_v40, %v7368_v60  ;;  %v1246_v10 = vsel %vm1072_vm9, %v627_v57, -inf  ;;  %v1248_v5 = vsel %vm1072_vm9, %v628_v58, -inf  ;;  %v1250_v11 = vsel %vm1072_vm9, %v629_v59, -inf  ;;  %v645_v51 = vld [vmem:[%s24117_s1 + $0x2a8] sm:$0xff]  ;;  %v648_v62 = vld [vmem:[%s24117_s1 + $0x2c0] sm:$0xff] }
  0x4c   :  { %v1197_v12 = vrot.slane %v1196_v0, 1  ;;  %v1214_v13 = vrot.slane %v1213_v1, 4  ;;  %v1230_v14 = vmax.f32 %v1228_v3, %v1229_v41  ;;  %v1245_v18 = vmax.f32 %v1243_v8, %v1244_v63  ;;  %v642_v41 = vld [vmem:[%s24117_s1 + $0x290] sm:$0xff]  ;;  %v649_v63 = vld [vmem:[%s24117_s1 + $0x2c8] sm:$0xff] }
  0x4d   :  { %v1252_v19 = vsel %vm1072_vm9, %v630_v61, -inf  ;;  %v1254_v22 = vsel %vm1072_vm9, %v631_v4, -inf  ;;  %v1262_v20 = vsel %vm1072_vm9, %v632_v6, -inf  ;;  %v1263_v23 = vsel %vm1072_vm9, %v633_v7, -inf  ;;  %v647_v61 = vld [vmem:[%s24117_s1 + $0x2b8] sm:$0xff] }
  0x4e   :  { %v1198_v24 = vmax.f32 %v1196_v0, %v1197_v12  ;;  %v1215_v25 = vmax.f32 %v1213_v1, %v1214_v13  ;;  %v1232_v26 = vmax.f32 %v1230_v14, %v1231_v45  ;;  %v1247_v30 = vmax.f32 %v1245_v18, %v1246_v10  ;;  %v650_v10 = vld [vmem:[%s24117_s1 + $0x2d0] sm:$0xff]  ;;  %v652_v13 = vld [vmem:[%s24117_s1 + $0x2e0] sm:$0xff] }
  0x4f   :  { %v1264_v33 = vmax.f32 %v1262_v20, %v1263_v23  ;;  %v1265_v21 = vsel %vm1072_vm9, %v634_v15, -inf  ;;  %v1267_v34 = vsel %vm1072_vm9, %v635_v16, -inf  ;;  %v1269_v35 = vsel %vm1072_vm9, %v636_v17, -inf  ;;  %v653_v20 = vld [vmem:[%s24117_s1 + $0x2e8] sm:$0xff] }
  0x50   :  { %v1216_v36 = vrot.slane %v1215_v25, 2  ;;  %v1234_v37 = vmax.f32 %v1232_v26, %v1233_v49  ;;  %v7370_v38 = vsel %vm2493_vm5, %v1198_v24, %v7369_v9  ;;  %v1249_v43 = vmax.f32 %v1247_v30, %v1248_v5  ;;  %v651_v5 = vld [vmem:[%s24117_s1 + $0x2d8] sm:$0xff] }
  0x51   :  { %v1266_v44 = vmax.f32 %v1264_v33, %v1265_v21  ;;  %v1271_v45 = vsel %vm1072_vm9, %v637_v27, -inf  ;;  %v1273_v47 = vsel %vm1072_vm9, %v638_v28, -inf  ;;  %v1275_v48 = vsel %vm1072_vm9, %v639_v29, -inf  ;;  %v657_v33 = vld [vmem:[%s24117_s1 + $0x308] sm:$0xff] }
  0x52   :  { %v1217_v46 = vmax.f32 %v1215_v25, %v1216_v36  ;;  %v1235_v49 = vrot.slane %v1234_v37, 4  ;;  %v1251_v53 = vmax.f32 %v1249_v43, %v1250_v11  ;;  %v1283_v54 = vsel %vm1072_vm9, %v640_v31, -inf  ;;  %v655_v25 = vld [vmem:[%s24117_s1 + $0x2f8] sm:$0xff]  ;;  %v656_v31 = vld [vmem:[%s24117_s1 + $0x300] sm:$0xff] }
  0x53   :  { %v1268_v55 = vmax.f32 %v1266_v44, %v1267_v34  ;;  %v1284_v57 = vsel %vm1072_vm9, %v641_v39, -inf  ;;  %v1286_v58 = vsel %vm1072_vm9, %v642_v41, -inf  ;;  %v1288_v59 = vsel %vm1072_vm9, %v643_v42, -inf  ;;  %v658_v42 = vld [vmem:[%s24117_s1 + $0x310] sm:$0xff]  ;;  %v659_v43 = vld [vmem:[%s24117_s1 + $0x318] sm:$0xff] }
  0x54   :  { %v1218_v40 = vrot.slane %v1217_v46, 1  ;;  %v1236_v60 = vmax.f32 %v1234_v37, %v1235_v49  ;;  %v1253_v0 = vmax.f32 %v1251_v53, %v1252_v19  ;;  %v1285_v1 = vmax.f32 %v1283_v54, %v1284_v57  ;;  %v661_v53 = vld [vmem:[%s24117_s1 + $0x328] sm:$0xff]  ;;  %v662_v54 = vld [vmem:[%s24117_s1 + $0x330] sm:$0xff] }
  0x55   :  { %v1270_v3 = vmax.f32 %v1268_v55, %v1269_v35  ;;  %v1290_v4 = vsel %vm1072_vm9, %v644_v50, -inf  ;;  %v1292_v6 = vsel %vm1072_vm9, %v645_v51, -inf  ;;  %v1294_v7 = vsel %vm1072_vm9, %v646_v52, -inf }
  0x56   :  { %v1219_v8 = vmax.f32 %v1217_v46, %v1218_v40  ;;  %v1237_v9 = vrot.slane %v1236_v60, 2  ;;  %v1255_v11 = vmax.f32 %v1253_v0, %v1254_v22  ;;  %v1287_v12 = vmax.f32 %v1285_v1, %v1286_v58  ;;  %v654_v22 = vld [vmem:[%s24117_s1 + $0x2f0] sm:$0xff]  ;;  %v665_v0 = vld [vmem:[%s24117_s1 + $0x348] sm:$0xff] }
  0x57   :  { %v1272_v14 = vmax.f32 %v1270_v3, %v1271_v45  ;;  %v1296_v15 = vsel %vm1072_vm9, %v647_v61, -inf  ;;  %v1304_v16 = vsel %vm1072_vm9, %v648_v62, -inf  ;;  %v1305_v17 = vsel %vm1072_vm9, %v649_v63, -inf  ;;  %v664_v63 = vld [vmem:[%s24117_s1 + $0x340] sm:$0xff] }
  0x58   :  { %v1238_v18 = vmax.f32 %v1236_v60, %v1237_v9  ;;  %v7371_v19 = vsel %vm2495_vm6, %v1219_v8, %v7370_v38  ;;  %v1256_v23 = vrot.slane %v1255_v11, 4  ;;  %v1289_v24 = vmax.f32 %v1287_v12, %v1288_v59  ;;  %v663_v59 = vld [vmem:[%s24117_s1 + $0x338] sm:$0xff]  ;;  %v668_v12 = vld [vmem:[%s24117_s1 + $0x360] sm:$0xff] }
  0x59   :  { %v1274_v26 = vmax.f32 %v1272_v14, %v1273_v47  ;;  %v1306_v27 = vmax.f32 %v1304_v16, %v1305_v17  ;;  %v1307_v28 = vsel %vm1072_vm9, %v650_v10, -inf  ;;  %v1309_v29 = vsel %vm1072_vm9, %v651_v5, -inf  ;;  %v669_v17 = vld [vmem:[%s24117_s1 + $0x368] sm:$0xff] }
  0x5a   :  { %v1239_v30 = vrot.slane %v1238_v18, 1  ;;  %v1257_v21 = vmax.f32 %v1255_v11, %v1256_v23  ;;  %v1291_v34 = vmax.f32 %v1289_v24, %v1290_v4  ;;  %v1311_v35 = vsel %vm1072_vm9, %v652_v13, -inf  ;;  %v667_v11 = vld [vmem:[%s24117_s1 + $0x358] sm:$0xff]  ;;  %v670_v23 = vld [vmem:[%s24117_s1 + $0x370] sm:$0xff] }
  0x5b   :  { %v1276_v36 = vmax.f32 %v1274_v26, %v1275_v48  ;;  %v1308_v37 = vmax.f32 %v1306_v27, %v1307_v28  ;;  %v1313_v38 = vsel %vm1072_vm9, %v653_v20, -inf  ;;  %v1315_v39 = vsel %vm1072_vm9, %v654_v22, -inf  ;;  %v660_v48 = vld [vmem:[%s24117_s1 + $0x320] sm:$0xff]  ;;  %v671_v24 = vld [vmem:[%s24117_s1 + $0x378] sm:$0xff] }
  0x5c   :  { %v1240_v41 = vmax.f32 %v1238_v18, %v1239_v30  ;;  %v1258_v44 = vrot.slane %v1257_v21, 2  ;;  %v1293_v45 = vmax.f32 %v1291_v34, %v1292_v6  ;;  %v1317_v47 = vsel %vm1072_vm9, %v655_v25, -inf  ;;  %v673_v34 = vld [vmem:[%s24117_s1 + $0x388] sm:$0xff] }
  0x5d   :  { %v1277_v46 = vrot.slane %v1276_v36, 4  ;;  %v1310_v49 = vmax.f32 %v1308_v37, %v1309_v29  ;;  %v1325_v50 = vsel %vm1072_vm9, %v656_v31, -inf  ;;  %v1326_v51 = vsel %vm1072_vm9, %v657_v33, -inf  ;;  %v672_v29 = vld [vmem:[%s24117_s1 + $0x380] sm:$0xff] }
  0x5e   :  { %v18421_v52 = vsel %vm2497_vm7, %v1240_v41, %v7371_v19  ;;  %v1259_v55 = vmax.f32 %v1257_v21, %v1258_v44  ;;  %v1295_v57 = vmax.f32 %v1293_v45, %v1294_v7  ;;  %v1327_v58 = vmax.f32 %v1325_v50, %v1326_v51  ;;  %v666_v7 = vld [vmem:[%s24117_s1 + $0x350] sm:$0xff] }
  0x5f   :  { %12832 = vmatmul.mubr.msk.f32.vlgmr.msra.gmra.mrb[4].mxu1 %vm1072_vm9, %v18421_v52  ;;  %v1278_v40 = vmax.f32 %v1276_v36, %v1277_v46  ;;  %v1312_v60 = vmax.f32 %v1310_v49, %v1311_v35  ;;  %v1328_v61 = vsel %vm1072_vm9, %v658_v42, -inf  ;;  %v1330_v62 = vsel %vm1072_vm9, %v659_v43, -inf  ;;  %v674_v35 = vld [vmem:[%s24117_s1 + $0x390] sm:$0xff]  ;;  %v675_v36 = vld [vmem:[%s24117_s1 + $0x398] sm:$0xff] }
  0x60   :  { %7521 = vmatprep.mubr.f32.mxu1 %v17818_v2  ;;  %v1260_v1 = vrot.slane %v1259_v55, 1  ;;  %v1297_v3 = vmax.f32 %v1295_v57, %v1296_v15  ;;  %v1329_v4 = vmax.f32 %v1327_v58, %v1328_v61  ;;  %v1332_v6 = vsel %vm1072_vm9, %v660_v48, -inf  ;;  %v677_v48 = vld [vmem:[%s24117_s1 + $0x3a8] sm:$0xff]  ;;  %v678_v46 = vld [vmem:[%s24117_s1 + $0x3b0] sm:$0xff] }
  0x61   :  { %v1279_v8 = vrot.slane %v1278_v40, 2  ;;  %v1314_v9 = vmax.f32 %v1312_v60, %v1313_v38  ;;  %v1334_v10 = vsel %vm1072_vm9, %v661_v53, -inf  ;;  %v1336_v5 = vsel %vm1072_vm9, %v662_v54, -inf  ;;  %v681_v60 = vld [vmem:[%s24117_s1 + $0x3c8] sm:$0xff] }
  0x62   :  { %v18455_v13 = vmax.f32 %v1259_v55, %v1260_v1  ;;  %v1298_v14 = vrot.slane %v1297_v3, 4  ;;  %v1331_v15 = vmax.f32 %v1329_v4, %v1330_v62  ;;  %v1338_v16 = vsel %vm1072_vm9, %v663_v59, -inf  ;;  %v679_v59 = vld [vmem:[%s24117_s1 + $0x3b8] sm:$0xff] }
  0x63   :  { %v1280_v18 = vmax.f32 %v1278_v40, %v1279_v8  ;;  %v1316_v19 = vmax.f32 %v1314_v9, %v1315_v39  ;;  %v1346_v20 = vsel %vm1072_vm9, %v664_v63, -inf  ;;  %v1347_v22 = vsel %vm1072_vm9, %v665_v0, -inf  ;;  %v680_v40 = vld [vmem:[%s24117_s1 + $0x3c0] sm:$0xff]  ;;  %v683_v8 = vld [vmem:[%s24117_s1 + $0x3d8] sm:$0xff] }
  0x64   :  { %v1299_v25 = vmax.f32 %v1297_v3, %v1298_v14  ;;  %v1333_v26 = vmax.f32 %v1331_v15, %v1332_v6  ;;  %v1348_v27 = vmax.f32 %v1346_v20, %v1347_v22  ;;  %v1349_v28 = vsel %vm1072_vm9, %v666_v7, -inf  ;;  %v682_v7 = vld [vmem:[%s24117_s1 + $0x3d0] sm:$0xff]  ;;  %v684_v9 = vld [vmem:[%s24117_s1 + $0x3e0] sm:$0xff]  ;;  %v687_v20 = vld [vmem:[%s24117_s1 + $0x3f8] sm:$0xff] }
  0x65   :  { %v1281_v30 = vrot.slane %v1280_v18, 1  ;;  %v1318_v31 = vmax.f32 %v1316_v19, %v1317_v47  ;;  %v1351_v33 = vsel %vm1072_vm9, %v667_v11, -inf  ;;  %v1353_v21 = vsel %vm1072_vm9, %v668_v12, -inf  ;;  %v676_v47 = vld [vmem:[%s24117_s1 + $0x3a0] sm:$0xff]  ;;  %v686_v19 = vld [vmem:[%s24117_s1 + $0x3f0] sm:$0xff] }
  0x66   :  { %v1300_v37 = vrot.slane %v1299_v25, 2  ;;  %v1335_v38 = vmax.f32 %v1333_v26, %v1334_v10  ;;  %v1350_v39 = vmax.f32 %v1348_v27, %v1349_v28  ;;  %v1355_v41 = vsel %vm1072_vm9, %v669_v17, -inf }
  0x67   :  { %v18485_v42 = vmax.f32 %v1280_v18, %v1281_v30  ;;  %v1319_v43 = vrot.slane %v1318_v31, 4  ;;  %v1357_v44 = vsel %vm1072_vm9, %v670_v23, -inf  ;;  %v1359_v45 = vsel %vm1072_vm9, %v671_v24, -inf  ;;  %v685_v18 = vld [vmem:[%s24117_s1 + $0x3e8] sm:$0xff] }
  0x68   :  { %v1301_v49 = vmax.f32 %v1299_v25, %v1300_v37  ;;  %v1337_v50 = vmax.f32 %v1335_v38, %v1336_v5  ;;  %v1352_v51 = vmax.f32 %v1350_v39, %v1351_v33  ;;  %v1367_v53 = vsel %vm1072_vm9, %v672_v29, -inf }
  0x69   :  { %v1320_v54 = vmax.f32 %v1318_v31, %v1319_v43  ;;  %v1368_v55 = vsel %vm1072_vm9, %v673_v34, -inf  ;;  %v1370_v57 = vsel %vm1072_vm9, %v674_v35, -inf  ;;  %v1372_v58 = vsel %vm1072_vm9, %v675_v36, -inf  ;;  %v688_v34 = vld [vmem:[%s24117_s1 + $0x400] sm:$0xff]  ;;  %v689_v35 = vld [vmem:[%s24117_s1 + $0x408] sm:$0xff]  ;;  %v690_v36 = vld [vmem:[%s24117_s1 + $0x410] sm:$0xff] }
  0x6a   :  { %v1302_v61 = vrot.slane %v1301_v49, 1  ;;  %v1339_v62 = vmax.f32 %v1337_v50, %v1338_v16  ;;  %v1354_v63 = vmax.f32 %v1352_v51, %v1353_v21  ;;  %v1369_v0 = vmax.f32 %v1367_v53, %v1368_v55 }
  0x6b   :  { %v1321_v1 = vrot.slane %v1320_v54, 2  ;;  %v1374_v3 = vsel %vm1072_vm9, %v676_v47, -inf  ;;  %v1376_v4 = vsel %vm1072_vm9, %v677_v48, -inf  ;;  %v1378_v6 = vsel %vm1072_vm9, %v678_v46, -inf  ;;  %v691_v48 = vld [vmem:[%s24117_s1 + $0x418] sm:$0xff]  ;;  %v692_v46 = vld [vmem:[%s24117_s1 + $0x420] sm:$0xff] }
  0x6c   :  { %v1303_v10 = vmax.f32 %v1301_v49, %v1302_v61  ;;  %v1340_v5 = vrot.slane %v1339_v62, 4  ;;  %v1356_v11 = vmax.f32 %v1354_v63, %v1355_v41  ;;  %v1371_v12 = vmax.f32 %v1369_v0, %v1370_v57 }
  0x6d   :  { %v1322_v14 = vmax.f32 %v1320_v54, %v1321_v1  ;;  %v1380_v15 = vsel %vm1072_vm9, %v679_v59, -inf  ;;  %v1388_v16 = vsel %vm1072_vm9, %v680_v40, -inf  ;;  %v1389_v17 = vsel %vm1072_vm9, %v681_v60, -inf  ;;  %v693_v59 = vld [vmem:[%s24117_s1 + $0x428] sm:$0xff]  ;;  %v694_v40 = vld [vmem:[%s24117_s1 + $0x430] sm:$0xff] }
  0x6e   :  { %v1341_v22 = vmax.f32 %v1339_v62, %v1340_v5  ;;  %v1358_v23 = vmax.f32 %v1356_v11, %v1357_v44  ;;  %v1373_v24 = vmax.f32 %v1371_v12, %v1372_v58  ;;  %v1390_v25 = vmax.f32 %v1388_v16, %v1389_v17  ;;  %v699_v16 = vld [vmem:[%s24117_s1 + $0x458] sm:$0xff]  ;;  %v700_v17 = vld [vmem:[%s24117_s1 + $0x460] sm:$0xff] }
  0x6f   :  { %v1323_v26 = vrot.slane %v1322_v14, 1  ;;  %v1391_v27 = vsel %vm1072_vm9, %v682_v7, -inf  ;;  %v1393_v28 = vsel %vm1072_vm9, %v683_v8, -inf  ;;  %v1395_v29 = vsel %vm1072_vm9, %v684_v9, -inf }
  0x70   :  { %v1342_v30 = vrot.slane %v1341_v22, 2  ;;  %v1360_v31 = vmax.f32 %v1358_v23, %v1359_v45  ;;  %v1375_v33 = vmax.f32 %v1373_v24, %v1374_v3  ;;  %v1392_v21 = vmax.f32 %v1390_v25, %v1391_v27  ;;  %v695_v3 = vld [vmem:[%s24117_s1 + $0x438] sm:$0xff]  ;;  %v702_v27 = vld [vmem:[%s24117_s1 + $0x470] sm:$0xff] }
  0x71   :  { %v1324_v37 = vmax.f32 %v1322_v14, %v1323_v26  ;;  %v1397_v38 = vsel %vm1072_vm9, %v685_v18, -inf  ;;  %v1399_v39 = vsel %vm1072_vm9, %v686_v19, -inf  ;;  %v1401_v41 = vsel %vm1072_vm9, %v687_v20, -inf  ;;  %v701_v26 = vld [vmem:[%s24117_s1 + $0x468] sm:$0xff] }
  0x72   :  { %v1343_v43 = vmax.f32 %v1341_v22, %v1342_v30  ;;  %v1361_v44 = vrot.slane %v1360_v31, 4  ;;  %v1377_v45 = vmax.f32 %v1375_v33, %v1376_v4  ;;  %v1394_v47 = vmax.f32 %v1392_v21, %v1393_v28  ;;  %v696_v4 = vld [vmem:[%s24117_s1 + $0x440] sm:$0xff]  ;;  %v703_v28 = vld [vmem:[%s24117_s1 + $0x478] sm:$0xff] }
  0x73   :  { %v7373_v49 = vsel %vm2485_vm1, %v18485_v42, %v18455_v13  ;;  %v1409_v50 = vsel %vm1072_vm9, %v688_v34, -inf  ;;  %v1410_v51 = vsel %vm1072_vm9, %v689_v35, -inf  ;;  %v1412_v53 = vsel %vm1072_vm9, %v690_v36, -inf }
  0x74   :  { %v1344_v54 = vrot.slane %v1343_v43, 1  ;;  %v1362_v55 = vmax.f32 %v1360_v31, %v1361_v44  ;;  %v1379_v57 = vmax.f32 %v1377_v45, %v1378_v6  ;;  %v1396_v58 = vmax.f32 %v1394_v47, %v1395_v29  ;;  %v697_v6 = vld [vmem:[%s24117_s1 + $0x448] sm:$0xff] }
  0x75   :  { %v7374_v13 = vsel %vm2487_vm2, %v1303_v10, %v7373_v49  ;;  %v1411_v42 = vmax.f32 %v1409_v50, %v1410_v51  ;;  %v1414_v60 = vsel %vm1072_vm9, %v691_v48, -inf  ;;  %v1416_v61 = vsel %vm1072_vm9, %v692_v46, -inf  ;;  %v707_v50 = vld [vmem:[%s24117_s1 + $0x498] sm:$0xff]  ;;  %v708_v51 = vld [vmem:[%s24117_s1 + $0x4a0] sm:$0xff] }
  0x76   :  { %v1345_v62 = vmax.f32 %v1343_v43, %v1344_v54  ;;  %v1363_v63 = vrot.slane %v1362_v55, 2  ;;  %v1381_v0 = vmax.f32 %v1379_v57, %v1380_v15  ;;  %v1398_v1 = vmax.f32 %v1396_v58, %v1397_v38  ;;  %v698_v15 = vld [vmem:[%s24117_s1 + $0x450] sm:$0xff]  ;;  %v705_v38 = vld [vmem:[%s24117_s1 + $0x488] sm:$0xff] }
  0x77   :  { %v7375_v7 = vsel %vm2489_vm3, %v1324_v37, %v7374_v13  ;;  %v1413_v8 = vmax.f32 %v1411_v42, %v1412_v53  ;;  %v1418_v9 = vsel %vm1072_vm9, %v693_v59, -inf  ;;  %v1420_v10 = vsel %vm1072_vm9, %v694_v40, -inf  ;;  %v704_v37 = vld [vmem:[%s24117_s1 + $0x480] sm:$0xff]  ;;  %v709_v53 = vld [vmem:[%s24117_s1 + $0x4a8] sm:$0xff]  ;;  %v710_v42 = vld [vmem:[%s24117_s1 + $0x4b0] sm:$0xff] }
  0x78   :  { %v1364_v5 = vmax.f32 %v1362_v55, %v1363_v63  ;;  %v1382_v11 = vrot.slane %v1381_v0, 4  ;;  %v1400_v12 = vmax.f32 %v1398_v1, %v1399_v39  ;;  %v7376_v14 = vsel %vm2491_vm4, %v1345_v62, %v7375_v7  ;;  %v706_v39 = vld [vmem:[%s24117_s1 + $0x490] sm:$0xff] }
  0x79   :  { %v1415_v18 = vmax.f32 %v1413_v8, %v1414_v60  ;;  %v1422_v19 = vsel %vm1072_vm9, %v695_v3, -inf  ;;  %v1430_v20 = vsel %vm1072_vm9, %v696_v4, -inf  ;;  %v1431_v22 = vsel %vm1072_vm9, %v697_v6, -inf  ;;  %v711_v60 = vld [vmem:[%s24117_s1 + $0x4b8] sm:$0xff]  ;;  %v713_v8 = vld [vmem:[%s24117_s1 + $0x4c8] sm:$0xff] }
  0x7a   :  { %v1365_v23 = vrot.slane %v1364_v5, 1  ;;  %v1383_v24 = vmax.f32 %v1381_v0, %v1382_v11  ;;  %v1402_v25 = vmax.f32 %v1400_v12, %v1401_v41  ;;  %v1432_v29 = vmax.f32 %v1430_v20, %v1431_v22  ;;  %v717_v20 = vld [vmem:[%s24117_s1 + $0x4e8] sm:$0xff]  ;;  %v718_v22 = vld [vmem:[%s24117_s1 + $0x4f0] sm:$0xff] }
  0x7b   :  { %v1417_v30 = vmax.f32 %v1415_v18, %v1416_v61  ;;  %v1433_v31 = vsel %vm1072_vm9, %v698_v15, -inf  ;;  %v1435_v33 = vsel %vm1072_vm9, %v699_v16, -inf  ;;  %v1437_v21 = vsel %vm1072_vm9, %v700_v17, -inf  ;;  %v712_v61 = vld [vmem:[%s24117_s1 + $0x4c0] sm:$0xff] }
  0x7c   :  { %v1366_v34 = vmax.f32 %v1364_v5, %v1365_v23  ;;  %v1384_v35 = vrot.slane %v1383_v24, 2  ;;  %v1403_v36 = vrot.slane %v1402_v25, 4  ;;  %v1434_v41 = vmax.f32 %v1432_v29, %v1433_v31  ;;  %v720_v31 = vld [vmem:[%s24117_s1 + $0x500] sm:$0xff] }
  0x7d   :  { %v1419_v43 = vmax.f32 %v1417_v30, %v1418_v9  ;;  %v1439_v44 = vsel %vm1072_vm9, %v701_v26, -inf  ;;  %v1441_v45 = vsel %vm1072_vm9, %v702_v27, -inf  ;;  %v1443_v47 = vsel %vm1072_vm9, %v703_v28, -inf  ;;  %v714_v9 = vld [vmem:[%s24117_s1 + $0x4d0] sm:$0xff]  ;;  %v719_v30 = vld [vmem:[%s24117_s1 + $0x4f8] sm:$0xff] }
  0x7e   :  { %v1385_v48 = vmax.f32 %v1383_v24, %v1384_v35  ;;  %v1404_v46 = vmax.f32 %v1402_v25, %v1403_v36  ;;  %v7377_v49 = vsel %vm2493_vm5, %v1366_v34, %v7376_v14  ;;  %v1436_v54 = vmax.f32 %v1434_v41, %v1435_v33  ;;  %v721_v33 = vld [vmem:[%s24117_s1 + $0x508] sm:$0xff] }
  0x7f   :  { %v1421_v55 = vmax.f32 %v1419_v43, %v1420_v10  ;;  %v1451_v57 = vsel %vm1072_vm9, %v704_v37, -inf  ;;  %v1452_v58 = vsel %vm1072_vm9, %v705_v38, -inf  ;;  %v1454_v59 = vsel %vm1072_vm9, %v706_v39, -inf  ;;  %v715_v10 = vld [vmem:[%s24117_s1 + $0x4d8] sm:$0xff]  ;;  %v722_v43 = vld [vmem:[%s24117_s1 + $0x510] sm:$0xff] }
  0x80   :  { %v1386_v40 = vrot.slane %v1385_v48, 1  ;;  %v1405_v13 = vrot.slane %v1404_v46, 2  ;;  %v1438_v62 = vmax.f32 %v1436_v54, %v1437_v21  ;;  %v1453_v63 = vmax.f32 %v1451_v57, %v1452_v58  ;;  %v725_v54 = vld [vmem:[%s24117_s1 + $0x528] sm:$0xff]  ;;  %v727_v57 = vld [vmem:[%s24117_s1 + $0x538] sm:$0xff] }
  0x81   :  { %v1423_v0 = vmax.f32 %v1421_v55, %v1422_v19  ;;  %v1456_v1 = vsel %vm1072_vm9, %v707_v50, -inf  ;;  %v1458_v3 = vsel %vm1072_vm9, %v708_v51, -inf  ;;  %v1460_v4 = vsel %vm1072_vm9, %v709_v53, -inf  ;;  %v716_v19 = vld [vmem:[%s24117_s1 + $0x4e0] sm:$0xff]  ;;  %v726_v55 = vld [vmem:[%s24117_s1 + $0x530] sm:$0xff] }
  0x82   :  { %v1387_v6 = vmax.f32 %v1385_v48, %v1386_v40  ;;  %v1406_v7 = vmax.f32 %v1404_v46, %v1405_v13  ;;  %v1440_v5 = vmax.f32 %v1438_v62, %v1439_v44  ;;  %v1455_v11 = vmax.f32 %v1453_v63, %v1454_v59  ;;  %v723_v44 = vld [vmem:[%s24117_s1 + $0x518] sm:$0xff] }
  0x83   :  { %v1424_v12 = vrot.slane %v1423_v0, 4  ;;  %v1462_v14 = vsel %vm1072_vm9, %v710_v42, -inf  ;;  %v1464_v15 = vsel %vm1072_vm9, %v711_v60, -inf  ;;  %v1472_v16 = vsel %vm1072_vm9, %v712_v61, -inf  ;;  %v728_v42 = vld [vmem:[%s24117_s1 + $0x540] sm:$0xff] }
  0x84   :  { %v1407_v17 = vrot.slane %v1406_v7, 1  ;;  %v7378_v18 = vsel %vm2495_vm6, %v1387_v6, %v7377_v49  ;;  %v1442_v23 = vmax.f32 %v1440_v5, %v1441_v45  ;;  %v1457_v24 = vmax.f32 %v1455_v11, %v1456_v1  ;;  %v724_v45 = vld [vmem:[%s24117_s1 + $0x520] sm:$0xff]  ;;  %v730_v1 = vld [vmem:[%s24117_s1 + $0x550] sm:$0xff] }
  0x85   :  { %v1425_v25 = vmax.f32 %v1423_v0, %v1424_v12  ;;  %v1473_v26 = vsel %vm1072_vm9, %v713_v8, -inf  ;;  %v1475_v27 = vsel %vm1072_vm9, %v714_v9, -inf  ;;  %v1477_v28 = vsel %vm1072_vm9, %v715_v10, -inf  ;;  %v729_v0 = vld [vmem:[%s24117_s1 + $0x548] sm:$0xff]  ;;  %v732_v12 = vld [vmem:[%s24117_s1 + $0x560] sm:$0xff] }
  0x86   :  { %v1408_v29 = vmax.f32 %v1406_v7, %v1407_v17  ;;  %v1444_v21 = vmax.f32 %v1442_v23, %v1443_v47  ;;  %v1459_v34 = vmax.f32 %v1457_v24, %v1458_v3  ;;  %v1474_v35 = vmax.f32 %v1472_v16, %v1473_v26  ;;  %v731_v3 = vld [vmem:[%s24117_s1 + $0x558] sm:$0xff]  ;;  %v736_v26 = vld [vmem:[%s24117_s1 + $0x580] sm:$0xff] }
  0x87   :  { %v1426_v36 = vrot.slane %v1425_v25, 2  ;;  %v1479_v37 = vsel %vm1072_vm9, %v716_v19, -inf  ;;  %v1481_v38 = vsel %vm1072_vm9, %v717_v20, -inf  ;;  %v1483_v39 = vsel %vm1072_vm9, %v718_v22, -inf }
  0x88   :  { %v18683_v41 = vsel %vm2497_vm7, %v1408_v29, %v7378_v18  ;;  %v1445_v47 = vrot.slane %v1444_v21, 4  ;;  %v1461_v48 = vmax.f32 %v1459_v34, %v1460_v4  ;;  %v1476_v46 = vmax.f32 %v1474_v35, %v1475_v27  ;;  %v737_v27 = vld [vmem:[%s24117_s1 + $0x588] sm:$0xff] }
  0x89   :  { %12833 = vmatmul.mubr.msk.f32.gmra.mrb[6].mxu1 %vm1072_vm9, %v18683_v41  ;;  %v1427_v49 = vmax.f32 %v1425_v25, %v1426_v36  ;;  %v1485_v50 = vsel %vm1072_vm9, %v719_v30, -inf  ;;  %v1493_v51 = vsel %vm1072_vm9, %v720_v31, -inf  ;;  %v1494_v53 = vsel %vm1072_vm9, %v721_v33, -inf  ;;  %v735_v25 = vld [vmem:[%s24117_s1 + $0x578] sm:$0xff]  ;;  %v738_v36 = vld [vmem:[%s24117_s1 + $0x590] sm:$0xff] }
  0x8a   :  { %7527 = vmatprep.mubr.f32.mxu1 %v17818_v2  ;;  %v1446_v58 = vmax.f32 %v1444_v21, %v1445_v47  ;;  %v1463_v59 = vmax.f32 %v1461_v48, %v1462_v14  ;;  %v1478_v40 = vmax.f32 %v1476_v46, %v1477_v28  ;;  %v1495_v13 = vmax.f32 %v1493_v51, %v1494_v53  ;;  %v733_v14 = vld [vmem:[%s24117_s1 + $0x568] sm:$0xff]  ;;  %v742_v53 = vld [vmem:[%s24117_s1 + $0x5b0] sm:$0xff] }
  0x8b   :  { %v1428_v60 = vrot.slane %v1427_v49, 1  ;;  %v1496_v61 = vsel %vm1072_vm9, %v722_v43, -inf  ;;  %v1498_v62 = vsel %vm1072_vm9, %v723_v44, -inf  ;;  %v1500_v63 = vsel %vm1072_vm9, %v724_v45, -inf  ;;  %v741_v51 = vld [vmem:[%s24117_s1 + $0x5a8] sm:$0xff] }
  0x8c   :  { %v1447_v4 = vrot.slane %v1446_v58, 2  ;;  %v1465_v6 = vmax.f32 %v1463_v59, %v1464_v15  ;;  %v1480_v7 = vmax.f32 %v1478_v40, %v1479_v37  ;;  %v1497_v8 = vmax.f32 %v1495_v13, %v1496_v61  ;;  %v734_v15 = vld [vmem:[%s24117_s1 + $0x570] sm:$0xff]  ;;  %v739_v37 = vld [vmem:[%s24117_s1 + $0x598] sm:$0xff]  ;;  %v745_v61 = vld [vmem:[%s24117_s1 + $0x5c8] sm:$0xff] }
  0x8d   :  { %v18724_v9 = vmax.f32 %v1427_v49, %v1428_v60  ;;  %v1502_v10 = vsel %vm1072_vm9, %v725_v54, -inf  ;;  %v1504_v5 = vsel %vm1072_vm9, %v726_v55, -inf  ;;  %v1506_v11 = vsel %vm1072_vm9, %v727_v57, -inf  ;;  %v744_v60 = vld [vmem:[%s24117_s1 + $0x5c0] sm:$0xff] }
  0x8e   :  { %v1448_v16 = vmax.f32 %v1446_v58, %v1447_v4  ;;  %v1466_v17 = vrot.slane %v1465_v6, 4  ;;  %v1482_v18 = vmax.f32 %v1480_v7, %v1481_v38  ;;  %v1499_v19 = vmax.f32 %v1497_v8, %v1498_v62  ;;  %v740_v38 = vld [vmem:[%s24117_s1 + $0x5a0] sm:$0xff]  ;;  %v746_v62 = vld [vmem:[%s24117_s1 + $0x5d0] sm:$0xff] }
  0x8f   :  { %v1514_v20 = vsel %vm1072_vm9, %v728_v42, -inf  ;;  %v1515_v22 = vsel %vm1072_vm9, %v729_v0, -inf  ;;  %v1517_v23 = vsel %vm1072_vm9, %v730_v1, -inf  ;;  %v1519_v24 = vsel %vm1072_vm9, %v731_v3, -inf }
  0x90   :  { %v1449_v28 = vrot.slane %v1448_v16, 1  ;;  %v1467_v29 = vmax.f32 %v1465_v6, %v1466_v17  ;;  %v1484_v30 = vmax.f32 %v1482_v18, %v1483_v39  ;;  %v1501_v31 = vmax.f32 %v1499_v19, %v1500_v63 }
  0x91   :  { %v1516_v33 = vmax.f32 %v1514_v20, %v1515_v22  ;;  %v1521_v21 = vsel %vm1072_vm9, %v732_v12, -inf  ;;  %v1523_v34 = vsel %vm1072_vm9, %v733_v14, -inf  ;;  %v1525_v35 = vsel %vm1072_vm9, %v734_v15, -inf  ;;  %v750_v22 = vld [vmem:[%s24117_s1 + $0x5f0] sm:$0xff] }
  0x92   :  { %v1450_v39 = vmax.f32 %v1448_v16, %v1449_v28  ;;  %v1468_v43 = vrot.slane %v1467_v29, 2  ;;  %v1486_v44 = vmax.f32 %v1484_v30, %v1485_v50  ;;  %v1503_v45 = vmax.f32 %v1501_v31, %v1502_v10  ;;  %v743_v50 = vld [vmem:[%s24117_s1 + $0x5b8] sm:$0xff] }
  0x93   :  { %v1518_v47 = vmax.f32 %v1516_v33, %v1517_v23  ;;  %v1527_v48 = vsel %vm1072_vm9, %v735_v25, -inf  ;;  %v1535_v46 = vsel %vm1072_vm9, %v736_v26, -inf  ;;  %v1536_v49 = vsel %vm1072_vm9, %v737_v27, -inf  ;;  %v747_v10 = vld [vmem:[%s24117_s1 + $0x5d8] sm:$0xff] }
  0x94   :  { %v1469_v54 = vmax.f32 %v1467_v29, %v1468_v43  ;;  %v1487_v55 = vrot.slane %v1486_v44, 4  ;;  %v1505_v57 = vmax.f32 %v1503_v45, %v1504_v5  ;;  %v1537_v58 = vmax.f32 %v1535_v46, %v1536_v49  ;;  %v748_v5 = vld [vmem:[%s24117_s1 + $0x5e0] sm:$0xff]  ;;  %v751_v23 = vld [vmem:[%s24117_s1 + $0x5f8] sm:$0xff] }
  0x95   :  { %v1520_v59 = vmax.f32 %v1518_v47, %v1519_v24  ;;  %v1538_v40 = vsel %vm1072_vm9, %v738_v36, -inf  ;;  %v1540_v13 = vsel %vm1072_vm9, %v739_v37, -inf  ;;  %v1542_v42 = vsel %vm1072_vm9, %v740_v38, -inf  ;;  %v752_v37 = vld [vmem:[%s24117_s1 + $0x600] sm:$0xff]  ;;  %v753_v38 = vld [vmem:[%s24117_s1 + $0x608] sm:$0xff] }
  0x96   :  { %v1470_v63 = vrot.slane %v1469_v54, 1  ;;  %v1488_v0 = vmax.f32 %v1486_v44, %v1487_v55  ;;  %v1507_v1 = vmax.f32 %v1505_v57, %v1506_v11  ;;  %v1539_v3 = vmax.f32 %v1537_v58, %v1538_v40  ;;  %v749_v11 = vld [vmem:[%s24117_s1 + $0x5e8] sm:$0xff]  ;;  %v756_v55 = vld [vmem:[%s24117_s1 + $0x620] sm:$0xff] }
  0x97   :  { %v1522_v4 = vmax.f32 %v1520_v59, %v1521_v21  ;;  %v1544_v6 = vsel %vm1072_vm9, %v741_v51, -inf  ;;  %v1546_v7 = vsel %vm1072_vm9, %v742_v53, -inf  ;;  %v1548_v8 = vsel %vm1072_vm9, %v743_v50, -inf  ;;  %v754_v53 = vld [vmem:[%s24117_s1 + $0x610] sm:$0xff]  ;;  %v755_v50 = vld [vmem:[%s24117_s1 + $0x618] sm:$0xff] }
  0x98   :  { %v1471_v12 = vmax.f32 %v1469_v54, %v1470_v63  ;;  %v1489_v14 = vrot.slane %v1488_v0, 2  ;;  %v1508_v15 = vrot.slane %v1507_v1, 4  ;;  %v1541_v16 = vmax.f32 %v1539_v3, %v1540_v13  ;;  %v757_v13 = vld [vmem:[%s24117_s1 + $0x628] sm:$0xff] }
  0x99   :  { %v1524_v17 = vmax.f32 %v1522_v4, %v1523_v34  ;;  %v1556_v18 = vsel %vm1072_vm9, %v744_v60, -inf  ;;  %v1557_v19 = vsel %vm1072_vm9, %v745_v61, -inf  ;;  %v1559_v20 = vsel %vm1072_vm9, %v746_v62, -inf  ;;  %v759_v61 = vld [vmem:[%s24117_s1 + $0x638] sm:$0xff] }
  0x9a   :  { %v1490_v24 = vmax.f32 %v1488_v0, %v1489_v14  ;;  %v1509_v25 = vmax.f32 %v1507_v1, %v1508_v15  ;;  %v1543_v26 = vmax.f32 %v1541_v16, %v1542_v42  ;;  %v1558_v27 = vmax.f32 %v1556_v18, %v1557_v19  ;;  %v758_v42 = vld [vmem:[%s24117_s1 + $0x630] sm:$0xff]  ;;  %v763_v18 = vld [vmem:[%s24117_s1 + $0x658] sm:$0xff]  ;;  %v764_v19 = vld [vmem:[%s24117_s1 + $0x660] sm:$0xff] }
  0x9b   :  { %v1526_v28 = vmax.f32 %v1524_v17, %v1525_v35  ;;  %v1561_v29 = vsel %vm1072_vm9, %v747_v10, -inf  ;;  %v1563_v30 = vsel %vm1072_vm9, %v748_v5, -inf  ;;  %v1565_v31 = vsel %vm1072_vm9, %v749_v11, -inf  ;;  %v762_v5 = vld [vmem:[%s24117_s1 + $0x650] sm:$0xff] }
  0x9c   :  { %v1491_v33 = vrot.slane %v1490_v24, 1  ;;  %v1510_v21 = vrot.slane %v1509_v25, 2  ;;  %v1545_v34 = vmax.f32 %v1543_v26, %v1544_v6  ;;  %v1560_v36 = vmax.f32 %v1558_v27, %v1559_v20  ;;  %v760_v6 = vld [vmem:[%s24117_s1 + $0x640] sm:$0xff] }
  0x9d   :  { %v1528_v43 = vmax.f32 %v1526_v28, %v1527_v48  ;;  %v1567_v35 = vsel %vm1072_vm9, %v750_v22, -inf  ;;  %v1569_v44 = vsel %vm1072_vm9, %v751_v23, -inf  ;;  %v7380_v45 = vsel %vm2485_vm1, %v1450_v39, %v18724_v9  ;;  %v765_v23 = vld [vmem:[%s24117_s1 + $0x668] sm:$0xff] }
  0x9e   :  { %v1492_v47 = vmax.f32 %v1490_v24, %v1491_v33  ;;  %v1511_v46 = vmax.f32 %v1509_v25, %v1510_v21  ;;  %v1547_v49 = vmax.f32 %v1545_v34, %v1546_v7  ;;  %v1562_v51 = vmax.f32 %v1560_v36, %v1561_v29  ;;  %v761_v7 = vld [vmem:[%s24117_s1 + $0x648] sm:$0xff]  ;;  %v766_v29 = vld [vmem:[%s24117_s1 + $0x670] sm:$0xff]  ;;  %v768_v34 = vld [vmem:[%s24117_s1 + $0x680] sm:$0xff] }
  0x9f   :  { %v1529_v48 = vrot.slane %v1528_v43, 4  ;;  %v7381_v54 = vsel %vm2487_vm2, %v1471_v12, %v7380_v45  ;;  %v1577_v9 = vsel %vm1072_vm9, %v752_v37, -inf  ;;  %v1578_v39 = vsel %vm1072_vm9, %v753_v38, -inf  ;;  %v770_v45 = vld [vmem:[%s24117_s1 + $0x690] sm:$0xff] }
  0xa0   :  { %v1512_v57 = vrot.slane %v1511_v46, 1  ;;  %v1549_v58 = vmax.f32 %v1547_v49, %v1548_v8  ;;  %v1564_v59 = vmax.f32 %v1562_v51, %v1563_v30  ;;  %v7382_v40 = vsel %vm2489_vm3, %v1492_v47, %v7381_v54  ;;  %v767_v30 = vld [vmem:[%s24117_s1 + $0x678] sm:$0xff] }
  0xa1   :  { %v1530_v60 = vmax.f32 %v1528_v43, %v1529_v48  ;;  %v1579_v62 = vmax.f32 %v1577_v9, %v1578_v39  ;;  %v1580_v63 = vsel %vm1072_vm9, %v754_v53, -inf  ;;  %v1582_v0 = vsel %vm1072_vm9, %v755_v50, -inf  ;;  %v772_v9 = vld [vmem:[%s24117_s1 + $0x6a0] sm:$0xff]  ;;  %v773_v39 = vld [vmem:[%s24117_s1 + $0x6a8] sm:$0xff] }
  0xa2   :  { %v1513_v1 = vmax.f32 %v1511_v46, %v1512_v57  ;;  %v1550_v3 = vrot.slane %v1549_v58, 4  ;;  %v1566_v4 = vmax.f32 %v1564_v59, %v1565_v31  ;;  %v1584_v8 = vsel %vm1072_vm9, %v756_v55, -inf  ;;  %v771_v55 = vld [vmem:[%s24117_s1 + $0x698] sm:$0xff] }
  0xa3   :  { %v1531_v10 = vrot.slane %v1530_v60, 2  ;;  %v1581_v11 = vmax.f32 %v1579_v62, %v1580_v63  ;;  %v1586_v12 = vsel %vm1072_vm9, %v757_v13, -inf  ;;  %v1588_v14 = vsel %vm1072_vm9, %v758_v42, -inf  ;;  %v774_v62 = vld [vmem:[%s24117_s1 + $0x6b0] sm:$0xff]  ;;  %v775_v63 = vld [vmem:[%s24117_s1 + $0x6b8] sm:$0xff] }
  0xa4   :  { %v1551_v15 = vmax.f32 %v1549_v58, %v1550_v3  ;;  %v1568_v16 = vmax.f32 %v1566_v4, %v1567_v35  ;;  %v7383_v17 = vsel %vm2491_vm4, %v1513_v1, %v7382_v40  ;;  %v1590_v20 = vsel %vm1072_vm9, %v759_v61, -inf  ;;  %v777_v4 = vld [vmem:[%s24117_s1 + $0x6c8] sm:$0xff] }
  0xa5   :  { %v1532_v22 = vmax.f32 %v1530_v60, %v1531_v10  ;;  %v1583_v24 = vmax.f32 %v1581_v11, %v1582_v0  ;;  %v1598_v25 = vsel %vm1072_vm9, %v760_v6, -inf  ;;  %v1599_v26 = vsel %vm1072_vm9, %v761_v7, -inf  ;;  %v776_v0 = vld [vmem:[%s24117_s1 + $0x6c0] sm:$0xff] }
  0xa6   :  { %v1552_v27 = vrot.slane %v1551_v15, 2  ;;  %v1570_v28 = vmax.f32 %v1568_v16, %v1569_v44  ;;  %v1600_v31 = vmax.f32 %v1598_v25, %v1599_v26  ;;  %v1601_v33 = vsel %vm1072_vm9, %v762_v5, -inf  ;;  %v769_v44 = vld [vmem:[%s24117_s1 + $0x688] sm:$0xff]  ;;  %v782_v25 = vld [vmem:[%s24117_s1 + $0x6f0] sm:$0xff] }
  0xa7   :  { %v1533_v21 = vrot.slane %v1532_v22, 1  ;;  %v1585_v36 = vmax.f32 %v1583_v24, %v1584_v8  ;;  %v1603_v37 = vsel %vm1072_vm9, %v763_v18, -inf  ;;  %v1605_v38 = vsel %vm1072_vm9, %v764_v19, -inf  ;;  %v781_v24 = vld [vmem:[%s24117_s1 + $0x6e8] sm:$0xff] }
  0xa8   :  { %v1553_v43 = vmax.f32 %v1551_v15, %v1552_v27  ;;  %v1571_v35 = vrot.slane %v1570_v28, 4  ;;  %v1602_v47 = vmax.f32 %v1600_v31, %v1601_v33  ;;  %v1607_v46 = vsel %vm1072_vm9, %v765_v23, -inf }
  0xa9   :  { %v1534_v49 = vmax.f32 %v1532_v22, %v1533_v21  ;;  %v1587_v51 = vmax.f32 %v1585_v36, %v1586_v12  ;;  %v1609_v53 = vsel %vm1072_vm9, %v766_v29, -inf  ;;  %v1611_v50 = vsel %vm1072_vm9, %v767_v30, -inf  ;;  %v778_v12 = vld [vmem:[%s24117_s1 + $0x6d0] sm:$0xff]  ;;  %v783_v29 = vld [vmem:[%s24117_s1 + $0x6f8] sm:$0xff]  ;;  %v784_v36 = vld [vmem:[%s24117_s1 + $0x700] sm:$0xff] }
  0xaa   :  { %v1554_v48 = vrot.slane %v1553_v43, 1  ;;  %v1572_v54 = vmax.f32 %v1570_v28, %v1571_v35  ;;  %v1604_v57 = vmax.f32 %v1602_v47, %v1603_v37  ;;  %v1619_v58 = vsel %vm1072_vm9, %v768_v34, -inf  ;;  %v785_v37 = vld [vmem:[%s24117_s1 + $0x708] sm:$0xff] }
  0xab   :  { %v7384_v59 = vsel %vm2493_vm5, %v1534_v49, %v7383_v17  ;;  %v1589_v40 = vmax.f32 %v1587_v51, %v1588_v14  ;;  %v1620_v13 = vsel %vm1072_vm9, %v769_v44, -inf  ;;  %v1622_v42 = vsel %vm1072_vm9, %v770_v45, -inf  ;;  %v779_v14 = vld [vmem:[%s24117_s1 + $0x6d8] sm:$0xff]  ;;  %v780_v17 = vld [vmem:[%s24117_s1 + $0x6e0] sm:$0xff]  ;;  %v786_v44 = vld [vmem:[%s24117_s1 + $0x710] sm:$0xff] }
  0xac   :  { %v1555_v60 = vmax.f32 %v1553_v43, %v1554_v48  ;;  %v1573_v61 = vrot.slane %v1572_v54, 2  ;;  %v1606_v1 = vmax.f32 %v1604_v57, %v1605_v38  ;;  %v1621_v3 = vmax.f32 %v1619_v58, %v1620_v13  ;;  %v791_v13 = vld [vmem:[%s24117_s1 + $0x738] sm:$0xff] }
  0xad   :  { %v1591_v6 = vmax.f32 %v1589_v40, %v1590_v20  ;;  %v1624_v7 = vsel %vm1072_vm9, %v771_v55, -inf  ;;  %v1626_v8 = vsel %vm1072_vm9, %v772_v9, -inf  ;;  %v1628_v10 = vsel %vm1072_vm9, %v773_v39, -inf  ;;  %v789_v9 = vld [vmem:[%s24117_s1 + $0x728] sm:$0xff]  ;;  %v790_v40 = vld [vmem:[%s24117_s1 + $0x730] sm:$0xff] }
  0xae   :  { %v1574_v5 = vmax.f32 %v1572_v54, %v1573_v61  ;;  %v7385_v11 = vsel %vm2495_vm6, %v1555_v60, %v7384_v59  ;;  %v1608_v15 = vmax.f32 %v1606_v1, %v1607_v46  ;;  %v1623_v16 = vmax.f32 %v1621_v3, %v1622_v42 }
  0xaf   :  { %v1592_v18 = vrot.slane %v1591_v6, 4  ;;  %v1630_v19 = vsel %vm1072_vm9, %v774_v62, -inf  ;;  %v1632_v20 = vsel %vm1072_vm9, %v775_v63, -inf  ;;  %v1640_v22 = vsel %vm1072_vm9, %v776_v0, -inf  ;;  %v792_v63 = vld [vmem:[%s24117_s1 + $0x740] sm:$0xff] }
  0xb0   :  { %v1575_v23 = vrot.slane %v1574_v5, 1  ;;  %v1610_v26 = vmax.f32 %v1608_v15, %v1609_v53  ;;  %v1625_v27 = vmax.f32 %v1623_v16, %v1624_v7  ;;  %v1641_v28 = vsel %vm1072_vm9, %v777_v4, -inf  ;;  %v787_v53 = vld [vmem:[%s24117_s1 + $0x718] sm:$0xff]  ;;  %v794_v7 = vld [vmem:[%s24117_s1 + $0x750] sm:$0xff] }
  0xb1   :  { %v1593_v30 = vmax.f32 %v1591_v6, %v1592_v18  ;;  %v1642_v31 = vmax.f32 %v1640_v22, %v1641_v28  ;;  %v1643_v33 = vsel %vm1072_vm9, %v778_v12, -inf  ;;  %v1645_v21 = vsel %vm1072_vm9, %v779_v14, -inf  ;;  %v793_v6 = vld [vmem:[%s24117_s1 + $0x748] sm:$0xff]  ;;  %v796_v18 = vld [vmem:[%s24117_s1 + $0x760] sm:$0xff] }
  0xb2   :  { %v1576_v34 = vmax.f32 %v1574_v5, %v1575_v23  ;;  %v1612_v38 = vmax.f32 %v1610_v26, %v1611_v50  ;;  %v1627_v43 = vmax.f32 %v1625_v27, %v1626_v8  ;;  %v1647_v35 = vsel %vm1072_vm9, %v780_v17, -inf  ;;  %v788_v50 = vld [vmem:[%s24117_s1 + $0x720] sm:$0xff]  ;;  %v795_v8 = vld [vmem:[%s24117_s1 + $0x758] sm:$0xff] }
  0xb3   :  { %v1594_v45 = vrot.slane %v1593_v30, 2  ;;  %v1644_v47 = vmax.f32 %v1642_v31, %v1643_v33  ;;  %v1649_v46 = vsel %vm1072_vm9, %v781_v24, -inf  ;;  %v1651_v49 = vsel %vm1072_vm9, %v782_v25, -inf  ;;  %v800_v31 = vld [vmem:[%s24117_s1 + $0x780] sm:$0xff]  ;;  %v801_v33 = vld [vmem:[%s24117_s1 + $0x788] sm:$0xff] }
  0xb4   :  { %v18957_v51 = vsel %vm2497_vm7, %v1576_v34, %v7385_v11  ;;  %v1613_v48 = vrot.slane %v1612_v38, 4  ;;  %v1629_v54 = vmax.f32 %v1627_v43, %v1628_v10  ;;  %v1653_v55 = vsel %vm1072_vm9, %v783_v29, -inf }
  0xb5   :  { %12834 = vmatmul.mubr.msk.f32.gmra.mrb[8].mxu1 %vm1072_vm9, %v18957_v51  ;;  %v1595_v39 = vmax.f32 %v1593_v30, %v1594_v45  ;;  %v1646_v57 = vmax.f32 %v1644_v47, %v1645_v21  ;;  %v1661_v58 = vsel %vm1072_vm9, %v784_v36, -inf  ;;  %v1662_v59 = vsel %vm1072_vm9, %v785_v37, -inf  ;;  %v799_v30 = vld [vmem:[%s24117_s1 + $0x778] sm:$0xff]  ;;  %v802_v45 = vld [vmem:[%s24117_s1 + $0x790] sm:$0xff] }
  0xb6   :  { %7533 = vmatprep.mubr.f32.mxu1 %v17818_v2  ;;  %v1614_v42 = vmax.f32 %v1612_v38, %v1613_v48  ;;  %v1631_v60 = vmax.f32 %v1629_v54, %v1630_v19  ;;  %v1663_v61 = vmax.f32 %v1661_v58, %v1662_v59  ;;  %v1664_v62 = vsel %vm1072_vm9, %v786_v44, -inf  ;;  %v797_v19 = vld [vmem:[%s24117_s1 + $0x768] sm:$0xff]  ;;  %v803_v47 = vld [vmem:[%s24117_s1 + $0x798] sm:$0xff]  ;;  %v806_v58 = vld [vmem:[%s24117_s1 + $0x7b0] sm:$0xff] }
  0xb7   :  { %v1596_v0 = vrot.slane %v1595_v39, 1  ;;  %v1648_v1 = vmax.f32 %v1646_v57, %v1647_v35  ;;  %v1666_v3 = vsel %vm1072_vm9, %v787_v53, -inf  ;;  %v1668_v4 = vsel %vm1072_vm9, %v788_v50, -inf  ;;  %v805_v57 = vld [vmem:[%s24117_s1 + $0x7a8] sm:$0xff]  ;;  %v807_v59 = vld [vmem:[%s24117_s1 + $0x7b8] sm:$0xff] }
  0xb8   :  { %v1615_v10 = vrot.slane %v1614_v42, 2  ;;  %v1633_v5 = vmax.f32 %v1631_v60, %v1632_v20  ;;  %v1665_v11 = vmax.f32 %v1663_v61, %v1664_v62  ;;  %v1670_v12 = vsel %vm1072_vm9, %v789_v9, -inf  ;;  %v798_v20 = vld [vmem:[%s24117_s1 + $0x770] sm:$0xff] }
  0xb9   :  { %v18996_v14 = vmax.f32 %v1595_v39, %v1596_v0  ;;  %v1650_v15 = vmax.f32 %v1648_v1, %v1649_v46  ;;  %v1672_v16 = vsel %vm1072_vm9, %v790_v40, -inf  ;;  %v1674_v17 = vsel %vm1072_vm9, %v791_v13, -inf  ;;  %v804_v46 = vld [vmem:[%s24117_s1 + $0x7a0] sm:$0xff] }
  0xba   :  { %v1616_v22 = vmax.f32 %v1614_v42, %v1615_v10  ;;  %v1634_v23 = vrot.slane %v1633_v5, 4  ;;  %v1667_v24 = vmax.f32 %v1665_v11, %v1666_v3  ;;  %v1682_v25 = vsel %vm1072_vm9, %v792_v63, -inf  ;;  %v808_v1 = vld [vmem:[%s24117_s1 + $0x7c0] sm:$0xff]  ;;  %v809_v3 = vld [vmem:[%s24117_s1 + $0x7c8] sm:$0xff] }
  0xbb   :  { %v1652_v26 = vmax.f32 %v1650_v15, %v1651_v49  ;;  %v1683_v27 = vsel %vm1072_vm9, %v793_v6, -inf  ;;  %v1685_v28 = vsel %vm1072_vm9, %v794_v7, -inf  ;;  %v1687_v29 = vsel %vm1072_vm9, %v795_v8, -inf }
  0xbc   :  { %v1617_v21 = vrot.slane %v1616_v22, 1  ;;  %v1635_v34 = vmax.f32 %v1633_v5, %v1634_v23  ;;  %v1669_v36 = vmax.f32 %v1667_v24, %v1668_v4  ;;  %v1684_v37 = vmax.f32 %v1682_v25, %v1683_v27  ;;  %v810_v4 = vld [vmem:[%s24117_s1 + $0x7d0] sm:$0xff] }
  0xbd   :  { %v1654_v38 = vmax.f32 %v1652_v26, %v1653_v55  ;;  %v1689_v43 = vsel %vm1072_vm9, %v796_v18, -inf  ;;  %v1691_v35 = vsel %vm1072_vm9, %v797_v19, -inf  ;;  %v1693_v44 = vsel %vm1072_vm9, %v798_v20, -inf  ;;  %v812_v18 = vld [vmem:[%s24117_s1 + $0x7e0] sm:$0xff] }
  0xbe   :  { %v1618_v49 = vmax.f32 %v1616_v22, %v1617_v21  ;;  %v1636_v53 = vrot.slane %v1635_v34, 2  ;;  %v1671_v50 = vmax.f32 %v1669_v36, %v1670_v12  ;;  %v1686_v48 = vmax.f32 %v1684_v37, %v1685_v28  ;;  %v814_v28 = vld [vmem:[%s24117_s1 + $0x7f0] sm:$0xff] }
  0xbf   :  { %v1655_v54 = vrot.slane %v1654_v38, 4  ;;  %v1695_v55 = vsel %vm1072_vm9, %v799_v30, -inf  ;;  %v1703_v9 = vsel %vm1072_vm9, %v800_v31, -inf  ;;  %v1704_v39 = vsel %vm1072_vm9, %v801_v33, -inf }
  0xc0   :  { %v1637_v40 = vmax.f32 %v1635_v34, %v1636_v53  ;;  %v1673_v13 = vmax.f32 %v1671_v50, %v1672_v16  ;;  %v1688_v42 = vmax.f32 %v1686_v48, %v1687_v29  ;;  %v1705_v60 = vmax.f32 %v1703_v9, %v1704_v39  ;;  %v811_v16 = vld [vmem:[%s24117_s1 + $0x7d8] sm:$0xff]  ;;  %v818_v53 = vld [vmem:[%s24117_s1 + $0x810] sm:$0xff] }
  0xc1   :  { %v1656_v61 = vmax.f32 %v1654_v38, %v1655_v54  ;;  %v1706_v62 = vsel %vm1072_vm9, %v802_v45, -inf  ;;  %v1708_v63 = vsel %vm1072_vm9, %v803_v47, -inf  ;;  %v1710_v0 = vsel %vm1072_vm9, %v804_v46, -inf  ;;  %v815_v29 = vld [vmem:[%s24117_s1 + $0x7f8] sm:$0xff]  ;;  %v816_v46 = vld [vmem:[%s24117_s1 + $0x800] sm:$0xff] }
  0xc2   :  { %v1638_v6 = vrot.slane %v1637_v40, 1  ;;  %v1675_v7 = vmax.f32 %v1673_v13, %v1674_v17  ;;  %v1690_v8 = vmax.f32 %v1688_v42, %v1689_v43  ;;  %v1707_v10 = vmax.f32 %v1705_v60, %v1706_v62  ;;  %v813_v17 = vld [vmem:[%s24117_s1 + $0x7e8] sm:$0xff] }
  0xc3   :  { %v1657_v5 = vrot.slane %v1656_v61, 2  ;;  %v1712_v11 = vsel %vm1072_vm9, %v805_v57, -inf  ;;  %v1714_v12 = vsel %vm1072_vm9, %v806_v58, -inf  ;;  %v1716_v15 = vsel %vm1072_vm9, %v807_v59, -inf  ;;  %v819_v59 = vld [vmem:[%s24117_s1 + $0x818] sm:$0xff] }
  0xc4   :  { %v1639_v19 = vmax.f32 %v1637_v40, %v1638_v6  ;;  %v1676_v20 = vrot.slane %v1675_v7, 4  ;;  %v1692_v22 = vmax.f32 %v1690_v8, %v1691_v35  ;;  %v1709_v23 = vmax.f32 %v1707_v10, %v1708_v63  ;;  %v820_v40 = vld [vmem:[%s24117_s1 + $0x820] sm:$0xff] }
  0xc5   :  { %v1658_v24 = vmax.f32 %v1656_v61, %v1657_v5  ;;  %v1724_v25 = vsel %vm1072_vm9, %v808_v1, -inf  ;;  %v1725_v26 = vsel %vm1072_vm9, %v809_v3, -inf  ;;  %v1727_v27 = vsel %vm1072_vm9, %v810_v4, -inf  ;;  %v822_v1 = vld [vmem:[%s24117_s1 + $0x830] sm:$0xff]  ;;  %v823_v3 = vld [vmem:[%s24117_s1 + $0x838] sm:$0xff] }
  0xc6   :  { %v1677_v30 = vmax.f32 %v1675_v7, %v1676_v20  ;;  %v1694_v31 = vmax.f32 %v1692_v22, %v1693_v44  ;;  %v1711_v33 = vmax.f32 %v1709_v23, %v1710_v0  ;;  %v1726_v21 = vmax.f32 %v1724_v25, %v1725_v26  ;;  %v817_v44 = vld [vmem:[%s24117_s1 + $0x808] sm:$0xff] }
  0xc7   :  { %v1659_v34 = vrot.slane %v1658_v24, 1  ;;  %v1729_v36 = vsel %vm1072_vm9, %v811_v16, -inf  ;;  %v1731_v37 = vsel %vm1072_vm9, %v812_v18, -inf  ;;  %v1733_v38 = vsel %vm1072_vm9, %v813_v17, -inf  ;;  %v821_v0 = vld [vmem:[%s24117_s1 + $0x828] sm:$0xff]  ;;  %v826_v18 = vld [vmem:[%s24117_s1 + $0x850] sm:$0xff] }
  0xc8   :  { %v1678_v43 = vrot.slane %v1677_v30, 2  ;;  %v1696_v35 = vmax.f32 %v1694_v31, %v1695_v55  ;;  %v1713_v45 = vmax.f32 %v1711_v33, %v1712_v11  ;;  %v1728_v47 = vmax.f32 %v1726_v21, %v1727_v27  ;;  %v825_v16 = vld [vmem:[%s24117_s1 + $0x848] sm:$0xff]  ;;  %v827_v27 = vld [vmem:[%s24117_s1 + $0x858] sm:$0xff] }
  0xc9   :  { %v1660_v50 = vmax.f32 %v1658_v24, %v1659_v34  ;;  %v1735_v48 = vsel %vm1072_vm9, %v814_v28, -inf  ;;  %v1737_v54 = vsel %vm1072_vm9, %v815_v29, -inf  ;;  %v7387_v55 = vsel %vm2485_vm1, %v1618_v49, %v18996_v14  ;;  %v828_v28 = vld [vmem:[%s24117_s1 + $0x860] sm:$0xff]  ;;  %v829_v29 = vld [vmem:[%s24117_s1 + $0x868] sm:$0xff] }
  0xca   :  { %v1679_v9 = vmax.f32 %v1677_v30, %v1678_v43  ;;  %v1697_v39 = vrot.slane %v1696_v35, 4  ;;  %v1715_v57 = vmax.f32 %v1713_v45, %v1714_v12  ;;  %v1730_v58 = vmax.f32 %v1728_v47, %v1729_v36  ;;  %v831_v43 = vld [vmem:[%s24117_s1 + $0x878] sm:$0xff] }
  0xcb   :  { %v7388_v13 = vsel %vm2487_vm2, %v1639_v19, %v7387_v55  ;;  %v1745_v42 = vsel %vm1072_vm9, %v816_v46, -inf  ;;  %v1746_v60 = vsel %vm1072_vm9, %v817_v44, -inf  ;;  %v1748_v14 = vsel %vm1072_vm9, %v818_v53, -inf  ;;  %v833_v55 = vld [vmem:[%s24117_s1 + $0x888] sm:$0xff] }
  0xcc   :  { %v1680_v49 = vrot.slane %v1679_v9, 1  ;;  %v1698_v61 = vmax.f32 %v1696_v35, %v1697_v39  ;;  %v1717_v62 = vmax.f32 %v1715_v57, %v1716_v15  ;;  %v1732_v63 = vmax.f32 %v1730_v58, %v1731_v37  ;;  %v824_v15 = vld [vmem:[%s24117_s1 + $0x840] sm:$0xff]  ;;  %v835_v39 = vld [vmem:[%s24117_s1 + $0x898] sm:$0xff] }
  0xcd   :  { %v7389_v4 = vsel %vm2489_vm3, %v1660_v50, %v7388_v13  ;;  %v1747_v6 = vmax.f32 %v1745_v42, %v1746_v60  ;;  %v1750_v7 = vsel %vm1072_vm9, %v819_v59, -inf  ;;  %v1752_v8 = vsel %vm1072_vm9, %v820_v40, -inf  ;;  %v832_v35 = vld [vmem:[%s24117_s1 + $0x880] sm:$0xff] }
  0xce   :  { %v1681_v10 = vmax.f32 %v1679_v9, %v1680_v49  ;;  %v1699_v5 = vrot.slane %v1698_v61, 2  ;;  %v1718_v11 = vrot.slane %v1717_v62, 4  ;;  %v1734_v12 = vmax.f32 %v1732_v63, %v1733_v38  ;;  %v830_v38 = vld [vmem:[%s24117_s1 + $0x870] sm:$0xff]  ;;  %v836_v49 = vld [vmem:[%s24117_s1 + $0x8a0] sm:$0xff] }
  0xcf   :  { %v1749_v17 = vmax.f32 %v1747_v6, %v1748_v14  ;;  %v1754_v19 = vsel %vm1072_vm9, %v821_v0, -inf  ;;  %v1756_v20 = vsel %vm1072_vm9, %v822_v1, -inf  ;;  %v1758_v22 = vsel %vm1072_vm9, %v823_v3, -inf  ;;  %v834_v9 = vld [vmem:[%s24117_s1 + $0x890] sm:$0xff] }
  0xd0   :  { %v1700_v23 = vmax.f32 %v1698_v61, %v1699_v5  ;;  %v1719_v24 = vmax.f32 %v1717_v62, %v1718_v11  ;;  %v1736_v25 = vmax.f32 %v1734_v12, %v1735_v48  ;;  %v7390_v26 = vsel %vm2491_vm4, %v1681_v10, %v7389_v4  ;;  %v837_v61 = vld [vmem:[%s24117_s1 + $0x8a8] sm:$0xff]  ;;  %v838_v62 = vld [vmem:[%s24117_s1 + $0x8b0] sm:$0xff]  ;;  %v840_v10 = vld [vmem:[%s24117_s1 + $0x8c0] sm:$0xff] }
  0xd1   :  { %v1751_v30 = vmax.f32 %v1749_v17, %v1750_v7  ;;  %v1766_v31 = vsel %vm1072_vm9, %v824_v15, -inf  ;;  %v1767_v33 = vsel %vm1072_vm9, %v825_v16, -inf  ;;  %v1769_v21 = vsel %vm1072_vm9, %v826_v18, -inf  ;;  %v841_v5 = vld [vmem:[%s24117_s1 + $0x8c8] sm:$0xff] }
  0xd2   :  { %v1701_v34 = vrot.slane %v1700_v23, 1  ;;  %v1720_v36 = vrot.slane %v1719_v24, 2  ;;  %v1738_v37 = vmax.f32 %v1736_v25, %v1737_v54  ;;  %v1768_v45 = vmax.f32 %v1766_v31, %v1767_v33  ;;  %v845_v33 = vld [vmem:[%s24117_s1 + $0x8e8] sm:$0xff] }
  0xd3   :  { %v1753_v47 = vmax.f32 %v1751_v30, %v1752_v8  ;;  %v1771_v46 = vsel %vm1072_vm9, %v827_v27, -inf  ;;  %v1773_v44 = vsel %vm1072_vm9, %v828_v28, -inf  ;;  %v1775_v53 = vsel %vm1072_vm9, %v829_v29, -inf  ;;  %v839_v8 = vld [vmem:[%s24117_s1 + $0x8b8] sm:$0xff] }
  0xd4   :  { %v1702_v50 = vmax.f32 %v1700_v23, %v1701_v34  ;;  %v1721_v48 = vmax.f32 %v1719_v24, %v1720_v36  ;;  %v1739_v54 = vrot.slane %v1738_v37, 4  ;;  %v1770_v57 = vmax.f32 %v1768_v45, %v1769_v21  ;;  %v842_v23 = vld [vmem:[%s24117_s1 + $0x8d0] sm:$0xff]  ;;  %v843_v24 = vld [vmem:[%s24117_s1 + $0x8d8] sm:$0xff] }
  0xd5   :  { %v1755_v58 = vmax.f32 %v1753_v47, %v1754_v19  ;;  %v1777_v59 = vsel %vm1072_vm9, %v830_v38, -inf  ;;  %v1779_v40 = vsel %vm1072_vm9, %v831_v43, -inf  ;;  %v1787_v13 = vsel %vm1072_vm9, %v832_v35, -inf  ;;  %v846_v21 = vld [vmem:[%s24117_s1 + $0x8f0] sm:$0xff]  ;;  %v847_v34 = vld [vmem:[%s24117_s1 + $0x8f8] sm:$0xff] }
  0xd6   :  { %v1722_v42 = vrot.slane %v1721_v48, 1  ;;  %v1740_v60 = vmax.f32 %v1738_v37, %v1739_v54  ;;  %v7391_v14 = vsel %vm2493_vm5, %v1702_v50, %v7390_v26  ;;  %v1772_v63 = vmax.f32 %v1770_v57, %v1771_v46  ;;  %v850_v50 = vld [vmem:[%s24117_s1 + $0x910] sm:$0xff] }
  0xd7   :  { %v1757_v0 = vmax.f32 %v1755_v58, %v1756_v20  ;;  %v1788_v1 = vsel %vm1072_vm9, %v833_v55, -inf  ;;  %v1790_v3 = vsel %vm1072_vm9, %v834_v9, -inf  ;;  %v1792_v4 = vsel %vm1072_vm9, %v835_v39, -inf }
  0xd8   :  { %v1723_v6 = vmax.f32 %v1721_v48, %v1722_v42  ;;  %v1741_v7 = vrot.slane %v1740_v60, 2  ;;  %v1774_v11 = vmax.f32 %v1772_v63, %v1773_v44  ;;  %v1789_v12 = vmax.f32 %v1787_v13, %v1788_v1  ;;  %v848_v44 = vld [vmem:[%s24117_s1 + $0x900] sm:$0xff]  ;;  %v851_v13 = vld [vmem:[%s24117_s1 + $0x918] sm:$0xff]  ;;  %v853_v42 = vld [vmem:[%s24117_s1 + $0x928] sm:$0xff] }
  0xd9   :  { %v1759_v15 = vmax.f32 %v1757_v0, %v1758_v22  ;;  %v1794_v16 = vsel %vm1072_vm9, %v836_v49, -inf  ;;  %v1796_v18 = vsel %vm1072_vm9, %v837_v61, -inf  ;;  %v1798_v17 = vsel %vm1072_vm9, %v838_v62, -inf  ;;  %v844_v22 = vld [vmem:[%s24117_s1 + $0x8e0] sm:$0xff]  ;;  %v854_v1 = vld [vmem:[%s24117_s1 + $0x930] sm:$0xff] }
  0xda   :  { %v1742_v19 = vmax.f32 %v1740_v60, %v1741_v7  ;;  %v7392_v20 = vsel %vm2495_vm6, %v1723_v6, %v7391_v14  ;;  %v1776_v25 = vmax.f32 %v1774_v11, %v1775_v53  ;;  %v1791_v26 = vmax.f32 %v1789_v12, %v1790_v3  ;;  %v849_v53 = vld [vmem:[%s24117_s1 + $0x908] sm:$0xff]  ;;  %v855_v3 = vld [vmem:[%s24117_s1 + $0x938] sm:$0xff] }
  0xdb   :  { %v1760_v27 = vrot.slane %v1759_v15, 4  ;;  %v1800_v28 = vsel %vm1072_vm9, %v839_v8, -inf  ;;  %v1808_v29 = vsel %vm1072_vm9, %v840_v10, -inf  ;;  %v1809_v30 = vsel %vm1072_vm9, %v841_v5, -inf  ;;  %v857_v5 = vld [vmem:[%s24117_s1 + $0x948] sm:$0xff] }
  0xdc   :  { %v1743_v31 = vrot.slane %v1742_v19, 1  ;;  %v1778_v36 = vmax.f32 %v1776_v25, %v1777_v59  ;;  %v1793_v37 = vmax.f32 %v1791_v26, %v1792_v4  ;;  %v1810_v38 = vmax.f32 %v1808_v29, %v1809_v30  ;;  %v856_v4 = vld [vmem:[%s24117_s1 + $0x940] sm:$0xff]  ;;  %v861_v25 = vld [vmem:[%s24117_s1 + $0x968] sm:$0xff]  ;;  %v862_v26 = vld [vmem:[%s24117_s1 + $0x970] sm:$0xff] }
  0xdd   :  { %v1761_v43 = vmax.f32 %v1759_v15, %v1760_v27  ;;  %v1811_v35 = vsel %vm1072_vm9, %v842_v23, -inf  ;;  %v1813_v45 = vsel %vm1072_vm9, %v843_v24, -inf  ;;  %v1815_v47 = vsel %vm1072_vm9, %v844_v22, -inf }
  0xde   :  { %v1744_v46 = vmax.f32 %v1742_v19, %v1743_v31  ;;  %v1780_v48 = vmax.f32 %v1778_v36, %v1779_v40  ;;  %v1795_v54 = vmax.f32 %v1793_v37, %v1794_v16  ;;  %v1812_v55 = vmax.f32 %v1810_v38, %v1811_v35  ;;  %v852_v40 = vld [vmem:[%s24117_s1 + $0x920] sm:$0xff]  ;;  %v2418_v37 = vld [vmem:[%s24114_s4 + $0x8] sm:$0xff] }
  0xdf   :  { %v1762_v9 = vrot.slane %v1761_v43, 2  ;;  %v1817_v39 = vsel %vm1072_vm9, %v845_v33, -inf  ;;  %v1819_v57 = vsel %vm1072_vm9, %v846_v21, -inf  ;;  %v1821_v58 = vsel %vm1072_vm9, %v847_v34, -inf  ;;  %v860_v19 = vld [vmem:[%s24117_s1 + $0x960] sm:$0xff]  ;;  %2564 = vmatprep.subr.mxu0 %v2418_v37 }
  0xe0   :  { %v19229_v59 = vsel %vm2497_vm7, %v1744_v46, %v7392_v20  ;;  %v1781_v60 = vrot.slane %v1780_v48, 4  ;;  %v1797_v14 = vmax.f32 %v1795_v54, %v1796_v18  ;;  %v1814_v49 = vmax.f32 %v1812_v55, %v1813_v45  ;;  %v858_v18 = vld [vmem:[%s24117_s1 + $0x950] sm:$0xff]  ;;  %v2417_v38 = vld [vmem:[%s24114_s4] sm:$0xff] }
  0xe1   :  { %12835 = vmatmul.mubr.msk.f32.gmra.mrb[10].mxu1 %vm1072_vm9, %v19229_v59  ;;  %v1763_v61 = vmax.f32 %v1761_v43, %v1762_v9  ;;  %v1829_v62 = vsel %vm1072_vm9, %v848_v44, -inf  ;;  %v1830_v63 = vsel %vm1072_vm9, %v849_v53, -inf  ;;  %v1832_v0 = vsel %vm1072_vm9, %v850_v50, -inf  ;;  %v864_v46 = vld [vmem:[%s24117_s1 + $0x980] sm:$0xff]  ;;  %v865_v44 = vld [vmem:[%s24117_s1 + $0x988] sm:$0xff]  ;;  %v866_v53 = vld [vmem:[%s24117_s1 + $0x990] sm:$0xff]  ;;  %2565 = vmatpush1.msra.mxu0 %v2417_v38 }
  0xe2   :  { %7539 = vmatprep.mubr.f32.mxu1 %v17818_v2  ;;  %v1782_v6 = vmax.f32 %v1780_v48, %v1781_v60  ;;  %v1799_v7 = vmax.f32 %v1797_v14, %v1798_v17  ;;  %v1816_v8 = vmax.f32 %v1814_v49, %v1815_v47  ;;  %v1831_v10 = vmax.f32 %v1829_v62, %v1830_v63  ;;  %v859_v17 = vld [vmem:[%s24117_s1 + $0x958] sm:$0xff]  ;;  %v869_v60 = vld [vmem:[%s24117_s1 + $0x9a8] sm:$0xff] }
  0xe3   :  { %v1764_v11 = vrot.slane %v1763_v61, 1  ;;  %v1834_v12 = vsel %vm1072_vm9, %v851_v13, -inf  ;;  %v1836_v15 = vsel %vm1072_vm9, %v852_v40, -inf  ;;  %v1838_v16 = vsel %vm1072_vm9, %v853_v42, -inf  ;;  %v17808_v40 = vld [vmem:[%s24114_s4 + $0x18] sm:$0xff] }
  0xe4   :  { %v1783_v20 = vrot.slane %v1782_v6, 2  ;;  %v1801_v23 = vmax.f32 %v1799_v7, %v1800_v28  ;;  %v1818_v24 = vmax.f32 %v1816_v8, %v1817_v39  ;;  %v1833_v22 = vmax.f32 %v1831_v10, %v1832_v0  ;;  %v863_v28 = vld [vmem:[%s24117_s1 + $0x978] sm:$0xff]  ;;  %2677 = vmatprep.subr.mxu0 %v17808_v40  ;;  %v872_v7 = vld [vmem:[%s24117_s1 + $0x9c0] sm:$0xff] }
  0xe5   :  { %v19276_v27 = vmax.f32 %v1763_v61, %v1764_v11  ;;  %v1840_v29 = vsel %vm1072_vm9, %v854_v1, -inf  ;;  %v1842_v30 = vsel %vm1072_vm9, %v855_v3, -inf  ;;  %v1850_v31 = vsel %vm1072_vm9, %v856_v4, -inf  ;;  %v867_v42 = vld [vmem:[%s24117_s1 + $0x998] sm:$0xff]  ;;  %v870_v4 = vld [vmem:[%s24117_s1 + $0x9b0] sm:$0xff] }
  0xe6   :  { %v1784_v33 = vmax.f32 %v1782_v6, %v1783_v20  ;;  %v1802_v21 = vrot.slane %v1801_v23, 4  ;;  %v1820_v34 = vmax.f32 %v1818_v24, %v1819_v57  ;;  %v1835_v36 = vmax.f32 %v1833_v22, %v1834_v12  ;;  %v871_v6 = vld [vmem:[%s24117_s1 + $0x9b8] sm:$0xff] }
  0xe7   :  { %v1851_v43 = vsel %vm1072_vm9, %v857_v5, -inf  ;;  %v1853_v35 = vsel %vm1072_vm9, %v858_v18, -inf  ;;  %v1855_v45 = vsel %vm1072_vm9, %v859_v17, -inf  ;;  %v1857_v47 = vsel %vm1072_vm9, %v860_v19, -inf  ;;  %v873_v17 = vld [vmem:[%s24117_s1 + $0x9c8] sm:$0xff]  ;;  %v874_v19 = vld [vmem:[%s24117_s1 + $0x9d0] sm:$0xff] }
  0xe8   :  { %v1785_v50 = vrot.slane %v1784_v33, 1  ;;  %v1803_v48 = vmax.f32 %v1801_v23, %v1802_v21  ;;  %v1822_v54 = vmax.f32 %v1820_v34, %v1821_v58  ;;  %v1837_v55 = vmax.f32 %v1835_v36, %v1836_v15  ;;  %v868_v58 = vld [vmem:[%s24117_s1 + $0x9a0] sm:$0xff]  ;;  %v875_v20 = vld [vmem:[%s24117_s1 + $0x9d8] sm:$0xff]  ;;  %v877_v21 = vld [vmem:[%s24117_s1 + $0x9e8] sm:$0xff] }
  0xe9   :  { %v1852_v9 = vmax.f32 %v1850_v31, %v1851_v43  ;;  %v1859_v39 = vsel %vm1072_vm9, %v861_v25, -inf  ;;  %v1861_v57 = vsel %vm1072_vm9, %v862_v26, -inf  ;;  %v19306_v13 = vsel %vm1072_vm9, %v863_v28, -inf }
  0xea   :  { %v1786_v14 = vmax.f32 %v1784_v33, %v1785_v50  ;;  %v1804_v49 = vrot.slane %v1803_v48, 2  ;;  %v1823_v61 = vrot.slane %v1822_v54, 4  ;;  %v1839_v62 = vmax.f32 %v1837_v55, %v1838_v16  ;;  %v876_v33 = vld [vmem:[%s24117_s1 + $0x9e0] sm:$0xff] }
  0xeb   :  { %v1854_v63 = vmax.f32 %v1852_v9, %v1853_v35  ;;  %v1871_v0 = vsel %vm1072_vm9, %v864_v46, -inf  ;;  %v1872_v1 = vsel %vm1072_vm9, %v865_v44, -inf  ;;  %v1874_v3 = vsel %vm1072_vm9, %v866_v53, -inf  ;;  %v879_v46 = vld [vmem:[%s24117_s1 + $0x9f8] sm:$0xff] }
  0xec   :  { %v1805_v8 = vmax.f32 %v1803_v48, %v1804_v49  ;;  %v1824_v10 = vmax.f32 %v1822_v54, %v1823_v61  ;;  %v1841_v5 = vmax.f32 %v1839_v62, %v1840_v29  ;;  %v1873_v11 = vmax.f32 %v1871_v0, %v1872_v1  ;;  %v880_v54 = vld [vmem:[%s24117_s1 + $0xa00] sm:$0xff]  ;;  %v881_v61 = vld [vmem:[%s24117_s1 + $0xa08] sm:$0xff]  ;;  %v882_v62 = vld [vmem:[%s24117_s1 + $0xa10] sm:$0xff] }
  0xed   :  { %v1856_v12 = vmax.f32 %v1854_v63, %v1855_v45  ;;  %v1876_v15 = vsel %vm1072_vm9, %v867_v42, -inf  ;;  %v1878_v16 = vsel %vm1072_vm9, %v868_v58, -inf  ;;  %v1880_v18 = vsel %vm1072_vm9, %v869_v60, -inf }
  0xee   :  { %v1806_v23 = vrot.slane %v1805_v8, 1  ;;  %v1825_v24 = vrot.slane %v1824_v10, 2  ;;  %v1843_v22 = vmax.f32 %v1841_v5, %v1842_v30  ;;  %v1875_v25 = vmax.f32 %v1873_v11, %v1874_v3  ;;  %v878_v30 = vld [vmem:[%s24117_s1 + $0x9f0] sm:$0xff] }
  0xef   :  { %v1858_v26 = vmax.f32 %v1856_v12, %v1857_v47  ;;  %v1882_v29 = vsel %vm1072_vm9, %v870_v4, -inf  ;;  %v1884_v31 = vsel %vm1072_vm9, %v871_v6, -inf  ;;  %v1892_v28 = vsel %vm1072_vm9, %v872_v7, -inf }
  0xf0   :  { %v1807_v34 = vmax.f32 %v1805_v8, %v1806_v23  ;;  %v1826_v36 = vmax.f32 %v1824_v10, %v1825_v24  ;;  %v1844_v37 = vrot.slane %v1843_v22, 4  ;;  %v1877_v38 = vmax.f32 %v1875_v25, %v1876_v15  ;;  %v883_v8 = vld [vmem:[%s24117_s1 + $0xa18] sm:$0xff]  ;;  %v885_v10 = vld [vmem:[%s24117_s1 + $0xa28] sm:$0xff] }
  0xf1   :  { %v1860_v43 = vmax.f32 %v1858_v26, %v1859_v39  ;;  %v1893_v35 = vsel %vm1072_vm9, %v873_v17, -inf  ;;  %v1895_v45 = vsel %vm1072_vm9, %v874_v19, -inf  ;;  %v1897_v47 = vsel %vm1072_vm9, %v875_v20, -inf  ;;  %v887_v17 = vld [vmem:[%s24117_s1 + $0xa38] sm:$0xff]  ;;  %v888_v19 = vld [vmem:[%s24117_s1 + $0xa40] sm:$0xff] }
  0xf2   :  { %v1827_v44 = vrot.slane %v1826_v36, 1  ;;  %v1845_v53 = vmax.f32 %v1843_v22, %v1844_v37  ;;  %v1879_v50 = vmax.f32 %v1877_v38, %v1878_v16  ;;  %v1894_v48 = vmax.f32 %v1892_v28, %v1893_v35  ;;  %v889_v28 = vld [vmem:[%s24117_s1 + $0xa48] sm:$0xff] }
  0xf3   :  { %v1862_v55 = vmax.f32 %v1860_v43, %v1861_v57  ;;  %v1899_v9 = vsel %vm1072_vm9, %v876_v33, -inf  ;;  %v1901_v39 = vsel %vm1072_vm9, %v877_v21, -inf  ;;  %v1903_v40 = vsel %vm1072_vm9, %v878_v30, -inf  ;;  %v890_v33 = vld [vmem:[%s24117_s1 + $0xa50] sm:$0xff]  ;;  %v891_v21 = vld [vmem:[%s24117_s1 + $0xa58] sm:$0xff] }
  0xf4   :  { %v1828_v42 = vmax.f32 %v1826_v36, %v1827_v44  ;;  %v1846_v58 = vrot.slane %v1845_v53, 2  ;;  %v1881_v60 = vmax.f32 %v1879_v50, %v1880_v18  ;;  %v1896_v49 = vmax.f32 %v1894_v48, %v1895_v45  ;;  %v886_v18 = vld [vmem:[%s24117_s1 + $0xa30] sm:$0xff] }
  0xf5   :  { %v1864_v57 = vmax.f32 %v1862_v55, %v19306_v13  ;;  %v1905_v63 = vsel %vm1072_vm9, %v879_v46, -inf  ;;  %v7394_v0 = vsel %vm2485_vm1, %v1786_v14, %v19276_v27  ;;  %v1913_v1 = vsel %vm1072_vm9, %v880_v54, -inf  ;;  %v884_v13 = vld [vmem:[%s24117_s1 + $0xa20] sm:$0xff]  ;;  %v893_v46 = vld [vmem:[%s24117_s1 + $0xa68] sm:$0xff]  ;;  %v894_v44 = vld [vmem:[%s24117_s1 + $0xa70] sm:$0xff] }
  0xf6   :  { %v1847_v3 = vmax.f32 %v1845_v53, %v1846_v58  ;;  %v1883_v4 = vmax.f32 %v1881_v60, %v1882_v29  ;;  %v1898_v6 = vmax.f32 %v1896_v49, %v1897_v47  ;;  %v7395_v7 = vsel %vm2487_vm2, %v1807_v34, %v7394_v0  ;;  %v892_v47 = vld [vmem:[%s24117_s1 + $0xa60] sm:$0xff]  ;;  %v897_v58 = vld [vmem:[%s24117_s1 + $0xa88] sm:$0xff] }
  0xf7   :  { %v1865_v27 = vrot.slane %v1864_v57, 4  ;;  %v7396_v14 = vsel %vm2489_vm3, %v1828_v42, %v7395_v7  ;;  %v1914_v5 = vsel %vm1072_vm9, %v881_v61, -inf  ;;  %v1916_v11 = vsel %vm1072_vm9, %v882_v62, -inf  ;;  %v896_v42 = vld [vmem:[%s24117_s1 + $0xa80] sm:$0xff] }
  0xf8   :  { %v1848_v12 = vrot.slane %v1847_v3, 1  ;;  %v1885_v15 = vmax.f32 %v1883_v4, %v1884_v31  ;;  %v1900_v16 = vmax.f32 %v1898_v6, %v1899_v9  ;;  %v1915_v20 = vmax.f32 %v1913_v1, %v1914_v5  ;;  %v899_v4 = vld [vmem:[%s24117_s1 + $0xa98] sm:$0xff] }
  0xf9   :  { %v1866_v23 = vmax.f32 %v1864_v57, %v1865_v27  ;;  %v1918_v24 = vsel %vm1072_vm9, %v883_v8, -inf  ;;  %v1920_v22 = vsel %vm1072_vm9, %v884_v13, -inf  ;;  %v1922_v25 = vsel %vm1072_vm9, %v885_v10, -inf }
  0xfa   :  { %v1849_v26 = vmax.f32 %v1847_v3, %v1848_v12  ;;  %v1886_v29 = vrot.slane %v1885_v15, 4  ;;  %v1902_v31 = vmax.f32 %v1900_v16, %v1901_v39  ;;  %v1917_v30 = vmax.f32 %v1915_v20, %v1916_v11  ;;  %v898_v3 = vld [vmem:[%s24117_s1 + $0xa90] sm:$0xff]  ;;  %v900_v11 = vld [vmem:[%s24117_s1 + $0xaa0] sm:$0xff]  ;;  %v901_v12 = vld [vmem:[%s24117_s1 + $0xaa8] sm:$0xff] }
  0xfb   :  { %v1867_v34 = vrot.slane %v1866_v23, 2  ;;  %v1924_v36 = vsel %vm1072_vm9, %v886_v18, -inf  ;;  %v1926_v37 = vsel %vm1072_vm9, %v887_v17, -inf  ;;  %v1934_v38 = vsel %vm1072_vm9, %v888_v19, -inf }
  0xfc   :  { %v1887_v43 = vmax.f32 %v1885_v15, %v1886_v29  ;;  %v1904_v35 = vmax.f32 %v1902_v31, %v1903_v40  ;;  %v7397_v45 = vsel %vm2491_vm4, %v1849_v26, %v7396_v14  ;;  %v1919_v53 = vmax.f32 %v1917_v30, %v1918_v24  ;;  %v895_v40 = vld [vmem:[%s24117_s1 + $0xa78] sm:$0xff]  ;;  %v902_v15 = vld [vmem:[%s24117_s1 + $0xab0] sm:$0xff]  ;;  %v904_v26 = vld [vmem:[%s24117_s1 + $0xac0] sm:$0xff] }
  0xfd   :  { %v1868_v50 = vmax.f32 %v1866_v23, %v1867_v34  ;;  %v1935_v48 = vsel %vm1072_vm9, %v889_v28, -inf  ;;  %v1937_v54 = vsel %vm1072_vm9, %v890_v33, -inf  ;;  %v1939_v55 = vsel %vm1072_vm9, %v891_v21, -inf  ;;  %v905_v29 = vld [vmem:[%s24117_s1 + $0xac8] sm:$0xff] }
  0xfe   :  { %v1888_v9 = vrot.slane %v1887_v43, 2  ;;  %v1906_v39 = vmax.f32 %v1904_v35, %v1905_v63  ;;  %v1921_v60 = vmax.f32 %v1919_v53, %v1920_v22  ;;  %v1936_v49 = vmax.f32 %v1934_v38, %v1935_v48  ;;  %v907_v35 = vld [vmem:[%s24117_s1 + $0xad8] sm:$0xff] }
  0xff   :  { %v1869_v61 = vrot.slane %v1868_v50, 1  ;;  %v1941_v62 = vsel %vm1072_vm9, %v892_v47, -inf  ;;  %v1943_v57 = vsel %vm1072_vm9, %v893_v46, -inf  ;;  %v1945_v63 = vsel %vm1072_vm9, %v894_v44, -inf }
 0x100   :  { %v1889_v0 = vmax.f32 %v1887_v43, %v1888_v9  ;;  %v1907_v1 = vrot.slane %v1906_v39, 4  ;;  %v1923_v6 = vmax.f32 %v1921_v60, %v1922_v25  ;;  %v1938_v7 = vmax.f32 %v1936_v49, %v1937_v54  ;;  %v903_v25 = vld [vmem:[%s24117_s1 + $0xab8] sm:$0xff]  ;;  %v906_v43 = vld [vmem:[%s24117_s1 + $0xad0] sm:$0xff]  ;;  %v909_v54 = vld [vmem:[%s24117_s1 + $0xae8] sm:$0xff] }
 0x101   :  { %v1870_v8 = vmax.f32 %v1868_v50, %v1869_v61  ;;  %v1947_v13 = vsel %vm1072_vm9, %v895_v40, -inf  ;;  %v1955_v10 = vsel %vm1072_vm9, %v896_v42, -inf  ;;  %v1956_v27 = vsel %vm1072_vm9, %v897_v58, -inf  ;;  %v911_v9 = vld [vmem:[%s24117_s1 + $0xaf8] sm:$0xff] }
 0x102   :  { %v1890_v14 = vrot.slane %v1889_v0, 1  ;;  %v1908_v5 = vmax.f32 %v1906_v39, %v1907_v1  ;;  %v1925_v16 = vmax.f32 %v1923_v6, %v1924_v36  ;;  %v1940_v18 = vmax.f32 %v1938_v7, %v1939_v55  ;;  %v910_v55 = vld [vmem:[%s24117_s1 + $0xaf0] sm:$0xff] }
 0x103   :  { %v7398_v17 = vsel %vm2493_vm5, %v1870_v8, %v7397_v45  ;;  %v1957_v19 = vmax.f32 %v1955_v10, %v1956_v27  ;;  %v1958_v20 = vsel %vm1072_vm9, %v898_v3, -inf  ;;  %v1960_v23 = vsel %vm1072_vm9, %v899_v4, -inf }
 0x104   :  { %v1891_v24 = vmax.f32 %v1889_v0, %v1890_v14  ;;  %v1909_v22 = vrot.slane %v1908_v5, 2  ;;  %v1927_v31 = vmax.f32 %v1925_v16, %v1926_v37  ;;  %v1942_v28 = vmax.f32 %v1940_v18, %v1941_v62  ;;  %v908_v37 = vld [vmem:[%s24117_s1 + $0xae0] sm:$0xff]  ;;  %v913_v0 = vld [vmem:[%s24117_s1 + $0xb08] sm:$0xff]  ;;  %v915_v14 = vld [vmem:[%s24117_s1 + $0xb18] sm:$0xff] }
 0x105   :  { %v1959_v33 = vmax.f32 %v1957_v19, %v1958_v20  ;;  %v1962_v21 = vsel %vm1072_vm9, %v900_v11, -inf  ;;  %v1964_v30 = vsel %vm1072_vm9, %v901_v12, -inf  ;;  %v1966_v34 = vsel %vm1072_vm9, %v902_v15, -inf  ;;  %v918_v20 = vld [vmem:[%s24117_s1 + $0xb30] sm:$0xff] }
 0x106   :  { %v1910_v36 = vmax.f32 %v1908_v5, %v1909_v22  ;;  %v7399_v38 = vsel %vm2495_vm6, %v1891_v24, %v7398_v17  ;;  %v1928_v45 = vrot.slane %v1927_v31, 4  ;;  %v1944_v47 = vmax.f32 %v1942_v28, %v1943_v57  ;;  %v912_v57 = vld [vmem:[%s24117_s1 + $0xb00] sm:$0xff] }
 0x107   :  { %v1961_v46 = vmax.f32 %v1959_v33, %v1960_v23  ;;  %v1968_v44 = vsel %vm1072_vm9, %v903_v25, -inf  ;;  %v1976_v53 = vsel %vm1072_vm9, %v904_v26, -inf  ;;  %v1977_v50 = vsel %vm1072_vm9, %v905_v29, -inf  ;;  %v916_v5 = vld [vmem:[%s24117_s1 + $0xb20] sm:$0xff]  ;;  %v919_v23 = vld [vmem:[%s24117_s1 + $0xb38] sm:$0xff] }
 0x108   :  { %v1911_v48 = vrot.slane %v1910_v36, 1  ;;  %v1929_v39 = vmax.f32 %v1927_v31, %v1928_v45  ;;  %v1946_v40 = vmax.f32 %v1944_v47, %v1945_v63  ;;  %v1978_v42 = vmax.f32 %v1976_v53, %v1977_v50  ;;  %v914_v63 = vld [vmem:[%s24117_s1 + $0xb10] sm:$0xff]  ;;  %v920_v24 = vld [vmem:[%s24117_s1 + $0xb40] sm:$0xff]  ;;  %v921_v31 = vld [vmem:[%s24117_s1 + $0xb48] sm:$0xff] }
 0x109   :  { %v1963_v58 = vmax.f32 %v1961_v46, %v1962_v21  ;;  %v1979_v60 = vsel %vm1072_vm9, %v906_v43, -inf  ;;  %v1981_v49 = vsel %vm1072_vm9, %v907_v35, -inf  ;;  %v1983_v61 = vsel %vm1072_vm9, %v908_v37, -inf  ;;  %v924_v45 = vld [vmem:[%s24117_s1 + $0xb60] sm:$0xff]  ;;  %v925_v50 = vld [vmem:[%s24117_s1 + $0xb68] sm:$0xff] }
 0x10a   :  { %v1912_v62 = vmax.f32 %v1910_v36, %v1911_v48  ;;  %v1930_v1 = vrot.slane %v1929_v39, 2  ;;  %v1948_v3 = vmax.f32 %v1946_v40, %v1947_v13  ;;  %v1980_v4 = vmax.f32 %v1978_v42, %v1979_v60  ;;  %v917_v13 = vld [vmem:[%s24117_s1 + $0xb28] sm:$0xff]  ;;  %v923_v36 = vld [vmem:[%s24117_s1 + $0xb58] sm:$0xff]  ;;  %v926_v48 = vld [vmem:[%s24117_s1 + $0xb70] sm:$0xff] }
 0x10b   :  { %v1965_v6 = vmax.f32 %v1963_v58, %v1964_v30  ;;  %v1985_v7 = vsel %vm1072_vm9, %v909_v54, -inf  ;;  %v1987_v8 = vsel %vm1072_vm9, %v910_v55, -inf  ;;  %v1989_v10 = vsel %vm1072_vm9, %v911_v9, -inf  ;;  %v927_v40 = vld [vmem:[%s24117_s1 + $0xb78] sm:$0xff] }
 0x10c   :  { %v19512_v27 = vsel %vm2497_vm7, %v1912_v62, %v7399_v38  ;;  %v1931_v11 = vmax.f32 %v1929_v39, %v1930_v1  ;;  %v1949_v12 = vrot.slane %v1948_v3, 4  ;;  %v1982_v15 = vmax.f32 %v1980_v4, %v1981_v49  ;;  %v929_v62 = vld [vmem:[%s24117_s1 + $0xb88] sm:$0xff] }
 0x10d   :  { %12836 = vmatmul.mubr.msk.f32.gmra.mrb[12].mxu1 %vm1072_vm9, %v19512_v27  ;;  %v1967_v16 = vmax.f32 %v1965_v6, %v1966_v34  ;;  %v1997_v18 = vsel %vm1072_vm9, %v912_v57, -inf  ;;  %v1998_v17 = vsel %vm1072_vm9, %v913_v0, -inf  ;;  %v2000_v19 = vsel %vm1072_vm9, %v914_v63, -inf  ;;  %v922_v34 = vld [vmem:[%s24117_s1 + $0xb50] sm:$0xff] }
 0x10e   :  { %7545 = vmatprep.mubr.f32.mxu1 %v17818_v2  ;;  %v1932_v22 = vrot.slane %v1931_v11, 1  ;;  %v1950_v25 = vmax.f32 %v1948_v3, %v1949_v12  ;;  %v1984_v26 = vmax.f32 %v1982_v15, %v1983_v61  ;;  %v1999_v29 = vmax.f32 %v1997_v18, %v1998_v17  ;;  %v928_v61 = vld [vmem:[%s24117_s1 + $0xb80] sm:$0xff]  ;;  %v930_v3 = vld [vmem:[%s24117_s1 + $0xb90] sm:$0xff]  ;;  %v933_v15 = vld [vmem:[%s24117_s1 + $0xba8] sm:$0xff] }
 0x10f   :  { %v1969_v28 = vmax.f32 %v1967_v16, %v1968_v44  ;;  %v2002_v33 = vsel %vm1072_vm9, %v915_v14, -inf  ;;  %v2004_v21 = vsel %vm1072_vm9, %v916_v5, -inf  ;;  %v2006_v30 = vsel %vm1072_vm9, %v917_v13, -inf  ;;  %v931_v14 = vld [vmem:[%s24117_s1 + $0xb98] sm:$0xff] }
 0x110   :  { %v19550_v38 = vmax.f32 %v1931_v11, %v1932_v22  ;;  %v1951_v43 = vrot.slane %v1950_v25, 2  ;;  %v1986_v35 = vmax.f32 %v1984_v26, %v1985_v7  ;;  %v2001_v37 = vmax.f32 %v1999_v29, %v2000_v19  ;;  %v936_v29 = vld [vmem:[%s24117_s1 + $0xbc0] sm:$0xff] }
 0x111   :  { %v1970_v47 = vrot.slane %v1969_v28, 4  ;;  %v2008_v46 = vsel %vm1072_vm9, %v918_v20, -inf  ;;  %v2010_v44 = vsel %vm1072_vm9, %v919_v23, -inf  ;;  %v2018_v53 = vsel %vm1072_vm9, %v920_v24, -inf  ;;  %v934_v20 = vld [vmem:[%s24117_s1 + $0xbb0] sm:$0xff]  ;;  %v935_v23 = vld [vmem:[%s24117_s1 + $0xbb8] sm:$0xff] }
 0x112   :  { %v1952_v54 = vmax.f32 %v1950_v25, %v1951_v43  ;;  %v1988_v55 = vmax.f32 %v1986_v35, %v1987_v8  ;;  %v2003_v9 = vmax.f32 %v2001_v37, %v2002_v33  ;;  %v2019_v39 = vsel %vm1072_vm9, %v921_v31, -inf }
 0x113   :  { %v1971_v42 = vmax.f32 %v1969_v28, %v1970_v47  ;;  %v2020_v58 = vmax.f32 %v2018_v53, %v2019_v39  ;;  %v2021_v60 = vsel %vm1072_vm9, %v922_v34, -inf  ;;  %v2023_v49 = vsel %vm1072_vm9, %v923_v36, -inf  ;;  %v938_v34 = vld [vmem:[%s24117_s1 + $0xbd0] sm:$0xff]  ;;  %v939_v36 = vld [vmem:[%s24117_s1 + $0xbd8] sm:$0xff] }
 0x114   :  { %v1953_v57 = vrot.slane %v1952_v54, 1  ;;  %v1990_v0 = vmax.f32 %v1988_v55, %v1989_v10  ;;  %v2005_v63 = vmax.f32 %v2003_v9, %v2004_v21  ;;  %v2025_v1 = vsel %vm1072_vm9, %v924_v45, -inf  ;;  %v932_v10 = vld [vmem:[%s24117_s1 + $0xba0] sm:$0xff] }
 0x115   :  { %v1972_v4 = vrot.slane %v1971_v42, 2  ;;  %v2022_v6 = vmax.f32 %v2020_v58, %v2021_v60  ;;  %v2027_v7 = vsel %vm1072_vm9, %v925_v50, -inf  ;;  %v2029_v8 = vsel %vm1072_vm9, %v926_v48, -inf  ;;  %v940_v48 = vld [vmem:[%s24117_s1 + $0xbe0] sm:$0xff] }
 0x116   :  { %v1954_v5 = vmax.f32 %v1952_v54, %v1953_v57  ;;  %v1991_v13 = vrot.slane %v1990_v0, 4  ;;  %v2007_v11 = vmax.f32 %v2005_v63, %v2006_v30  ;;  %v2031_v12 = vsel %vm1072_vm9, %v927_v40, -inf  ;;  %v937_v30 = vld [vmem:[%s24117_s1 + $0xbc8] sm:$0xff] }
 0x117   :  { %v1973_v16 = vmax.f32 %v1971_v42, %v1972_v4  ;;  %v2024_v18 = vmax.f32 %v2022_v6, %v2023_v49  ;;  %v2039_v17 = vsel %vm1072_vm9, %v928_v61, -inf  ;;  %v2040_v19 = vsel %vm1072_vm9, %v929_v62, -inf  ;;  %v941_v54 = vld [vmem:[%s24117_s1 + $0xbe8] sm:$0xff]  ;;  %v943_v61 = vld [vmem:[%s24117_s1 + $0xbf8] sm:$0xff] }
 0x118   :  { %v1992_v24 = vmax.f32 %v1990_v0, %v1991_v13  ;;  %v2009_v22 = vmax.f32 %v2007_v11, %v2008_v46  ;;  %v2041_v25 = vmax.f32 %v2039_v17, %v2040_v19  ;;  %v2042_v26 = vsel %vm1072_vm9, %v930_v3, -inf  ;;  %v945_v11 = vld [vmem:[%s24117_s1 + $0xc08] sm:$0xff] }
 0x119   :  { %v1974_v31 = vrot.slane %v1973_v16, 1  ;;  %v2026_v28 = vmax.f32 %v2024_v18, %v2025_v1  ;;  %v2044_v33 = vsel %vm1072_vm9, %v931_v14, -inf  ;;  %v2046_v21 = vsel %vm1072_vm9, %v932_v10, -inf  ;;  %v944_v1 = vld [vmem:[%s24117_s1 + $0xc00] sm:$0xff] }
 0x11a   :  { %v1993_v43 = vrot.slane %v1992_v24, 2  ;;  %v2011_v35 = vmax.f32 %v2009_v22, %v2010_v44  ;;  %v2043_v37 = vmax.f32 %v2041_v25, %v2042_v26  ;;  %v2048_v45 = vsel %vm1072_vm9, %v933_v15, -inf  ;;  %v942_v44 = vld [vmem:[%s24117_s1 + $0xbf0] sm:$0xff]  ;;  %v947_v22 = vld [vmem:[%s24117_s1 + $0xc18] sm:$0xff]  ;;  %v948_v25 = vld [vmem:[%s24117_s1 + $0xc20] sm:$0xff] }
 0x11b   :  { %v1975_v47 = vmax.f32 %v1973_v16, %v1974_v31  ;;  %v2028_v46 = vmax.f32 %v2026_v28, %v2027_v7  ;;  %v2050_v53 = vsel %vm1072_vm9, %v934_v20, -inf  ;;  %v2052_v50 = vsel %vm1072_vm9, %v935_v23, -inf  ;;  %v946_v15 = vld [vmem:[%s24117_s1 + $0xc10] sm:$0xff]  ;;  %v949_v26 = vld [vmem:[%s24117_s1 + $0xc28] sm:$0xff] }
 0x11c   :  { %v1994_v55 = vmax.f32 %v1992_v24, %v1993_v43  ;;  %v2012_v9 = vrot.slane %v2011_v35, 4  ;;  %v2045_v39 = vmax.f32 %v2043_v37, %v2044_v33  ;;  %v2060_v40 = vsel %vm1072_vm9, %v936_v29, -inf }
 0x11d   :  { %v2030_v42 = vmax.f32 %v2028_v46, %v2029_v8  ;;  %v2061_v58 = vsel %vm1072_vm9, %v937_v30, -inf  ;;  %v2063_v60 = vsel %vm1072_vm9, %v938_v34, -inf  ;;  %v2065_v49 = vsel %vm1072_vm9, %v939_v36, -inf  ;;  %v950_v30 = vld [vmem:[%s24117_s1 + $0xc30] sm:$0xff]  ;;  %v951_v34 = vld [vmem:[%s24117_s1 + $0xc38] sm:$0xff]  ;;  %v952_v36 = vld [vmem:[%s24117_s1 + $0xc40] sm:$0xff] }
 0x11e   :  { %v1995_v62 = vrot.slane %v1994_v55, 1  ;;  %v2013_v57 = vmax.f32 %v2011_v35, %v2012_v9  ;;  %v2047_v0 = vmax.f32 %v2045_v39, %v2046_v21  ;;  %v2062_v63 = vmax.f32 %v2060_v40, %v2061_v58 }
 0x11f   :  { %v2032_v3 = vmax.f32 %v2030_v42, %v2031_v12  ;;  %v2067_v4 = vsel %vm1072_vm9, %v940_v48, -inf  ;;  %v2069_v6 = vsel %vm1072_vm9, %v941_v54, -inf  ;;  %v2071_v7 = vsel %vm1072_vm9, %v942_v44, -inf  ;;  %v953_v48 = vld [vmem:[%s24117_s1 + $0xc48] sm:$0xff]  ;;  %v954_v54 = vld [vmem:[%s24117_s1 + $0xc50] sm:$0xff]  ;;  %v955_v44 = vld [vmem:[%s24117_s1 + $0xc58] sm:$0xff] }
 0x120   :  { %v1996_v8 = vmax.f32 %v1994_v55, %v1995_v62  ;;  %v2014_v14 = vrot.slane %v2013_v57, 2  ;;  %v2049_v10 = vmax.f32 %v2047_v0, %v2048_v45  ;;  %v2064_v13 = vmax.f32 %v2062_v63, %v2063_v60  ;;  %v957_v62 = vld [vmem:[%s24117_s1 + $0xc68] sm:$0xff] }
 0x121   :  { %v2033_v16 = vrot.slane %v2032_v3, 4  ;;  %v2073_v12 = vsel %vm1072_vm9, %v943_v61, -inf  ;;  %v7401_v18 = vsel %vm2485_vm1, %v1954_v5, %v19550_v38  ;;  %v2081_v17 = vsel %vm1072_vm9, %v944_v1, -inf  ;;  %v956_v61 = vld [vmem:[%s24117_s1 + $0xc60] sm:$0xff] }
 0x122   :  { %v2015_v19 = vmax.f32 %v2013_v57, %v2014_v14  ;;  %v2051_v20 = vmax.f32 %v2049_v10, %v2050_v53  ;;  %v2066_v23 = vmax.f32 %v2064_v13, %v2065_v49  ;;  %v7402_v24 = vsel %vm2487_vm2, %v1975_v47, %v7401_v18  ;;  %v958_v57 = vld [vmem:[%s24117_s1 + $0xc70] sm:$0xff]  ;;  %v960_v14 = vld [vmem:[%s24117_s1 + $0xc80] sm:$0xff]  ;;  %v961_v10 = vld [vmem:[%s24117_s1 + $0xc88] sm:$0xff] }
 0x123   :  { %v2034_v38 = vmax.f32 %v2032_v3, %v2033_v16  ;;  %v7403_v5 = vsel %vm2489_vm3, %v1996_v8, %v7402_v24  ;;  %v2082_v29 = vsel %vm1072_vm9, %v945_v11, -inf  ;;  %v2084_v31 = vsel %vm1072_vm9, %v946_v15, -inf  ;;  %v959_v8 = vld [vmem:[%s24117_s1 + $0xc78] sm:$0xff]  ;;  %v964_v24 = vld [vmem:[%s24117_s1 + $0xca0] sm:$0xff] }
 0x124   :  { %v2016_v28 = vrot.slane %v2015_v19, 1  ;;  %v2053_v33 = vmax.f32 %v2051_v20, %v2052_v50  ;;  %v2068_v21 = vmax.f32 %v2066_v23, %v2067_v4  ;;  %v2083_v43 = vmax.f32 %v2081_v17, %v2082_v29  ;;  %v962_v20 = vld [vmem:[%s24117_s1 + $0xc90] sm:$0xff]  ;;  %v963_v23 = vld [vmem:[%s24117_s1 + $0xc98] sm:$0xff] }
 0x125   :  { %v2035_v35 = vrot.slane %v2034_v38, 2  ;;  %v2086_v37 = vsel %vm1072_vm9, %v947_v22, -inf  ;;  %v2088_v45 = vsel %vm1072_vm9, %v948_v25, -inf  ;;  %v2090_v47 = vsel %vm1072_vm9, %v949_v26, -inf }
 0x126   :  { %v2017_v46 = vmax.f32 %v2015_v19, %v2016_v28  ;;  %v2054_v53 = vrot.slane %v2053_v33, 4  ;;  %v2070_v50 = vmax.f32 %v2068_v21, %v2069_v6  ;;  %v2085_v55 = vmax.f32 %v2083_v43, %v2084_v31  ;;  %v966_v21 = vld [vmem:[%s24117_s1 + $0xcb0] sm:$0xff] }
 0x127   :  { %v2036_v9 = vmax.f32 %v2034_v38, %v2035_v35  ;;  %v2092_v39 = vsel %vm1072_vm9, %v950_v30, -inf  ;;  %v2094_v40 = vsel %vm1072_vm9, %v951_v34, -inf  ;;  %v2102_v42 = vsel %vm1072_vm9, %v952_v36, -inf  ;;  %v967_v30 = vld [vmem:[%s24117_s1 + $0xcb8] sm:$0xff] }
 0x128   :  { %v2055_v58 = vmax.f32 %v2053_v33, %v2054_v53  ;;  %v2072_v60 = vmax.f32 %v2070_v50, %v2071_v7  ;;  %v7404_v49 = vsel %vm2491_vm4, %v2017_v46, %v7403_v5  ;;  %v2087_v0 = vmax.f32 %v2085_v55, %v2086_v37  ;;  %v965_v33 = vld [vmem:[%s24117_s1 + $0xca8] sm:$0xff]  ;;  %v968_v53 = vld [vmem:[%s24117_s1 + $0xcc0] sm:$0xff] }
 0x129   :  { %v2037_v63 = vrot.slane %v2036_v9, 1  ;;  %v2103_v1 = vsel %vm1072_vm9, %v953_v48, -inf  ;;  %v2105_v3 = vsel %vm1072_vm9, %v954_v54, -inf  ;;  %v2107_v4 = vsel %vm1072_vm9, %v955_v44, -inf  ;;  %v969_v50 = vld [vmem:[%s24117_s1 + $0xcc8] sm:$0xff]  ;;  %v970_v48 = vld [vmem:[%s24117_s1 + $0xcd0] sm:$0xff] }
 0x12a   :  { %v2056_v6 = vrot.slane %v2055_v58, 2  ;;  %v2074_v7 = vmax.f32 %v2072_v60, %v2073_v12  ;;  %v2089_v13 = vmax.f32 %v2087_v0, %v2088_v45  ;;  %v2104_v11 = vmax.f32 %v2102_v42, %v2103_v1 }
 0x12b   :  { %v2038_v15 = vmax.f32 %v2036_v9, %v2037_v63  ;;  %v2109_v16 = vsel %vm1072_vm9, %v956_v61, -inf  ;;  %v2111_v18 = vsel %vm1072_vm9, %v957_v62, -inf  ;;  %v2113_v12 = vsel %vm1072_vm9, %v958_v57, -inf  ;;  %v972_v61 = vld [vmem:[%s24117_s1 + $0xce0] sm:$0xff] }
 0x12c   :  { %v2057_v17 = vmax.f32 %v2055_v58, %v2056_v6  ;;  %v2075_v19 = vrot.slane %v2074_v7, 4  ;;  %v2091_v22 = vmax.f32 %v2089_v13, %v2090_v47  ;;  %v2106_v25 = vmax.f32 %v2104_v11, %v2105_v3  ;;  %v974_v6 = vld [vmem:[%s24117_s1 + $0xcf0] sm:$0xff] }
 0x12d   :  { %v7405_v26 = vsel %vm2493_vm5, %v2038_v15, %v7404_v49  ;;  %v2115_v38 = vsel %vm1072_vm9, %v959_v8, -inf  ;;  %v2123_v5 = vsel %vm1072_vm9, %v960_v14, -inf  ;;  %v2124_v29 = vsel %vm1072_vm9, %v961_v10, -inf  ;;  %v971_v49 = vld [vmem:[%s24117_s1 + $0xcd8] sm:$0xff]  ;;  %v976_v8 = vld [vmem:[%s24117_s1 + $0xd00] sm:$0xff] }
 0x12e   :  { %v2058_v31 = vrot.slane %v2057_v17, 1  ;;  %v2076_v28 = vmax.f32 %v2074_v7, %v2075_v19  ;;  %v2093_v34 = vmax.f32 %v2091_v22, %v2092_v39  ;;  %v2108_v36 = vmax.f32 %v2106_v25, %v2107_v4  ;;  %v975_v7 = vld [vmem:[%s24117_s1 + $0xcf8] sm:$0xff]  ;;  %v977_v19 = vld [vmem:[%s24117_s1 + $0xd08] sm:$0xff] }
 0x12f   :  { %v2125_v43 = vmax.f32 %v2123_v5, %v2124_v29  ;;  %v2126_v35 = vsel %vm1072_vm9, %v962_v20, -inf  ;;  %v2128_v37 = vsel %vm1072_vm9, %v963_v23, -inf  ;;  %v2130_v45 = vsel %vm1072_vm9, %v964_v24, -inf  ;;  %v978_v20 = vld [vmem:[%s24117_s1 + $0xd10] sm:$0xff] }
 0x130   :  { %v2059_v47 = vmax.f32 %v2057_v17, %v2058_v31  ;;  %v2077_v46 = vrot.slane %v2076_v28, 2  ;;  %v2095_v54 = vmax.f32 %v2093_v34, %v2094_v40  ;;  %v2110_v44 = vmax.f32 %v2108_v36, %v2109_v16  ;;  %v973_v40 = vld [vmem:[%s24117_s1 + $0xce8] sm:$0xff] }
 0x131   :  { %v2127_v55 = vmax.f32 %v2125_v43, %v2126_v35  ;;  %v2132_v9 = vsel %vm1072_vm9, %v965_v33, -inf  ;;  %v2134_v39 = vsel %vm1072_vm9, %v966_v21, -inf  ;;  %v2136_v42 = vsel %vm1072_vm9, %v967_v30, -inf  ;;  %v981_v33 = vld [vmem:[%s24117_s1 + $0xd28] sm:$0xff] }
 0x132   :  { %v2078_v58 = vmax.f32 %v2076_v28, %v2077_v46  ;;  %v7406_v60 = vsel %vm2495_vm6, %v2059_v47, %v7405_v26  ;;  %v2096_v62 = vrot.slane %v2095_v54, 4  ;;  %v2112_v57 = vmax.f32 %v2110_v44, %v2111_v18  ;;  %v980_v28 = vld [vmem:[%s24117_s1 + $0xd20] sm:$0xff]  ;;  %v985_v46 = vld [vmem:[%s24117_s1 + $0xd48] sm:$0xff] }
 0x133   :  { %v2129_v0 = vmax.f32 %v2127_v55, %v2128_v37  ;;  %v2144_v63 = vsel %vm1072_vm9, %v968_v53, -inf  ;;  %v2145_v1 = vsel %vm1072_vm9, %v969_v50, -inf  ;;  %v2147_v3 = vsel %vm1072_vm9, %v970_v48, -inf  ;;  %v984_v47 = vld [vmem:[%s24117_s1 + $0xd40] sm:$0xff] }
 0x134   :  { %v2079_v4 = vrot.slane %v2078_v58, 1  ;;  %v2097_v14 = vmax.f32 %v2095_v54, %v2096_v62  ;;  %v2114_v10 = vmax.f32 %v2112_v57, %v2113_v12  ;;  %v2146_v13 = vmax.f32 %v2144_v63, %v2145_v1  ;;  %v979_v12 = vld [vmem:[%s24117_s1 + $0xd18] sm:$0xff] }
 0x135   :  { %v2131_v11 = vmax.f32 %v2129_v0, %v2130_v45  ;;  %v2149_v15 = vsel %vm1072_vm9, %v971_v49, -inf  ;;  %v2151_v16 = vsel %vm1072_vm9, %v972_v61, -inf  ;;  %v2153_v18 = vsel %vm1072_vm9, %v973_v40, -inf  ;;  %v983_v45 = vld [vmem:[%s24117_s1 + $0xd38] sm:$0xff]  ;;  %v988_v49 = vld [vmem:[%s24117_s1 + $0xd60] sm:$0xff] }
 0x136   :  { %v2080_v17 = vmax.f32 %v2078_v58, %v2079_v4  ;;  %v2098_v23 = vrot.slane %v2097_v14, 2  ;;  %v2116_v24 = vmax.f32 %v2114_v10, %v2115_v38  ;;  %v2148_v22 = vmax.f32 %v2146_v13, %v2147_v3  ;;  %v982_v38 = vld [vmem:[%s24117_s1 + $0xd30] sm:$0xff]  ;;  %v989_v3 = vld [vmem:[%s24117_s1 + $0xd68] sm:$0xff] }
 0x137   :  { %v2133_v25 = vmax.f32 %v2131_v11, %v2132_v9  ;;  %v2155_v26 = vsel %vm1072_vm9, %v974_v6, -inf  ;;  %v2157_v5 = vsel %vm1072_vm9, %v975_v7, -inf  ;;  %v2165_v29 = vsel %vm1072_vm9, %v976_v8, -inf  ;;  %v986_v58 = vld [vmem:[%s24117_s1 + $0xd50] sm:$0xff]  ;;  %v991_v6 = vld [vmem:[%s24117_s1 + $0xd78] sm:$0xff] }
 0x138   :  { %v19787_v31 = vsel %vm2497_vm7, %v2080_v17, %v7406_v60  ;;  %v2099_v21 = vmax.f32 %v2097_v14, %v2098_v23  ;;  %v2117_v30 = vrot.slane %v2116_v24, 4  ;;  %v2150_v34 = vmax.f32 %v2148_v22, %v2149_v15  ;;  %v987_v60 = vld [vmem:[%s24117_s1 + $0xd58] sm:$0xff]  ;;  %v990_v4 = vld [vmem:[%s24117_s1 + $0xd70] sm:$0xff]  ;;  %v993_v17 = vld [vmem:[%s24117_s1 + $0xd88] sm:$0xff] }
 0x139   :  { %12837 = vmatmul.mubr.msk.f32.gmra.mrb[14].mxu1 %vm1072_vm9, %v19787_v31  ;;  %v2135_v36 = vmax.f32 %v2133_v25, %v2134_v39  ;;  %v2166_v43 = vsel %vm1072_vm9, %v977_v19, -inf  ;;  %v2168_v35 = vsel %vm1072_vm9, %v978_v20, -inf  ;;  %v2170_v37 = vsel %vm1072_vm9, %v979_v12, -inf  ;;  %v994_v19 = vld [vmem:[%s24117_s1 + $0xd90] sm:$0xff] }
 0x13a   :  { %7551 = vmatprep.mubr.f32.mxu1 %v17818_v2  ;;  %v2100_v53 = vrot.slane %v2099_v21, 1  ;;  %v2118_v50 = vmax.f32 %v2116_v24, %v2117_v30  ;;  %v2152_v48 = vmax.f32 %v2150_v34, %v2151_v16  ;;  %v2167_v54 = vmax.f32 %v2165_v29, %v2166_v43 }
 0x13b   :  { %v2137_v44 = vmax.f32 %v2135_v36, %v2136_v42  ;;  %v2172_v55 = vsel %vm1072_vm9, %v980_v28, -inf  ;;  %v2174_v9 = vsel %vm1072_vm9, %v981_v33, -inf  ;;  %v2176_v39 = vsel %vm1072_vm9, %v982_v38, -inf  ;;  %v995_v28 = vld [vmem:[%s24117_s1 + $0xd98] sm:$0xff]  ;;  %v996_v33 = vld [vmem:[%s24117_s1 + $0xda0] sm:$0xff] }
 0x13c   :  { %v19825_v61 = vmax.f32 %v2099_v21, %v2100_v53  ;;  %v2119_v42 = vrot.slane %v2118_v50, 2  ;;  %v2154_v40 = vmax.f32 %v2152_v48, %v2153_v18  ;;  %v2169_v62 = vmax.f32 %v2167_v54, %v2168_v35  ;;  %v992_v18 = vld [vmem:[%s24117_s1 + $0xd80] sm:$0xff] }
 0x13d   :  { %v2138_v57 = vrot.slane %v2137_v44, 4  ;;  %v2178_v0 = vsel %vm1072_vm9, %v983_v45, -inf  ;;  %v2186_v63 = vsel %vm1072_vm9, %v984_v47, -inf  ;;  %v2187_v1 = vsel %vm1072_vm9, %v985_v46, -inf  ;;  %v998_v45 = vld [vmem:[%s24117_s1 + $0xdb0] sm:$0xff]  ;;  %v999_v47 = vld [vmem:[%s24117_s1 + $0xdb8] sm:$0xff] }
 0x13e   :  { %v2120_v7 = vmax.f32 %v2118_v50, %v2119_v42  ;;  %v2156_v8 = vmax.f32 %v2154_v40, %v2155_v26  ;;  %v2171_v14 = vmax.f32 %v2169_v62, %v2170_v37  ;;  %v2188_v10 = vmax.f32 %v2186_v63, %v2187_v1  ;;  %v1000_v46 = vld [vmem:[%s24117_s1 + $0xdc0] sm:$0xff] }
 0x13f   :  { %v2139_v13 = vmax.f32 %v2137_v44, %v2138_v57  ;;  %v2189_v11 = vsel %vm1072_vm9, %v986_v58, -inf  ;;  %v2191_v15 = vsel %vm1072_vm9, %v987_v60, -inf  ;;  %v2193_v16 = vsel %vm1072_vm9, %v988_v49, -inf  ;;  %v1001_v44 = vld [vmem:[%s24117_s1 + $0xdc8] sm:$0xff]  ;;  %v1002_v49 = vld [vmem:[%s24117_s1 + $0xdd0] sm:$0xff]  ;;  %v1004_v42 = vld [vmem:[%s24117_s1 + $0xde0] sm:$0xff] }
 0x140   :  { %v2121_v20 = vrot.slane %v2120_v7, 1  ;;  %v2158_v12 = vmax.f32 %v2156_v8, %v2157_v5  ;;  %v2173_v23 = vmax.f32 %v2171_v14, %v2172_v55  ;;  %v2190_v24 = vmax.f32 %v2188_v10, %v2189_v11  ;;  %v997_v5 = vld [vmem:[%s24117_s1 + $0xda8] sm:$0xff]  ;;  %v1006_v8 = vld [vmem:[%s24117_s1 + $0xdf0] sm:$0xff] }
 0x141   :  { %v2140_v22 = vrot.slane %v2139_v13, 2  ;;  %v2195_v25 = vsel %vm1072_vm9, %v989_v3, -inf  ;;  %v2197_v26 = vsel %vm1072_vm9, %v990_v4, -inf  ;;  %v2199_v29 = vsel %vm1072_vm9, %v991_v6, -inf }
 0x142   :  { %v2122_v38 = vmax.f32 %v2120_v7, %v2121_v20  ;;  %v2159_v21 = vrot.slane %v2158_v12, 4  ;;  %v2175_v30 = vmax.f32 %v2173_v23, %v2174_v9  ;;  %v2192_v34 = vmax.f32 %v2190_v24, %v2191_v15  ;;  %v1005_v7 = vld [vmem:[%s24117_s1 + $0xde8] sm:$0xff]  ;;  %v47_v24 = vld [vmem:[%s24115_s0] sm:$0xff] }
 0x143   :  { %v2141_v36 = vmax.f32 %v2139_v13, %v2140_v22  ;;  %v2207_v43 = vsel %vm1072_vm9, %v992_v18, -inf  ;;  %v2208_v35 = vsel %vm1072_vm9, %v993_v17, -inf  ;;  %v2210_v37 = vsel %vm1072_vm9, %v994_v19, -inf  ;;  %v48_v22 = vld [vmem:[%s24115_s0 + $0x8] sm:$0xff] }
 0x144   :  { %v2160_v53 = vmax.f32 %v2158_v12, %v2159_v21  ;;  %v2177_v50 = vmax.f32 %v2175_v30, %v2176_v39  ;;  %v2194_v48 = vmax.f32 %v2192_v34, %v2193_v16  ;;  %v2209_v54 = vmax.f32 %v2207_v43, %v2208_v35  ;;  %v1003_v39 = vld [vmem:[%s24117_s1 + $0xdd8] sm:$0xff]  ;;  %v49_v43 = vld [vmem:[%s24115_s0 + $0x10] sm:$0xff] }
 0x145   :  { %v2142_v55 = vrot.slane %v2141_v36, 1  ;;  %v2212_v9 = vsel %vm1072_vm9, %v995_v28, -inf  ;;  %v2214_v58 = vsel %vm1072_vm9, %v996_v33, -inf  ;;  %v2216_v60 = vsel %vm1072_vm9, %v997_v5, -inf }
 0x146   :  { %v2161_v40 = vrot.slane %v2160_v53, 2  ;;  %v2179_v62 = vmax.f32 %v2177_v50, %v2178_v0  ;;  %v2196_v57 = vmax.f32 %v2194_v48, %v2195_v25  ;;  %v2211_v63 = vmax.f32 %v2209_v54, %v2210_v37  ;;  %v1007_v0 = vld [vmem:[%s24117_s1 + $0xdf8] sm:$0xff] }
 0x147   :  { %v2143_v1 = vmax.f32 %v2141_v36, %v2142_v55  ;;  %v2218_v3 = vsel %vm1072_vm9, %v998_v45, -inf  ;;  %v2220_v4 = vsel %vm1072_vm9, %v999_v47, -inf  ;;  %v2228_v6 = vsel %vm1072_vm9, %v1000_v46, -inf }
 0x148   :  { %v2162_v14 = vmax.f32 %v2160_v53, %v2161_v40  ;;  %v2180_v10 = vrot.slane %v2179_v62, 4  ;;  %v2198_v13 = vmax.f32 %v2196_v57, %v2197_v26  ;;  %v2213_v11 = vmax.f32 %v2211_v63, %v2212_v9 }
 0x149   :  { %v2229_v15 = vsel %vm1072_vm9, %v1001_v44, -inf  ;;  %v2231_v16 = vsel %vm1072_vm9, %v1002_v49, -inf  ;;  %v2233_v18 = vsel %vm1072_vm9, %v1003_v39, -inf  ;;  %v2235_v17 = vsel %vm1072_vm9, %v1004_v42, -inf }
 0x14a   :  { %v2163_v19 = vrot.slane %v2162_v14, 1  ;;  %v2181_v20 = vmax.f32 %v2179_v62, %v2180_v10  ;;  %v2200_v12 = vmax.f32 %v2198_v13, %v2199_v29  ;;  %v2215_v23 = vmax.f32 %v2213_v11, %v2214_v58 }
 0x14b   :  { %v2230_v25 = vmax.f32 %v2228_v6, %v2229_v15  ;;  %v2237_v26 = vsel %vm1072_vm9, %v1005_v7, -inf  ;;  %v2239_v28 = vsel %vm1072_vm9, %v1006_v8, -inf  ;;  %v2241_v33 = vsel %vm1072_vm9, %v1007_v0, -inf }
 0x14c   :  { %v2164_v5 = vmax.f32 %v2162_v14, %v2163_v19  ;;  %v2182_v21 = vrot.slane %v2181_v20, 2  ;;  %v2201_v30 = vrot.slane %v2200_v12, 4  ;;  %v2217_v29 = vmax.f32 %v2215_v23, %v2216_v60  ;;  %v52_v23 = vld [vmem:[%s24115_s0 + $0x28] sm:$0xff] }
 0x14d   :  { %v2232_v34 = vmax.f32 %v2230_v25, %v2231_v16  ;;  %v7408_v36 = vsel %vm2485_vm1, %v2122_v38, %v19825_v61  ;;  %v112_v35 = vsel %vm111_vm0, %v47_v24, -inf  ;;  %v119_v37 = vsel %vm111_vm0, %v48_v22, -inf  ;;  %v50_v61 = vld [vmem:[%s24115_s0 + $0x18] sm:$0xff] }
 0x14e   :  { %v2183_v45 = vmax.f32 %v2181_v20, %v2182_v21  ;;  %v2202_v47 = vmax.f32 %v2200_v12, %v2201_v30  ;;  %v2219_v46 = vmax.f32 %v2217_v29, %v2218_v3  ;;  %v7409_v53 = vsel %vm2487_vm2, %v2143_v1, %v7408_v36  ;;  %v51_v3 = vld [vmem:[%s24115_s0 + $0x20] sm:$0xff] }
 0x14f   :  { %v2234_v50 = vmax.f32 %v2232_v34, %v2233_v18  ;;  %v7410_v48 = vsel %vm2489_vm3, %v2164_v5, %v7409_v53  ;;  %v113_v38 = vrot.slane %v112_v35, 4  ;;  %v120_v54 = vrot.slane %v119_v37, 4 }
 0x150   :  { %v2184_v44 = vrot.slane %v2183_v45, 1  ;;  %v2203_v55 = vrot.slane %v2202_v47, 2  ;;  %v2221_v9 = vmax.f32 %v2219_v46, %v2220_v4  ;;  %v126_v58 = vsel %vm111_vm0, %v49_v43, -inf }
 0x151   :  { %v2236_v60 = vmax.f32 %v2234_v50, %v2235_v17  ;;  %v114_v49 = vmax.f32 %v112_v35, %v113_v38  ;;  %v121_v39 = vmax.f32 %v119_v37, %v120_v54  ;;  %v127_v42 = vrot.slane %v126_v58, 4  ;;  %v54_v35 = vld [vmem:[%s24115_s0 + $0x38] sm:$0xff] }
 0x152   :  { %v2185_v40 = vmax.f32 %v2183_v45, %v2184_v44  ;;  %v2204_v62 = vmax.f32 %v2202_v47, %v2203_v55  ;;  %v2222_v57 = vrot.slane %v2221_v9, 4  ;;  %v133_v63 = vsel %vm111_vm0, %v50_v61, -inf }
 0x153   :  { %v2238_v1 = vmax.f32 %v2236_v60, %v2237_v26  ;;  %v115_v6 = vrot.slane %v114_v49, 2  ;;  %v122_v7 = vrot.slane %v121_v39, 2  ;;  %v128_v8 = vmax.f32 %v126_v58, %v127_v42 }
 0x154   :  { %v2205_v4 = vrot.slane %v2204_v62, 1  ;;  %v2223_v0 = vmax.f32 %v2221_v9, %v2222_v57  ;;  %v7411_v14 = vsel %vm2491_vm4, %v2185_v40, %v7410_v48  ;;  %v134_v10 = vrot.slane %v133_v63, 4  ;;  %v1009_v57 = vld [vmem:[%s24117_s1 + $0xe08] sm:$0xff] }
 0x155   :  { %v2240_v13 = vmax.f32 %v2238_v1, %v2239_v28  ;;  %v116_v11 = vmax.f32 %v114_v49, %v115_v6  ;;  %v123_v15 = vmax.f32 %v121_v39, %v122_v7  ;;  %v129_v16 = vrot.slane %v128_v8, 2  ;;  %v53_v28 = vld [vmem:[%s24115_s0 + $0x30] sm:$0xff]  ;;  %v1008_v49 = vld [vmem:[%s24117_s1 + $0xe00] sm:$0xff] }
 0x156   :  { %v2206_v18 = vmax.f32 %v2204_v62, %v2205_v4  ;;  %v2224_v17 = vrot.slane %v2223_v0, 2  ;;  %v135_v19 = vmax.f32 %v133_v63, %v134_v10  ;;  %v140_v20 = vsel %vm111_vm0, %v51_v3, -inf  ;;  %v1010_v7 = vld [vmem:[%s24117_s1 + $0xe10] sm:$0xff] }
 0x157   :  { %v2242_v12 = vmax.f32 %v2240_v13, %v2241_v33  ;;  %v117_v24 = vrot.slane %v116_v11, 1  ;;  %v124_v22 = vrot.slane %v123_v15, 1  ;;  %v130_v25 = vmax.f32 %v128_v8, %v129_v16  ;;  %v1012_v16 = vld [vmem:[%s24117_s1 + $0xe20] sm:$0xff] }
 0x158   :  { %v2225_v26 = vmax.f32 %v2223_v0, %v2224_v17  ;;  %v7412_v5 = vsel %vm2493_vm5, %v2206_v18, %v7411_v14  ;;  %v136_v21 = vrot.slane %v135_v19, 2  ;;  %v141_v30 = vrot.slane %v140_v20, 4  ;;  %v1011_v14 = vld [vmem:[%s24117_s1 + $0xe18] sm:$0xff] }
 0x159   :  { %v2243_v29 = vrot.slane %v2242_v12, 4  ;;  %v118_v34 = vmax.f32 %v116_v11, %v117_v24  ;;  %v125_v36 = vmax.f32 %v123_v15, %v124_v22  ;;  %v131_v33 = vrot.slane %v130_v25, 1 }
 0x15a   :  { %v2226_v43 = vrot.slane %v2225_v26, 1  ;;  %v137_v37 = vmax.f32 %v135_v19, %v136_v21  ;;  %v142_v45 = vmax.f32 %v140_v20, %v141_v30  ;;  %v147_v47 = vsel %vm111_vm0, %v52_v23, -inf  ;;  %v1013_v20 = vld [vmem:[%s24117_s1 + $0xe28] sm:$0xff] }
 0x15b   :  { %v2244_v46 = vmax.f32 %v2242_v12, %v2243_v29  ;;  %v132_v53 = vmax.f32 %v130_v25, %v131_v33  ;;  %v148_v50 = vrot.slane %v147_v47, 4  ;;  %v154_v48 = vsel %vm111_vm0, %v53_v28, -inf  ;;  %v1016_v29 = vld [vmem:[%s24117_s1 + $0xe40] sm:$0xff] }
 0x15c   :  { %v2227_v61 = vmax.f32 %v2225_v26, %v2226_v43  ;;  %v138_v38 = vrot.slane %v137_v37, 1  ;;  %v143_v54 = vrot.slane %v142_v45, 2  ;;  %v155_v44 = vrot.slane %v154_v48, 4  ;;  %v1014_v26 = vld [vmem:[%s24117_s1 + $0xe30] sm:$0xff] }
 0x15d   :  { %v2245_v55 = vrot.slane %v2244_v46, 2  ;;  %v149_v9 = vmax.f32 %v147_v47, %v148_v50  ;;  %v161_v58 = vsel %vm111_vm0, %v54_v35, -inf  ;;  %v2486_v60 = vsel %vm2485_vm1, %v125_v36, %v118_v34  ;;  %v1017_v34 = vld [vmem:[%s24117_s1 + $0xe48] sm:$0xff]  ;;  %v1020_v50 = vld [vmem:[%s24117_s1 + $0xe60] sm:$0xff] }
 0x15e   :  { %v7413_v39 = vsel %vm2495_vm6, %v2227_v61, %v7412_v5  ;;  %v139_v42 = vmax.f32 %v137_v37, %v138_v38  ;;  %v144_v40 = vmax.f32 %v142_v45, %v143_v54  ;;  %v156_v62 = vmax.f32 %v154_v48, %v155_v44  ;;  %v1015_v5 = vld [vmem:[%s24117_s1 + $0xe38] sm:$0xff]  ;;  %v1018_v45 = vld [vmem:[%s24117_s1 + $0xe50] sm:$0xff]  ;;  %v1021_v48 = vld [vmem:[%s24117_s1 + $0xe68] sm:$0xff] }
 0x15f   :  { %v2246_v63 = vmax.f32 %v2244_v46, %v2245_v55  ;;  %v150_v1 = vrot.slane %v149_v9, 2  ;;  %v162_v3 = vrot.slane %v161_v58, 4  ;;  %v2488_v6 = vsel %vm2487_vm2, %v132_v53, %v2486_v60  ;;  %v1019_v53 = vld [vmem:[%s24117_s1 + $0xe58] sm:$0xff] }
 0x160   :  { %v145_v8 = vrot.slane %v144_v40, 1  ;;  %v157_v4 = vrot.slane %v156_v62, 2  ;;  %v2490_v0 = vsel %vm2489_vm3, %v139_v42, %v2488_v6  ;;  %v2249_v10 = vsel %vm1072_vm9, %v1008_v49, -inf  ;;  %v1024_v42 = vld [vmem:[%s24117_s1 + $0xe80] sm:$0xff]  ;;  %v1027_v6 = vld [vmem:[%s24117_s1 + $0xe98] sm:$0xff] }
 0x161   :  { %v2247_v13 = vrot.slane %v2246_v63, 1  ;;  %v151_v11 = vmax.f32 %v149_v9, %v150_v1  ;;  %v163_v15 = vmax.f32 %v161_v58, %v162_v3  ;;  %v2250_v18 = vsel %vm1072_vm9, %v1009_v57, -inf  ;;  %v1022_v9 = vld [vmem:[%s24117_s1 + $0xe70] sm:$0xff]  ;;  %v1023_v58 = vld [vmem:[%s24117_s1 + $0xe78] sm:$0xff] }
 0x162   :  { %v146_v17 = vmax.f32 %v144_v40, %v145_v8  ;;  %v158_v19 = vmax.f32 %v156_v62, %v157_v4  ;;  %v2251_v12 = vmax.f32 %v2249_v10, %v2250_v18  ;;  %v2252_v23 = vsel %vm1072_vm9, %v1010_v7, -inf  ;;  %v1025_v40 = vld [vmem:[%s24117_s1 + $0xe88] sm:$0xff]  ;;  %v1026_v62 = vld [vmem:[%s24117_s1 + $0xe90] sm:$0xff]  ;;  %v1028_v7 = vld [vmem:[%s24117_s1 + $0xea0] sm:$0xff] }
 0x163   :  { %v2248_v24 = vmax.f32 %v2246_v63, %v2247_v13  ;;  %v152_v22 = vrot.slane %v151_v11, 1  ;;  %v164_v25 = vrot.slane %v163_v15, 2  ;;  %v2254_v28 = vsel %vm1072_vm9, %v1011_v14, -inf  ;;  %v1029_v14 = vld [vmem:[%s24117_s1 + $0xea8] sm:$0xff]  ;;  %v1030_v10 = vld [vmem:[%s24117_s1 + $0xeb0] sm:$0xff]  ;;  %v1031_v13 = vld [vmem:[%s24117_s1 + $0xeb8] sm:$0xff] }
 0x164   :  { %v159_v21 = vrot.slane %v158_v19, 1  ;;  %v2492_v30 = vsel %vm2491_vm4, %v146_v17, %v2490_v0  ;;  %v2253_v36 = vmax.f32 %v2251_v12, %v2252_v23  ;;  %v2256_v33 = vsel %vm1072_vm9, %v1012_v16, -inf }
 0x165   :  { %v19988_v43 = vsel %vm2497_vm7, %v2248_v24, %v7413_v39  ;;  %v153_v35 = vmax.f32 %v151_v11, %v152_v22  ;;  %v165_v37 = vmax.f32 %v163_v15, %v164_v25  ;;  %v2258_v47 = vsel %vm1072_vm9, %v1013_v20, -inf  ;;  %v1033_v20 = vld [vmem:[%s24117_s1 + $0xec8] sm:$0xff]  ;;  %v1034_v22 = vld [vmem:[%s24117_s1 + $0xed0] sm:$0xff]  ;;  %v1035_v25 = vld [vmem:[%s24117_s1 + $0xed8] sm:$0xff] }
 0x166   :  { %12838 = vmatmul.mubr.msk.f32.gmra.mrb[16].mxu1 %vm1072_vm9, %v19988_v43  ;;  %v160_v46 = vmax.f32 %v158_v19, %v159_v21  ;;  %v2255_v61 = vmax.f32 %v2253_v36, %v2254_v28  ;;  %v2260_v38 = vsel %vm1072_vm9, %v1014_v26, -inf  ;;  %v2262_v54 = vsel %vm1072_vm9, %v1015_v5, -inf  ;;  %v1032_v19 = vld [vmem:[%s24117_s1 + $0xec0] sm:$0xff] }
 0x167   :  { %7557 = vmatprep.mubr.f32.mxu1 %v17818_v2  ;;  %v166_v44 = vrot.slane %v165_v37, 1  ;;  %v2494_v55 = vsel %vm2493_vm5, %v153_v35, %v2492_v30  ;;  %v2270_v60 = vsel %vm1072_vm9, %v1016_v29, -inf  ;;  %v2271_v49 = vsel %vm1072_vm9, %v1017_v34, -inf  ;;  %v1036_v26 = vld [vmem:[%s24117_s1 + $0xee0] sm:$0xff] }
 0x168   :  { %v2496_v39 = vsel %vm2495_vm6, %v160_v46, %v2494_v55  ;;  %v2257_v57 = vmax.f32 %v2255_v61, %v2256_v33  ;;  %v2272_v63 = vmax.f32 %v2270_v60, %v2271_v49  ;;  %v2273_v1 = vsel %vm1072_vm9, %v1018_v45, -inf  ;;  %v1040_v29 = vld [vmem:[%s24117_s1 + $0xf00] sm:$0xff]  ;;  %v1037_v45 = vld [vmem:[%s24117_s1 + $0xee8] sm:$0xff]  ;;  %v1039_v46 = vld [vmem:[%s24117_s1 + $0xef8] sm:$0xff] }
 0x169   :  { %v167_v3 = vmax.f32 %v165_v37, %v166_v44  ;;  %v2275_v8 = vsel %vm1072_vm9, %v1019_v53, -inf  ;;  %v2277_v4 = vsel %vm1072_vm9, %v1020_v50, -inf  ;;  %v2279_v0 = vsel %vm1072_vm9, %v1021_v48, -inf  ;;  %v17809_v37 = vld [vmem:[%s24114_s4 + $0x10] sm:$0xff]  ;;  %v1041_v44 = vld [vmem:[%s24117_s1 + $0xf08] sm:$0xff]  ;;  %s17826_s4 = smov 127  }
 0x16a   :  { %v2259_v11 = vmax.f32 %v2257_v57, %v2258_v47  ;;  %v2274_v15 = vmax.f32 %v2272_v63, %v2273_v1  ;;  %v2281_v16 = vsel %vm1072_vm9, %v1022_v9, -inf  ;;  %v20048_v18 = vsel %vm1072_vm9, %v1023_v58, -inf  ;;  %v1038_v47 = vld [vmem:[%s24117_s1 + $0xef0] sm:$0xff] }
 0x16b   :  { %v20051_v17 = vsel %vm2497_vm7, %v167_v3, %v2496_v39  ;;  %v2291_v12 = vsel %vm1072_vm9, %v1024_v42, -inf  ;;  %v2292_v23 = vsel %vm1072_vm9, %v1025_v40, -inf  ;;  %v2294_v24 = vsel %vm1072_vm9, %v1026_v62, -inf  ;;  %v1043_v39 = vld [vmem:[%s24117_s1 + $0xf18] sm:$0xff]  ;;  %v1044_v42 = vld [vmem:[%s24117_s1 + $0xf20] sm:$0xff] }
 0x16c   :  { %12390 = vmatmul.mubr.msk.f32.vlgmr.msra.gmra.mrb[0].mxu0 %vm111_vm0, %v20051_v17  ;;  %v2261_v5 = vmax.f32 %v2259_v11, %v2260_v38  ;;  %v2276_v28 = vmax.f32 %v2274_v15, %v2275_v8  ;;  %v2293_v21 = vmax.f32 %v2291_v12, %v2292_v23  ;;  %v2296_v30 = vsel %vm1072_vm9, %v1027_v6, -inf  ;;  %v20099_v38 = vpop.f32.mrb[0].mxu1 }
 0x16d   :  { %v2298_v34 = vsel %vm1072_vm9, %v1028_v7, -inf  ;;  %v20079_v36 = vsel %vm1072_vm9, %v1029_v14, -inf  ;;  %v2302_v33 = vsel %vm1072_vm9, %v1030_v10, -inf  ;;  %v20083_v35 = vsel %vm1072_vm9, %v1031_v13, -inf  ;;  %2634 = vmatprep.mubr.f32.mxu0 %v17818_v2  ;;  %2678 = vmatpush1.msra.mxu0 %v17809_v37  ;;  %v20108_v49 = vpop.f32.mrb[1].mxu1  ;;  %v1045_v14 = vld [vmem:[%s24117_s1 + $0xf28] sm:$0xff] }
 0x16e   :  { %v2263_v53 = vmax.f32 %v2261_v5, %v2262_v54  ;;  %v2278_v50 = vmax.f32 %v2276_v28, %v2277_v4  ;;  %v2295_v48 = vmax.f32 %v2293_v21, %v2294_v24  ;;  %v2312_v61 = vsel %vm1072_vm9, %v1032_v19, -inf  ;;  %v1042_v54 = vld [vmem:[%s24117_s1 + $0xf10] sm:$0xff]  ;;  %v20119_v1 = vpop.f32.mrb[2].mxu1  ;;  %v1047_v10 = vld [vmem:[%s24117_s1 + $0xf38] sm:$0xff] }
 0x16f   :  { %v2313_v55 = vsel %vm1072_vm9, %v1033_v20, -inf  ;;  %v2315_v9 = vsel %vm1072_vm9, %v1034_v22, -inf  ;;  %v2317_v58 = vsel %vm1072_vm9, %v1035_v25, -inf  ;;  %v2319_v60 = vsel %vm1072_vm9, %v1036_v26, -inf  ;;  %v20127_v4 = vpop.f32.mrb[3].mxu1  ;;  %v1048_v26 = vld [vmem:[%s24117_s1 + $0xf40] sm:$0xff] }
 0x170   :  { %v2264_v40 = vrot.slane %v2263_v53, 4  ;;  %v2280_v62 = vmax.f32 %v2278_v50, %v2279_v0  ;;  %v2297_v57 = vmax.f32 %v2295_v48, %v2296_v30  ;;  %v2314_v63 = vmax.f32 %v2312_v61, %v2313_v55  ;;  %v1046_v0 = vld [vmem:[%s24117_s1 + $0xf30] sm:$0xff]  ;;  %v20138_v20 = vpop.f32.mrb[4].mxu1  ;;  %v1051_v50 = vld [vmem:[%s24117_s1 + $0xf58] sm:$0xff] }
 0x171   :  { %v2321_v3 = vsel %vm1072_vm9, %v1037_v45, -inf  ;;  %v2323_v6 = vsel %vm1072_vm9, %v1038_v47, -inf  ;;  %v20124_v7 = vsel %vm1072_vm9, %v1039_v46, -inf  ;;  %v2333_v8 = vsel %vm1072_vm9, %v1040_v29, -inf  ;;  %v20144_v25 = vpop.f32.mrb[5].mxu1  ;;  %v1050_v5 = vld [vmem:[%s24117_s1 + $0xf50] sm:$0xff] }
 0x172   :  { %v2265_v13 = vmax.f32 %v2263_v53, %v2264_v40  ;;  %v2282_v11 = vmax.f32 %v2280_v62, %v2281_v16  ;;  %v2299_v15 = vmax.f32 %v2297_v57, %v2298_v34  ;;  %v2316_v19 = vmax.f32 %v2314_v63, %v2315_v9  ;;  %v1049_v16 = vld [vmem:[%s24117_s1 + $0xf48] sm:$0xff]  ;;  %v20157_v34 = vpop.f32.mrb[6].mxu1  ;;  %v1055_v57 = vld [vmem:[%s24117_s1 + $0xf78] sm:$0xff] }
 0x173   :  { %v2334_v12 = vsel %vm1072_vm9, %v1041_v44, -inf  ;;  %v2336_v23 = vsel %vm1072_vm9, %v1042_v54, -inf  ;;  %v2338_v24 = vsel %vm1072_vm9, %v1043_v39, -inf  ;;  %v2340_v22 = vsel %vm1072_vm9, %v1044_v42, -inf  ;;  %v20162_v53 = vpop.f32.mrb[7].mxu1  ;;  %v1053_v39 = vld [vmem:[%s24117_s1 + $0xf68] sm:$0xff] }
 0x174   :  { %v2266_v28 = vrot.slane %v2265_v13, 2  ;;  %v2284_v21 = vmax.f32 %v2282_v11, %v20048_v18  ;;  %v2301_v30 = vmax.f32 %v2299_v15, %v20079_v36  ;;  %v2318_v29 = vmax.f32 %v2316_v19, %v2317_v58  ;;  %v1052_v18 = vld [vmem:[%s24117_s1 + $0xf60] sm:$0xff]  ;;  %v1054_v42 = vld [vmem:[%s24117_s1 + $0xf70] sm:$0xff] }
 0x175   :  { %v2335_v37 = vmax.f32 %v2333_v8, %v2334_v12  ;;  %v2342_v45 = vsel %vm1072_vm9, %v1045_v14, -inf  ;;  %v2344_v47 = vsel %vm1072_vm9, %v1046_v0, -inf  ;;  %v2346_v46 = vsel %vm1072_vm9, %v1047_v10, -inf  ;;  %v1056_v10 = vld [vmem:[%s24117_s1 + $0xf80] sm:$0xff] }
 0x176   :  { %v2267_v36 = vmax.f32 %v2265_v13, %v2266_v28  ;;  %v2285_v48 = vrot.slane %v2284_v21, 4  ;;  %v2303_v61 = vmax.f32 %v2301_v30, %v2302_v33  ;;  %v2320_v44 = vmax.f32 %v2318_v29, %v2319_v60  ;;  %v1057_v13 = vld [vmem:[%s24117_s1 + $0xf88] sm:$0xff] }
 0x177   :  { %v2337_v55 = vmax.f32 %v2335_v37, %v2336_v23  ;;  %v2354_v9 = vsel %vm1072_vm9, %v1048_v26, -inf  ;;  %v2355_v58 = vsel %vm1072_vm9, %v1049_v16, -inf  ;;  %v2357_v54 = vsel %vm1072_vm9, %v1050_v5, -inf  ;;  %v1058_v26 = vld [vmem:[%s24117_s1 + $0xf90] sm:$0xff]  ;;  %v1059_v16 = vld [vmem:[%s24117_s1 + $0xf98] sm:$0xff] }
 0x178   :  { %v2268_v40 = vrot.slane %v2267_v36, 1  ;;  %v2286_v62 = vmax.f32 %v2284_v21, %v2285_v48  ;;  %v2305_v33 = vmax.f32 %v2303_v61, %v20083_v35  ;;  %v2322_v60 = vmax.f32 %v2320_v44, %v2321_v3 }
 0x179   :  { %v2339_v63 = vmax.f32 %v2337_v55, %v2338_v24  ;;  %v2356_v8 = vmax.f32 %v2354_v9, %v2355_v58  ;;  %v2359_v14 = vsel %vm1072_vm9, %v1051_v50, -inf  ;;  %v2361_v0 = vsel %vm1072_vm9, %v1052_v18, -inf  ;;  %v1060_v50 = vld [vmem:[%s24117_s1 + $0xfa0] sm:$0xff]  ;;  %v1061_v18 = vld [vmem:[%s24117_s1 + $0xfa8] sm:$0xff] }
 0x17a   :  { %v20191_v35 = vmax.f32 %v2267_v36, %v2268_v40  ;;  %v2287_v3 = vrot.slane %v2286_v62, 2  ;;  %v2306_v11 = vrot.slane %v2305_v33, 4  ;;  %v2324_v15 = vmax.f32 %v2322_v60, %v2323_v6 }
 0x17b   :  { %v2341_v19 = vmax.f32 %v2339_v63, %v2340_v22  ;;  %v2358_v12 = vmax.f32 %v2356_v8, %v2357_v54  ;;  %v2363_v23 = vsel %vm1072_vm9, %v1053_v39, -inf  ;;  %v2365_v24 = vsel %vm1072_vm9, %v1054_v42, -inf  ;;  %v1063_v54 = vld [vmem:[%s24117_s1 + $0xfb8] sm:$0xff]  ;;  %v1064_v39 = vld [vmem:[%s24117_s1 + $0xfc0] sm:$0xff] }
 0x17c   :  { %v2288_v5 = vmax.f32 %v2286_v62, %v2287_v3  ;;  %v2307_v28 = vmax.f32 %v2305_v33, %v2306_v11  ;;  %v2326_v21 = vmax.f32 %v2324_v15, %v20124_v7  ;;  %v2367_v6 = vsel %vm1072_vm9, %v1055_v57, -inf  ;;  %v1067_v11 = vld [vmem:[%s24117_s1 + $0xfd8] sm:$0xff] }
 0x17d   :  { %v2343_v22 = vmax.f32 %v2341_v19, %v2342_v45  ;;  %v2360_v30 = vmax.f32 %v2358_v12, %v2359_v14  ;;  %v2375_v29 = vsel %vm1072_vm9, %v1056_v10, -inf  ;;  %v2376_v37 = vsel %vm1072_vm9, %v1057_v13, -inf  ;;  %v1062_v45 = vld [vmem:[%s24117_s1 + $0xfb0] sm:$0xff] }
 0x17e   :  { %v2289_v36 = vrot.slane %v2288_v5, 1  ;;  %v2308_v48 = vrot.slane %v2307_v28, 2  ;;  %v2327_v61 = vrot.slane %v2326_v21, 4  ;;  %v2377_v7 = vmax.f32 %v2375_v29, %v2376_v37  ;;  %v1066_v14 = vld [vmem:[%s24117_s1 + $0xfd0] sm:$0xff] }
 0x17f   :  { %v2345_v44 = vmax.f32 %v2343_v22, %v2344_v47  ;;  %v2362_v55 = vmax.f32 %v2360_v30, %v2361_v0  ;;  %v2378_v9 = vsel %vm1072_vm9, %v1058_v26, -inf  ;;  %v2380_v58 = vsel %vm1072_vm9, %v1059_v16, -inf  ;;  %v1065_v47 = vld [vmem:[%s24117_s1 + $0xfc8] sm:$0xff]  ;;  %v1070_v22 = vld [vmem:[%s24117_s1 + $0xff0] sm:$0xff] }
 0x180   :  { %v2290_v42 = vmax.f32 %v2288_v5, %v2289_v36  ;;  %v2309_v40 = vmax.f32 %v2307_v28, %v2308_v48  ;;  %v2328_v62 = vmax.f32 %v2326_v21, %v2327_v61  ;;  %v2379_v33 = vmax.f32 %v2377_v7, %v2378_v9  ;;  %v1069_v26 = vld [vmem:[%s24117_s1 + $0xfe8] sm:$0xff]  ;;  %v55_v9 = vld [vmem:[%s24115_s0 + $0x40] sm:$0xff] }
 0x181   :  { %v2347_v60 = vmax.f32 %v2345_v44, %v2346_v46  ;;  %v2364_v57 = vmax.f32 %v2362_v55, %v2363_v23  ;;  %v2382_v63 = vsel %vm1072_vm9, %v1060_v50, -inf  ;;  %v2384_v8 = vsel %vm1072_vm9, %v1061_v18, -inf  ;;  %v1068_v46 = vld [vmem:[%s24117_s1 + $0xfe0] sm:$0xff] }
 0x182   :  { %v2310_v0 = vrot.slane %v2309_v40, 1  ;;  %v2329_v10 = vrot.slane %v2328_v62, 2  ;;  %v2381_v13 = vmax.f32 %v2379_v33, %v2380_v58  ;;  %v2386_v3 = vsel %vm1072_vm9, %v1062_v45, -inf }
 0x183   :  { %v2348_v15 = vrot.slane %v2347_v60, 4  ;;  %v2366_v19 = vmax.f32 %v2364_v57, %v2365_v24  ;;  %v2388_v12 = vsel %vm1072_vm9, %v1063_v54, -inf  ;;  %v2396_v23 = vsel %vm1072_vm9, %v1064_v39, -inf  ;;  %v1071_v24 = vld [vmem:[%s24117_s1 + $0xff8] sm:$0xff] }
 0x184   :  { %v2311_v16 = vmax.f32 %v2309_v40, %v2310_v0  ;;  %v2330_v5 = vmax.f32 %v2328_v62, %v2329_v10  ;;  %v2383_v28 = vmax.f32 %v2381_v13, %v2382_v63  ;;  %v2397_v21 = vsel %vm1072_vm9, %v1065_v47, -inf  ;;  %v57_v63 = vld [vmem:[%s24115_s0 + $0x50] sm:$0xff] }
 0x185   :  { %v2349_v30 = vmax.f32 %v2347_v60, %v2348_v15  ;;  %v2368_v29 = vmax.f32 %v2366_v19, %v2367_v6  ;;  %v2398_v37 = vmax.f32 %v2396_v23, %v2397_v21  ;;  %v2399_v50 = vsel %vm1072_vm9, %v1066_v14, -inf  ;;  %v56_v6 = vld [vmem:[%s24115_s0 + $0x48] sm:$0xff] }
 0x186   :  { %v2331_v18 = vrot.slane %v2330_v5, 1  ;;  %v2385_v36 = vmax.f32 %v2383_v28, %v2384_v8  ;;  %v2401_v48 = vsel %vm1072_vm9, %v1067_v11, -inf  ;;  %v2403_v61 = vsel %vm1072_vm9, %v1068_v46, -inf }
 0x187   :  { %v2350_v7 = vrot.slane %v2349_v30, 2  ;;  %v2369_v45 = vrot.slane %v2368_v29, 4  ;;  %v2400_v44 = vmax.f32 %v2398_v37, %v2399_v50  ;;  %v2405_v55 = vsel %vm1072_vm9, %v1069_v26, -inf }
 0x188   :  { %v2332_v58 = vmax.f32 %v2330_v5, %v2331_v18  ;;  %v2387_v54 = vmax.f32 %v2385_v36, %v2386_v3  ;;  %v2407_v39 = vsel %vm1072_vm9, %v1070_v22, -inf  ;;  %v2409_v40 = vsel %vm1072_vm9, %v1071_v24, -inf  ;;  %v20261_v62 = vpop.f32.mrb[8].mxu1  ;;  %v59_v22 = vld [vmem:[%s24115_s0 + $0x60] sm:$0xff] }
 0x189   :  { %v2351_v33 = vmax.f32 %v2349_v30, %v2350_v7  ;;  %v2370_v47 = vmax.f32 %v2368_v29, %v2369_v45  ;;  %v2402_v60 = vmax.f32 %v2400_v44, %v2401_v48  ;;  %v7415_v57 = vsel %vm2485_vm1, %v2290_v42, %v20191_v35  ;;  %v20268_v8 = vpop.f32.mrb[9].mxu1  ;;  %v58_v35 = vld [vmem:[%s24115_s0 + $0x58] sm:$0xff] }
 0x18a   :  { %v2389_v14 = vmax.f32 %v2387_v54, %v2388_v12  ;;  %v7416_v0 = vsel %vm2487_vm2, %v2311_v16, %v7415_v57  ;;  %v168_v10 = vsel %vm111_vm0, %v55_v9, -inf  ;;  %v175_v13 = vsel %vm111_vm0, %v56_v6, -inf  ;;  %v60_v54 = vld [vmem:[%s24115_s0 + $0x68] sm:$0xff] }
 0x18b   :  { %v2352_v3 = vrot.slane %v2351_v33, 1  ;;  %v2371_v11 = vrot.slane %v2370_v47, 2  ;;  %v2404_v46 = vmax.f32 %v2402_v60, %v2403_v61  ;;  %v7417_v15 = vsel %vm2489_vm3, %v2332_v58, %v7416_v0 }
 0x18c   :  { %v2390_v42 = vrot.slane %v2389_v14, 4  ;;  %v169_v19 = vrot.slane %v168_v10, 4  ;;  %v176_v23 = vrot.slane %v175_v13, 4  ;;  %v182_v12 = vsel %vm111_vm0, %v57_v63, -inf }
 0x18d   :  { %v2353_v26 = vmax.f32 %v2351_v33, %v2352_v3  ;;  %v2372_v16 = vmax.f32 %v2370_v47, %v2371_v11  ;;  %v2406_v5 = vmax.f32 %v2404_v46, %v2405_v55  ;;  %v183_v28 = vrot.slane %v182_v12, 4  ;;  %v61_v11 = vld [vmem:[%s24115_s0 + $0x70] sm:$0xff]  ;;  %v62_v46 = vld [vmem:[%s24115_s0 + $0x78] sm:$0xff] }
 0x18e   :  { %v2391_v21 = vmax.f32 %v2389_v14, %v2390_v42  ;;  %v170_v24 = vmax.f32 %v168_v10, %v169_v19  ;;  %v177_v30 = vmax.f32 %v175_v13, %v176_v23  ;;  %v189_v29 = vsel %vm111_vm0, %v58_v35, -inf }
 0x18f   :  { %v2373_v37 = vrot.slane %v2372_v16, 1  ;;  %v2408_v50 = vmax.f32 %v2406_v5, %v2407_v39  ;;  %v7418_v18 = vsel %vm2491_vm4, %v2353_v26, %v7417_v15  ;;  %v184_v36 = vmax.f32 %v182_v12, %v183_v28 }
 0x190   :  { %v2392_v48 = vrot.slane %v2391_v21, 2  ;;  %v171_v61 = vrot.slane %v170_v24, 2  ;;  %v178_v7 = vrot.slane %v177_v30, 2  ;;  %v190_v45 = vrot.slane %v189_v29, 4 }
 0x191   :  { %v2374_v44 = vmax.f32 %v2372_v16, %v2373_v37  ;;  %v2410_v55 = vmax.f32 %v2408_v50, %v2409_v40  ;;  %v185_v9 = vrot.slane %v184_v36, 2  ;;  %v196_v6 = vsel %vm111_vm0, %v59_v22, -inf  ;;  %v63_v22 = vld [vmem:[%s24115_s0 + $0x80] sm:$0xff] }
 0x192   :  { %v2393_v58 = vmax.f32 %v2391_v21, %v2392_v48  ;;  %v172_v33 = vmax.f32 %v170_v24, %v171_v61  ;;  %v179_v47 = vmax.f32 %v177_v30, %v178_v7  ;;  %v191_v39 = vmax.f32 %v189_v29, %v190_v45  ;;  %v64_v61 = vld [vmem:[%s24115_s0 + $0x88] sm:$0xff] }
 0x193   :  { %v2411_v60 = vrot.slane %v2410_v55, 4  ;;  %v7419_v57 = vsel %vm2493_vm5, %v2374_v44, %v7418_v18  ;;  %v186_v63 = vmax.f32 %v184_v36, %v185_v9  ;;  %v197_v14 = vrot.slane %v196_v6, 4 }
 0x194   :  { %v2394_v0 = vrot.slane %v2393_v58, 1  ;;  %v173_v10 = vrot.slane %v172_v33, 1  ;;  %v180_v13 = vrot.slane %v179_v47, 1  ;;  %v192_v40 = vrot.slane %v191_v39, 2 }
 0x195   :  { %v2412_v3 = vmax.f32 %v2410_v55, %v2411_v60  ;;  %v187_v15 = vrot.slane %v186_v63, 1  ;;  %v198_v35 = vmax.f32 %v196_v6, %v197_v14  ;;  %v203_v42 = vsel %vm111_vm0, %v60_v54, -inf }
 0x196   :  { %v2395_v19 = vmax.f32 %v2393_v58, %v2394_v0  ;;  %v174_v23 = vmax.f32 %v172_v33, %v173_v10  ;;  %v181_v12 = vmax.f32 %v179_v47, %v180_v13  ;;  %v193_v26 = vmax.f32 %v191_v39, %v192_v40  ;;  %v65_v10 = vld [vmem:[%s24115_s0 + $0x90] sm:$0xff] }
 0x197   :  { %v2413_v16 = vrot.slane %v2412_v3, 2  ;;  %v188_v5 = vmax.f32 %v186_v63, %v187_v15  ;;  %v199_v28 = vrot.slane %v198_v35, 2  ;;  %v204_v21 = vrot.slane %v203_v42, 4 }
 0x198   :  { %v7420_v24 = vsel %vm2495_vm6, %v2395_v19, %v7419_v57  ;;  %v194_v30 = vrot.slane %v193_v26, 1  ;;  %v210_v29 = vsel %vm111_vm0, %v61_v11, -inf  ;;  %v217_v37 = vsel %vm111_vm0, %v62_v46, -inf }
 0x199   :  { %v2414_v50 = vmax.f32 %v2412_v3, %v2413_v16  ;;  %v200_v18 = vmax.f32 %v198_v35, %v199_v28  ;;  %v205_v36 = vmax.f32 %v203_v42, %v204_v21  ;;  %v211_v48 = vrot.slane %v210_v29, 4  ;;  %v66_v3 = vld [vmem:[%s24115_s0 + $0x98] sm:$0xff] }
 0x19a   :  { %v195_v7 = vmax.f32 %v193_v26, %v194_v30  ;;  %v218_v45 = vrot.slane %v217_v37, 4  ;;  %v2499_v44 = vsel %vm2485_vm1, %v181_v12, %v174_v23  ;;  %v224_v55 = vsel %vm111_vm0, %v63_v22, -inf  ;;  %v67_v12 = vld [vmem:[%s24115_s0 + $0xa0] sm:$0xff] }
 0x19b   :  { %v2415_v9 = vrot.slane %v2414_v50, 1  ;;  %v201_v6 = vrot.slane %v200_v18, 1  ;;  %v206_v58 = vrot.slane %v205_v36, 2  ;;  %v212_v54 = vmax.f32 %v210_v29, %v211_v48  ;;  %v68_v29 = vld [vmem:[%s24115_s0 + $0xa8] sm:$0xff] }
 0x19c   :  { %v219_v33 = vmax.f32 %v217_v37, %v218_v45  ;;  %v2500_v47 = vsel %vm2487_vm2, %v188_v5, %v2499_v44  ;;  %v225_v39 = vrot.slane %v224_v55, 4  ;;  %v231_v60 = vsel %vm111_vm0, %v64_v61, -inf  ;;  %v69_v44 = vld [vmem:[%s24115_s0 + $0xb0] sm:$0xff] }
 0x19d   :  { %v2416_v57 = vmax.f32 %v2414_v50, %v2415_v9  ;;  %v202_v63 = vmax.f32 %v200_v18, %v201_v6  ;;  %v207_v14 = vmax.f32 %v205_v36, %v206_v58  ;;  %v213_v0 = vrot.slane %v212_v54, 2 }
 0x19e   :  { %v220_v13 = vrot.slane %v219_v33, 2  ;;  %v2501_v40 = vsel %vm2489_vm3, %v195_v7, %v2500_v47  ;;  %v226_v11 = vmax.f32 %v224_v55, %v225_v39  ;;  %v232_v46 = vrot.slane %v231_v60, 4 }
 0x19f   :  { %v20316_v15 = vsel %vm2497_vm7, %v2416_v57, %v7420_v24  ;;  %v208_v35 = vrot.slane %v207_v14, 1  ;;  %v214_v42 = vmax.f32 %v212_v54, %v213_v0  ;;  %v2502_v19 = vsel %vm2491_vm4, %v202_v63, %v2501_v40  ;;  %v70_v54 = vld [vmem:[%s24115_s0 + $0xb8] sm:$0xff] }
 0x1a0   :  { %12839 = vmatmul.mubr.msk.f32.gmra.mrb[18].mxu1 %vm1072_vm9, %v20316_v15  ;;  %v221_v23 = vmax.f32 %v219_v33, %v220_v13  ;;  %v227_v26 = vrot.slane %v226_v11, 2  ;;  %v233_v16 = vmax.f32 %v231_v60, %v232_v46  ;;  %v238_v5 = vsel %vm111_vm0, %v65_v10, -inf }
 0x1a1   :  { %v209_v28 = vmax.f32 %v207_v14, %v208_v35  ;;  %v215_v21 = vrot.slane %v214_v42, 1  ;;  %v239_v22 = vrot.slane %v238_v5, 4  ;;  %v245_v24 = vsel %vm111_vm0, %v66_v3, -inf  ;;  %7628 = vmatprep.mubr.f32.mxu1 %v17818_v2  ;;  %v71_v3 = vld [vmem:[%s24115_s0 + $0xc0] sm:$0xff] }
 0x1a2   :  { %v222_v30 = vrot.slane %v221_v23, 1  ;;  %v228_v37 = vmax.f32 %v226_v11, %v227_v26  ;;  %v234_v50 = vrot.slane %v233_v16, 2  ;;  %v246_v18 = vrot.slane %v245_v24, 4 }
 0x1a3   :  { %v216_v36 = vmax.f32 %v214_v42, %v215_v21  ;;  %v2503_v48 = vsel %vm2493_vm5, %v209_v28, %v2502_v19  ;;  %v240_v61 = vmax.f32 %v238_v5, %v239_v22  ;;  %v252_v7 = vsel %vm111_vm0, %v67_v12, -inf }
 0x1a4   :  { %v223_v45 = vmax.f32 %v221_v23, %v222_v30  ;;  %v229_v55 = vrot.slane %v228_v37, 1  ;;  %v235_v9 = vmax.f32 %v233_v16, %v234_v50  ;;  %v247_v6 = vmax.f32 %v245_v24, %v246_v18  ;;  %v72_v16 = vld [vmem:[%s24115_s0 + $0xc8] sm:$0xff] }
 0x1a5   :  { %v2504_v58 = vsel %vm2495_vm6, %v216_v36, %v2503_v48  ;;  %v241_v33 = vrot.slane %v240_v61, 2  ;;  %v253_v47 = vrot.slane %v252_v7, 4  ;;  %v259_v39 = vsel %vm111_vm0, %v68_v29, -inf  ;;  %v73_v36 = vld [vmem:[%s24115_s0 + $0xd0] sm:$0xff] }
 0x1a6   :  { %v20341_v60 = vsel %vm2497_vm7, %v223_v45, %v2504_v58  ;;  %v230_v57 = vmax.f32 %v228_v37, %v229_v55  ;;  %v236_v63 = vrot.slane %v235_v9, 1  ;;  %v248_v14 = vrot.slane %v247_v6, 2  ;;  %v74_v58 = vld [vmem:[%s24115_s0 + $0xd8] sm:$0xff] }
 0x1a7   :  { %12391 = vmatmul.mubr.msk.f32.gmra.mrb[2].mxu0 %vm111_vm0, %v20341_v60  ;;  %v242_v0 = vmax.f32 %v240_v61, %v241_v33  ;;  %v254_v10 = vmax.f32 %v252_v7, %v253_v47  ;;  %v260_v13 = vrot.slane %v259_v39, 4  ;;  %v266_v40 = vsel %vm111_vm0, %v69_v44, -inf }
 0x1a8   :  { %2640 = vmatprep.mubr.f32.mxu0 %v17818_v2  ;;  %v237_v11 = vmax.f32 %v235_v9, %v236_v63  ;;  %v249_v46 = vmax.f32 %v247_v6, %v248_v14  ;;  %v267_v35 = vrot.slane %v266_v40, 4  ;;  %v273_v42 = vsel %vm111_vm0, %v70_v54, -inf }
 0x1a9   :  { %v243_v19 = vrot.slane %v242_v0, 1  ;;  %v255_v23 = vrot.slane %v254_v10, 2  ;;  %v261_v12 = vmax.f32 %v259_v39, %v260_v13  ;;  %v274_v26 = vrot.slane %v273_v42, 4 }
 0x1aa   :  { %v250_v5 = vrot.slane %v249_v46, 1  ;;  %v268_v28 = vmax.f32 %v266_v40, %v267_v35  ;;  %v2506_v21 = vsel %vm2485_vm1, %v237_v11, %v230_v57  ;;  %v280_v22 = vsel %vm111_vm0, %v71_v3, -inf }
 0x1ab   :  { %v244_v24 = vmax.f32 %v242_v0, %v243_v19  ;;  %v256_v30 = vmax.f32 %v254_v10, %v255_v23  ;;  %v262_v29 = vrot.slane %v261_v12, 2  ;;  %v275_v37 = vmax.f32 %v273_v42, %v274_v26  ;;  %v75_v0 = vld [vmem:[%s24115_s0 + $0xe0] sm:$0xff]  ;;  %v76_v19 = vld [vmem:[%s24115_s0 + $0xe8] sm:$0xff] }
 0x1ac   :  { %v251_v50 = vmax.f32 %v249_v46, %v250_v5  ;;  %v269_v18 = vrot.slane %v268_v28, 2  ;;  %v281_v48 = vrot.slane %v280_v22, 4  ;;  %v287_v61 = vsel %vm111_vm0, %v72_v16, -inf }
 0x1ad   :  { %v257_v7 = vrot.slane %v256_v30, 1  ;;  %v263_v45 = vmax.f32 %v261_v12, %v262_v29  ;;  %v276_v44 = vrot.slane %v275_v37, 2  ;;  %v2507_v55 = vsel %vm2487_vm2, %v244_v24, %v2506_v21  ;;  %v77_v24 = vld [vmem:[%s24115_s0 + $0xf0] sm:$0xff] }
 0x1ae   :  { %v270_v9 = vmax.f32 %v268_v28, %v269_v18  ;;  %v2508_v6 = vsel %vm2489_vm3, %v251_v50, %v2507_v55  ;;  %v282_v54 = vmax.f32 %v280_v22, %v281_v48  ;;  %v288_v33 = vrot.slane %v287_v61, 4 }
 0x1af   :  { %v258_v47 = vmax.f32 %v256_v30, %v257_v7  ;;  %v264_v39 = vrot.slane %v263_v45, 1  ;;  %v277_v57 = vmax.f32 %v275_v37, %v276_v44  ;;  %v294_v63 = vsel %vm111_vm0, %v73_v36, -inf  ;;  %v78_v30 = vld [vmem:[%s24115_s0 + $0xf8] sm:$0xff] }
 0x1b0   :  { %v271_v14 = vrot.slane %v270_v9, 1  ;;  %v283_v10 = vrot.slane %v282_v54, 2  ;;  %v289_v13 = vmax.f32 %v287_v61, %v288_v33  ;;  %v295_v40 = vrot.slane %v294_v63, 4 }
 0x1b1   :  { %v265_v3 = vmax.f32 %v263_v45, %v264_v39  ;;  %v278_v11 = vrot.slane %v277_v57, 1  ;;  %v2509_v46 = vsel %vm2491_vm4, %v258_v47, %v2508_v6  ;;  %v301_v35 = vsel %vm111_vm0, %v74_v58, -inf  ;;  %v79_v58 = vld [vmem:[%s24115_s0 + $0x100] sm:$0xff] }
 0x1b2   :  { %v272_v42 = vmax.f32 %v270_v9, %v271_v14  ;;  %v284_v23 = vmax.f32 %v282_v54, %v283_v10  ;;  %v290_v12 = vrot.slane %v289_v13, 2  ;;  %v296_v26 = vmax.f32 %v294_v63, %v295_v40 }
 0x1b3   :  { %v279_v16 = vmax.f32 %v277_v57, %v278_v11  ;;  %v2510_v5 = vsel %vm2493_vm5, %v265_v3, %v2509_v46  ;;  %v302_v28 = vrot.slane %v301_v35, 4  ;;  %v308_v21 = vsel %vm111_vm0, %v75_v0, -inf  ;;  %v80_v3 = vld [vmem:[%s24115_s0 + $0x108] sm:$0xff] }
 0x1b4   :  { %v2511_v22 = vsel %vm2495_vm6, %v272_v42, %v2510_v5  ;;  %v285_v29 = vrot.slane %v284_v23, 1  ;;  %v291_v37 = vmax.f32 %v289_v13, %v290_v12  ;;  %v297_v50 = vrot.slane %v296_v26, 2  ;;  %v20383_v18 = vpop.f32.mrb[10].mxu1 }
 0x1b5   :  { %v20386_v36 = vsel %vm2497_vm7, %v279_v16, %v2511_v22  ;;  %v303_v48 = vmax.f32 %v301_v35, %v302_v28  ;;  %v309_v61 = vrot.slane %v308_v21, 4  ;;  %v315_v7 = vsel %vm111_vm0, %v76_v19, -inf  ;;  %v20389_v45 = vpop.f32.mrb[11].mxu1  ;;  %v81_v16 = vld [vmem:[%s24115_s0 + $0x110] sm:$0xff] }
 0x1b6   :  { %12392 = vmatmul.mubr.msk.f32.gmra.mrb[4].mxu0 %vm111_vm0, %v20386_v36  ;;  %v286_v44 = vmax.f32 %v284_v23, %v285_v29  ;;  %v292_v55 = vrot.slane %v291_v37, 1  ;;  %v298_v9 = vmax.f32 %v296_v26, %v297_v50  ;;  %v316_v6 = vrot.slane %v315_v7, 4 }
 0x1b7   :  { %2646 = vmatprep.mubr.f32.mxu0 %v17818_v2  ;;  %v304_v54 = vrot.slane %v303_v48, 2  ;;  %v310_v33 = vmax.f32 %v308_v21, %v309_v61  ;;  %v322_v47 = vsel %vm111_vm0, %v77_v24, -inf  ;;  %v329_v39 = vsel %vm111_vm0, %v78_v30, -inf }
 0x1b8   :  { %v293_v57 = vmax.f32 %v291_v37, %v292_v55  ;;  %v299_v63 = vrot.slane %v298_v9, 1  ;;  %v317_v14 = vmax.f32 %v315_v7, %v316_v6  ;;  %v323_v0 = vrot.slane %v322_v47, 4  ;;  %v82_v7 = vld [vmem:[%s24115_s0 + $0x118] sm:$0xff] }
 0x1b9   :  { %v305_v10 = vmax.f32 %v303_v48, %v304_v54  ;;  %v311_v13 = vrot.slane %v310_v33, 2  ;;  %v330_v40 = vrot.slane %v329_v39, 4  ;;  %v336_v11 = vsel %vm111_vm0, %v79_v58, -inf }
 0x1ba   :  { %v300_v46 = vmax.f32 %v298_v9, %v299_v63  ;;  %v318_v35 = vrot.slane %v317_v14, 2  ;;  %v324_v42 = vmax.f32 %v322_v47, %v323_v0  ;;  %v2513_v19 = vsel %vm2485_vm1, %v293_v57, %v286_v44 }
 0x1bb   :  { %v306_v23 = vrot.slane %v305_v10, 1  ;;  %v312_v12 = vmax.f32 %v310_v33, %v311_v13  ;;  %v331_v26 = vmax.f32 %v329_v39, %v330_v40  ;;  %v337_v5 = vrot.slane %v336_v11, 4  ;;  %v83_v39 = vld [vmem:[%s24115_s0 + $0x120] sm:$0xff] }
 0x1bc   :  { %v319_v28 = vmax.f32 %v317_v14, %v318_v35  ;;  %v325_v21 = vrot.slane %v324_v42, 2  ;;  %v2514_v22 = vsel %vm2487_vm2, %v300_v46, %v2513_v19  ;;  %v343_v24 = vsel %vm111_vm0, %v80_v3, -inf }
 0x1bd   :  { %v307_v30 = vmax.f32 %v305_v10, %v306_v23  ;;  %v313_v29 = vrot.slane %v312_v12, 1  ;;  %v332_v37 = vrot.slane %v331_v26, 2  ;;  %v338_v50 = vmax.f32 %v336_v11, %v337_v5  ;;  %v84_v11 = vld [vmem:[%s24115_s0 + $0x128] sm:$0xff]  ;;  %v86_v5 = vld [vmem:[%s24115_s0 + $0x138] sm:$0xff] }
 0x1be   :  { %v320_v48 = vrot.slane %v319_v28, 1  ;;  %v326_v61 = vmax.f32 %v324_v42, %v325_v21  ;;  %v344_v44 = vrot.slane %v343_v24, 4  ;;  %v350_v55 = vsel %vm111_vm0, %v81_v16, -inf  ;;  %v85_v16 = vld [vmem:[%s24115_s0 + $0x130] sm:$0xff] }
 0x1bf   :  { %v314_v9 = vmax.f32 %v312_v12, %v313_v29  ;;  %v333_v6 = vmax.f32 %v331_v26, %v332_v37  ;;  %v2515_v58 = vsel %vm2489_vm3, %v307_v30, %v2514_v22  ;;  %v339_v54 = vrot.slane %v338_v50, 2 }
 0x1c0   :  { %v321_v33 = vmax.f32 %v319_v28, %v320_v48  ;;  %v327_v47 = vrot.slane %v326_v61, 1  ;;  %v345_v57 = vmax.f32 %v343_v24, %v344_v44  ;;  %v351_v63 = vrot.slane %v350_v55, 4  ;;  %v87_v24 = vld [vmem:[%s24115_s0 + $0x140] sm:$0xff] }
 0x1c1   :  { %v334_v14 = vrot.slane %v333_v6, 1  ;;  %v2516_v0 = vsel %vm2491_vm4, %v314_v9, %v2515_v58  ;;  %v340_v10 = vmax.f32 %v338_v50, %v339_v54  ;;  %v357_v13 = vsel %vm111_vm0, %v82_v7, -inf }
 0x1c2   :  { %v328_v40 = vmax.f32 %v326_v61, %v327_v47  ;;  %v2517_v3 = vsel %vm2493_vm5, %v321_v33, %v2516_v0  ;;  %v346_v46 = vrot.slane %v345_v57, 2  ;;  %v352_v35 = vmax.f32 %v350_v55, %v351_v63  ;;  %v88_v0 = vld [vmem:[%s24115_s0 + $0x148] sm:$0xff] }
 0x1c3   :  { %v335_v42 = vmax.f32 %v333_v6, %v334_v14  ;;  %v341_v19 = vrot.slane %v340_v10, 1  ;;  %v358_v23 = vrot.slane %v357_v13, 4  ;;  %v364_v12 = vsel %vm111_vm0, %v83_v39, -inf }
 0x1c4   :  { %v2518_v26 = vsel %vm2495_vm6, %v328_v40, %v2517_v3  ;;  %v347_v28 = vmax.f32 %v345_v57, %v346_v46  ;;  %v353_v21 = vrot.slane %v352_v35, 2  ;;  %v365_v22 = vrot.slane %v364_v12, 4 }
 0x1c5   :  { %v20435_v30 = vsel %vm2497_vm7, %v335_v42, %v2518_v26  ;;  %v342_v29 = vmax.f32 %v340_v10, %v341_v19  ;;  %v359_v37 = vmax.f32 %v357_v13, %v358_v23  ;;  %v371_v50 = vsel %vm111_vm0, %v84_v11, -inf  ;;  %v89_v19 = vld [vmem:[%s24115_s0 + $0x150] sm:$0xff] }
 0x1c6   :  { %12393 = vmatmul.mubr.msk.f32.gmra.mrb[6].mxu0 %vm111_vm0, %v20435_v30  ;;  %v348_v48 = vrot.slane %v347_v28, 1  ;;  %v354_v61 = vmax.f32 %v352_v35, %v353_v21  ;;  %v366_v7 = vmax.f32 %v364_v12, %v365_v22  ;;  %v372_v44 = vrot.slane %v371_v50, 4 }
 0x1c7   :  { %2652 = vmatprep.mubr.f32.mxu0 %v17818_v2  ;;  %v360_v55 = vrot.slane %v359_v37, 2  ;;  %v378_v9 = vsel %vm111_vm0, %v85_v16, -inf  ;;  %v385_v6 = vsel %vm111_vm0, %v86_v5, -inf  ;;  %v392_v58 = vsel %vm111_vm0, %v87_v24, -inf }
 0x1c8   :  { %v349_v54 = vmax.f32 %v347_v28, %v348_v48  ;;  %v355_v33 = vrot.slane %v354_v61, 1  ;;  %v367_v47 = vrot.slane %v366_v7, 2  ;;  %v373_v39 = vmax.f32 %v371_v50, %v372_v44  ;;  %v90_v50 = vld [vmem:[%s24115_s0 + $0x158] sm:$0xff] }
 0x1c9   :  { %v361_v57 = vmax.f32 %v359_v37, %v360_v55  ;;  %v379_v63 = vrot.slane %v378_v9, 4  ;;  %v386_v14 = vrot.slane %v385_v6, 4  ;;  %v393_v10 = vrot.slane %v392_v58, 4 }
 0x1ca   :  { %v356_v13 = vmax.f32 %v354_v61, %v355_v33  ;;  %v368_v40 = vmax.f32 %v366_v7, %v367_v47  ;;  %v374_v3 = vrot.slane %v373_v39, 2  ;;  %v2520_v11 = vsel %vm2485_vm1, %v349_v54, %v342_v29  ;;  %v91_v54 = vld [vmem:[%s24115_s0 + $0x160] sm:$0xff] }
 0x1cb   :  { %v362_v46 = vrot.slane %v361_v57, 1  ;;  %v380_v35 = vmax.f32 %v378_v9, %v379_v63  ;;  %v387_v42 = vmax.f32 %v385_v6, %v386_v14  ;;  %v394_v23 = vmax.f32 %v392_v58, %v393_v10  ;;  %v92_v10 = vld [vmem:[%s24115_s0 + $0x168] sm:$0xff] }
 0x1cc   :  { %v369_v12 = vrot.slane %v368_v40, 1  ;;  %v375_v26 = vmax.f32 %v373_v39, %v374_v3  ;;  %v2521_v16 = vsel %vm2487_vm2, %v356_v13, %v2520_v11  ;;  %v399_v5 = vsel %vm111_vm0, %v88_v0, -inf  ;;  %v93_v13 = vld [vmem:[%s24115_s0 + $0x170] sm:$0xff] }
 0x1cd   :  { %v363_v28 = vmax.f32 %v361_v57, %v362_v46  ;;  %v381_v21 = vrot.slane %v380_v35, 2  ;;  %v388_v22 = vrot.slane %v387_v42, 2  ;;  %v395_v24 = vrot.slane %v394_v23, 2 }
 0x1ce   :  { %v370_v37 = vmax.f32 %v368_v40, %v369_v12  ;;  %v376_v29 = vrot.slane %v375_v26, 1  ;;  %v400_v48 = vrot.slane %v399_v5, 4  ;;  %v406_v61 = vsel %vm111_vm0, %v89_v19, -inf  ;;  %v94_v40 = vld [vmem:[%s24115_s0 + $0x178] sm:$0xff] }
 0x1cf   :  { %v382_v7 = vmax.f32 %v380_v35, %v381_v21  ;;  %v389_v44 = vmax.f32 %v387_v42, %v388_v22  ;;  %v2522_v55 = vsel %vm2489_vm3, %v363_v28, %v2521_v16  ;;  %v396_v9 = vmax.f32 %v394_v23, %v395_v24 }
 0x1d0   :  { %v377_v6 = vmax.f32 %v375_v26, %v376_v29  ;;  %v2523_v58 = vsel %vm2491_vm4, %v370_v37, %v2522_v55  ;;  %v401_v33 = vmax.f32 %v399_v5, %v400_v48  ;;  %v407_v47 = vrot.slane %v406_v61, 4  ;;  %v7301_v37 = vld [vmem:[%s24116_s5 + $0x8] sm:$0xff]  ;;  %s17819_s5 = smov 112  }
 0x1d1   :  { %v383_v39 = vrot.slane %v382_v7, 1  ;;  %v390_v57 = vrot.slane %v389_v44, 1  ;;  %v397_v63 = vrot.slane %v396_v9, 1  ;;  %v413_v14 = vsel %vm111_vm0, %v90_v50, -inf }
 0x1d2   :  { %v2524_v0 = vsel %vm2493_vm5, %v377_v6, %v2523_v58  ;;  %v402_v3 = vrot.slane %v401_v33, 2  ;;  %v408_v11 = vmax.f32 %v406_v61, %v407_v47  ;;  %v414_v46 = vrot.slane %v413_v14, 4 }
 0x1d3   :  { %v384_v35 = vmax.f32 %v382_v7, %v383_v39  ;;  %v391_v42 = vmax.f32 %v389_v44, %v390_v57  ;;  %v398_v19 = vmax.f32 %v396_v9, %v397_v63  ;;  %v420_v23 = vsel %vm111_vm0, %v91_v54, -inf }
 0x1d4   :  { %v403_v12 = vmax.f32 %v401_v33, %v402_v3  ;;  %v409_v26 = vrot.slane %v408_v11, 2  ;;  %v415_v16 = vmax.f32 %v413_v14, %v414_v46  ;;  %v421_v5 = vrot.slane %v420_v23, 4 }
 0x1d5   :  { %v2525_v28 = vsel %vm2495_vm6, %v384_v35, %v2524_v0  ;;  %v427_v21 = vsel %vm111_vm0, %v92_v10, -inf  ;;  %v434_v22 = vsel %vm111_vm0, %v93_v13, -inf  ;;  %v441_v24 = vsel %vm111_vm0, %v94_v40, -inf }
 0x1d6   :  { %v20482_v29 = vsel %vm2497_vm7, %v391_v42, %v2525_v28  ;;  %v404_v50 = vrot.slane %v403_v12, 1  ;;  %v410_v48 = vmax.f32 %v408_v11, %v409_v26  ;;  %v416_v61 = vrot.slane %v415_v16, 2 }
 0x1d7   :  { %12394 = vmatmul.mubr.msk.f32.gmra.mrb[8].mxu0 %vm111_vm0, %v20482_v29  ;;  %v422_v7 = vmax.f32 %v420_v23, %v421_v5  ;;  %v428_v44 = vrot.slane %v427_v21, 4  ;;  %v435_v55 = vrot.slane %v434_v22, 4  ;;  %v442_v9 = vrot.slane %v441_v24, 4 }
 0x1d8   :  { %2658 = vmatprep.mubr.f32.mxu0 %v17818_v2  ;;  %v405_v6 = vmax.f32 %v403_v12, %v404_v50  ;;  %v411_v58 = vrot.slane %v410_v48, 1  ;;  %v417_v54 = vmax.f32 %v415_v16, %v416_v61  ;;  %v7425_v33 = vcombine.high %v7301_v37, %v7301_v37 }
 0x1d9   :  { %v423_v47 = vrot.slane %v422_v7, 2  ;;  %v429_v39 = vmax.f32 %v427_v21, %v428_v44  ;;  %v436_v57 = vmax.f32 %v434_v22, %v435_v55  ;;  %v443_v63 = vmax.f32 %v441_v24, %v442_v9 }
 0x1da   :  { %v412_v14 = vmax.f32 %v410_v48, %v411_v58  ;;  %v418_v0 = vrot.slane %v417_v54, 1  ;;  %v2527_v10 = vsel %vm2485_vm1, %v405_v6, %v398_v19  ;;  %12840 = vmatprep.subr.msk.mxu1 %vm7442_vm8, %v7425_v33  ;;  %v20491_v13 = vpack.i.bf16 %v20127_v4, %v20108_v49 }
 0x1db   :  { %v424_v40 = vmax.f32 %v422_v7, %v423_v47  ;;  %v430_v3 = vrot.slane %v429_v39, 2  ;;  %v437_v11 = vrot.slane %v436_v57, 2  ;;  %v444_v46 = vrot.slane %v443_v63, 2  ;;  %12841 = vmatpush1.msk.msra.mxu1 %vm7442_vm8, %v7301_v37 }
 0x1dc   :  { %24180 = vst [vmem:[#allocation2_spill] sm:$0xff] %v20491_v13  ;;  %v419_v35 = vmax.f32 %v417_v54, %v418_v0  ;;  %v2528_v42 = vsel %vm2487_vm2, %v412_v14, %v2527_v10  ;;  %12842 = vmatmul.mubr.msk.f32.vlgmr.msra.gmra.mrb[20].mxu1 %vm1072_vm9, %v18421_v52  ;;  %v20499_v19 = vpack.c.bf16 %v20127_v4, %v20108_v49  ;;  %vm11328_vm11 = vcmask 130048  }
 0x1dd   :  { %v425_v23 = vrot.slane %v424_v40, 1  ;;  %v431_v12 = vmax.f32 %v429_v39, %v430_v3  ;;  %v438_v26 = vmax.f32 %v436_v57, %v437_v11  ;;  %v445_v16 = vmax.f32 %v443_v63, %v444_v46  ;;  %7634 = vmatprep.mubr.f32.mxu1 %v17818_v2 }
 0x1de   :  { %24181 = vst [vmem:[#allocation3_spill] sm:$0xff] %v20499_v19  ;;  %v2529_v5 = vsel %vm2489_vm3, %v419_v35, %v2528_v42  ;;  %v20505_v28 = vpack.i.bf16 %v20157_v34, %v20138_v20  ;;  %v20509_v21 = vpack.i.bf16 %v20383_v18, %v20261_v62  ;;  %vm11339_vm12 = vcmask 261120  }
 0x1df   :  { %v426_v52 = vmax.f32 %v424_v40, %v425_v23  ;;  %v432_v22 = vrot.slane %v431_v12, 1  ;;  %v439_v49 = vrot.slane %v438_v26, 1  ;;  %v446_v4 = vrot.slane %v445_v16, 1 }
 0x1e0   :  { %12843 = vmatmul.mubr.msk.f32.gmra.mrb[22].mxu1 %vm1072_vm9, %v18683_v41  ;;  %16815 = vrot.lane.b32.xlu0 %v20505_v28, %s17819_s5  ;;  %v7541_v24 = vpop.f32.mrb[12].mxu1  ;;  %vm11516_vm13 = vcmask 326656   ;;  %vm11803_vm8 = vcmask 7168  }
 0x1e1   :  { %v433_v37 = vmax.f32 %v431_v12, %v432_v22  ;;  %v440_v50 = vmax.f32 %v438_v26, %v439_v49  ;;  %v447_v48 = vmax.f32 %v445_v16, %v446_v4  ;;  %v2530_v61 = vsel %vm2491_vm4, %v426_v52, %v2529_v5  ;;  %7640 = vmatprep.mubr.f32.mxu1 %v17818_v2  ;;  %v7543_v7 = vpop.f32.mrb[13].mxu1  ;;  %v12406_v4 = vld [vmem:[%s24118_s3 + $0x40] sm:$0xff] }
 0x1e3   :  { %v2531_v44 = vsel %vm2493_vm5, %v433_v37, %v2530_v61 }
 0x1e4   :  { %v2532_v55 = vsel %vm2495_vm6, %v440_v50, %v2531_v44  ;;  %12844 = vmatmul.mubr.msk.f32.gmra.mrb[24].mxu1 %vm1072_vm9, %v18957_v51  ;;  %16820 = vrot.lane.b32.xlu0 %v20509_v21, %s17819_s5 }
 0x1e5   :  { %v2533_v41 = vsel %vm2497_vm7, %v447_v48, %v2532_v55  ;;  %7646 = vmatprep.mubr.f32.mxu1 %v17818_v2  ;;  %vm11648_vm7 = vcmask 48128  }
 0x1e6   :  { %12395 = vmatmul.mubr.msk.f32.gmra.mrb[10].mxu0 %vm111_vm0, %v2533_v41 }
 0x1e7   :  { %2664 = vmatprep.mubr.f32.mxu0 %v17818_v2 }
 0x1e8   :  { %12845 = vmatmul.mubr.msk.f32.gmra.mrb[26].mxu1 %vm1072_vm9, %v19229_v59  ;;  %16835 = vrot.lane.b32.xlu0 %v20505_v28, %s17820_s30 }
 0x1e9   :  { %7652 = vmatprep.mubr.f32.mxu1 %v17818_v2 }
 0x1ea   :  { %12396 = vmatmul.mubr.msk.f32.gmra.mrb[12].mxu0 %vm111_vm0, %v17985_v32  ;;  %v20567_v32 = vpack.i.bf16 %v20119_v1, %v20099_v38 }
 0x1eb   :  { %2670 = vmatprep.mubr.f32.mxu0 %v17818_v2 }
 0x1ec   :  { %12846 = vmatmul.mubr.msk.f32.gmra.mrb[28].mxu1 %vm1072_vm9, %v19512_v27  ;;  %24182 = vst [vmem:[#allocation4_spill] sm:$0xff] %v20567_v32  ;;  %v20573_v27 = vpack.c.bf16 %v20157_v34, %v20138_v20  ;;  %v20601_v20 = vpack.c.bf16 %v20389_v45, %v20268_v8  ;;  %v20953_v32 = vld [vmem:[%s24118_s3 + $0x28] sm:$0xff] }
 0x1ed   :  { %7658 = vmatprep.mubr.f32.mxu1 %v17818_v2  ;;  %24198 = vst [vmem:[#allocation20_spill] sm:$0xff] %v20953_v32 }
 0x1ee   :  { %12397 = vmatmul.mubr.msk.f32.gmra.mrb[14].mxu0 %vm111_vm0, %v18076_v56  ;;  %24184 = vst [vmem:[#allocation6_spill] sm:$0xff] %v20601_v20  ;;  %v20980_v20 = vld [vmem:[%s24118_s3 + $0x80] sm:$0xff] }
 0x1ef   :  { %2741 = vmatprep.mubr.f32.mxu0 %v17818_v2  ;;  %24201 = vst [vmem:[#allocation23_spill] sm:$0xff] %v20980_v20 }
 0x1f0   :  { %12847 = vmatmul.mubr.msk.f32.gmra.mrb[30].mxu1 %vm1072_vm9, %v19787_v31  ;;  %v20585_v31 = vpack.c.bf16 %v20162_v53, %v20144_v25 }
 0x1f1   :  { %7664 = vmatprep.mubr.f32.mxu1 %v17818_v2 }
 0x1f2   :  { %12398 = vmatmul.mubr.msk.f32.vlgmr.msra.gmra.mrb[16].mxu0 %vm111_vm0, %v20051_v17  ;;  %24183 = vst [vmem:[#allocation5_spill] sm:$0xff] %v20585_v31  ;;  %v20597_v17 = vpack.i.bf16 %v20389_v45, %v20268_v8 }
 0x1f3   :  { %2747 = vmatprep.mubr.f32.mxu0 %v17818_v2 }
 0x1f4   :  { %12848 = vmatmul.mubr.msk.f32.gmra.mrb[32].mxu1 %vm1072_vm9, %v19988_v43  ;;  %v20591_v43 = vpack.c.bf16 %v20383_v18, %v20261_v62  ;;  %v20611_v62 = vpack.c.bf16 %v20119_v1, %v20099_v38 }
 0x1f5   :  { %7670 = vmatprep.mubr.f32.mxu1 %v17818_v2 }
 0x1f6   :  { %12399 = vmatmul.mubr.msk.f32.gmra.mrb[18].mxu0 %vm111_vm0, %v20341_v60  ;;  %24186 = vst [vmem:[#allocation8_spill] sm:$0xff] %v20611_v62 }
 0x1f7   :  { %2753 = vmatprep.mubr.f32.mxu0 %v17818_v2 }
 0x1f8   :  { %12849 = vmatmul.mubr.msk.f32.gmra.mrb[34].mxu1 %vm1072_vm9, %v20316_v15  ;;  %vm11812_vm9 = vcmask 15360  }
 0x1f9   :  { %14746 = vmatprep.mubr.msk.f32.mxu1 %vm2839_vm10, %v12406_v4 }
 0x1fa   :  { %12400 = vmatmul.mubr.msk.f32.gmra.mrb[20].mxu0 %vm111_vm0, %v20386_v36 }
 0x1fb   :  { %2759 = vmatprep.mubr.f32.mxu0 %v17818_v2 }
 0x1fe   :  { %12401 = vmatmul.mubr.msk.f32.gmra.mrb[22].mxu0 %vm111_vm0, %v20435_v30 }
 0x1ff   :  { %2765 = vmatprep.mubr.f32.mxu0 %v17818_v2 }
 0x202   :  { %12402 = vmatmul.mubr.msk.f32.gmra.mrb[24].mxu0 %vm111_vm0, %v20482_v29 }
 0x203   :  { %2771 = vmatprep.mubr.f32.mxu0 %v17818_v2  ;;  %v20581_v2 = vpack.i.bf16 %v20162_v53, %v20144_v25 }
 0x206   :  { %12403 = vmatmul.mubr.msk.f32.gmra.mrb[26].mxu0 %vm111_vm0, %v2533_v41 }
 0x207   :  { %13990 = vmatprep.mubr.msk.f32.mxu0 %vm2839_vm10, %v12406_v4 }
 0x20c   :  { %v7547_v56 = vpop.f32.mrb[14].mxu1 }
 0x20d   :  { %v7549_v51 = vpop.f32.mrb[15].mxu1  ;;  %v20569_v59 = vpack.i.bf16 %v7547_v56, %v7541_v24  ;;  %v20603_v25 = vpack.c.bf16 %v7547_v56, %v7541_v24 }
 0x20e   :  { %v20605_v34 = vpack.i.bf16 %v7549_v51, %v7543_v7  ;;  %v20607_v53 = vpack.c.bf16 %v7549_v51, %v7543_v7 }
 0x20f   :  { %16845 = vrot.lane.b32.xlu0 %v20569_v59, %s17820_s30  ;;  %16825 = vrot.lane.b32.xlu1 %v20569_v59, %s17819_s5 }
 0x210   :  { %24185 = vst [vmem:[#allocation7_spill] sm:$0xff] %v20607_v53  ;;  %v20975_v53 = vld [vmem:[%s24118_s3 + $0x38] sm:$0xff] }
 0x213   :  { %16855 = vrot.lane.b32.xlu0 %v20505_v28, %s17821_s15 }
 0x217   :  { %16865 = vrot.lane.b32.xlu0 %v20569_v59, %s17821_s15 }
 0x239   :  { %v7553_v15 = vpop.f32.mrb[16].mxu1 }
 0x23a   :  { %v7555_v60 = vpop.f32.mrb[17].mxu1 }
 0x23f   :  { %v2630_v18 = vpop.f32.mrb[0].mxu0 }
 0x240   :  { %v2632_v36 = vpop.f32.mrb[1].mxu0 }
 0x252   :  { %v16816_v39 = vpop.permute.xlu0 %16815 }
 0x253   :  { %v16818_v57 = vunpack.i.h.bf16 %v16816_v39  ;;  %v16817_v63 = vunpack.i.l.bf16 %v16816_v39 }
 0x255   :  { %v15940_v14 = vpack.c.bf16 %v16818_v57, %v16817_v63 }
 0x256   :  { %v16821_v0 = vpop.permute.xlu0 %16820 }
 0x257   :  { %15941 = vmatprep.subr.bf16.mxu1 %v15940_v14  ;;  %v16823_v40 = vunpack.i.h.bf16 %v16821_v0  ;;  %v16822_v3 = vunpack.i.l.bf16 %v16821_v0 }
 0x258   :  { %15943 = vmatpush3.bf16.msra.mxu1 %v15940_v14 }
 0x259   :  { %v15944_v46 = vpack.c.bf16 %v16823_v40, %v16822_v3 }
 0x25b   :  { %15945 = vmatprep.subr.bf16.mxu1 %v15944_v46 }
 0x25c   :  { %15947 = vmatpush3.bf16.msra.mxu1 %v15944_v46 }
 0x273   :  { %v7559_v30 = vpop.f32.mrb[18].mxu1 }
 0x274   :  { %v7561_v29 = vpop.f32.mrb[19].mxu1  ;;  %v20613_v9 = vpack.i.bf16 %v7559_v30, %v7553_v15  ;;  %v20621_v45 = vpack.c.bf16 %v7559_v30, %v7553_v15 }
 0x275   :  { %v20615_v8 = vpack.i.bf16 %v7561_v29, %v7555_v60  ;;  %v20623_v38 = vpack.c.bf16 %v7561_v29, %v7555_v60 }
 0x276   :  { %16830 = vrot.lane.b32.xlu1 %v20613_v9, %s17819_s5  ;;  %16880 = vrot.lane.b32.xlu0 %v20613_v9, %s17821_s15 }
 0x277   :  { %24187 = vst [vmem:[#allocation9_spill] sm:$0xff] %v20623_v38  ;;  %v20958_v38 = vld [vmem:[%s24118_s3 + $0x30] sm:$0xff] }
 0x278   :  { %24199 = vst [vmem:[#allocation21_spill] sm:$0xff] %v20958_v38 }
 0x27a   :  { %16840 = vrot.lane.b32.xlu1 %v20509_v21, %s17820_s30  ;;  %16885 = vrot.lane.b32.xlu0 %v20505_v28, %s17822_s16  ;;  %v2636_v1 = vpop.f32.mrb[2].mxu0 }
 0x27b   :  { %v2638_v6 = vpop.f32.mrb[3].mxu0  ;;  %v20629_v58 = vpack.i.bf16 %v2636_v1, %v2630_v18  ;;  %v20633_v33 = vpack.c.bf16 %v2636_v1, %v2630_v18 }
 0x27c   :  { %v20631_v54 = vpack.i.bf16 %v2638_v6, %v2632_v36  ;;  %v20639_v47 = vpack.c.bf16 %v2638_v6, %v2632_v36  ;;  %v20722_v36 = vpop.permute.xlu0 %16835 }
 0x27d   :  { %v16838_v62 = vunpack.i.h.bf16 %v20722_v36  ;;  %v16837_v13 = vunpack.i.l.bf16 %v20722_v36 }
 0x27e   :  { %16850 = vrot.lane.b32.xlu1 %v20613_v9, %s17820_s30  ;;  %16895 = vrot.lane.b32.xlu0 %v20509_v21, %s17822_s16  ;;  %24188 = vst [vmem:[#allocation10_spill] sm:$0xff] %v20639_v47  ;;  %v20936_v47 = vld [vmem:[%s24118_s3 + $0x20] sm:$0xff] }
 0x281   :  { %v16826_v35 = vpop.permute.xlu1 %16825  ;;  %v20728_v30 = vpop.permute.xlu0 %16845 }
 0x282   :  { %16860 = vrot.lane.b32.xlu1 %v20509_v21, %s17821_s15  ;;  %16905 = vrot.lane.b32.xlu0 %v20569_v59, %s17822_s16  ;;  %v16828_v42 = vunpack.i.h.bf16 %v16826_v35  ;;  %v16827_v23 = vunpack.i.l.bf16 %v16826_v35 }
 0x284   :  { %v15948_v12 = vpack.c.bf16 %v16828_v42, %v16827_v23 }
 0x285   :  { %v20740_v29 = vpop.permute.xlu0 %16855 }
 0x286   :  { %16870 = vrot.lane.b32.xlu1 %v20629_v58, %s17819_s5  ;;  %16915 = vrot.lane.b32.xlu0 %v20505_v28, %s17823_s17 }
 0x287   :  { %15949 = vmatprep.subr.bf16.mxu1 %v15948_v12 }
 0x288   :  { %15951 = vmatpush3.bf16.msra.mxu1 %v15948_v12 }
 0x289   :  { %v2642_v10 = vpop.f32.mrb[4].mxu0  ;;  %v20760_v40 = vpop.permute.xlu0 %16865 }
 0x28a   :  { %v2644_v11 = vpop.f32.mrb[5].mxu0  ;;  %16925 = vrot.lane.b32.xlu0 %v20569_v59, %s17823_s17 }
 0x28e   :  { %16940 = vrot.lane.b32.xlu0 %v20613_v9, %s17823_s17 }
 0x292   :  { %16945 = vrot.lane.b32.xlu0 %v20505_v28, %s17824_s18 }
 0x296   :  { %16955 = vrot.lane.b32.xlu0 %v20509_v21, %s17824_s18 }
 0x299   :  { %v2648_v26 = vpop.f32.mrb[6].mxu0 }
 0x29a   :  { %v2650_v16 = vpop.f32.mrb[7].mxu0  ;;  %v20657_v5 = vpack.i.bf16 %v2648_v26, %v2642_v10  ;;  %16965 = vrot.lane.b32.xlu0 %v20569_v59, %s17824_s18  ;;  %v20665_v22 = vpack.c.bf16 %v2648_v26, %v2642_v10 }
 0x29b   :  { %v20661_v52 = vpack.i.bf16 %v2650_v16, %v2644_v11  ;;  %v20669_v49 = vpack.c.bf16 %v2650_v16, %v2644_v11 }
 0x29c   :  { %16875 = vrot.lane.b32.xlu1 %v20657_v5, %s17819_s5 }
 0x29d   :  { %24189 = vst [vmem:[#allocation11_spill] sm:$0xff] %v20669_v49  ;;  %v20931_v49 = vld [vmem:[%s24118_s3 + $0x18] sm:$0xff] }
 0x29e   :  { %16980 = vrot.lane.b32.xlu0 %v20613_v9, %s17824_s18 }
 0x2a2   :  { %16985 = vrot.lane.b32.xlu0 %v20505_v28, %s17825_s21 }
 0x2a6   :  { %16995 = vrot.lane.b32.xlu0 %v20509_v21, %s17825_s21 }
 0x2aa   :  { %v2654_v24 = vpop.f32.mrb[8].mxu0  ;;  %17005 = vrot.lane.b32.xlu0 %v20569_v59, %s17825_s21 }
 0x2ab   :  { %v2656_v37 = vpop.f32.mrb[9].mxu0 }
 0x2ae   :  { %17015 = vrot.lane.b32.xlu0 %v20613_v9, %s17825_s21 }
 0x2b9   :  { %v2660_v50 = vpop.f32.mrb[10].mxu0 }
 0x2ba   :  { %v2662_v48 = vpop.f32.mrb[11].mxu0  ;;  %v20684_v61 = vpack.i.bf16 %v2660_v50, %v2654_v24  ;;  %v20692_v7 = vpack.c.bf16 %v2660_v50, %v2654_v24 }
 0x2bb   :  { %v20686_v28 = vpack.i.bf16 %v2662_v48, %v2656_v37  ;;  %v20694_v41 = vpack.c.bf16 %v2662_v48, %v2656_v37 }
 0x2bc   :  { %16890 = vrot.lane.b32.xlu1 %v20684_v61, %s17819_s5  ;;  %17025 = vrot.lane.b32.xlu0 %v20684_v61, %s17822_s16 }
 0x2bd   :  { %v2666_v44 = vpop.f32.mrb[12].mxu0  ;;  %24190 = vst [vmem:[#allocation12_spill] sm:$0xff] %v20694_v41 }
 0x2be   :  { %v2668_v55 = vpop.f32.mrb[13].mxu0 }
 0x2c0   :  { %17035 = vrot.lane.b32.xlu0 %v20629_v58, %s17823_s17 }
 0x2c1   :  { %v2672_v56 = vpop.f32.mrb[14].mxu0 }
 0x2c2   :  { %v20698_v51 = vpack.i.bf16 %v2672_v56, %v2666_v44  ;;  %v2674_v59 = vpop.f32.mrb[15].mxu0  ;;  %v20706_v60 = vpack.c.bf16 %v2672_v56, %v2666_v44 }
 0x2c3   :  { %v20700_v15 = vpack.i.bf16 %v2674_v59, %v2668_v55  ;;  %v20708_v18 = vpack.c.bf16 %v2674_v59, %v2668_v55 }
 0x2c4   :  { %16900 = vrot.lane.b32.xlu1 %v20698_v51, %s17819_s5  ;;  %17045 = vrot.lane.b32.xlu0 %v20581_v2, %s17819_s5 }
 0x2c5   :  { %24191 = vst [vmem:[#allocation13_spill] sm:$0xff] %v20708_v18 }
 0x2c8   :  { %16910 = vrot.lane.b32.xlu1 %v20613_v9, %s17822_s16  ;;  %17055 = vrot.lane.b32.xlu0 %v20597_v17, %s17819_s5 }
 0x2cc   :  { %16920 = vrot.lane.b32.xlu1 %v20509_v21, %s17823_s17  ;;  %17065 = vrot.lane.b32.xlu0 %v20605_v34, %s17819_s5  ;;  %v20734_v21 = vpop.f32.mrb[20].mxu1 }
 0x2cd   :  { %v7632_v9 = vpop.f32.mrb[21].mxu1 }
 0x2ce   :  { %v20742_v1 = vpop.f32.mrb[22].mxu1 }
 0x2cf   :  { %v7638_v6 = vpop.f32.mrb[23].mxu1  ;;  %v20746_v39 = vpack.i.bf16 %v20742_v1, %v20734_v21 }
 0x2d0   :  { %16930 = vrot.lane.b32.xlu1 %v20629_v58, %s17820_s30  ;;  %17080 = vrot.lane.b32.xlu0 %v20615_v8, %s17819_s5  ;;  %v20748_v57 = vpack.i.bf16 %v7638_v6, %v7632_v9  ;;  %v20750_v63 = vpack.c.bf16 %v7638_v6, %v7632_v9  ;;  %v20752_v14 = vpop.f32.mrb[24].mxu1 }
 0x2d1   :  { %v7644_v0 = vpop.f32.mrb[25].mxu1 }
 0x2d2   :  { %24192 = vst [vmem:[#allocation14_spill] sm:$0xff] %v20748_v57  ;;  %24193 = vst [vmem:[#allocation15_spill] sm:$0xff] %v20750_v63  ;;  %v20758_v10 = vpop.f32.mrb[26].mxu1  ;;  %v20885_v57 = vld [vmem:[%s24118_s3 + $0x78] sm:$0xff] }
 0x2d3   :  { %v7650_v3 = vpop.f32.mrb[27].mxu1  ;;  %v20764_v11 = vpack.i.bf16 %v20758_v10, %v20752_v14 }
 0x2d4   :  { %16935 = vrot.lane.b32.xlu1 %v20657_v5, %s17820_s30  ;;  %17085 = vrot.lane.b32.xlu0 %v20581_v2, %s17820_s30  ;;  %v20766_v46 = vpack.i.bf16 %v7650_v3, %v7644_v0  ;;  %v20768_v35 = vpack.c.bf16 %v7650_v3, %v7644_v0  ;;  %v20770_v42 = vpop.f32.mrb[28].mxu1 }
 0x2d5   :  { %v7656_v23 = vpop.f32.mrb[29].mxu1 }
 0x2d6   :  { %24194 = vst [vmem:[#allocation16_spill] sm:$0xff] %v20766_v46  ;;  %24195 = vst [vmem:[#allocation17_spill] sm:$0xff] %v20768_v35  ;;  %v20776_v12 = vpop.f32.mrb[30].mxu1  ;;  %v20867_v35 = vld [vmem:[%s24118_s3 + $0x70] sm:$0xff] }
 0x2d7   :  { %v7662_v26 = vpop.f32.mrb[31].mxu1  ;;  %v20780_v16 = vpack.i.bf16 %v20776_v12, %v20770_v42 }
 0x2d8   :  { %16950 = vrot.lane.b32.xlu1 %v20684_v61, %s17820_s30  ;;  %17095 = vrot.lane.b32.xlu0 %v20597_v17, %s17820_s30  ;;  %v20782_v4 = vpack.i.bf16 %v7662_v26, %v7656_v23  ;;  %v20784_v24 = vpack.c.bf16 %v7662_v26, %v7656_v23  ;;  %v20786_v37 = vpop.f32.mrb[32].mxu1  ;;  %v20813_v23 = vld [vmem:[%s24118_s3 + $0x48] sm:$0xff]  ;;  %v20819_v26 = vld [vmem:[%s24118_s3 + $0x50] sm:$0xff] }
 0x2d9   :  { %v20794_v56 = vpop.f32.mrb[33].mxu1 }
 0x2da   :  { %24196 = vst [vmem:[#allocation18_spill] sm:$0xff] %v20782_v4  ;;  %24197 = vst [vmem:[#allocation19_spill] sm:$0xff] %v20784_v24  ;;  %v20796_v59 = vpop.f32.mrb[34].mxu1  ;;  %v20861_v24 = vld [vmem:[%s24118_s3 + $0x68] sm:$0xff] }
 0x2db   :  { %v20800_v6 = vpack.i.bf16 %v20796_v59, %v20786_v37 }
 0x2dc   :  { %16960 = vrot.lane.b32.xlu1 %v20698_v51, %s17820_s30  ;;  %17105 = vrot.lane.b32.xlu0 %v20605_v34, %s17820_s30 }
 0x2e0   :  { %16970 = vrot.lane.b32.xlu1 %v20629_v58, %s17821_s15  ;;  %17120 = vrot.lane.b32.xlu0 %v20615_v8, %s17820_s30 }
 0x2e4   :  { %16975 = vrot.lane.b32.xlu1 %v20657_v5, %s17821_s15  ;;  %17125 = vrot.lane.b32.xlu0 %v20581_v2, %s17821_s15 }
 0x2e8   :  { %16990 = vrot.lane.b32.xlu1 %v20684_v61, %s17821_s15  ;;  %17135 = vrot.lane.b32.xlu0 %v20597_v17, %s17821_s15  ;;  %v16831_v50 = vpop.permute.xlu1 %16830  ;;  %v20792_v48 = vpop.permute.xlu0 %16880 }
 0x2e9   :  { %v16833_v44 = vunpack.i.h.bf16 %v16831_v50  ;;  %v16832_v55 = vunpack.i.l.bf16 %v16831_v50 }
 0x2eb   :  { %v15952_v9 = vpack.c.bf16 %v16833_v44, %v16832_v55  ;;  %v20837_v55 = vld [vmem:[%s24118_s3 + $0x58] sm:$0xff] }
 0x2ec   :  { %17000 = vrot.lane.b32.xlu1 %v20698_v51, %s17821_s15  ;;  %17145 = vrot.lane.b32.xlu0 %v20605_v34, %s17821_s15  ;;  %v20806_v0 = vpop.permute.xlu1 %16840  ;;  %v20808_v3 = vpop.permute.xlu0 %16885 }
 0x2ed   :  { %15953 = vmatprep.subr.bf16.mxu1 %v15952_v9  ;;  %v16842_v41 = vunpack.i.l.bf16 %v20806_v0 }
 0x2ee   :  { %15955 = vmatpush3.bf16.msra.mxu1 %v15952_v9  ;;  %v20843_v9 = vld [vmem:[%s24118_s3 + $0x60] sm:$0xff] }
 0x2ef   :  { %15957 = vmatprep.subr.bf16.mxu1 %v20573_v27 }
 0x2f0   :  { %17010 = vrot.lane.b32.xlu1 %v20629_v58, %s17822_s16  ;;  %17155 = vrot.lane.b32.xlu0 %v20581_v2, %s17822_s16  ;;  %v20825_v50 = vpop.permute.xlu1 %16850  ;;  %v20827_v44 = vpop.permute.xlu0 %16895 }
 0x2f1   :  { %14747 = vmatmul.mubr.msk.f32.vlgmr.msra.gmra.mrb[36].mxu1 %vm2839_vm10, %v20813_v23 }
 0x2f2   :  { %15959 = vmatpush3.bf16.msra.mxu1 %v20573_v27  ;;  %14749 = vmatprep.mubr.msk.f32.mxu1 %vm2839_vm10, %v20819_v26 }
 0x2f3   :  { %15961 = vmatprep.subr.bf16.mxu1 %v20591_v43 }
 0x2f4   :  { %17020 = vrot.lane.b32.xlu1 %v20657_v5, %s17822_s16  ;;  %17165 = vrot.lane.b32.xlu0 %v20605_v34, %s17822_s16  ;;  %v20849_v27 = vpop.permute.xlu1 %16860  ;;  %v20851_v19 = vpop.permute.xlu0 %16905 }
 0x2f5   :  { %14750 = vmatmul.mubr.msk.f32.gmra.mrb[38].mxu1 %vm2839_vm10, %v20837_v55 }
 0x2f6   :  { %15963 = vmatpush3.bf16.msra.mxu1 %v20591_v43  ;;  %14752 = vmatprep.mubr.msk.f32.mxu1 %vm2839_vm10, %v20843_v9 }
 0x2f7   :  { %15965 = vmatprep.subr.bf16.mxu1 %v20603_v25 }
 0x2f8   :  { %17030 = vrot.lane.b32.xlu1 %v20698_v51, %s17822_s16  ;;  %17180 = vrot.lane.b32.xlu0 %v20615_v8, %s17822_s16  ;;  %v16871_v43 = vpop.permute.xlu1 %16870  ;;  %v20873_v63 = vpop.permute.xlu0 %16915 }
 0x2f9   :  { %v16873_v4 = vunpack.i.h.bf16 %v16871_v43  ;;  %v16872_v46 = vunpack.i.l.bf16 %v16871_v43  ;;  %14753 = vmatmul.mubr.msk.f32.gmra.mrb[40].mxu1 %vm2839_vm10, %v20861_v24  ;;  %v16843_v43 = vunpack.i.h.bf16 %v20806_v0  ;;  %v20914_v0 = vld [vmem:[%s24118_s3 + $0x10] sm:$0xff] }
 0x2fa   :  { %15967 = vmatpush3.bf16.msra.mxu1 %v20603_v25  ;;  %14755 = vmatprep.mubr.msk.f32.mxu1 %vm2839_vm10, %v20867_v35  ;;  %v20897_v25 = vld [vmem:[%s24118_s3] sm:$0xff] }
 0x2fb   :  { %15969 = vmatprep.subr.bf16.mxu1 %v20621_v45  ;;  %v15508_v18 = vpack.c.bf16 %v16873_v4, %v16872_v46  ;;  %v15972_v46 = vpack.c.bf16 %v16838_v62, %v16837_v13  ;;  %v20907_v4 = vld [vmem:[%s24118_s3 + $0x8] sm:$0xff]  ;;  %v16848_v62 = vunpack.i.h.bf16 %v20728_v30 }
 0x2fc   :  { %17040 = vrot.lane.b32.xlu1 %v20657_v5, %s17823_s17  ;;  %17185 = vrot.lane.b32.xlu0 %v20581_v2, %s17823_s17  ;;  %v20892_v36 = vpop.permute.xlu0 %16925 }
 0x2fd   :  { %15509 = vmatprep.subr.bf16.mxu0 %v15508_v18  ;;  %14756 = vmatmul.mubr.msk.f32.gmra.mrb[42].mxu1 %vm2839_vm10, %v20885_v57 }
 0x2fe   :  { %15511 = vmatpush3.bf16.msra.mxu0 %v15508_v18  ;;  %15971 = vmatpush3.bf16.msra.mxu1 %v20621_v45  ;;  %v16847_v45 = vunpack.i.l.bf16 %v20728_v30  ;;  %v15976_v18 = vpack.c.bf16 %v16843_v43, %v16842_v41  ;;  %v16853_v30 = vunpack.i.h.bf16 %v20825_v50  ;;  %v16852_v43 = vunpack.i.l.bf16 %v20825_v50 }
 0x2ff   :  { %15973 = vmatprep.subr.bf16.mxu1 %v15972_v46  ;;  %14774 = vmatprep.mubr.msk.f32.mxu1 %vm2839_vm10, %v20897_v25 }
 0x300   :  { %17050 = vrot.lane.b32.xlu1 %v20684_v61, %s17823_s17  ;;  %17195 = vrot.lane.b32.xlu0 %v20597_v17, %s17823_s17  ;;  %v20920_v13 = vpop.permute.xlu0 %16940 }
 0x301   :  { %14775 = vmatmul.mubr.msk.f32.vlgmr.msra.gmra.mrb[36].mxu1 %vm2839_vm10, %v20907_v4 }
 0x302   :  { %15975 = vmatpush3.bf16.msra.mxu1 %v15972_v46  ;;  %14777 = vmatprep.mubr.msk.f32.mxu1 %vm2839_vm10, %v20914_v0  ;;  %v15980_v46 = vpack.c.bf16 %v16848_v62, %v16847_v45  ;;  %v16858_v62 = vunpack.i.h.bf16 %v20740_v29  ;;  %v16857_v45 = vunpack.i.l.bf16 %v20740_v29  ;;  %v16863_v29 = vunpack.i.h.bf16 %v20849_v27 }
 0x303   :  { %15977 = vmatprep.subr.bf16.mxu1 %v15976_v18 }
 0x304   :  { %17060 = vrot.lane.b32.xlu1 %v20698_v51, %s17823_s17  ;;  %17205 = vrot.lane.b32.xlu0 %v20605_v34, %s17823_s17  ;;  %v20942_v41 = vpop.permute.xlu0 %16945 }
 0x305   :  { %14778 = vmatmul.mubr.msk.f32.gmra.mrb[38].mxu1 %vm2839_vm10, %v20931_v49 }
 0x306   :  { %15979 = vmatpush3.bf16.msra.mxu1 %v15976_v18  ;;  %14780 = vmatprep.mubr.msk.f32.mxu1 %vm2839_vm10, %v20936_v47  ;;  %v15984_v18 = vpack.c.bf16 %v16853_v30, %v16852_v43  ;;  %v16862_v30 = vunpack.i.l.bf16 %v20849_v27  ;;  %v15988_v43 = vpack.c.bf16 %v16858_v62, %v16857_v45  ;;  %v21002_v27 = vld [vmem:[%s24118_s3 + $0x90] sm:$0xff]  ;;  %v16868_v62 = vunpack.i.h.bf16 %v20760_v40 }
 0x307   :  { %15981 = vmatprep.subr.bf16.mxu1 %v15980_v46  ;;  %v16867_v45 = vunpack.i.l.bf16 %v20760_v40  ;;  %v16882_v40 = vunpack.i.l.bf16 %v20792_v48 }
 0x308   :  { %17070 = vrot.lane.b32.xlu1 %v20629_v58, %s17824_s18  ;;  %17220 = vrot.lane.b32.xlu0 %v20615_v8, %s17823_s17  ;;  %v20964_v50 = vpop.permute.xlu0 %16955 }
 0x309   :  { %24200 = vst [vmem:[#allocation22_spill] sm:$0xff] %v20964_v50  ;;  %14781 = vmatmul.mubr.msk.f32.gmra.mrb[40].mxu1 %vm2839_vm10, %v20953_v32  ;;  %v20997_v50 = vld [vmem:[%s24118_s3 + $0x88] sm:$0xff] }
 0x30a   :  { %15983 = vmatpush3.bf16.msra.mxu1 %v15980_v46  ;;  %14783 = vmatprep.mubr.msk.f32.mxu1 %vm2839_vm10, %v20958_v38 }
 0x30b   :  { %15985 = vmatprep.subr.bf16.mxu1 %v15984_v18 }
 0x30c   :  { %17075 = vrot.lane.b32.xlu1 %v20657_v5, %s17824_s18  ;;  %17225 = vrot.lane.b32.xlu0 %v20581_v2, %s17824_s18  ;;  %v20990_v46 = vpop.permute.xlu0 %16965 }
 0x30d   :  { %14784 = vmatmul.mubr.msk.f32.gmra.mrb[42].mxu1 %vm2839_vm10, %v20975_v53  ;;  %24202 = vst [vmem:[#allocation24_spill] sm:$0xff] %v20990_v46  ;;  %v21017_v46 = vld [vmem:[%s24118_s3 + $0x98] sm:$0xff] }
 0x30e   :  { %v16876_v31 = vpop.permute.xlu1 %16875  ;;  %15987 = vmatpush3.bf16.msra.mxu1 %v15984_v18  ;;  %14802 = vmatprep.mubr.msk.f32.mxu1 %vm2839_vm10, %v20980_v20 }
 0x30f   :  { %v16878_v38 = vunpack.i.h.bf16 %v16876_v31  ;;  %v16877_v32 = vunpack.i.l.bf16 %v16876_v31  ;;  %15989 = vmatprep.subr.bf16.mxu1 %v15988_v43  ;;  %v15992_v31 = vpack.c.bf16 %v16863_v29, %v16862_v30  ;;  %v15996_v29 = vpack.c.bf16 %v16868_v62, %v16867_v45  ;;  %v21039_v30 = vld [vmem:[%s24118_s3 + $0xa8] sm:$0xff] }
 0x310   :  { %17090 = vrot.lane.b32.xlu1 %v20684_v61, %s17824_s18  ;;  %17235 = vrot.lane.b32.xlu0 %v20597_v17, %s17824_s18  ;;  %v21019_v20 = vpop.permute.xlu0 %16980  ;;  %v16887_v62 = vunpack.i.l.bf16 %v20808_v3 }
 0x311   :  { %v15512_v18 = vpack.c.bf16 %v16878_v38, %v16877_v32  ;;  %14803 = vmatmul.mubr.msk.f32.vlgmr.msra.gmra.mrb[36].mxu1 %vm2839_vm10, %v20997_v50  ;;  %v21024_v32 = vld [vmem:[%s24118_s3 + $0xa0] sm:$0xff]  ;;  %v16883_v38 = vunpack.i.h.bf16 %v20792_v48  ;;  %v21044_v48 = vld [vmem:[%s24118_s3 + $0xb0] sm:$0xff] }
 0x312   :  { %15991 = vmatpush3.bf16.msra.mxu1 %v15988_v43  ;;  %14805 = vmatprep.mubr.msk.f32.mxu1 %vm2839_vm10, %v21002_v27  ;;  %24203 = vst [vmem:[#allocation25_spill] sm:$0xff] %v21044_v48  ;;  %v16888_v43 = vunpack.i.h.bf16 %v20808_v3  ;;  %v21066_v3 = vld [vmem:[%s24118_s3 + $0xc0] sm:$0xff] }
 0x313   :  { %15513 = vmatprep.subr.bf16.mxu0 %v15512_v18  ;;  %15993 = vmatprep.subr.bf16.mxu1 %v15992_v31  ;;  %24206 = vst [vmem:[#allocation28_spill] sm:$0xff] %v21066_v3 }
 0x314   :  { %17100 = vrot.lane.b32.xlu1 %v20698_v51, %s17824_s18  ;;  %15515 = vmatpush3.bf16.msra.mxu0 %v15512_v18  ;;  %v21052_v45 = vpop.permute.xlu0 %16985  ;;  %v16000_v18 = vpack.c.bf16 %v16883_v38, %v16882_v40  ;;  %v16898_v38 = vunpack.i.h.bf16 %v20827_v44  ;;  %v16897_v40 = vunpack.i.l.bf16 %v20827_v44 }
 0x315   :  { %17245 = vrot.lane.b32.xlu0 %v20605_v34, %s17824_s18  ;;  %14806 = vmatmul.mubr.msk.f32.gmra.mrb[38].mxu1 %vm2839_vm10, %v21017_v46  ;;  %24204 = vst [vmem:[#allocation26_spill] sm:$0xff] %v21052_v45  ;;  %v21083_v45 = vld [vmem:[%s24118_s3 + $0xc8] sm:$0xff] }
 0x316   :  { %15995 = vmatpush3.bf16.msra.mxu1 %v15992_v31  ;;  %14808 = vmatprep.mubr.msk.f32.mxu1 %vm2839_vm10, %v21024_v32  ;;  %v21068_v31 = vpop.f32.mrb[16].mxu0 }
 0x317   :  { %15997 = vmatprep.subr.bf16.mxu1 %v15996_v29  ;;  %24207 = vst [vmem:[#allocation29_spill] sm:$0xff] %v21068_v31 }
 0x318   :  { %17110 = vrot.lane.b32.xlu1 %v20629_v58, %s17825_s21  ;;  %v21061_v58 = vld [vmem:[%s24118_s3 + $0xb8] sm:$0xff] }
 0x319   :  { %17260 = vrot.lane.b32.xlu0 %v20615_v8, %s17824_s18  ;;  %14809 = vmatmul.mubr.msk.f32.gmra.mrb[40].mxu1 %vm2839_vm10, %v21039_v30  ;;  %24205 = vst [vmem:[#allocation27_spill] sm:$0xff] %v21061_v58 }
 0x31a   :  { %15999 = vmatpush3.bf16.msra.mxu1 %v15996_v29  ;;  %14811 = vmatprep.mubr.msk.f32.mxu1 %vm2839_vm10, %v21044_v48  ;;  %v16004_v29 = vpack.c.bf16 %v16888_v43, %v16887_v62  ;;  %v21085_v48 = vpop.permute.xlu0 %16995  ;;  %v16008_v43 = vpack.c.bf16 %v16898_v38, %v16897_v40  ;;  %v21122_v40 = vld [vmem:[%s24118_s3 + $0xe0] sm:$0xff] }
 0x31b   :  { %16001 = vmatprep.subr.bf16.mxu1 %v16000_v18  ;;  %24208 = vst [vmem:[#allocation30_spill] sm:$0xff] %v21085_v48 }
 0x31c   :  { %17115 = vrot.lane.b32.xlu1 %v20657_v5, %s17825_s21  ;;  %v2745_v5 = vpop.f32.mrb[17].mxu0 }
 0x31d   :  { %17265 = vrot.lane.b32.xlu0 %v20581_v2, %s17825_s21  ;;  %14812 = vmatmul.mubr.msk.f32.gmra.mrb[42].mxu1 %vm2839_vm10, %v21061_v58  ;;  %v21090_v2 = vld [vmem:[%s24118_s3 + $0xd0] sm:$0xff]  ;;  %v21092_v44 = vpop.f32.mrb[18].mxu0 }
 0x31e   :  { %16003 = vmatpush3.bf16.msra.mxu1 %v16000_v18  ;;  %14830 = vmatprep.mubr.msk.f32.mxu1 %vm2839_vm10, %v21066_v3  ;;  %24209 = vst [vmem:[#allocation31_spill] sm:$0xff] %v21092_v44  ;;  %v2751_v62 = vpop.f32.mrb[19].mxu0  ;;  %v16908_v18 = vunpack.i.h.bf16 %v20851_v19  ;;  %v16907_v3 = vunpack.i.l.bf16 %v20851_v19  ;;  %v21117_v38 = vpack.i.bf16 %v21092_v44, %v21068_v31 }
 0x31f   :  { %16005 = vmatprep.subr.bf16.mxu1 %v16004_v29  ;;  %v21102_v48 = vpack.i.bf16 %v2751_v62, %v2745_v5  ;;  %v21104_v58 = vpop.f32.mrb[20].mxu0  ;;  %v21113_v19 = vpack.c.bf16 %v2751_v62, %v2745_v5  ;;  %v21130_v5 = vpop.permute.xlu0 %17005 }
 0x320   :  { %17130 = vrot.lane.b32.xlu1 %v20684_v61, %s17825_s21  ;;  %24211 = vst [vmem:[#allocation33_spill] sm:$0xff] %v21104_v58  ;;  %v21111_v61 = vld [vmem:[%s24118_s3 + $0xd8] sm:$0xff]  ;;  %24213 = vst [vmem:[#allocation35_spill] sm:$0xff] %v21117_v38  ;;  %v16012_v62 = vpack.c.bf16 %v16908_v18, %v16907_v3  ;;  %v21150_v3 = vld [vmem:[%s24118_s3 + $0xf0] sm:$0xff] }
 0x321   :  { %17275 = vrot.lane.b32.xlu0 %v20597_v17, %s17825_s21  ;;  %14831 = vmatmul.mubr.msk.f32.vlgmr.msra.gmra.mrb[36].mxu1 %vm2839_vm10, %v21083_v45  ;;  %24210 = vst [vmem:[#allocation32_spill] sm:$0xff] %v21102_v48  ;;  %24212 = vst [vmem:[#allocation34_spill] sm:$0xff] %v21113_v19 }
 0x322   :  { %16007 = vmatpush3.bf16.msra.mxu1 %v16004_v29  ;;  %14833 = vmatprep.mubr.msk.f32.mxu1 %vm2839_vm10, %v21090_v2  ;;  %v2757_v29 = vpop.f32.mrb[21].mxu0 }
 0x323   :  { %16009 = vmatprep.subr.bf16.mxu1 %v16008_v43  ;;  %v21126_v48 = vpop.f32.mrb[22].mxu0 }
 0x324   :  { %17140 = vrot.lane.b32.xlu1 %v20698_v51, %s17825_s21  ;;  %24214 = vst [vmem:[#allocation36_spill] sm:$0xff] %v21126_v48  ;;  %v2763_v19 = vpop.f32.mrb[23].mxu0  ;;  %v21139_v51 = vld [vmem:[%s24118_s3 + $0xe8] sm:$0xff] }
 0x325   :  { %17285 = vrot.lane.b32.xlu0 %v20605_v34, %s17825_s21  ;;  %14834 = vmatmul.mubr.msk.f32.gmra.mrb[38].mxu1 %vm2839_vm10, %v21111_v61  ;;  %v21141_v44 = vpack.i.bf16 %v2763_v19, %v2757_v29  ;;  %v21143_v31 = vpack.c.bf16 %v2763_v19, %v2757_v29  ;;  %v21145_v34 = vpop.f32.mrb[24].mxu0  ;;  %v21171_v29 = vld [vmem:[%s24118_s3 + $0xf8] sm:$0xff] }
 0x326   :  { %16011 = vmatpush3.bf16.msra.mxu1 %v16008_v43  ;;  %14836 = vmatprep.mubr.msk.f32.mxu1 %vm2839_vm10, %v21122_v40  ;;  %24217 = vst [vmem:[#allocation39_spill] sm:$0xff] %v21145_v34  ;;  %v21154_v43 = vpack.i.bf16 %v21126_v48, %v21104_v58  ;;  %v21158_v18 = vpop.f32.mrb[25].mxu0 }
 0x327   :  { %24215 = vst [vmem:[#allocation37_spill] sm:$0xff] %v21141_v44  ;;  %24216 = vst [vmem:[#allocation38_spill] sm:$0xff] %v21143_v31  ;;  %16013 = vmatprep.subr.bf16.mxu1 %v16012_v62  ;;  %v21164_v19 = vpop.f32.mrb[26].mxu0  ;;  %v21173_v31 = vpop.permute.xlu0 %17015 }
 0x328   :  { %24218 = vst [vmem:[#allocation40_spill] sm:$0xff] %v21154_v43  ;;  %17150 = vrot.lane.b32.xlu1 %v20615_v8, %s17821_s15  ;;  %24219 = vst [vmem:[#allocation41_spill] sm:$0xff] %v21158_v18  ;;  %v21182_v44 = vpack.i.bf16 %v21164_v19, %v21145_v34 }
 0x329   :  { %17295 = vrot.lane.b32.xlu0 %v20615_v8, %s17825_s21  ;;  %14837 = vmatmul.mubr.msk.f32.gmra.mrb[40].mxu1 %vm2839_vm10, %v21139_v51  ;;  %24220 = vst [vmem:[#allocation42_spill] sm:$0xff] %v21164_v19  ;;  %24221 = vst [vmem:[#allocation43_spill] sm:$0xff] %v21173_v31  ;;  %v21178_v8 = vld [vmem:[%s24118_s3 + $0x100] sm:$0xff] }
 0x32a   :  { %16015 = vmatpush3.bf16.msra.mxu1 %v16012_v62  ;;  %14839 = vmatprep.mubr.msk.f32.mxu1 %vm2839_vm10, %v21150_v3  ;;  %24222 = vst [vmem:[#allocation44_spill] sm:$0xff] %v21178_v8  ;;  %24223 = vst [vmem:[#allocation45_spill] sm:$0xff] %v21182_v44 }
 0x32c   :  { %17160 = vrot.lane.b32.xlu1 %v20597_v17, %s17822_s16 }
 0x32d   :  { %17305 = vrot.lane.b32.xlu0 %v20686_v28, %s17822_s16  ;;  %14840 = vmatmul.mubr.msk.f32.gmra.mrb[42].mxu1 %vm2839_vm10, %v21171_v29 }
 0x32e   :  { %v16891_v62 = vpop.permute.xlu1 %16890  ;;  %14858 = vmatprep.mubr.msk.f32.mxu1 %vm2839_vm10, %v21178_v8  ;;  %v21194_v34 = vpop.permute.xlu0 %17025 }
 0x32f   :  { %v16893_v48 = vunpack.i.h.bf16 %v16891_v62  ;;  %v16892_v58 = vunpack.i.l.bf16 %v16891_v62 }
 0x330   :  { %17170 = vrot.lane.b32.xlu1 %v20631_v54, %s17819_s5 }
 0x331   :  { %v15516_v19 = vpack.c.bf16 %v16893_v48, %v16892_v58  ;;  %17315 = vrot.lane.b32.xlu0 %v20631_v54, %s17823_s17  ;;  %v7674_v58 = vpop.f32.mrb[35].mxu1 }
 0x332   :  { %v21202_v18 = vpop.permute.xlu0 %17035  ;;  %v21209_v38 = vpack.i.bf16 %v7674_v58, %v20794_v56 }
 0x333   :  { %15517 = vmatprep.subr.bf16.mxu0 %v15516_v19 }
 0x334   :  { %17175 = vrot.lane.b32.xlu1 %v20661_v52, %s17819_s5  ;;  %15519 = vmatpush3.bf16.msra.mxu0 %v15516_v19  ;;  %24224 = vst [vmem:[#allocation46_spill] sm:$0xff] %v21209_v38  ;;  %v21212_v19 = vpack.c.bf16 %v7674_v58, %v20794_v56 }
 0x335   :  { %17345 = vrot.lane.b32.xlu0 %v20746_v39, %s17819_s5 }
 0x336   :  { %v16901_v17 = vpop.permute.xlu1 %16900  ;;  %24225 = vst [vmem:[#allocation47_spill] sm:$0xff] %v21212_v19  ;;  %v21223_v56 = vpop.permute.xlu0 %17045  ;;  %v21944_v19 = vld [vmem:[%s24118_s3 + $0x260] sm:$0xff] }
 0x337   :  { %v16903_v44 = vunpack.i.h.bf16 %v16901_v17  ;;  %v16902_v62 = vunpack.i.l.bf16 %v16901_v17  ;;  %v16918_v17 = vunpack.i.h.bf16 %v20873_v63 }
 0x338   :  { %17190 = vrot.lane.b32.xlu1 %v20686_v28, %s17819_s5 }
 0x339   :  { %v15520_v48 = vpack.c.bf16 %v16903_v44, %v16902_v62  ;;  %17350 = vrot.lane.b32.xlu0 %v20764_v11, %s17819_s5  ;;  %v21218_v44 = vpack.c.bf16 %v20742_v1, %v20734_v21  ;;  %v16917_v62 = vunpack.i.l.bf16 %v20873_v63 }
 0x33a   :  { %v16911_v43 = vpop.permute.xlu1 %16910  ;;  %v21244_v63 = vpop.permute.xlu0 %17055 }
 0x33b   :  { %v16913_v31 = vunpack.i.h.bf16 %v16911_v43  ;;  %v16912_v8 = vunpack.i.l.bf16 %v16911_v43  ;;  %15521 = vmatprep.subr.bf16.mxu0 %v15520_v48  ;;  %v16020_v21 = vpack.c.bf16 %v16918_v17, %v16917_v62 }
 0x33c   :  { %15523 = vmatpush3.bf16.msra.mxu0 %v15520_v48  ;;  %17200 = vrot.lane.b32.xlu1 %v20700_v15, %s17819_s5 }
 0x33d   :  { %15525 = vmatprep.subr.bf16.mxu0 %v20633_v33  ;;  %v16016_v38 = vpack.c.bf16 %v16913_v31, %v16912_v8  ;;  %17355 = vrot.lane.b32.xlu0 %v20780_v16, %s17819_s5  ;;  %v16928_v8 = vunpack.i.h.bf16 %v20892_v36 }
 0x33e   :  { %v16921_v43 = vpop.permute.xlu1 %16920  ;;  %v21280_v48 = vpop.permute.xlu0 %17065 }
 0x33f   :  { %13991 = vmatmul.mubr.msk.f32.vlgmr.msra.gmra.mrb[28].mxu0 %vm2839_vm10, %v20813_v23  ;;  %16017 = vmatprep.subr.bf16.mxu1 %v16016_v38  ;;  %v16923_v23 = vunpack.i.h.bf16 %v16921_v43  ;;  %v16922_v31 = vunpack.i.l.bf16 %v16921_v43 }
 0x340   :  { %15527 = vmatpush3.bf16.msra.mxu0 %v20633_v33  ;;  %17210 = vrot.lane.b32.xlu1 %v20631_v54, %s17820_s30  ;;  %v21242_v33 = vld [vmem:[%s24118_s3 + $0x108] sm:$0xff] }
 0x341   :  { %15529 = vmatprep.subr.bf16.mxu0 %v20665_v22  ;;  %13993 = vmatprep.mubr.msk.f32.mxu0 %vm2839_vm10, %v20819_v26  ;;  %v21251_v26 = vpack.c.bf16 %v20758_v10, %v20752_v14  ;;  %v21265_v14 = vld [vmem:[%s24118_s3 + $0x110] sm:$0xff]  ;;  %v16024_v10 = vpack.c.bf16 %v16923_v23, %v16922_v31  ;;  %v16942_v23 = vunpack.i.l.bf16 %v20920_v13 }
 0x342   :  { %v16931_v1 = vpop.permute.xlu1 %16930  ;;  %16019 = vmatpush3.bf16.msra.mxu1 %v16016_v38  ;;  %17360 = vrot.lane.b32.xlu0 %v20800_v6, %s17819_s5 }
 0x343   :  { %13994 = vmatmul.mubr.msk.f32.gmra.mrb[30].mxu0 %vm2839_vm10, %v20837_v55  ;;  %16021 = vmatprep.subr.bf16.mxu1 %v16020_v21  ;;  %v16932_v38 = vunpack.i.l.bf16 %v16931_v1 }
 0x344   :  { %15531 = vmatpush3.bf16.msra.mxu0 %v20665_v22  ;;  %17215 = vrot.lane.b32.xlu1 %v20661_v52, %s17820_s30  ;;  %v16933_v22 = vunpack.i.h.bf16 %v16931_v1 }
 0x345   :  { %15533 = vmatprep.subr.bf16.mxu0 %v20692_v7  ;;  %13996 = vmatprep.mubr.msk.f32.mxu0 %vm2839_vm10, %v20843_v9  ;;  %v21273_v9 = vld [vmem:[%s24118_s3 + $0x118] sm:$0xff] }
 0x346   :  { %v16936_v55 = vpop.permute.xlu1 %16935  ;;  %14859 = vmatmul.mubr.msk.f32.vlgmr.msra.gmra.mrb[36].mxu1 %vm2839_vm10, %v21242_v33  ;;  %17365 = vrot.lane.b32.xlu0 %v20746_v39, %s17820_s30  ;;  %v15540_v62 = vpack.c.bf16 %v16933_v22, %v16932_v38  ;;  %v21328_v22 = vld [vmem:[%s24118_s3 + $0x130] sm:$0xff]  ;;  %v21335_v38 = vld [vmem:[%s24118_s3 + $0x138] sm:$0xff] }
 0x347   :  { %13997 = vmatmul.mubr.msk.f32.gmra.mrb[32].mxu0 %vm2839_vm10, %v20861_v24  ;;  %16023 = vmatpush3.bf16.msra.mxu1 %v16020_v21  ;;  %v16927_v24 = vunpack.i.l.bf16 %v20892_v36  ;;  %v16938_v58 = vunpack.i.h.bf16 %v16936_v55  ;;  %v16937_v17 = vunpack.i.l.bf16 %v16936_v55  ;;  %v21298_v36 = vpack.c.bf16 %v20776_v12, %v20770_v42  ;;  %v21309_v42 = vld [vmem:[%s24118_s3 + $0x128] sm:$0xff]  ;;  %v21311_v12 = vpop.permute.xlu0 %17080 }
 0x348   :  { %15535 = vmatpush3.bf16.msra.mxu0 %v20692_v7  ;;  %17230 = vrot.lane.b32.xlu1 %v20686_v28, %s17820_s30 }
 0x349   :  { %15537 = vmatprep.subr.bf16.mxu0 %v20706_v60  ;;  %13999 = vmatprep.mubr.msk.f32.mxu0 %vm2839_vm10, %v20867_v35  ;;  %v21291_v35 = vld [vmem:[%s24118_s3 + $0x120] sm:$0xff] }
 0x34a   :  { %v16951_v7 = vpop.permute.xlu1 %16950  ;;  %16025 = vmatprep.subr.bf16.mxu1 %v16024_v10  ;;  %14861 = vmatprep.mubr.msk.f32.mxu1 %vm2839_vm10, %v21265_v14 }
 0x34b   :  { %14000 = vmatmul.mubr.msk.f32.gmra.mrb[34].mxu0 %vm2839_vm10, %v20885_v57  ;;  %14862 = vmatmul.mubr.msk.f32.gmra.mrb[38].mxu1 %vm2839_vm10, %v21273_v9  ;;  %v16028_v57 = vpack.c.bf16 %v16928_v8, %v16927_v24  ;;  %v16953_v21 = vunpack.i.h.bf16 %v16951_v7  ;;  %v16952_v1 = vunpack.i.l.bf16 %v16951_v7  ;;  %v16947_v8 = vunpack.i.l.bf16 %v20942_v41  ;;  %v21345_v24 = vpop.permute.xlu0 %17085 }
 0x34c   :  { %15539 = vmatpush3.bf16.msra.mxu0 %v20706_v60  ;;  %17240 = vrot.lane.b32.xlu1 %v20700_v15, %s17820_s30  ;;  %v15544_v60 = vpack.c.bf16 %v16938_v58, %v16937_v17 }
 0x34d   :  { %15541 = vmatprep.subr.bf16.mxu0 %v15540_v62  ;;  %14018 = vmatprep.mubr.msk.f32.mxu0 %vm2839_vm10, %v20897_v25  ;;  %v16943_v25 = vunpack.i.h.bf16 %v20920_v13  ;;  %v15548_v13 = vpack.c.bf16 %v16953_v21, %v16952_v1 }
 0x34e   :  { %v16961_v43 = vpop.permute.xlu1 %16960  ;;  %16027 = vmatpush3.bf16.msra.mxu1 %v16024_v10  ;;  %14864 = vmatprep.mubr.msk.f32.mxu1 %vm2839_vm10, %v21291_v35  ;;  %v16948_v10 = vunpack.i.h.bf16 %v20942_v41 }
 0x34f   :  { %14019 = vmatmul.mubr.msk.f32.vlgmr.msra.gmra.mrb[28].mxu0 %vm2839_vm10, %v20907_v4  ;;  %16029 = vmatprep.subr.bf16.mxu1 %v16028_v57  ;;  %v16963_v31 = vunpack.i.h.bf16 %v16961_v43  ;;  %v16962_v55 = vunpack.i.l.bf16 %v16961_v43 }
 0x350   :  { %15543 = vmatpush3.bf16.msra.mxu0 %v15540_v62  ;;  %17250 = vrot.lane.b32.xlu1 %v20631_v54, %s17821_s15  ;;  %v24226_v62 = vld [vmem:[#allocation20_spill] sm:$0xff]  ;;  %v16036_v41 = vpack.c.bf16 %v16948_v10, %v16947_v8 }
 0x351   :  { %15545 = vmatprep.subr.bf16.mxu0 %v15544_v60  ;;  %14021 = vmatprep.mubr.msk.f32.mxu0 %vm2839_vm10, %v20914_v0  ;;  %v16032_v0 = vpack.c.bf16 %v16943_v25, %v16942_v23  ;;  %v21371_v25 = vpop.permute.xlu0 %17095  ;;  %v24228_v23 = vld [vmem:[#allocation22_spill] sm:$0xff]  ;;  %v21388_v8 = vld [vmem:[%s24118_s3 + $0x150] sm:$0xff] }
 0x352   :  { %v16971_v4 = vpop.permute.xlu1 %16970  ;;  %14865 = vmatmul.mubr.msk.f32.gmra.mrb[40].mxu1 %vm2839_vm10, %v21309_v42  ;;  %17375 = vrot.lane.b32.xlu0 %v20764_v11, %s17820_s30 }
 0x353   :  { %14022 = vmatmul.mubr.msk.f32.gmra.mrb[30].mxu0 %vm2839_vm10, %v20931_v49  ;;  %16031 = vmatpush3.bf16.msra.mxu1 %v16028_v57  ;;  %v21339_v49 = vpack.c.bf16 %v20796_v59, %v20786_v37  ;;  %v16973_v58 = vunpack.i.h.bf16 %v16971_v4  ;;  %v16972_v17 = vunpack.i.l.bf16 %v16971_v4  ;;  %v15552_v37 = vpack.c.bf16 %v16963_v31, %v16962_v55  ;;  %v24227_v59 = vld [vmem:[#allocation21_spill] sm:$0xff]  ;;  %v24229_v55 = vld [vmem:[#allocation23_spill] sm:$0xff] }
 0x354   :  { %15547 = vmatpush3.bf16.msra.mxu0 %v15544_v60  ;;  %17255 = vrot.lane.b32.xlu1 %v20661_v52, %s17821_s15  ;;  %v21369_v60 = vld [vmem:[%s24118_s3 + $0x148] sm:$0xff]  ;;  %v16958_v4 = vunpack.i.h.bf16 %v24228_v23  ;;  %v16957_v31 = vunpack.i.l.bf16 %v24228_v23 }
 0x355   :  { %15549 = vmatprep.subr.bf16.mxu0 %v15548_v13  ;;  %14024 = vmatprep.mubr.msk.f32.mxu0 %vm2839_vm10, %v20936_v47  ;;  %v21356_v47 = vld [vmem:[%s24118_s3 + $0x140] sm:$0xff]  ;;  %v15556_v1 = vpack.c.bf16 %v16973_v58, %v16972_v17  ;;  %v21395_v58 = vld [vmem:[%s24118_s3 + $0x158] sm:$0xff]  ;;  %v24230_v17 = vld [vmem:[#allocation24_spill] sm:$0xff] }
 0x356   :  { %v16976_v7 = vpop.permute.xlu1 %16975  ;;  %16033 = vmatprep.subr.bf16.mxu1 %v16032_v0  ;;  %14867 = vmatprep.mubr.msk.f32.mxu1 %vm2839_vm10, %v21328_v22 }
 0x357   :  { %14025 = vmatmul.mubr.msk.f32.gmra.mrb[32].mxu0 %vm2839_vm10, %v24226_v62  ;;  %14868 = vmatmul.mubr.msk.f32.gmra.mrb[42].mxu1 %vm2839_vm10, %v21335_v38  ;;  %v16978_v43 = vunpack.i.h.bf16 %v16976_v7  ;;  %v16977_v21 = vunpack.i.l.bf16 %v16976_v7  ;;  %v16040_v7 = vpack.c.bf16 %v16958_v4, %v16957_v31  ;;  %v16968_v62 = vunpack.i.h.bf16 %v24230_v17  ;;  %v21425_v31 = vld [vmem:[%s24118_s3 + $0x168] sm:$0xff] }
 0x358   :  { %15551 = vmatpush3.bf16.msra.mxu0 %v15548_v13  ;;  %17270 = vrot.lane.b32.xlu1 %v20686_v28, %s17821_s15 }
 0x359   :  { %14027 = vmatprep.mubr.msk.f32.mxu0 %vm2839_vm10, %v24227_v59  ;;  %15553 = vmatprep.subr.bf16.mxu0 %v15552_v37  ;;  %v15560_v10 = vpack.c.bf16 %v16978_v43, %v16977_v21 }
 0x35a   :  { %v16991_v57 = vpop.permute.xlu1 %16990  ;;  %16035 = vmatpush3.bf16.msra.mxu1 %v16032_v0  ;;  %14886 = vmatprep.mubr.msk.f32.mxu1 %vm2839_vm10, %v21356_v47 }
 0x35b   :  { %14028 = vmatmul.mubr.msk.f32.gmra.mrb[34].mxu0 %vm2839_vm10, %v20975_v53  ;;  %16037 = vmatprep.subr.bf16.mxu1 %v16036_v41  ;;  %v16993_v13 = vunpack.i.h.bf16 %v16991_v57  ;;  %v16992_v0 = vunpack.i.l.bf16 %v16991_v57 }
 0x35c   :  { %15555 = vmatpush3.bf16.msra.mxu0 %v15552_v37  ;;  %17280 = vrot.lane.b32.xlu1 %v20700_v15, %s17821_s15  ;;  %v21401_v37 = vpop.permute.xlu0 %17105 }
 0x35d   :  { %15557 = vmatprep.subr.bf16.mxu0 %v15556_v1  ;;  %14046 = vmatprep.mubr.msk.f32.mxu0 %vm2839_vm10, %v24229_v55  ;;  %v15564_v43 = vpack.c.bf16 %v16993_v13, %v16992_v0  ;;  %v24231_v13 = vld [vmem:[#allocation25_spill] sm:$0xff] }
 0x35e   :  { %v17001_v53 = vpop.permute.xlu1 %17000  ;;  %14887 = vmatmul.mubr.msk.f32.vlgmr.msra.gmra.mrb[36].mxu1 %vm2839_vm10, %v21369_v60  ;;  %17385 = vrot.lane.b32.xlu0 %v20780_v16, %s17820_s30 }
 0x35f   :  { %14047 = vmatmul.mubr.msk.f32.vlgmr.msra.gmra.mrb[28].mxu0 %vm2839_vm10, %v20997_v50  ;;  %16039 = vmatpush3.bf16.msra.mxu1 %v16036_v41  ;;  %v16967_v50 = vunpack.i.l.bf16 %v24230_v17  ;;  %v17003_v41 = vunpack.i.h.bf16 %v17001_v53  ;;  %v17002_v57 = vunpack.i.l.bf16 %v17001_v53  ;;  %v16982_v53 = vunpack.i.l.bf16 %v21019_v20  ;;  %v21444_v17 = vld [vmem:[%s24118_s3 + $0x170] sm:$0xff] }
 0x360   :  { %15559 = vmatpush3.bf16.msra.mxu0 %v15556_v1  ;;  %17290 = vrot.lane.b32.xlu1 %v20631_v54, %s17822_s16  ;;  %v21427_v55 = vpop.permute.xlu0 %17120 }
 0x361   :  { %15561 = vmatprep.subr.bf16.mxu0 %v15560_v10  ;;  %14049 = vmatprep.mubr.msk.f32.mxu0 %vm2839_vm10, %v21002_v27  ;;  %v21412_v27 = vld [vmem:[%s24118_s3 + $0x160] sm:$0xff]  ;;  %v16044_v21 = vpack.c.bf16 %v16968_v62, %v16967_v50  ;;  %v15568_v4 = vpack.c.bf16 %v17003_v41, %v17002_v57  ;;  %v21451_v50 = vld [vmem:[%s24118_s3 + $0x178] sm:$0xff] }
 0x362   :  { %v17011_v59 = vpop.permute.xlu1 %17010  ;;  %16041 = vmatprep.subr.bf16.mxu1 %v16040_v7  ;;  %14889 = vmatprep.mubr.msk.f32.mxu1 %vm2839_vm10, %v21388_v8 }
 0x363   :  { %14050 = vmatmul.mubr.msk.f32.gmra.mrb[30].mxu0 %vm2839_vm10, %v21017_v46  ;;  %14890 = vmatmul.mubr.msk.f32.gmra.mrb[38].mxu1 %vm2839_vm10, %v21395_v58  ;;  %v17013_v46 = vunpack.i.h.bf16 %v17011_v59  ;;  %v17012_v23 = vunpack.i.l.bf16 %v17011_v59  ;;  %v24233_v59 = vld [vmem:[#allocation26_spill] sm:$0xff] }
 0x364   :  { %15563 = vmatpush3.bf16.msra.mxu0 %v15560_v10  ;;  %17300 = vrot.lane.b32.xlu1 %v20661_v52, %s17822_s16  ;;  %v16988_v41 = vunpack.i.h.bf16 %v24233_v59  ;;  %v16987_v57 = vunpack.i.l.bf16 %v24233_v59  ;;  %v17037_v59 = vunpack.i.l.bf16 %v21202_v18 }
 0x365   :  { %15565 = vmatprep.subr.bf16.mxu0 %v15564_v43  ;;  %14052 = vmatprep.mubr.msk.f32.mxu0 %vm2839_vm10, %v21024_v32  ;;  %v16983_v32 = vunpack.i.h.bf16 %v21019_v20  ;;  %v15572_v20 = vpack.c.bf16 %v17013_v46, %v17012_v23  ;;  %v17028_v46 = vunpack.i.h.bf16 %v21194_v34  ;;  %v17027_v23 = vunpack.i.l.bf16 %v21194_v34 }
 0x366   :  { %v17021_v1 = vpop.permute.xlu1 %17020  ;;  %16043 = vmatpush3.bf16.msra.mxu1 %v16040_v7  ;;  %14892 = vmatprep.mubr.msk.f32.mxu1 %vm2839_vm10, %v21412_v27  ;;  %v24232_v7 = vld [vmem:[#allocation27_spill] sm:$0xff] }
 0x367   :  { %14053 = vmatmul.mubr.msk.f32.gmra.mrb[32].mxu0 %vm2839_vm10, %v21039_v30  ;;  %16045 = vmatprep.subr.bf16.mxu1 %v16044_v21  ;;  %v17023_v0 = vunpack.i.h.bf16 %v17021_v1  ;;  %v17022_v10 = vunpack.i.l.bf16 %v17021_v1  ;;  %v16048_v62 = vpack.c.bf16 %v16983_v32, %v16982_v53  ;;  %v16052_v32 = vpack.c.bf16 %v16988_v41, %v16987_v57 }
 0x368   :  { %15567 = vmatpush3.bf16.msra.mxu0 %v15564_v43  ;;  %17310 = vrot.lane.b32.xlu1 %v20700_v15, %s17822_s16  ;;  %v24234_v43 = vld [vmem:[#allocation28_spill] sm:$0xff] }
 0x369   :  { %15569 = vmatprep.subr.bf16.mxu0 %v15568_v4  ;;  %14055 = vmatprep.mubr.msk.f32.mxu0 %vm2839_vm10, %v24231_v13  ;;  %v15580_v13 = vpack.c.bf16 %v17028_v46, %v17027_v23 }
 0x36a   :  { %v17031_v30 = vpop.permute.xlu1 %17030  ;;  %14893 = vmatmul.mubr.msk.f32.gmra.mrb[40].mxu1 %vm2839_vm10, %v21425_v31  ;;  %17400 = vrot.lane.b32.xlu0 %v20800_v6, %s17820_s30 }
 0x36b   :  { %14056 = vmatmul.mubr.msk.f32.gmra.mrb[34].mxu0 %vm2839_vm10, %v24232_v7  ;;  %16047 = vmatpush3.bf16.msra.mxu1 %v16044_v21  ;;  %v21457_v21 = vpop.permute.xlu0 %17125  ;;  %v17032_v34 = vunpack.i.l.bf16 %v17031_v30 }
 0x36c   :  { %15571 = vmatpush3.bf16.msra.mxu0 %v15568_v4  ;;  %17320 = vrot.lane.b32.xlu1 %v20661_v52, %s17823_s17  ;;  %v15576_v4 = vpack.c.bf16 %v17023_v0, %v17022_v10  ;;  %v21482_v0 = vld [vmem:[%s24118_s3 + $0x180] sm:$0xff] }
 0x36d   :  { %15573 = vmatprep.subr.bf16.mxu0 %v15572_v20  ;;  %14074 = vmatprep.mubr.msk.f32.mxu0 %vm2839_vm10, %v24234_v43  ;;  %v24235_v10 = vld [vmem:[#allocation30_spill] sm:$0xff] }
 0x36e   :  { %v21459_v1 = vpop.permute.xlu1 %17040  ;;  %16049 = vmatprep.subr.bf16.mxu1 %v16048_v62  ;;  %14895 = vmatprep.mubr.msk.f32.mxu1 %vm2839_vm10, %v21444_v17  ;;  %v16997_v7 = vunpack.i.l.bf16 %v24235_v10 }
 0x36f   :  { %14075 = vmatmul.mubr.msk.f32.vlgmr.msra.gmra.mrb[28].mxu0 %vm2839_vm10, %v21083_v45  ;;  %14896 = vmatmul.mubr.msk.f32.gmra.mrb[42].mxu1 %vm2839_vm10, %v21451_v50  ;;  %v17033_v45 = vunpack.i.h.bf16 %v17031_v30  ;;  %v21491_v30 = vld [vmem:[%s24118_s3 + $0x188] sm:$0xff]  ;;  %v17043_v43 = vunpack.i.h.bf16 %v21459_v1  ;;  %v17042_v46 = vunpack.i.l.bf16 %v21459_v1  ;;  %v24236_v1 = vld [vmem:[#allocation44_spill] sm:$0xff] }
 0x370   :  { %15575 = vmatpush3.bf16.msra.mxu0 %v15572_v20  ;;  %17325 = vrot.lane.b32.xlu1 %v20686_v28, %s17823_s17 }
 0x371   :  { %15577 = vmatprep.subr.bf16.mxu0 %v15576_v4  ;;  %14077 = vmatprep.mubr.msk.f32.mxu0 %vm2839_vm10, %v21090_v2  ;;  %v21484_v2 = vpop.permute.xlu0 %17135  ;;  %v15584_v41 = vpack.c.bf16 %v17033_v45, %v17032_v34  ;;  %v15592_v34 = vpack.c.bf16 %v17043_v43, %v17042_v46 }
 0x372   :  { %v21473_v53 = vpop.permute.xlu1 %17050  ;;  %17405 = vrot.lane.b32.xlu0 %v20746_v39, %s17821_s15  ;;  %16051 = vmatpush3.bf16.msra.mxu1 %v16048_v62  ;;  %v17038_v62 = vunpack.i.h.bf16 %v21202_v18 }
 0x373   :  { %14078 = vmatmul.mubr.msk.f32.gmra.mrb[30].mxu0 %vm2839_vm10, %v21111_v61  ;;  %16053 = vmatprep.subr.bf16.mxu1 %v16052_v32  ;;  %v16998_v61 = vunpack.i.h.bf16 %v24235_v10  ;;  %v17053_v45 = vunpack.i.h.bf16 %v21473_v53 }
 0x374   :  { %15579 = vmatpush3.bf16.msra.mxu0 %v15576_v4  ;;  %17330 = vrot.lane.b32.xlu1 %v20700_v15, %s17823_s17  ;;  %v15588_v23 = vpack.c.bf16 %v17038_v62, %v17037_v59  ;;  %v17008_v4 = vunpack.i.h.bf16 %v21130_v5 }
 0x375   :  { %15581 = vmatprep.subr.bf16.mxu0 %v15580_v13  ;;  %14080 = vmatprep.mubr.msk.f32.mxu0 %vm2839_vm10, %v21122_v40  ;;  %v21512_v40 = vld [vmem:[%s24118_s3 + $0x190] sm:$0xff]  ;;  %v16056_v18 = vpack.c.bf16 %v16998_v61, %v16997_v7  ;;  %v21518_v57 = vpop.permute.xlu0 %17145 }
 0x376   :  { %v21497_v20 = vpop.permute.xlu1 %17060  ;;  %14914 = vmatprep.mubr.msk.f32.mxu1 %vm2839_vm10, %v21482_v0  ;;  %17415 = vrot.lane.b32.xlu0 %v20764_v11, %s17821_s15 }
 0x377   :  { %14081 = vmatmul.mubr.msk.f32.gmra.mrb[32].mxu0 %vm2839_vm10, %v21139_v51  ;;  %14915 = vmatmul.mubr.msk.f32.vlgmr.msra.gmra.mrb[36].mxu1 %vm2839_vm10, %v21491_v30 }
 0x378   :  { %15583 = vmatpush3.bf16.msra.mxu0 %v15580_v13  ;;  %17335 = vrot.lane.b32.xlu1 %v20631_v54, %s17824_s18  ;;  %v21552_v13 = vld [vmem:[%s24118_s3 + $0x1a0] sm:$0xff] }
 0x379   :  { %15585 = vmatprep.subr.bf16.mxu0 %v15584_v41  ;;  %14083 = vmatprep.mubr.msk.f32.mxu0 %vm2839_vm10, %v21150_v3  ;;  %v21531_v3 = vld [vmem:[%s24118_s3 + $0x198] sm:$0xff]  ;;  %v21554_v10 = vpop.permute.xlu0 %17155 }
 0x37a   :  { %v21520_v51 = vpop.permute.xlu1 %17070  ;;  %16055 = vmatpush3.bf16.msra.mxu1 %v16052_v32  ;;  %14917 = vmatprep.mubr.msk.f32.mxu1 %vm2839_vm10, %v21512_v40  ;;  %v17007_v32 = vunpack.i.l.bf16 %v21130_v5  ;;  %v17052_v5 = vunpack.i.l.bf16 %v21473_v53  ;;  %v21561_v53 = vld [vmem:[%s24118_s3 + $0x1a8] sm:$0xff] }
 0x37b   :  { %14084 = vmatmul.mubr.msk.f32.gmra.mrb[34].mxu0 %vm2839_vm10, %v21171_v29  ;;  %16057 = vmatprep.subr.bf16.mxu1 %v16056_v18 }
 0x37c   :  { %15587 = vmatpush3.bf16.msra.mxu0 %v15584_v41  ;;  %17340 = vrot.lane.b32.xlu1 %v20661_v52, %s17824_s18  ;;  %v16060_v61 = vpack.c.bf16 %v17008_v4, %v17007_v32  ;;  %v17063_v41 = vunpack.i.h.bf16 %v21497_v20  ;;  %v15596_v43 = vpack.c.bf16 %v17053_v45, %v17052_v5  ;;  %v21599_v32 = vld [vmem:[%s24118_s3 + $0x1b8] sm:$0xff] }
 0x37d   :  { %15589 = vmatprep.subr.bf16.mxu0 %v15588_v23  ;;  %14102 = vmatprep.mubr.msk.f32.mxu0 %vm2839_vm10, %v24236_v1  ;;  %v21579_v46 = vpop.permute.xlu0 %17165 }
 0x37e   :  { %v21539_v29 = vpop.permute.xlu1 %17075  ;;  %14918 = vmatmul.mubr.msk.f32.gmra.mrb[38].mxu1 %vm2839_vm10, %v21531_v3  ;;  %17425 = vrot.lane.b32.xlu0 %v20780_v16, %s17821_s15 }
 0x37f   :  { %14103 = vmatmul.mubr.msk.f32.vlgmr.msra.gmra.mrb[28].mxu0 %vm2839_vm10, %v21242_v33  ;;  %16059 = vmatpush3.bf16.msra.mxu1 %v16056_v18  ;;  %v24237_v33 = vld [vmem:[#allocation43_spill] sm:$0xff]  ;;  %v17062_v18 = vunpack.i.l.bf16 %v21497_v20  ;;  %v17072_v20 = vunpack.i.l.bf16 %v21520_v51 }
 0x380   :  { %15591 = vmatpush3.bf16.msra.mxu0 %v15588_v23  ;;  %17370 = vrot.lane.b32.xlu1 %v20686_v28, %s17824_s18  ;;  %v17018_v7 = vunpack.i.h.bf16 %v24237_v33  ;;  %v17017_v62 = vunpack.i.l.bf16 %v24237_v33 }
 0x381   :  { %15593 = vmatprep.subr.bf16.mxu0 %v15592_v34  ;;  %14105 = vmatprep.mubr.msk.f32.mxu0 %vm2839_vm10, %v21265_v14  ;;  %v15600_v4 = vpack.c.bf16 %v17063_v41, %v17062_v18  ;;  %v21620_v45 = vpop.permute.xlu0 %17180 }
 0x382   :  { %v17091_v59 = vpop.permute.xlu1 %17090  ;;  %16061 = vmatprep.subr.bf16.mxu1 %v16060_v61  ;;  %14920 = vmatprep.mubr.msk.f32.mxu1 %vm2839_vm10, %v21552_v13  ;;  %v16064_v14 = vpack.c.bf16 %v17018_v7, %v17017_v62  ;;  %v24239_v62 = vld [vmem:[#allocation6_spill] sm:$0xff] }
 0x383   :  { %14106 = vmatmul.mubr.msk.f32.gmra.mrb[30].mxu0 %vm2839_vm10, %v21273_v9  ;;  %14921 = vmatmul.mubr.msk.f32.gmra.mrb[40].mxu1 %vm2839_vm10, %v21561_v53  ;;  %v17073_v9 = vunpack.i.h.bf16 %v21520_v51  ;;  %v17078_v51 = vunpack.i.h.bf16 %v21539_v29  ;;  %v17092_v5 = vunpack.i.l.bf16 %v17091_v59 }
 0x384   :  { %15595 = vmatpush3.bf16.msra.mxu0 %v15592_v34  ;;  %17380 = vrot.lane.b32.xlu1 %v20700_v15, %s17824_s18 }
 0x385   :  { %15597 = vmatprep.subr.bf16.mxu0 %v15596_v43  ;;  %14108 = vmatprep.mubr.msk.f32.mxu0 %vm2839_vm10, %v21291_v35  ;;  %v21592_v35 = vld [vmem:[%s24118_s3 + $0x1b0] sm:$0xff]  ;;  %v15604_v1 = vpack.c.bf16 %v17073_v9, %v17072_v20 }
 0x386   :  { %v21581_v23 = vpop.permute.xlu1 %17100  ;;  %17435 = vrot.lane.b32.xlu0 %v20746_v39, %s17822_s16  ;;  %16063 = vmatpush3.bf16.msra.mxu1 %v16060_v61  ;;  %v24238_v61 = vld [vmem:[#allocation5_spill] sm:$0xff]  ;;  %v21713_v20 = vld [vmem:[%s24118_s3 + $0x1f0] sm:$0xff] }
 0x387   :  { %14109 = vmatmul.mubr.msk.f32.gmra.mrb[32].mxu0 %vm2839_vm10, %v21309_v42  ;;  %16065 = vmatprep.subr.bf16.mxu1 %v16064_v14  ;;  %v17102_v7 = vunpack.i.l.bf16 %v21581_v23 }
 0x388   :  { %15599 = vmatpush3.bf16.msra.mxu0 %v15596_v43  ;;  %17390 = vrot.lane.b32.xlu1 %v20631_v54, %s17825_s21  ;;  %v17077_v54 = vunpack.i.l.bf16 %v21539_v29  ;;  %v17093_v29 = vunpack.i.h.bf16 %v17091_v59 }
 0x389   :  { %15601 = vmatprep.subr.bf16.mxu0 %v15600_v4  ;;  %14111 = vmatprep.mubr.msk.f32.mxu0 %vm2839_vm10, %v21328_v22  ;;  %v21618_v22 = vld [vmem:[%s24118_s3 + $0x1c0] sm:$0xff] }
 0x38a   :  { %v21603_v42 = vpop.permute.xlu1 %17110  ;;  %14923 = vmatprep.mubr.msk.f32.mxu1 %vm2839_vm10, %v21592_v35  ;;  %17445 = vrot.lane.b32.xlu0 %v20780_v16, %s17822_s16  ;;  %v15608_v34 = vpack.c.bf16 %v17078_v51, %v17077_v54 }
 0x38b   :  { %14112 = vmatmul.mubr.msk.f32.gmra.mrb[34].mxu0 %vm2839_vm10, %v21335_v38  ;;  %14924 = vmatmul.mubr.msk.f32.gmra.mrb[42].mxu1 %vm2839_vm10, %v21599_v32  ;;  %v17113_v18 = vunpack.i.h.bf16 %v21603_v42  ;;  %v17112_v43 = vunpack.i.l.bf16 %v21603_v42  ;;  %v17047_v42 = vunpack.i.l.bf16 %v21223_v56 }
 0x38c   :  { %15603 = vmatpush3.bf16.msra.mxu0 %v15600_v4  ;;  %17395 = vrot.lane.b32.xlu1 %v20661_v52, %s17825_s21  ;;  %v21636_v52 = vld [vmem:[%s24118_s3 + $0x1c8] sm:$0xff]  ;;  %v17048_v4 = vunpack.i.h.bf16 %v21223_v56 }
 0x38d   :  { %15605 = vmatprep.subr.bf16.mxu0 %v15604_v1  ;;  %14130 = vmatprep.mubr.msk.f32.mxu0 %vm2839_vm10, %v21356_v47  ;;  %v21642_v47 = vpop.permute.xlu0 %17185  ;;  %v15620_v9 = vpack.c.bf16 %v17113_v18, %v17112_v43  ;;  %v21780_v43 = vld [vmem:[%s24118_s3 + $0x210] sm:$0xff] }
 0x38e   :  { %v21626_v38 = vpop.permute.xlu1 %17115  ;;  %16067 = vmatpush3.bf16.msra.mxu1 %v16064_v14  ;;  %14942 = vmatprep.mubr.msk.f32.mxu1 %vm2839_vm10, %v21618_v22  ;;  %v24240_v14 = vld [vmem:[#allocation7_spill] sm:$0xff] }
 0x38f   :  { %14131 = vmatmul.mubr.msk.f32.vlgmr.msra.gmra.mrb[28].mxu0 %vm2839_vm10, %v21369_v60  ;;  %16069 = vmatprep.subr.bf16.mxu1 %v24238_v61  ;;  %v21656_v60 = vld [vmem:[%s24118_s3 + $0x1d0] sm:$0xff]  ;;  %v17117_v51 = vunpack.i.l.bf16 %v21626_v38 }
 0x390   :  { %15607 = vmatpush3.bf16.msra.mxu0 %v15604_v1  ;;  %17410 = vrot.lane.b32.xlu1 %v20686_v28, %s17825_s21  ;;  %v15612_v28 = vpack.c.bf16 %v17093_v29, %v17092_v5  ;;  %v21729_v1 = vld [vmem:[%s24118_s3 + $0x1f8] sm:$0xff] }
 0x391   :  { %15609 = vmatprep.subr.bf16.mxu0 %v15608_v34  ;;  %14133 = vmatprep.mubr.msk.f32.mxu0 %vm2839_vm10, %v21388_v8  ;;  %v17103_v8 = vunpack.i.h.bf16 %v21581_v23  ;;  %v24241_v29 = vld [vmem:[#allocation9_spill] sm:$0xff] }
 0x392   :  { %v21644_v33 = vpop.permute.xlu1 %17130  ;;  %14943 = vmatmul.mubr.msk.f32.vlgmr.msra.gmra.mrb[36].mxu1 %vm2839_vm10, %v21636_v52  ;;  %17460 = vrot.lane.b32.xlu0 %v20800_v6, %s17822_s16 }
 0x393   :  { %14134 = vmatmul.mubr.msk.f32.gmra.mrb[30].mxu0 %vm2839_vm10, %v21395_v58  ;;  %16071 = vmatpush3.bf16.msra.mxu1 %v24238_v61  ;;  %v21665_v58 = vld [vmem:[%s24118_s3 + $0x1d8] sm:$0xff]  ;;  %v15616_v41 = vpack.c.bf16 %v17103_v8, %v17102_v7  ;;  %v17133_v61 = vunpack.i.h.bf16 %v21644_v33  ;;  %v24242_v8 = vld [vmem:[#allocation35_spill] sm:$0xff] }
 0x394   :  { %15611 = vmatpush3.bf16.msra.mxu0 %v15608_v34  ;;  %17420 = vrot.lane.b32.xlu1 %v20700_v15, %s17825_s21  ;;  %v21678_v15 = vpop.permute.xlu0 %17195  ;;  %v17058_v34 = vunpack.i.h.bf16 %v21244_v63  ;;  %v21759_v7 = vld [vmem:[%s24118_s3 + $0x208] sm:$0xff] }
 0x395   :  { %15613 = vmatprep.subr.bf16.mxu0 %v15612_v28  ;;  %16073 = vmatprep.subr.bf16.mxu1 %v24239_v62 }
 0x396   :  { %v21668_v59 = vpop.permute.xlu1 %17140  ;;  %14136 = vmatprep.mubr.msk.f32.mxu0 %vm2839_vm10, %v21412_v27  ;;  %14945 = vmatprep.mubr.msk.f32.mxu1 %vm2839_vm10, %v21656_v60  ;;  %v21685_v27 = vld [vmem:[%s24118_s3 + $0x1e0] sm:$0xff] }
 0x397   :  { %14137 = vmatmul.mubr.msk.f32.gmra.mrb[32].mxu0 %vm2839_vm10, %v21425_v31  ;;  %14946 = vmatmul.mubr.msk.f32.gmra.mrb[38].mxu1 %vm2839_vm10, %v21665_v58  ;;  %v21695_v31 = vld [vmem:[%s24118_s3 + $0x1e8] sm:$0xff] }
 0x398   :  { %17465 = vrot.lane.b32.xlu0 %v20746_v39, %s17823_s17  ;;  %15615 = vmatpush3.bf16.msra.mxu0 %v15612_v28  ;;  %v17132_v28 = vunpack.i.l.bf16 %v21644_v33  ;;  %v17068_v33 = vunpack.i.h.bf16 %v21280_v48 }
 0x399   :  { %16075 = vmatpush3.bf16.msra.mxu1 %v24239_v62  ;;  %17430 = vrot.lane.b32.xlu1 %v20800_v6, %s17821_s15 }
 0x39a   :  { %15617 = vmatprep.subr.bf16.mxu0 %v15616_v41  ;;  %16077 = vmatprep.subr.bf16.mxu1 %v24240_v14  ;;  %v21698_v23 = vpop.permute.xlu1 %17150 }
 0x39b   :  { %14139 = vmatprep.mubr.msk.f32.mxu0 %vm2839_vm10, %v21444_v17  ;;  %14948 = vmatprep.mubr.msk.f32.mxu1 %vm2839_vm10, %v21685_v27  ;;  %v21715_v17 = vpop.permute.xlu0 %17205 }
 0x39c   :  { %14140 = vmatmul.mubr.msk.f32.gmra.mrb[34].mxu0 %vm2839_vm10, %v21451_v50  ;;  %14949 = vmatmul.mubr.msk.f32.gmra.mrb[40].mxu1 %vm2839_vm10, %v21695_v31  ;;  %v17118_v50 = vunpack.i.h.bf16 %v21626_v38  ;;  %v16084_v38 = vpack.c.bf16 %v17048_v4, %v17047_v42  ;;  %v24243_v4 = vld [vmem:[#allocation40_spill] sm:$0xff]  ;;  %v24244_v42 = vld [vmem:[#allocation41_spill] sm:$0xff] }
 0x39d   :  { %17475 = vrot.lane.b32.xlu0 %v20764_v11, %s17823_s17  ;;  %15619 = vmatpush3.bf16.msra.mxu0 %v15616_v41  ;;  %v17067_v41 = vunpack.i.l.bf16 %v21280_v48  ;;  %v21789_v48 = vld [vmem:[%s24118_s3 + $0x218] sm:$0xff] }
 0x39e   :  { %16079 = vmatpush3.bf16.msra.mxu1 %v24240_v14  ;;  %17440 = vrot.lane.b32.xlu1 %v20764_v11, %s17822_s16  ;;  %v21724_v54 = vpop.permute.xlu1 %17160  ;;  %v15624_v56 = vpack.c.bf16 %v17118_v50, %v17117_v51  ;;  %v17143_v14 = vunpack.i.h.bf16 %v21668_v59 }
 0x39f   :  { %15621 = vmatprep.subr.bf16.mxu0 %v15620_v9  ;;  %16081 = vmatprep.subr.bf16.mxu1 %v24241_v29  ;;  %v21761_v62 = vpop.permute.xlu0 %17220 }
 0x3a0   :  { %14158 = vmatprep.mubr.msk.f32.mxu0 %vm2839_vm10, %v21482_v0  ;;  %14951 = vmatprep.mubr.msk.f32.mxu1 %vm2839_vm10, %v21713_v20  ;;  %v21747_v0 = vld [vmem:[%s24118_s3 + $0x200] sm:$0xff] }
 0x3a1   :  { %14159 = vmatmul.mubr.msk.f32.vlgmr.msra.gmra.mrb[28].mxu0 %vm2839_vm10, %v21491_v30  ;;  %14952 = vmatmul.mubr.msk.f32.gmra.mrb[42].mxu1 %vm2839_vm10, %v21729_v1  ;;  %v17057_v30 = vunpack.i.l.bf16 %v21244_v63 }
 0x3a2   :  { %17485 = vrot.lane.b32.xlu0 %v20780_v16, %s17823_s17  ;;  %15623 = vmatpush3.bf16.msra.mxu0 %v15620_v9  ;;  %v21742_v5 = vpop.permute.xlu1 %17170  ;;  %v17142_v9 = vunpack.i.l.bf16 %v21668_v59 }
 0x3a3   :  { %16083 = vmatpush3.bf16.msra.mxu1 %v24241_v29  ;;  %17450 = vrot.lane.b32.xlu1 %v24242_v8, %s17819_s5  ;;  %v16088_v18 = vpack.c.bf16 %v17058_v34, %v17057_v30  ;;  %v21794_v51 = vpop.permute.xlu0 %17225  ;;  %v17083_v34 = vunpack.i.h.bf16 %v21311_v12  ;;  %v17082_v30 = vunpack.i.l.bf16 %v21311_v12 }
 0x3a4   :  { %15625 = vmatprep.subr.bf16.mxu0 %v15624_v56  ;;  %16085 = vmatprep.subr.bf16.mxu1 %v16084_v38 }
 0x3a5   :  { %14161 = vmatprep.mubr.msk.f32.mxu0 %vm2839_vm10, %v21512_v40  ;;  %14970 = vmatprep.mubr.msk.f32.mxu1 %vm2839_vm10, %v21747_v0  ;;  %v15628_v40 = vpack.c.bf16 %v17133_v61, %v17132_v28  ;;  %v21823_v61 = vld [vmem:[%s24118_s3 + $0x228] sm:$0xff] }
 0x3a6   :  { %14162 = vmatmul.mubr.msk.f32.gmra.mrb[30].mxu0 %vm2839_vm10, %v21531_v3  ;;  %14971 = vmatmul.mubr.msk.f32.vlgmr.msra.gmra.mrb[36].mxu1 %vm2839_vm10, %v21759_v7  ;;  %v21771_v63 = vpop.permute.xlu1 %17175  ;;  %v2775_v3 = vpop.f32.mrb[27].mxu0 }
 0x3a7   :  { %17500 = vrot.lane.b32.xlu0 %v20800_v6, %s17823_s17  ;;  %15627 = vmatpush3.bf16.msra.mxu0 %v15624_v56  ;;  %v21792_v50 = vpack.i.bf16 %v2775_v3, %v24244_v42  ;;  %v21797_v29 = vpack.c.bf16 %v2775_v3, %v24244_v42  ;;  %v15632_v56 = vpack.c.bf16 %v17143_v14, %v17142_v9  ;;  %v21831_v12 = vpop.permute.xlu0 %17235  ;;  %v17088_v3 = vunpack.i.h.bf16 %v21345_v24  ;;  %v21855_v9 = vld [vmem:[%s24118_s3 + $0x238] sm:$0xff] }
 0x3a8   :  { %16087 = vmatpush3.bf16.msra.mxu1 %v16084_v38  ;;  %17455 = vrot.lane.b32.xlu1 %v24243_v4, %s17819_s5  ;;  %v16092_v38 = vpack.c.bf16 %v17068_v33, %v17067_v41  ;;  %v24247_v33 = vld [vmem:[#allocation29_spill] sm:$0xff]  ;;  %v24248_v41 = vld [vmem:[#allocation31_spill] sm:$0xff]  ;;  %v17087_v14 = vunpack.i.l.bf16 %v21345_v24 }
 0x3a9   :  { %15629 = vmatprep.subr.bf16.mxu0 %v15628_v40  ;;  %16089 = vmatprep.subr.bf16.mxu1 %v16088_v18  ;;  %24245 = vst [vmem:[#allocation20_spill] sm:$0xff] %v21797_v29 }
 0x3aa   :  { %14164 = vmatprep.mubr.msk.f32.mxu0 %vm2839_vm10, %v21552_v13  ;;  %14973 = vmatprep.mubr.msk.f32.mxu1 %vm2839_vm10, %v21780_v43  ;;  %v21803_v59 = vpop.permute.xlu1 %17190  ;;  %v21814_v13 = vld [vmem:[%s24118_s3 + $0x220] sm:$0xff] }
 0x3ab   :  { %14165 = vmatmul.mubr.msk.f32.gmra.mrb[32].mxu0 %vm2839_vm10, %v21561_v53  ;;  %14974 = vmatmul.mubr.msk.f32.gmra.mrb[38].mxu1 %vm2839_vm10, %v21789_v48  ;;  %v24246_v53 = vld [vmem:[#allocation45_spill] sm:$0xff]  ;;  %v21868_v24 = vpop.permute.xlu0 %17245 }
 0x3ac   :  { %17505 = vrot.lane.b32.xlu0 %v20746_v39, %s17824_s18  ;;  %15631 = vmatpush3.bf16.msra.mxu0 %v15628_v40  ;;  %v21835_v40 = vpack.c.bf16 %v24248_v41, %v24247_v33  ;;  %v21887_v33 = vld [vmem:[%s24118_s3 + $0x248] sm:$0xff]  ;;  %v24252_v41 = vld [vmem:[#allocation33_spill] sm:$0xff] }
 0x3ad   :  { %16091 = vmatpush3.bf16.msra.mxu1 %v16088_v18  ;;  %17470 = vrot.lane.b32.xlu1 %v24246_v53, %s17819_s5  ;;  %v21846_v18 = vld [vmem:[%s24118_s3 + $0x230] sm:$0xff] }
 0x3ae   :  { %15633 = vmatprep.subr.bf16.mxu0 %v15632_v56  ;;  %16093 = vmatprep.subr.bf16.mxu1 %v16092_v38  ;;  %v21825_v28 = vpop.permute.xlu1 %17200  ;;  %24249 = vst [vmem:[#allocation21_spill] sm:$0xff] %v21835_v40  ;;  %v17173_v40 = vunpack.i.h.bf16 %v21742_v5 }
 0x3af   :  { %14167 = vmatprep.mubr.msk.f32.mxu0 %vm2839_vm10, %v21592_v35  ;;  %14976 = vmatprep.mubr.msk.f32.mxu1 %vm2839_vm10, %v21814_v13  ;;  %v16096_v35 = vpack.c.bf16 %v17083_v34, %v17082_v30  ;;  %v17097_v30 = vunpack.i.l.bf16 %v21371_v25 }
 0x3b0   :  { %14168 = vmatmul.mubr.msk.f32.gmra.mrb[34].mxu0 %vm2839_vm10, %v21599_v32  ;;  %14977 = vmatmul.mubr.msk.f32.gmra.mrb[40].mxu1 %vm2839_vm10, %v21823_v61  ;;  %v24250_v32 = vld [vmem:[#allocation4_spill] sm:$0xff] }
 0x3b1   :  { %17515 = vrot.lane.b32.xlu0 %v20764_v11, %s17824_s18  ;;  %15635 = vmatpush3.bf16.msra.mxu0 %v15632_v56  ;;  %v24251_v56 = vld [vmem:[#allocation10_spill] sm:$0xff] }
 0x3b2   :  { %16095 = vmatpush3.bf16.msra.mxu1 %v16092_v38  ;;  %17480 = vrot.lane.b32.xlu1 %v24250_v32, %s17819_s5  ;;  %v21857_v42 = vpop.permute.xlu1 %17210  ;;  %v16100_v38 = vpack.c.bf16 %v17088_v3, %v17087_v14  ;;  %v24253_v3 = vld [vmem:[#allocation36_spill] sm:$0xff] }
 0x3b3   :  { %15637 = vmatprep.subr.bf16.mxu0 %v24251_v56  ;;  %16097 = vmatprep.subr.bf16.mxu1 %v16096_v35  ;;  %v21891_v14 = vpack.c.bf16 %v24253_v3, %v24252_v41  ;;  %v21907_v41 = vpop.permute.xlu0 %17260  ;;  %v17107_v3 = vunpack.i.l.bf16 %v21401_v37 }
 0x3b4   :  { %14186 = vmatprep.mubr.msk.f32.mxu0 %vm2839_vm10, %v21618_v22  ;;  %14979 = vmatprep.mubr.msk.f32.mxu1 %vm2839_vm10, %v21846_v18  ;;  %v21876_v22 = vld [vmem:[%s24118_s3 + $0x240] sm:$0xff] }
 0x3b5   :  { %14187 = vmatmul.mubr.msk.f32.vlgmr.msra.gmra.mrb[28].mxu0 %vm2839_vm10, %v21636_v52  ;;  %14980 = vmatmul.mubr.msk.f32.gmra.mrb[42].mxu1 %vm2839_vm10, %v21855_v9  ;;  %v17098_v52 = vunpack.i.h.bf16 %v21371_v25  ;;  %24254 = vst [vmem:[#allocation22_spill] sm:$0xff] %v21891_v14  ;;  %v17122_v14 = vunpack.i.l.bf16 %v21427_v55 }
 0x3b6   :  { %17525 = vrot.lane.b32.xlu0 %v20780_v16, %s17824_s18  ;;  %15639 = vmatpush3.bf16.msra.mxu0 %v24251_v56  ;;  %v21878_v34 = vpop.permute.xlu1 %17215  ;;  %v24255_v56 = vld [vmem:[#allocation11_spill] sm:$0xff] }
 0x3b7   :  { %16099 = vmatpush3.bf16.msra.mxu1 %v16096_v35  ;;  %17490 = vrot.lane.b32.xlu1 %v24242_v8, %s17820_s30  ;;  %v16104_v35 = vpack.c.bf16 %v17098_v52, %v17097_v30  ;;  %v24256_v52 = vld [vmem:[#allocation12_spill] sm:$0xff] }
 0x3b8   :  { %15641 = vmatprep.subr.bf16.mxu0 %v24255_v56  ;;  %16101 = vmatprep.subr.bf16.mxu1 %v16100_v38 }
 0x3b9   :  { %14189 = vmatprep.mubr.msk.f32.mxu0 %vm2839_vm10, %v21656_v60  ;;  %14998 = vmatprep.mubr.msk.f32.mxu1 %vm2839_vm10, %v21876_v22  ;;  %v21912_v60 = vld [vmem:[%s24118_s3 + $0x250] sm:$0xff] }
 0x3ba   :  { %14190 = vmatmul.mubr.msk.f32.gmra.mrb[30].mxu0 %vm2839_vm10, %v21665_v58  ;;  %14999 = vmatmul.mubr.msk.f32.vlgmr.msra.gmra.mrb[36].mxu1 %vm2839_vm10, %v21887_v33  ;;  %v21902_v25 = vpop.permute.xlu1 %17230  ;;  %v17108_v58 = vunpack.i.h.bf16 %v21401_v37  ;;  %v24257_v37 = vld [vmem:[#allocation39_spill] sm:$0xff] }
 0x3bb   :  { %17540 = vrot.lane.b32.xlu0 %v20800_v6, %s17824_s18  ;;  %15643 = vmatpush3.bf16.msra.mxu0 %v24255_v56  ;;  %v21921_v56 = vld [vmem:[%s24118_s3 + $0x258] sm:$0xff] }
 0x3bc   :  { %16103 = vmatpush3.bf16.msra.mxu1 %v16100_v38  ;;  %17495 = vrot.lane.b32.xlu1 %v24243_v4, %s17820_s30  ;;  %v24258_v38 = vld [vmem:[#allocation42_spill] sm:$0xff] }
 0x3bd   :  { %15645 = vmatprep.subr.bf16.mxu0 %v24256_v52  ;;  %16105 = vmatprep.subr.bf16.mxu1 %v16104_v35  ;;  %v21936_v29 = vpack.c.bf16 %v24258_v38, %v24257_v37  ;;  %v17172_v37 = vunpack.i.l.bf16 %v21742_v5  ;;  %v17127_v38 = vunpack.i.l.bf16 %v21457_v21 }
 0x3be   :  { %14192 = vmatprep.mubr.msk.f32.mxu0 %vm2839_vm10, %v21685_v27  ;;  %15001 = vmatprep.mubr.msk.f32.mxu1 %vm2839_vm10, %v21912_v60  ;;  %v21928_v30 = vpop.permute.xlu1 %17240  ;;  %v16108_v27 = vpack.c.bf16 %v17108_v58, %v17107_v3  ;;  %v21957_v58 = vld [vmem:[%s24118_s3 + $0x268] sm:$0xff]  ;;  %v24260_v3 = vld [vmem:[#allocation13_spill] sm:$0xff] }
 0x3bf   :  { %14193 = vmatmul.mubr.msk.f32.gmra.mrb[32].mxu0 %vm2839_vm10, %v21695_v31  ;;  %15002 = vmatmul.mubr.msk.f32.gmra.mrb[38].mxu1 %vm2839_vm10, %v21921_v56  ;;  %24259 = vst [vmem:[#allocation23_spill] sm:$0xff] %v21936_v29  ;;  %v17123_v31 = vunpack.i.h.bf16 %v21427_v55  ;;  %v15652_v55 = vpack.c.bf16 %v17173_v40, %v17172_v37  ;;  %v17177_v29 = vunpack.i.l.bf16 %v21771_v63  ;;  %v17193_v37 = vunpack.i.h.bf16 %v21803_v59 }
 0x3c0   :  { %17545 = vrot.lane.b32.xlu0 %v20746_v39, %s17825_s21  ;;  %15647 = vmatpush3.bf16.msra.mxu0 %v24256_v52  ;;  %v21952_v39 = vpop.permute.xlu0 %17265 }
 0x3c1   :  { %16107 = vmatpush3.bf16.msra.mxu1 %v16104_v35  ;;  %17510 = vrot.lane.b32.xlu1 %v24246_v53, %s17820_s30  ;;  %v16112_v5 = vpack.c.bf16 %v17123_v31, %v17122_v14  ;;  %v17128_v35 = vunpack.i.h.bf16 %v21457_v21  ;;  %v17138_v31 = vunpack.i.h.bf16 %v21484_v2 }
 0x3c2   :  { %15649 = vmatprep.subr.bf16.mxu0 %v24260_v3  ;;  %16109 = vmatprep.subr.bf16.mxu1 %v16108_v27  ;;  %v21960_v52 = vpop.permute.xlu1 %17250 }
 0x3c3   :  { %14195 = vmatprep.mubr.msk.f32.mxu0 %vm2839_vm10, %v21713_v20  ;;  %15004 = vmatprep.mubr.msk.f32.mxu1 %vm2839_vm10, %v21944_v19  ;;  %v21976_v20 = vld [vmem:[%s24118_s3 + $0x270] sm:$0xff] }
 0x3c4   :  { %14196 = vmatmul.mubr.msk.f32.gmra.mrb[34].mxu0 %vm2839_vm10, %v21729_v1  ;;  %15005 = vmatmul.mubr.msk.f32.gmra.mrb[40].mxu1 %vm2839_vm10, %v21957_v58  ;;  %v17178_v1 = vunpack.i.h.bf16 %v21771_v63  ;;  %v21991_v14 = vpop.permute.xlu0 %17275  ;;  %v16116_v63 = vpack.c.bf16 %v17128_v35, %v17127_v38  ;;  %v17203_v35 = vunpack.i.h.bf16 %v21825_v28  ;;  %v17202_v38 = vunpack.i.l.bf16 %v21825_v28 }
 0x3c5   :  { %17555 = vrot.lane.b32.xlu0 %v20764_v11, %s17825_s21  ;;  %15651 = vmatpush3.bf16.msra.mxu0 %v24260_v3  ;;  %v21987_v11 = vld [vmem:[%s24118_s3 + $0x278] sm:$0xff]  ;;  %v17192_v3 = vunpack.i.l.bf16 %v21803_v59 }
 0x3c6   :  { %16111 = vmatpush3.bf16.msra.mxu1 %v16108_v27  ;;  %17520 = vrot.lane.b32.xlu1 %v24250_v32, %s17820_s30  ;;  %v21989_v40 = vpop.permute.xlu1 %17255  ;;  %v15656_v21 = vpack.c.bf16 %v17178_v1, %v17177_v29  ;;  %v22006_v27 = vld [vmem:[%s24118_s3 + $0x280] sm:$0xff]  ;;  %v15664_v1 = vpack.c.bf16 %v17203_v35, %v17202_v38  ;;  %v22109_v35 = vld [vmem:[%s24118_s3 + $0x2b8] sm:$0xff] }
 0x3c7   :  { %15653 = vmatprep.subr.bf16.mxu0 %v15652_v55  ;;  %16113 = vmatprep.subr.bf16.mxu1 %v16112_v5  ;;  %v15660_v59 = vpack.c.bf16 %v17193_v37, %v17192_v3  ;;  %v22079_v37 = vld [vmem:[%s24118_s3 + $0x2a8] sm:$0xff] }
 0x3c8   :  { %14214 = vmatprep.mubr.msk.f32.mxu0 %vm2839_vm10, %v21747_v0  ;;  %15007 = vmatprep.mubr.msk.f32.mxu1 %vm2839_vm10, %v21976_v20  ;;  %v22021_v29 = vpop.permute.xlu0 %17285 }
 0x3c9   :  { %14215 = vmatmul.mubr.msk.f32.vlgmr.msra.gmra.mrb[28].mxu0 %vm2839_vm10, %v21759_v7  ;;  %15008 = vmatmul.mubr.msk.f32.gmra.mrb[42].mxu1 %vm2839_vm10, %v21987_v11  ;;  %v17137_v7 = vunpack.i.l.bf16 %v21484_v2 }
 0x3ca   :  { %17565 = vrot.lane.b32.xlu0 %v20780_v16, %s17825_s21  ;;  %15655 = vmatpush3.bf16.msra.mxu0 %v15652_v55  ;;  %v22008_v0 = vpop.permute.xlu1 %17270  ;;  %v22019_v16 = vld [vmem:[%s24118_s3 + $0x288] sm:$0xff] }
 0x3cb   :  { %16115 = vmatpush3.bf16.msra.mxu1 %v16112_v5  ;;  %17530 = vrot.lane.b32.xlu1 %v24242_v8, %s17821_s15  ;;  %v16120_v55 = vpack.c.bf16 %v17138_v31, %v17137_v7  ;;  %v22038_v5 = vld [vmem:[%s24118_s3 + $0x290] sm:$0xff]  ;;  %v17152_v31 = vunpack.i.l.bf16 %v21698_v23  ;;  %v17213_v7 = vunpack.i.h.bf16 %v21857_v42 }
 0x3cc   :  { %15657 = vmatprep.subr.bf16.mxu0 %v15656_v21  ;;  %16117 = vmatprep.subr.bf16.mxu1 %v16116_v63  ;;  %v22057_v28 = vpop.permute.xlu0 %17295 }
 0x3cd   :  { %15026 = vmatprep.mubr.msk.f32.mxu1 %vm2839_vm10, %v22006_v27  ;;  %14217 = vmatprep.mubr.msk.f32.mxu0 %vm2839_vm10, %v21780_v43  ;;  %v17148_v43 = vunpack.i.h.bf16 %v21518_v57 }
 0x3ce   :  { %14218 = vmatmul.mubr.msk.f32.gmra.mrb[30].mxu0 %vm2839_vm10, %v21789_v48  ;;  %15027 = vmatmul.mubr.msk.f32.vlgmr.msra.gmra.mrb[36].mxu1 %vm2839_vm10, %v22019_v16  ;;  %v22031_v2 = vpop.permute.xlu1 %17280  ;;  %v17147_v48 = vunpack.i.l.bf16 %v21518_v57 }
 0x3cf   :  { %17575 = vrot.lane.b32.xlu0 %v20800_v6, %s17825_s21  ;;  %15659 = vmatpush3.bf16.msra.mxu0 %v15656_v21  ;;  %v22049_v6 = vld [vmem:[%s24118_s3 + $0x298] sm:$0xff] }
 0x3d0   :  { %16119 = vmatpush3.bf16.msra.mxu1 %v16116_v63  ;;  %17535 = vrot.lane.b32.xlu1 %v24243_v4, %s17821_s15  ;;  %v16124_v21 = vpack.c.bf16 %v17148_v43, %v17147_v48  ;;  %v22066_v63 = vld [vmem:[%s24118_s3 + $0x2a0] sm:$0xff]  ;;  %v17158_v43 = vunpack.i.h.bf16 %v21554_v10  ;;  %v17217_v48 = vunpack.i.l.bf16 %v21878_v34 }
 0x3d1   :  { %15661 = vmatprep.subr.bf16.mxu0 %v15660_v59  ;;  %16121 = vmatprep.subr.bf16.mxu1 %v16120_v55 }
 0x3d2   :  { %15029 = vmatprep.mubr.msk.f32.mxu1 %vm2839_vm10, %v22038_v5  ;;  %14220 = vmatprep.mubr.msk.f32.mxu0 %vm2839_vm10, %v21814_v13  ;;  %v22055_v57 = vpop.permute.xlu1 %17290  ;;  %v17153_v13 = vunpack.i.h.bf16 %v21698_v23  ;;  %v22091_v23 = vpop.permute.xlu0 %17305 }
 0x3d3   :  { %14221 = vmatmul.mubr.msk.f32.gmra.mrb[32].mxu0 %vm2839_vm10, %v21823_v61  ;;  %15030 = vmatmul.mubr.msk.f32.gmra.mrb[38].mxu1 %vm2839_vm10, %v22049_v6  ;;  %v17212_v61 = vunpack.i.l.bf16 %v21857_v42 }
 0x3d4   :  { %15663 = vmatpush3.bf16.msra.mxu0 %v15660_v59  ;;  %16123 = vmatpush3.bf16.msra.mxu1 %v16120_v55  ;;  %v16128_v59 = vpack.c.bf16 %v17153_v13, %v17152_v31  ;;  %v22096_v55 = vld [vmem:[%s24118_s3 + $0x2b0] sm:$0xff]  ;;  %v17162_v13 = vunpack.i.l.bf16 %v21724_v54 }
 0x3d5   :  { %17585 = vrot.lane.b32.xlu0 %v24246_v53, %s17822_s16  ;;  %17550 = vrot.lane.b32.xlu1 %v24246_v53, %s17821_s15  ;;  %v15668_v42 = vpack.c.bf16 %v17213_v7, %v17212_v61  ;;  %v24261_v7 = vld [vmem:[#allocation14_spill] sm:$0xff]  ;;  %v22139_v61 = vld [vmem:[%s24118_s3 + $0x2c8] sm:$0xff] }
 0x3d6   :  { %15665 = vmatprep.subr.bf16.mxu0 %v15664_v1  ;;  %16125 = vmatprep.subr.bf16.mxu1 %v16124_v21  ;;  %v22081_v3 = vpop.permute.xlu1 %17300  ;;  %v22130_v31 = vpop.permute.xlu0 %17315 }
 0x3d7   :  { %15032 = vmatprep.mubr.msk.f32.mxu1 %vm2839_vm10, %v22066_v63  ;;  %14223 = vmatprep.mubr.msk.f32.mxu0 %vm2839_vm10, %v21846_v18  ;;  %v17157_v18 = vunpack.i.l.bf16 %v21554_v10 }
 0x3d8   :  { %14224 = vmatmul.mubr.msk.f32.gmra.mrb[34].mxu0 %vm2839_vm10, %v21855_v9  ;;  %15033 = vmatmul.mubr.msk.f32.gmra.mrb[40].mxu1 %vm2839_vm10, %v22079_v37  ;;  %v17218_v9 = vunpack.i.h.bf16 %v21878_v34 }
 0x3d9   :  { %15667 = vmatpush3.bf16.msra.mxu0 %v15664_v1  ;;  %16127 = vmatpush3.bf16.msra.mxu1 %v16124_v21  ;;  %v16132_v34 = vpack.c.bf16 %v17158_v43, %v17157_v18  ;;  %v22124_v1 = vld [vmem:[%s24118_s3 + $0x2c0] sm:$0xff]  ;;  %v17163_v21 = vunpack.i.h.bf16 %v21724_v54  ;;  %v17168_v43 = vunpack.i.h.bf16 %v21579_v46  ;;  %v17167_v18 = vunpack.i.l.bf16 %v21579_v46 }
 0x3da   :  { %17595 = vrot.lane.b32.xlu0 %v24242_v8, %s17823_s17  ;;  %17560 = vrot.lane.b32.xlu1 %v24250_v32, %s17821_s15  ;;  %v22111_v38 = vpop.permute.xlu1 %17310  ;;  %v15672_v10 = vpack.c.bf16 %v17218_v9, %v17217_v48  ;;  %v24262_v9 = vld [vmem:[#allocation16_spill] sm:$0xff]  ;;  %v22167_v48 = vld [vmem:[%s24118_s3 + $0x2d8] sm:$0xff] }
 0x3db   :  { %15669 = vmatprep.subr.bf16.mxu0 %v15668_v42  ;;  %16129 = vmatprep.subr.bf16.mxu1 %v16128_v59 }
 0x3dc   :  { %15035 = vmatprep.mubr.msk.f32.mxu1 %vm2839_vm10, %v22096_v55  ;;  %14242 = vmatprep.mubr.msk.f32.mxu0 %vm2839_vm10, %v21876_v22  ;;  %v17233_v22 = vunpack.i.h.bf16 %v21902_v25 }
 0x3dd   :  { %14243 = vmatmul.mubr.msk.f32.vlgmr.msra.gmra.mrb[28].mxu0 %vm2839_vm10, %v21887_v33  ;;  %15036 = vmatmul.mubr.msk.f32.gmra.mrb[42].mxu1 %vm2839_vm10, %v22109_v35  ;;  %v17232_v33 = vunpack.i.l.bf16 %v21902_v25  ;;  %v16136_v25 = vpack.c.bf16 %v17163_v21, %v17162_v13  ;;  %v22184_v21 = vld [vmem:[%s24118_s3 + $0x2e0] sm:$0xff]  ;;  %v17183_v13 = vunpack.i.h.bf16 %v21620_v45 }
 0x3de   :  { %15671 = vmatpush3.bf16.msra.mxu0 %v15668_v42  ;;  %16131 = vmatpush3.bf16.msra.mxu1 %v16128_v59  ;;  %v22141_v42 = vpop.permute.xlu1 %17320  ;;  %v22154_v59 = vld [vmem:[%s24118_s3 + $0x2d0] sm:$0xff] }
 0x3df   :  { %17605 = vrot.lane.b32.xlu0 %v24261_v7, %s17819_s5  ;;  %17570 = vrot.lane.b32.xlu1 %v24242_v8, %s17822_s16  ;;  %v15676_v54 = vpack.c.bf16 %v17233_v22, %v17232_v33  ;;  %v17182_v22 = vunpack.i.l.bf16 %v21620_v45  ;;  %v24263_v33 = vld [vmem:[#allocation18_spill] sm:$0xff] }
 0x3e0   :  { %15673 = vmatprep.subr.bf16.mxu0 %v15672_v10  ;;  %16133 = vmatprep.subr.bf16.mxu1 %v16132_v34 }
 0x3e1   :  { %15054 = vmatprep.mubr.msk.f32.mxu1 %vm2839_vm10, %v22124_v1  ;;  %14245 = vmatprep.mubr.msk.f32.mxu0 %vm2839_vm10, %v21912_v60  ;;  %v17243_v60 = vunpack.i.h.bf16 %v21928_v30 }
 0x3e2   :  { %14246 = vmatmul.mubr.msk.f32.gmra.mrb[30].mxu0 %vm2839_vm10, %v21921_v56  ;;  %15055 = vmatmul.mubr.msk.f32.vlgmr.msra.gmra.mrb[36].mxu1 %vm2839_vm10, %v22139_v61  ;;  %v17242_v56 = vunpack.i.l.bf16 %v21928_v30  ;;  %v22171_v46 = vpop.permute.xlu1 %17325 }
 0x3e3   :  { %15675 = vmatpush3.bf16.msra.mxu0 %v15672_v10  ;;  %16135 = vmatpush3.bf16.msra.mxu1 %v16132_v34  ;;  %v22169_v10 = vpop.permute.xlu0 %17345  ;;  %v16140_v34 = vpack.c.bf16 %v17168_v43, %v17167_v18  ;;  %v16144_v43 = vpack.c.bf16 %v17183_v13, %v17182_v22  ;;  %v22214_v18 = vld [vmem:[%s24118_s3 + $0x2f0] sm:$0xff]  ;;  %v22244_v22 = vld [vmem:[%s24118_s3 + $0x300] sm:$0xff] }
 0x3e4   :  { %17615 = vrot.lane.b32.xlu0 %v24262_v9, %s17819_s5  ;;  %17580 = vrot.lane.b32.xlu1 %v24243_v4, %s17822_s16  ;;  %v15680_v30 = vpack.c.bf16 %v17243_v60, %v17242_v56  ;;  %v17188_v60 = vunpack.i.h.bf16 %v21642_v47  ;;  %v17258_v56 = vunpack.i.h.bf16 %v21989_v40 }
 0x3e5   :  { %15677 = vmatprep.subr.bf16.mxu0 %v15676_v54  ;;  %16137 = vmatprep.subr.bf16.mxu1 %v16136_v25 }
 0x3e6   :  { %15057 = vmatprep.mubr.msk.f32.mxu1 %vm2839_vm10, %v22154_v59  ;;  %14248 = vmatprep.mubr.msk.f32.mxu0 %vm2839_vm10, %v21944_v19  ;;  %v17253_v19 = vunpack.i.h.bf16 %v21960_v52  ;;  %v22205_v45 = vpop.permute.xlu1 %17330 }
 0x3e7   :  { %14249 = vmatmul.mubr.msk.f32.gmra.mrb[32].mxu0 %vm2839_vm10, %v21957_v58  ;;  %15058 = vmatmul.mubr.msk.f32.gmra.mrb[38].mxu1 %vm2839_vm10, %v22167_v48  ;;  %v17252_v58 = vunpack.i.l.bf16 %v21960_v52 }
 0x3e8   :  { %15679 = vmatpush3.bf16.msra.mxu0 %v15676_v54  ;;  %16139 = vmatpush3.bf16.msra.mxu1 %v16136_v25  ;;  %v22197_v54 = vld [vmem:[%s24118_s3 + $0x2e8] sm:$0xff]  ;;  %v22199_v25 = vpop.permute.xlu0 %17350 }
 0x3e9   :  { %17625 = vrot.lane.b32.xlu0 %v24263_v33, %s17819_s5  ;;  %17590 = vrot.lane.b32.xlu1 %v24250_v32, %s17822_s16  ;;  %24264 = vst [vmem:[#allocation24_spill] sm:$0xff] %v22199_v25  ;;  %v15684_v52 = vpack.c.bf16 %v17253_v19, %v17252_v58  ;;  %v24265_v25 = vld [vmem:[#allocation46_spill] sm:$0xff]  ;;  %v17197_v19 = vunpack.i.l.bf16 %v21678_v15  ;;  %v17272_v58 = vunpack.i.l.bf16 %v22008_v0 }
 0x3ea   :  { %15681 = vmatprep.subr.bf16.mxu0 %v15680_v30  ;;  %16141 = vmatprep.subr.bf16.mxu1 %v16140_v34 }
 0x3eb   :  { %15060 = vmatprep.mubr.msk.f32.mxu1 %vm2839_vm10, %v22184_v21  ;;  %14251 = vmatprep.mubr.msk.f32.mxu0 %vm2839_vm10, %v21976_v20  ;;  %v17187_v20 = vunpack.i.l.bf16 %v21642_v47 }
 0x3ec   :  { %14252 = vmatmul.mubr.msk.f32.gmra.mrb[34].mxu0 %vm2839_vm10, %v21987_v11  ;;  %15061 = vmatmul.mubr.msk.f32.gmra.mrb[40].mxu1 %vm2839_vm10, %v22197_v54  ;;  %v17257_v11 = vunpack.i.l.bf16 %v21989_v40  ;;  %v22233_v47 = vpop.permute.xlu0 %17355  ;;  %v22239_v40 = vpop.permute.xlu1 %17335 }
 0x3ed   :  { %15683 = vmatpush3.bf16.msra.mxu0 %v15680_v30  ;;  %16143 = vmatpush3.bf16.msra.mxu1 %v16140_v34  ;;  %v22227_v30 = vld [vmem:[%s24118_s3 + $0x2f8] sm:$0xff]  ;;  %v16148_v13 = vpack.c.bf16 %v17188_v60, %v17187_v20  ;;  %v17283_v20 = vunpack.i.h.bf16 %v22031_v2 }
 0x3ee   :  { %17635 = vrot.lane.b32.xlu0 %v24265_v25, %s17819_s5  ;;  %17600 = vrot.lane.b32.xlu1 %v24243_v4, %s17823_s17  ;;  %v15688_v34 = vpack.c.bf16 %v17258_v56, %v17257_v11  ;;  %v17282_v56 = vunpack.i.l.bf16 %v22031_v2  ;;  %v22287_v11 = vld [vmem:[%s24118_s3 + $0x318] sm:$0xff]  ;;  %v17222_v2 = vunpack.i.l.bf16 %v21761_v62 }
 0x3ef   :  { %15685 = vmatprep.subr.bf16.mxu0 %v15684_v52  ;;  %16145 = vmatprep.subr.bf16.mxu1 %v16144_v43 }
 0x3f0   :  { %15063 = vmatprep.mubr.msk.f32.mxu1 %vm2839_vm10, %v22214_v18  ;;  %14270 = vmatprep.mubr.msk.f32.mxu0 %vm2839_vm10, %v22006_v27  ;;  %v17198_v27 = vunpack.i.h.bf16 %v21678_v15  ;;  %v22267_v15 = vpop.permute.xlu0 %17360  ;;  %v22274_v60 = vpop.permute.xlu1 %17340 }
 0x3f1   :  { %14271 = vmatmul.mubr.msk.f32.vlgmr.msra.gmra.mrb[28].mxu0 %vm2839_vm10, %v22019_v16  ;;  %15064 = vmatmul.mubr.msk.f32.gmra.mrb[42].mxu1 %vm2839_vm10, %v22227_v30  ;;  %v17273_v16 = vunpack.i.h.bf16 %v22008_v0 }
 0x3f2   :  { %15687 = vmatpush3.bf16.msra.mxu0 %v15684_v52  ;;  %16147 = vmatpush3.bf16.msra.mxu1 %v16144_v43  ;;  %v22257_v52 = vld [vmem:[%s24118_s3 + $0x308] sm:$0xff]  ;;  %v22272_v43 = vld [vmem:[%s24118_s3 + $0x310] sm:$0xff] }
 0x3f3   :  { %17645 = vrot.lane.b32.xlu0 %v24261_v7, %s17820_s30  ;;  %17610 = vrot.lane.b32.xlu1 %v24246_v53, %s17823_s17  ;;  %v15692_v0 = vpack.c.bf16 %v17273_v16, %v17272_v58  ;;  %v16152_v7 = vpack.c.bf16 %v17198_v27, %v17197_v19  ;;  %v17227_v16 = vunpack.i.l.bf16 %v21794_v51  ;;  %v17303_v58 = vunpack.i.h.bf16 %v22081_v3 }
 0x3f4   :  { %15689 = vmatprep.subr.bf16.mxu0 %v15688_v34  ;;  %16149 = vmatprep.subr.bf16.mxu1 %v16148_v13  ;;  %v22306_v27 = vpop.permute.xlu0 %17365  ;;  %v22317_v19 = vpop.permute.xlu1 %17370 }
 0x3f5   :  { %15082 = vmatprep.mubr.msk.f32.mxu1 %vm2839_vm10, %v22244_v22  ;;  %14273 = vmatprep.mubr.msk.f32.mxu0 %vm2839_vm10, %v22038_v5  ;;  %v17208_v5 = vunpack.i.h.bf16 %v21715_v17 }
 0x3f6   :  { %14274 = vmatmul.mubr.msk.f32.gmra.mrb[30].mxu0 %vm2839_vm10, %v22049_v6  ;;  %15083 = vmatmul.mubr.msk.f32.vlgmr.msra.gmra.mrb[36].mxu1 %vm2839_vm10, %v22257_v52  ;;  %v17207_v6 = vunpack.i.l.bf16 %v21715_v17  ;;  %v17223_v17 = vunpack.i.h.bf16 %v21761_v62  ;;  %v22315_v62 = vld [vmem:[%s24118_s3 + $0x328] sm:$0xff] }
 0x3f7   :  { %15691 = vmatpush3.bf16.msra.mxu0 %v15688_v34  ;;  %16151 = vmatpush3.bf16.msra.mxu1 %v16148_v13  ;;  %v22302_v13 = vld [vmem:[%s24118_s3 + $0x320] sm:$0xff] }
 0x3f8   :  { %17655 = vrot.lane.b32.xlu0 %v24262_v9, %s17820_s30  ;;  %17620 = vrot.lane.b32.xlu1 %v24250_v32, %s17823_s17  ;;  %v15696_v9 = vpack.c.bf16 %v17283_v20, %v17282_v56  ;;  %v16156_v34 = vpack.c.bf16 %v17208_v5, %v17207_v6  ;;  %v22360_v6 = vld [vmem:[%s24118_s3 + $0x340] sm:$0xff]  ;;  %v17238_v20 = vunpack.i.h.bf16 %v21831_v12  ;;  %v17237_v56 = vunpack.i.l.bf16 %v21831_v12  ;;  %s17833_s17 = smov 24  }
 0x3f9   :  { %15693 = vmatprep.subr.bf16.mxu0 %v15692_v0  ;;  %16153 = vmatprep.subr.bf16.mxu1 %v16152_v7 }
 0x3fa   :  { %15085 = vmatprep.mubr.msk.f32.mxu1 %vm2839_vm10, %v22272_v43  ;;  %14276 = vmatprep.mubr.msk.f32.mxu0 %vm2839_vm10, %v22066_v63  ;;  %v17293_v63 = vunpack.i.h.bf16 %v22055_v57 }
 0x3fb   :  { %14277 = vmatmul.mubr.msk.f32.gmra.mrb[32].mxu0 %vm2839_vm10, %v22079_v37  ;;  %15086 = vmatmul.mubr.msk.f32.gmra.mrb[38].mxu1 %vm2839_vm10, %v22287_v11  ;;  %v17292_v37 = vunpack.i.l.bf16 %v22055_v57  ;;  %v17228_v57 = vunpack.i.h.bf16 %v21794_v51  ;;  %v22343_v51 = vld [vmem:[%s24118_s3 + $0x338] sm:$0xff] }
 0x3fc   :  { %15695 = vmatpush3.bf16.msra.mxu0 %v15692_v0  ;;  %16155 = vmatpush3.bf16.msra.mxu1 %v16152_v7  ;;  %v17302_v0 = vunpack.i.l.bf16 %v22081_v3  ;;  %v22345_v3 = vpop.permute.xlu0 %17375 }
 0x3fd   :  { %17665 = vrot.lane.b32.xlu0 %v24263_v33, %s17820_s30  ;;  %17630 = vrot.lane.b32.xlu1 %v24242_v8, %s17824_s18  ;;  %v16160_v33 = vpack.c.bf16 %v17223_v17, %v17222_v2  ;;  %v15700_v7 = vpack.c.bf16 %v17293_v63, %v17292_v37  ;;  %v16164_v5 = vpack.c.bf16 %v17228_v57, %v17227_v16  ;;  %v17308_v17 = vunpack.i.h.bf16 %v22091_v23  ;;  %v22390_v37 = vld [vmem:[%s24118_s3 + $0x350] sm:$0xff]  ;;  %v22414_v16 = vld [vmem:[%s24118_s3 + $0x360] sm:$0xff] }
 0x3fe   :  { %15697 = vmatprep.subr.bf16.mxu0 %v15696_v9  ;;  %16157 = vmatprep.subr.bf16.mxu1 %v16156_v34  ;;  %v17313_v2 = vunpack.i.h.bf16 %v22111_v38  ;;  %v16168_v63 = vpack.c.bf16 %v17238_v20, %v17237_v56  ;;  %v17247_v57 = vunpack.i.l.bf16 %v21868_v24  ;;  %v17323_v20 = vunpack.i.h.bf16 %v22141_v42 }
 0x3ff   :  { %15088 = vmatprep.mubr.msk.f32.mxu1 %vm2839_vm10, %v22302_v13  ;;  %14279 = vmatprep.mubr.msk.f32.mxu0 %vm2839_vm10, %v22096_v55  ;;  %v22334_v55 = vld [vmem:[%s24118_s3 + $0x330] sm:$0xff] }
 0x400   :  { %14280 = vmatmul.mubr.msk.f32.gmra.mrb[34].mxu0 %vm2839_vm10, %v22109_v35  ;;  %15089 = vmatmul.mubr.msk.f32.gmra.mrb[40].mxu1 %vm2839_vm10, %v22315_v62  ;;  %v22347_v35 = vpop.permute.xlu1 %17380  ;;  %v22375_v12 = vpop.permute.xlu0 %17385 }
 0x401   :  { %15699 = vmatpush3.bf16.msra.mxu0 %v15696_v9  ;;  %16159 = vmatpush3.bf16.msra.mxu1 %v16156_v34  ;;  %v17312_v9 = vunpack.i.l.bf16 %v22111_v38  ;;  %v22399_v38 = vld [vmem:[%s24118_s3 + $0x358] sm:$0xff] }
 0x402   :  { %17675 = vrot.lane.b32.xlu0 %v24265_v25, %s17820_s30  ;;  %17640 = vrot.lane.b32.xlu1 %v24243_v4, %s17824_s18  ;;  %v15704_v25 = vpack.c.bf16 %v17303_v58, %v17302_v0  ;;  %v17318_v58 = vunpack.i.h.bf16 %v22130_v31 }
 0x403   :  { %15701 = vmatprep.subr.bf16.mxu0 %v15700_v7  ;;  %16161 = vmatprep.subr.bf16.mxu1 %v16160_v33 }
 0x404   :  { %15091 = vmatprep.mubr.msk.f32.mxu1 %vm2839_vm10, %v22334_v55  ;;  %14298 = vmatprep.mubr.msk.f32.mxu0 %vm2839_vm10, %v22124_v1  ;;  %v17307_v1 = vunpack.i.l.bf16 %v22091_v23  ;;  %v22381_v23 = vpop.permute.xlu1 %17390  ;;  %v22418_v0 = vpop.permute.xlu0 %17400 }
 0x405   :  { %14299 = vmatmul.mubr.msk.f32.vlgmr.msra.gmra.mrb[28].mxu0 %vm2839_vm10, %v22139_v61  ;;  %15092 = vmatmul.mubr.msk.f32.gmra.mrb[42].mxu1 %vm2839_vm10, %v22343_v51  ;;  %v22369_v61 = vld [vmem:[%s24118_s3 + $0x348] sm:$0xff] }
 0x406   :  { %15703 = vmatpush3.bf16.msra.mxu0 %v15700_v7  ;;  %16163 = vmatpush3.bf16.msra.mxu1 %v16160_v33  ;;  %v15708_v34 = vpack.c.bf16 %v17308_v17, %v17307_v1  ;;  %v15712_v33 = vpack.c.bf16 %v17313_v2, %v17312_v9  ;;  %v22444_v17 = vld [vmem:[%s24118_s3 + $0x370] sm:$0xff]  ;;  %v22468_v1 = vld [vmem:[%s24118_s3 + $0x380] sm:$0xff]  ;;  %v17278_v2 = vunpack.i.h.bf16 %v21991_v14  ;;  %v17277_v9 = vunpack.i.l.bf16 %v21991_v14 }
 0x407   :  { %17650 = vrot.lane.b32.xlu1 %v24246_v53, %s17824_s18  ;;  %15705 = vmatprep.subr.bf16.mxu0 %v15704_v25 }
 0x408   :  { %16165 = vmatprep.subr.bf16.mxu1 %v16164_v5  ;;  %15110 = vmatprep.mubr.msk.f32.mxu1 %vm2839_vm10, %v22360_v6  ;;  %v22425_v7 = vpop.permute.xlu1 %17395 }
 0x409   :  { %14301 = vmatprep.mubr.msk.f32.mxu0 %vm2839_vm10, %v22154_v59  ;;  %15111 = vmatmul.mubr.msk.f32.vlgmr.msra.gmra.mrb[36].mxu1 %vm2839_vm10, %v22369_v61  ;;  %v17248_v59 = vunpack.i.h.bf16 %v21868_v24  ;;  %v17262_v24 = vunpack.i.l.bf16 %v21907_v41 }
 0x40a   :  { %14302 = vmatmul.mubr.msk.f32.gmra.mrb[30].mxu0 %vm2839_vm10, %v22167_v48  ;;  %16167 = vmatpush3.bf16.msra.mxu1 %v16164_v5  ;;  %v17263_v48 = vunpack.i.h.bf16 %v21907_v41  ;;  %v17267_v5 = vunpack.i.l.bf16 %v21952_v39 }
 0x40b   :  { %15707 = vmatpush3.bf16.msra.mxu0 %v15704_v25  ;;  %17660 = vrot.lane.b32.xlu1 %v24250_v32, %s17824_s18  ;;  %v16172_v41 = vpack.c.bf16 %v17248_v59, %v17247_v57  ;;  %v22496_v59 = vld [vmem:[%s24118_s3 + $0x390] sm:$0xff]  ;;  %v17288_v57 = vunpack.i.h.bf16 %v22021_v29 }
 0x40c   :  { %15709 = vmatprep.subr.bf16.mxu0 %v15708_v34  ;;  %16169 = vmatprep.subr.bf16.mxu1 %v16168_v63  ;;  %v16176_v25 = vpack.c.bf16 %v17263_v48, %v17262_v24  ;;  %v17333_v48 = vunpack.i.h.bf16 %v22205_v45  ;;  %v17332_v24 = vunpack.i.l.bf16 %v22205_v45 }
 0x40d   :  { %15113 = vmatprep.mubr.msk.f32.mxu1 %vm2839_vm10, %v22390_v37  ;;  %14304 = vmatprep.mubr.msk.f32.mxu0 %vm2839_vm10, %v22184_v21  ;;  %v17317_v21 = vunpack.i.l.bf16 %v22130_v31  ;;  %v17268_v31 = vunpack.i.h.bf16 %v21952_v39  ;;  %v22451_v39 = vld [vmem:[%s24118_s3 + $0x378] sm:$0xff] }
 0x40e   :  { %14305 = vmatmul.mubr.msk.f32.gmra.mrb[32].mxu0 %vm2839_vm10, %v22197_v54  ;;  %15114 = vmatmul.mubr.msk.f32.gmra.mrb[38].mxu1 %vm2839_vm10, %v22399_v38  ;;  %v22423_v54 = vld [vmem:[%s24118_s3 + $0x368] sm:$0xff]  ;;  %v15728_v45 = vpack.c.bf16 %v17333_v48, %v17332_v24  ;;  %v17397_v24 = vunpack.i.l.bf16 %v22425_v7 }
 0x40f   :  { %15711 = vmatpush3.bf16.msra.mxu0 %v15708_v34  ;;  %16171 = vmatpush3.bf16.msra.mxu1 %v16168_v63  ;;  %v15716_v56 = vpack.c.bf16 %v17318_v58, %v17317_v21  ;;  %v17328_v34 = vunpack.i.h.bf16 %v22171_v46  ;;  %v16184_v63 = vpack.c.bf16 %v17278_v2, %v17277_v9  ;;  %v22522_v21 = vld [vmem:[%s24118_s3 + $0x3a0] sm:$0xff]  ;;  %v17372_v2 = vunpack.i.l.bf16 %v22317_v19 }
 0x410   :  { %17670 = vrot.lane.b32.xlu1 %v24242_v8, %s17825_s21  ;;  %15713 = vmatprep.subr.bf16.mxu0 %v15712_v33  ;;  %v17322_v8 = vunpack.i.l.bf16 %v22141_v42  ;;  %v22453_v42 = vpop.permute.xlu0 %17405 }
 0x411   :  { %16173 = vmatprep.subr.bf16.mxu1 %v16172_v41  ;;  %15116 = vmatprep.mubr.msk.f32.mxu1 %vm2839_vm10, %v22414_v16 }
 0x412   :  { %14307 = vmatprep.mubr.msk.f32.mxu0 %vm2839_vm10, %v22214_v18  ;;  %15117 = vmatmul.mubr.msk.f32.gmra.mrb[40].mxu1 %vm2839_vm10, %v22423_v54  ;;  %v22455_v18 = vpop.permute.xlu1 %17410 }
 0x413   :  { %14308 = vmatmul.mubr.msk.f32.gmra.mrb[34].mxu0 %vm2839_vm10, %v22227_v30  ;;  %16175 = vmatpush3.bf16.msra.mxu1 %v16172_v41  ;;  %v16180_v30 = vpack.c.bf16 %v17268_v31, %v17267_v5  ;;  %v17338_v31 = vunpack.i.h.bf16 %v22239_v40  ;;  %v24267_v5 = vld [vmem:[#allocation2_spill] sm:$0xff] }
 0x414   :  { %15715 = vmatpush3.bf16.msra.mxu0 %v15712_v33  ;;  %17680 = vrot.lane.b32.xlu1 %v24243_v4, %s17825_s21  ;;  %v15720_v4 = vpack.c.bf16 %v17323_v20, %v17322_v8  ;;  %v22483_v14 = vpop.permute.xlu0 %17415  ;;  %v24266_v33 = vld [vmem:[#allocation37_spill] sm:$0xff]  ;;  %v22537_v20 = vld [vmem:[%s24118_s3 + $0x3a8] sm:$0xff]  ;;  %v17343_v8 = vunpack.i.h.bf16 %v22274_v60 }
 0x415   :  { %15717 = vmatprep.subr.bf16.mxu0 %v15716_v56  ;;  %16177 = vmatprep.subr.bf16.mxu1 %v16176_v25 }
 0x416   :  { %15119 = vmatprep.mubr.msk.f32.mxu1 %vm2839_vm10, %v22444_v17  ;;  %14326 = vmatprep.mubr.msk.f32.mxu0 %vm2839_vm10, %v22244_v22  ;;  %v17327_v22 = vunpack.i.l.bf16 %v22171_v46  ;;  %v22489_v46 = vpop.permute.xlu1 %17420 }
 0x417   :  { %14327 = vmatmul.mubr.msk.f32.vlgmr.msra.gmra.mrb[28].mxu0 %vm2839_vm10, %v22257_v52  ;;  %15120 = vmatmul.mubr.msk.f32.gmra.mrb[42].mxu1 %vm2839_vm10, %v22451_v39  ;;  %v22477_v52 = vld [vmem:[%s24118_s3 + $0x388] sm:$0xff] }
 0x418   :  { %15719 = vmatpush3.bf16.msra.mxu0 %v15716_v56  ;;  %16179 = vmatpush3.bf16.msra.mxu1 %v16176_v25  ;;  %v17337_v25 = vunpack.i.l.bf16 %v22239_v40  ;;  %v22550_v40 = vld [vmem:[%s24118_s3 + $0x3b0] sm:$0xff]  ;;  %v17342_v56 = vunpack.i.l.bf16 %v22274_v60  ;;  %v17373_v60 = vunpack.i.h.bf16 %v22317_v19 }
 0x419   :  { %17690 = vrot.lane.b32.xlu1 %v24250_v32, %s17825_s21  ;;  %15721 = vmatprep.subr.bf16.mxu0 %v15720_v4  ;;  %v15724_v32 = vpack.c.bf16 %v17328_v34, %v17327_v22  ;;  %v22580_v34 = vld [vmem:[%s24118_s3 + $0x3c0] sm:$0xff]  ;;  %v17383_v22 = vunpack.i.h.bf16 %v22347_v35 }
 0x41a   :  { %16181 = vmatprep.subr.bf16.mxu1 %v16180_v30  ;;  %15138 = vmatprep.mubr.msk.f32.mxu1 %vm2839_vm10, %v22468_v1  ;;  %v22524_v41 = vpop.permute.xlu1 %17430  ;;  %v15736_v9 = vpack.c.bf16 %v17343_v8, %v17342_v56  ;;  %v17422_v56 = vunpack.i.l.bf16 %v22489_v46 }
 0x41b   :  { %14329 = vmatprep.mubr.msk.f32.mxu0 %vm2839_vm10, %v22272_v43  ;;  %15139 = vmatmul.mubr.msk.f32.vlgmr.msra.gmra.mrb[36].mxu1 %vm2839_vm10, %v22477_v52  ;;  %v17287_v43 = vunpack.i.l.bf16 %v22021_v29  ;;  %v22517_v29 = vpop.permute.xlu0 %17425 }
 0x41c   :  { %14330 = vmatmul.mubr.msk.f32.gmra.mrb[30].mxu0 %vm2839_vm10, %v22287_v11  ;;  %16183 = vmatpush3.bf16.msra.mxu1 %v16180_v30  ;;  %v22507_v11 = vld [vmem:[%s24118_s3 + $0x398] sm:$0xff] }
 0x41d   :  { %15723 = vmatpush3.bf16.msra.mxu0 %v15720_v4  ;;  %17700 = vrot.lane.b32.xlu1 %v24266_v33, %s17819_s5  ;;  %v16188_v58 = vpack.c.bf16 %v17288_v57, %v17287_v43  ;;  %v22565_v30 = vld [vmem:[%s24118_s3 + $0x3b8] sm:$0xff] }
 0x41e   :  { %15725 = vmatprep.subr.bf16.mxu0 %v15724_v32  ;;  %16185 = vmatprep.subr.bf16.mxu1 %v16184_v63  ;;  %v22560_v4 = vpop.permute.xlu1 %17440 }
 0x41f   :  { %15141 = vmatprep.mubr.msk.f32.mxu1 %vm2839_vm10, %v22496_v59  ;;  %14332 = vmatprep.mubr.msk.f32.mxu0 %vm2839_vm10, %v22302_v13  ;;  %v17298_v13 = vunpack.i.h.bf16 %v22057_v28 }
 0x420   :  { %14333 = vmatmul.mubr.msk.f32.gmra.mrb[32].mxu0 %vm2839_vm10, %v22315_v62  ;;  %15142 = vmatmul.mubr.msk.f32.gmra.mrb[38].mxu1 %vm2839_vm10, %v22507_v11  ;;  %v17297_v62 = vunpack.i.l.bf16 %v22057_v28 }
 0x421   :  { %15727 = vmatpush3.bf16.msra.mxu0 %v15724_v32  ;;  %16187 = vmatpush3.bf16.msra.mxu1 %v16184_v63  ;;  %v17382_v32 = vunpack.i.l.bf16 %v22347_v35  ;;  %v15740_v63 = vpack.c.bf16 %v17373_v60, %v17372_v2  ;;  %v22617_v35 = vld [vmem:[%s24118_s3 + $0x3d8] sm:$0xff]  ;;  %v22736_v60 = vld [vmem:[%s24118_s3 + $0x420] sm:$0xff]  ;;  %v17363_v2 = vunpack.i.h.bf16 %v22267_v15 }
 0x422   :  { %17685 = vrot.lane.b32.xlu0 %v24246_v53, %s17825_s21  ;;  %17710 = vrot.lane.b32.xlu1 %v24267_v5, %s17819_s5  ;;  %v15732_v53 = vpack.c.bf16 %v17338_v31, %v17337_v25  ;;  %v16192_v28 = vpack.c.bf16 %v17298_v13, %v17297_v62  ;;  %v17413_v31 = vunpack.i.h.bf16 %v22455_v18  ;;  %v17412_v25 = vunpack.i.l.bf16 %v22455_v18 }
 0x423   :  { %15729 = vmatprep.subr.bf16.mxu0 %v15728_v45  ;;  %16189 = vmatprep.subr.bf16.mxu1 %v16188_v58  ;;  %v15744_v48 = vpack.c.bf16 %v17383_v22, %v17382_v32  ;;  %v17358_v18 = vunpack.i.h.bf16 %v22233_v47  ;;  %v17367_v32 = vunpack.i.l.bf16 %v22306_v27 }
 0x424   :  { %15144 = vmatprep.mubr.msk.f32.mxu1 %vm2839_vm10, %v22522_v21  ;;  %14335 = vmatprep.mubr.msk.f32.mxu0 %vm2839_vm10, %v22334_v55  ;;  %v22554_v55 = vpop.permute.xlu0 %17435 }
 0x425   :  { %14336 = vmatmul.mubr.msk.f32.gmra.mrb[34].mxu0 %vm2839_vm10, %v22343_v51  ;;  %15145 = vmatmul.mubr.msk.f32.gmra.mrb[40].mxu1 %vm2839_vm10, %v22537_v20  ;;  %v24268_v51 = vld [vmem:[#allocation32_spill] sm:$0xff] }
 0x426   :  { %15731 = vmatpush3.bf16.msra.mxu0 %v15728_v45  ;;  %16191 = vmatpush3.bf16.msra.mxu1 %v16188_v58  ;;  %v17347_v45 = vunpack.i.l.bf16 %v22169_v10 }
 0x427   :  { %17695 = vrot.lane.b32.xlu0 %v24268_v51, %s17819_s5  ;;  %17720 = vrot.lane.b32.xlu1 %v24266_v33, %s17820_s30  ;;  %v17348_v33 = vunpack.i.h.bf16 %v22169_v10  ;;  %v22671_v10 = vld [vmem:[%s24118_s3 + $0x3f8] sm:$0xff] }
 0x428   :  { %15733 = vmatprep.subr.bf16.mxu0 %v15732_v53  ;;  %16193 = vmatprep.subr.bf16.mxu1 %v16192_v28  ;;  %v22591_v19 = vpop.permute.xlu0 %17445 }
 0x429   :  { %15147 = vmatprep.mubr.msk.f32.mxu1 %vm2839_vm10, %v22550_v40  ;;  %14354 = vmatprep.mubr.msk.f32.mxu0 %vm2839_vm10, %v22360_v6  ;;  %v22589_v6 = vld [vmem:[%s24118_s3 + $0x3c8] sm:$0xff] }
 0x42a   :  { %14355 = vmatmul.mubr.msk.f32.vlgmr.msra.gmra.mrb[28].mxu0 %vm2839_vm10, %v22369_v61  ;;  %15148 = vmatmul.mubr.msk.f32.gmra.mrb[42].mxu1 %vm2839_vm10, %v22565_v30  ;;  %v22594_v61 = vpop.permute.xlu1 %17450 }
 0x42b   :  { %15735 = vmatpush3.bf16.msra.mxu0 %v15732_v53  ;;  %16195 = vmatpush3.bf16.msra.mxu1 %v16192_v28  ;;  %v17357_v53 = vunpack.i.l.bf16 %v22233_v47 }
 0x42c   :  { %17730 = vrot.lane.b32.xlu1 %v24267_v5, %s17820_s30  ;;  %17705 = vrot.lane.b32.xlu0 %v21792_v50, %s17819_s5  ;;  %v22624_v57 = vpop.permute.xlu0 %17460  ;;  %v22689_v5 = vld [vmem:[%s24118_s3 + $0x400] sm:$0xff] }
 0x42d   :  { %15737 = vmatprep.subr.bf16.mxu0 %v15736_v9  ;;  %16197 = vmatprep.subr.bf16.mxu1 %v21218_v44 }
 0x42e   :  { %14357 = vmatprep.mubr.msk.f32.mxu0 %vm2839_vm10, %v22390_v37  ;;  %15166 = vmatprep.mubr.msk.f32.mxu1 %vm2839_vm10, %v22580_v34  ;;  %v22610_v37 = vld [vmem:[%s24118_s3 + $0x3d0] sm:$0xff]  ;;  %v22628_v43 = vpop.permute.xlu1 %17455 }
 0x42f   :  { %14358 = vmatmul.mubr.msk.f32.gmra.mrb[30].mxu0 %vm2839_vm10, %v22399_v38  ;;  %15167 = vmatmul.mubr.msk.f32.vlgmr.msra.gmra.mrb[36].mxu1 %vm2839_vm10, %v22589_v6  ;;  %v17392_v38 = vunpack.i.l.bf16 %v22381_v23 }
 0x430   :  { %15739 = vmatpush3.bf16.msra.mxu0 %v15736_v9  ;;  %16199 = vmatpush3.bf16.msra.mxu1 %v21218_v44  ;;  %v17393_v44 = vunpack.i.h.bf16 %v22381_v23  ;;  %v22643_v23 = vld [vmem:[%s24118_s3 + $0x3e8] sm:$0xff] }
 0x431   :  { %17715 = vrot.lane.b32.xlu0 %v24268_v51, %s17820_s30  ;;  %15741 = vmatprep.subr.bf16.mxu0 %v15740_v63  ;;  %v22716_v51 = vld [vmem:[%s24118_s3 + $0x410] sm:$0xff] }
 0x432   :  { %16201 = vmatprep.subr.bf16.mxu1 %v21251_v26  ;;  %14360 = vmatprep.mubr.msk.f32.mxu0 %vm2839_vm10, %v22414_v16  ;;  %v22637_v16 = vld [vmem:[%s24118_s3 + $0x3e0] sm:$0xff]  ;;  %v22665_v58 = vpop.permute.xlu1 %17470 }
 0x433   :  { %15169 = vmatprep.mubr.msk.f32.mxu1 %vm2839_vm10, %v22610_v37  ;;  %14361 = vmatmul.mubr.msk.f32.gmra.mrb[32].mxu0 %vm2839_vm10, %v22423_v54  ;;  %v17398_v54 = vunpack.i.h.bf16 %v22425_v7  ;;  %v22663_v7 = vpop.permute.xlu0 %17465 }
 0x434   :  { %15170 = vmatmul.mubr.msk.f32.gmra.mrb[38].mxu1 %vm2839_vm10, %v22617_v35  ;;  %15743 = vmatpush3.bf16.msra.mxu0 %v15740_v63  ;;  %v22762_v63 = vld [vmem:[%s24118_s3 + $0x430] sm:$0xff] }
 0x435   :  { %16203 = vmatpush3.bf16.msra.mxu1 %v21251_v26  ;;  %15745 = vmatprep.subr.bf16.mxu0 %v15744_v48  ;;  %v15748_v26 = vpack.c.bf16 %v17393_v44, %v17392_v38 }
 0x436   :  { %16205 = vmatprep.subr.bf16.mxu1 %v21298_v36  ;;  %14363 = vmatprep.mubr.msk.f32.mxu0 %vm2839_vm10, %v22444_v17  ;;  %v22661_v17 = vld [vmem:[%s24118_s3 + $0x3f0] sm:$0xff]  ;;  %v22703_v8 = vpop.permute.xlu1 %17480 }
 0x437   :  { %15172 = vmatprep.mubr.msk.f32.mxu1 %vm2839_vm10, %v22637_v16  ;;  %14364 = vmatmul.mubr.msk.f32.gmra.mrb[34].mxu0 %vm2839_vm10, %v22451_v39  ;;  %v24269_v39 = vld [vmem:[#allocation24_spill] sm:$0xff]  ;;  %v22701_v28 = vpop.permute.xlu0 %17475 }
 0x438   :  { %15173 = vmatmul.mubr.msk.f32.gmra.mrb[40].mxu1 %vm2839_vm10, %v22643_v23  ;;  %15747 = vmatpush3.bf16.msra.mxu0 %v15744_v48  ;;  %v17353_v13 = vunpack.i.h.bf16 %v24269_v39  ;;  %v17352_v62 = vunpack.i.l.bf16 %v24269_v39  ;;  %v17378_v48 = vunpack.i.h.bf16 %v22345_v3  ;;  %v22809_v39 = vld [vmem:[%s24118_s3 + $0x450] sm:$0xff] }
 0x439   :  { %16207 = vmatpush3.bf16.msra.mxu1 %v21298_v36  ;;  %15749 = vmatprep.subr.bf16.mxu0 %v15748_v26  ;;  %v15752_v36 = vpack.c.bf16 %v17398_v54, %v17397_v24  ;;  %v17377_v54 = vunpack.i.l.bf16 %v22345_v3  ;;  %v24271_v3 = vld [vmem:[#allocation22_spill] sm:$0xff] }
 0x43a   :  { %16209 = vmatprep.subr.bf16.mxu1 %v21339_v49  ;;  %14382 = vmatprep.mubr.msk.f32.mxu0 %vm2839_vm10, %v22468_v1  ;;  %v16212_v1 = vpack.c.bf16 %v17348_v33, %v17347_v45  ;;  %v16216_v47 = vpack.c.bf16 %v17353_v13, %v17352_v62  ;;  %v22742_v22 = vpop.permute.xlu1 %17490  ;;  %v17387_v33 = vunpack.i.l.bf16 %v22375_v12  ;;  %v17452_v62 = vunpack.i.l.bf16 %v22594_v61 }
 0x43b   :  { %15175 = vmatprep.mubr.msk.f32.mxu1 %vm2839_vm10, %v22661_v17  ;;  %14383 = vmatmul.mubr.msk.f32.vlgmr.msra.gmra.mrb[28].mxu0 %vm2839_vm10, %v22477_v52  ;;  %v22695_v52 = vld [vmem:[%s24118_s3 + $0x408] sm:$0xff]  ;;  %v22740_v9 = vpop.permute.xlu0 %17485  ;;  %v16232_v45 = vpack.c.bf16 %v17378_v48, %v17377_v54  ;;  %v17428_v48 = vunpack.i.h.bf16 %v22517_v29  ;;  %v17427_v54 = vunpack.i.l.bf16 %v22517_v29  ;;  %v17493_v29 = vunpack.i.h.bf16 %v22742_v22 }
 0x43c   :  { %15176 = vmatmul.mubr.msk.f32.gmra.mrb[42].mxu1 %vm2839_vm10, %v22671_v10  ;;  %15751 = vmatpush3.bf16.msra.mxu0 %v15748_v26  ;;  %v22793_v26 = vld [vmem:[%s24118_s3 + $0x448] sm:$0xff] }
 0x43d   :  { %16211 = vmatpush3.bf16.msra.mxu1 %v21339_v49  ;;  %15753 = vmatprep.subr.bf16.mxu0 %v15752_v36  ;;  %v17423_v49 = vunpack.i.h.bf16 %v22489_v46  ;;  %v16220_v46 = vpack.c.bf16 %v17358_v18, %v17357_v53  ;;  %v17457_v18 = vunpack.i.l.bf16 %v22628_v43 }
 0x43e   :  { %16213 = vmatprep.subr.bf16.mxu1 %v16212_v1  ;;  %14385 = vmatprep.mubr.msk.f32.mxu0 %vm2839_vm10, %v22496_v59  ;;  %v15756_v59 = vpack.c.bf16 %v17413_v31, %v17412_v25  ;;  %v22774_v38 = vpop.permute.xlu1 %17495  ;;  %v17403_v31 = vunpack.i.h.bf16 %v22418_v0  ;;  %v17402_v25 = vunpack.i.l.bf16 %v22418_v0  ;;  %v24273_v0 = vld [vmem:[#allocation8_spill] sm:$0xff] }
 0x43f   :  { %15194 = vmatprep.mubr.msk.f32.mxu1 %vm2839_vm10, %v22689_v5  ;;  %14386 = vmatmul.mubr.msk.f32.gmra.mrb[30].mxu0 %vm2839_vm10, %v22507_v11  ;;  %v22723_v11 = vld [vmem:[%s24118_s3 + $0x418] sm:$0xff] }
 0x440   :  { %15195 = vmatmul.mubr.msk.f32.vlgmr.msra.gmra.mrb[36].mxu1 %vm2839_vm10, %v22695_v52  ;;  %15755 = vmatpush3.bf16.msra.mxu0 %v15752_v36  ;;  %v17453_v36 = vunpack.i.h.bf16 %v22594_v61  ;;  %v22837_v61 = vld [vmem:[%s24118_s3 + $0x460] sm:$0xff] }
 0x441   :  { %16215 = vmatpush3.bf16.msra.mxu1 %v16212_v1  ;;  %17725 = vrot.lane.b32.xlu0 %v21792_v50, %s17820_s30  ;;  %v15760_v50 = vpack.c.bf16 %v17423_v49, %v17422_v56 }
 0x442   :  { %15757 = vmatprep.subr.bf16.mxu0 %v15756_v59  ;;  %16217 = vmatprep.subr.bf16.mxu1 %v16216_v47  ;;  %v22813_v13 = vpop.permute.xlu1 %17510  ;;  %v15780_v56 = vpack.c.bf16 %v17453_v36, %v17452_v62  ;;  %v22940_v36 = vld [vmem:[%s24118_s3 + $0x4a0] sm:$0xff]  ;;  %v22956_v62 = vld [vmem:[%s24118_s3 + $0x4b0] sm:$0xff] }
 0x443   :  { %14388 = vmatprep.mubr.msk.f32.mxu0 %vm2839_vm10, %v22522_v21  ;;  %15197 = vmatprep.mubr.msk.f32.mxu1 %vm2839_vm10, %v22716_v51  ;;  %v17362_v21 = vunpack.i.l.bf16 %v22267_v15  ;;  %v17368_v15 = vunpack.i.h.bf16 %v22306_v27  ;;  %v24270_v27 = vld [vmem:[#allocation21_spill] sm:$0xff] }
 0x444   :  { %14389 = vmatmul.mubr.msk.f32.gmra.mrb[32].mxu0 %vm2839_vm10, %v22537_v20  ;;  %15198 = vmatmul.mubr.msk.f32.gmra.mrb[38].mxu1 %vm2839_vm10, %v22723_v11  ;;  %v22747_v20 = vld [vmem:[%s24118_s3 + $0x428] sm:$0xff] }
 0x445   :  { %15759 = vmatpush3.bf16.msra.mxu0 %v15756_v59  ;;  %16219 = vmatpush3.bf16.msra.mxu1 %v16216_v47  ;;  %v16224_v44 = vpack.c.bf16 %v17363_v2, %v17362_v21  ;;  %v16228_v24 = vpack.c.bf16 %v17368_v15, %v17367_v32  ;;  %v17408_v59 = vunpack.i.h.bf16 %v22453_v42  ;;  %v17407_v47 = vunpack.i.l.bf16 %v22453_v42  ;;  %v22884_v21 = vld [vmem:[%s24118_s3 + $0x480] sm:$0xff]  ;;  %v22897_v32 = vld [vmem:[%s24118_s3 + $0x488] sm:$0xff] }
 0x446   :  { %15761 = vmatprep.subr.bf16.mxu0 %v15760_v50  ;;  %16221 = vmatprep.subr.bf16.mxu1 %v16220_v46  ;;  %v22850_v49 = vpop.permute.xlu1 %17520  ;;  %v17418_v42 = vunpack.i.h.bf16 %v22483_v14  ;;  %v17472_v2 = vunpack.i.l.bf16 %v22665_v58 }
 0x447   :  { %14391 = vmatprep.mubr.msk.f32.mxu0 %vm2839_vm10, %v22550_v40  ;;  %15200 = vmatprep.mubr.msk.f32.mxu1 %vm2839_vm10, %v22736_v60  ;;  %v22767_v40 = vld [vmem:[%s24118_s3 + $0x438] sm:$0xff] }
 0x448   :  { %14392 = vmatmul.mubr.msk.f32.gmra.mrb[34].mxu0 %vm2839_vm10, %v22565_v30  ;;  %15201 = vmatmul.mubr.msk.f32.gmra.mrb[40].mxu1 %vm2839_vm10, %v22747_v20  ;;  %v22772_v30 = vpop.permute.xlu0 %17500 }
 0x449   :  { %15763 = vmatpush3.bf16.msra.mxu0 %v15760_v50  ;;  %16223 = vmatpush3.bf16.msra.mxu1 %v16220_v46  ;;  %v22865_v50 = vld [vmem:[%s24118_s3 + $0x470] sm:$0xff]  ;;  %v17473_v46 = vunpack.i.h.bf16 %v22665_v58 }
 0x44a   :  { %15765 = vmatprep.subr.bf16.mxu0 %v24270_v27  ;;  %14410 = vmatprep.mubr.msk.f32.mxu0 %vm2839_vm10, %v22580_v34  ;;  %v22787_v34 = vld [vmem:[%s24118_s3 + $0x440] sm:$0xff]  ;;  %v22892_v58 = vpop.permute.xlu1 %17530 }
 0x44b   :  { %15203 = vmatprep.mubr.msk.f32.mxu1 %vm2839_vm10, %v22762_v63  ;;  %16225 = vmatprep.subr.bf16.mxu1 %v16224_v44 }
 0x44c   :  { %14411 = vmatmul.mubr.msk.f32.vlgmr.msra.gmra.mrb[28].mxu0 %vm2839_vm10, %v22589_v6  ;;  %15204 = vmatmul.mubr.msk.f32.gmra.mrb[42].mxu1 %vm2839_vm10, %v22767_v40  ;;  %v17388_v6 = vunpack.i.h.bf16 %v22375_v12  ;;  %v22819_v12 = vld [vmem:[%s24118_s3 + $0x458] sm:$0xff] }
 0x44d   :  { %15767 = vmatpush3.bf16.msra.mxu0 %v24270_v27  ;;  %16227 = vmatpush3.bf16.msra.mxu1 %v16224_v44  ;;  %v22906_v44 = vld [vmem:[%s24118_s3 + $0x490] sm:$0xff]  ;;  %v15788_v27 = vpack.c.bf16 %v17473_v46, %v17472_v2  ;;  %v17447_v46 = vunpack.i.l.bf16 %v22591_v19  ;;  %v17523_v2 = vunpack.i.h.bf16 %v22850_v49 }
 0x44e   :  { %15769 = vmatprep.subr.bf16.mxu0 %v24271_v3  ;;  %16229 = vmatprep.subr.bf16.mxu1 %v16228_v24  ;;  %v16236_v1 = vpack.c.bf16 %v17388_v6, %v17387_v33  ;;  %v17433_v33 = vunpack.i.h.bf16 %v22524_v41 }
 0x44f   :  { %14413 = vmatprep.mubr.msk.f32.mxu0 %vm2839_vm10, %v22610_v37  ;;  %15222 = vmatprep.mubr.msk.f32.mxu1 %vm2839_vm10, %v22787_v34  ;;  %v22811_v37 = vpop.permute.xlu0 %17505 }
 0x450   :  { %14414 = vmatmul.mubr.msk.f32.gmra.mrb[30].mxu0 %vm2839_vm10, %v22617_v35  ;;  %15223 = vmatmul.mubr.msk.f32.vlgmr.msra.gmra.mrb[36].mxu1 %vm2839_vm10, %v22793_v26  ;;  %v24272_v35 = vld [vmem:[#allocation23_spill] sm:$0xff] }
 0x451   :  { %15771 = vmatpush3.bf16.msra.mxu0 %v24271_v3  ;;  %16231 = vmatpush3.bf16.msra.mxu1 %v16228_v24  ;;  %v17483_v24 = vunpack.i.h.bf16 %v22703_v8  ;;  %v17482_v3 = vunpack.i.l.bf16 %v22703_v8  ;;  %v17492_v8 = vunpack.i.l.bf16 %v22742_v22  ;;  %v16252_v22 = vpack.c.bf16 %v17428_v48, %v17427_v54 }
 0x452   :  { %15773 = vmatprep.subr.bf16.mxu0 %v24272_v35  ;;  %16233 = vmatprep.subr.bf16.mxu1 %v16232_v45 }
 0x453   :  { %14416 = vmatprep.mubr.msk.f32.mxu0 %vm2839_vm10, %v22637_v16  ;;  %15225 = vmatprep.mubr.msk.f32.mxu1 %vm2839_vm10, %v22809_v39  ;;  %v22843_v16 = vld [vmem:[%s24118_s3 + $0x468] sm:$0xff]  ;;  %v22848_v53 = vpop.permute.xlu0 %17515 }
 0x454   :  { %14417 = vmatmul.mubr.msk.f32.gmra.mrb[32].mxu0 %vm2839_vm10, %v22643_v23  ;;  %15226 = vmatmul.mubr.msk.f32.gmra.mrb[38].mxu1 %vm2839_vm10, %v22819_v12  ;;  %v17458_v23 = vunpack.i.h.bf16 %v22628_v43  ;;  %v16240_v43 = vpack.c.bf16 %v17403_v31, %v17402_v25  ;;  %v15796_v31 = vpack.c.bf16 %v17493_v29, %v17492_v8  ;;  %v17438_v25 = vunpack.i.h.bf16 %v22554_v55 }
 0x455   :  { %15775 = vmatpush3.bf16.msra.mxu0 %v24272_v35  ;;  %16235 = vmatpush3.bf16.msra.mxu1 %v16232_v45  ;;  %v17432_v45 = vunpack.i.l.bf16 %v22524_v41  ;;  %v15792_v35 = vpack.c.bf16 %v17483_v24, %v17482_v3  ;;  %v17498_v41 = vunpack.i.h.bf16 %v22774_v38  ;;  %v23056_v3 = vld [vmem:[%s24118_s3 + $0x4f0] sm:$0xff]  ;;  %v17468_v8 = vunpack.i.h.bf16 %v22663_v7 }
 0x456   :  { %15777 = vmatprep.subr.bf16.mxu0 %v24273_v0  ;;  %16237 = vmatprep.subr.bf16.mxu1 %v16236_v1  ;;  %v15784_v15 = vpack.c.bf16 %v17458_v23, %v17457_v18  ;;  %v22971_v23 = vld [vmem:[%s24118_s3 + $0x4b8] sm:$0xff]  ;;  %v22982_v18 = vld [vmem:[%s24118_s3 + $0x4c0] sm:$0xff] }
 0x457   :  { %14419 = vmatprep.mubr.msk.f32.mxu0 %vm2839_vm10, %v22661_v17  ;;  %15228 = vmatprep.mubr.msk.f32.mxu1 %vm2839_vm10, %v22837_v61  ;;  %v22871_v17 = vld [vmem:[%s24118_s3 + $0x478] sm:$0xff] }
 0x458   :  { %14420 = vmatmul.mubr.msk.f32.gmra.mrb[34].mxu0 %vm2839_vm10, %v22671_v10  ;;  %15229 = vmatmul.mubr.msk.f32.gmra.mrb[40].mxu1 %vm2839_vm10, %v22843_v16  ;;  %v17417_v10 = vunpack.i.l.bf16 %v22483_v14  ;;  %v16244_v14 = vpack.c.bf16 %v17408_v59, %v17407_v47  ;;  %v17443_v59 = vunpack.i.h.bf16 %v22560_v4  ;;  %v17442_v47 = vunpack.i.l.bf16 %v22560_v4 }
 0x459   :  { %15779 = vmatpush3.bf16.msra.mxu0 %v24273_v0  ;;  %16239 = vmatpush3.bf16.msra.mxu1 %v16236_v1  ;;  %v17437_v1 = vunpack.i.l.bf16 %v22554_v55  ;;  %v17513_v55 = vunpack.i.h.bf16 %v22813_v13  ;;  %v17448_v4 = vunpack.i.h.bf16 %v22591_v19  ;;  %v17533_v19 = vunpack.i.h.bf16 %v22892_v58 }
 0x45a   :  { %16241 = vmatprep.subr.bf16.mxu1 %v16240_v43  ;;  %14438 = vmatprep.mubr.msk.f32.mxu0 %vm2839_vm10, %v22689_v5  ;;  %v22890_v5 = vpop.permute.xlu0 %17525 }
 0x45b   :  { %15231 = vmatprep.mubr.msk.f32.mxu1 %vm2839_vm10, %v22865_v50  ;;  %15781 = vmatprep.subr.bf16.mxu0 %v15780_v56  ;;  %v16268_v48 = vpack.c.bf16 %v17448_v4, %v17447_v46 }
 0x45c   :  { %14439 = vmatmul.mubr.msk.f32.vlgmr.msra.gmra.mrb[28].mxu0 %vm2839_vm10, %v22695_v52  ;;  %15232 = vmatmul.mubr.msk.f32.gmra.mrb[42].mxu1 %vm2839_vm10, %v22871_v17  ;;  %v16248_v52 = vpack.c.bf16 %v17418_v42, %v17417_v10  ;;  %v23007_v42 = vld [vmem:[%s24118_s3 + $0x4d0] sm:$0xff] }
 0x45d   :  { %15783 = vmatpush3.bf16.msra.mxu0 %v15780_v56  ;;  %16243 = vmatpush3.bf16.msra.mxu1 %v16240_v43 }
 0x45e   :  { %16245 = vmatprep.subr.bf16.mxu1 %v16244_v14  ;;  %15250 = vmatprep.mubr.msk.f32.mxu1 %vm2839_vm10, %v22884_v21  ;;  %v22925_v6 = vpop.permute.xlu0 %17540 }
 0x45f   :  { %14441 = vmatprep.mubr.msk.f32.mxu0 %vm2839_vm10, %v22716_v51  ;;  %15785 = vmatprep.subr.bf16.mxu0 %v15784_v15  ;;  %v22919_v51 = vld [vmem:[%s24118_s3 + $0x498] sm:$0xff] }
 0x460   :  { %14442 = vmatmul.mubr.msk.f32.gmra.mrb[30].mxu0 %vm2839_vm10, %v22723_v11  ;;  %15251 = vmatmul.mubr.msk.f32.vlgmr.msra.gmra.mrb[36].mxu1 %vm2839_vm10, %v22897_v32  ;;  %v22927_v11 = vpop.permute.xlu1 %17535 }
 0x461   :  { %15787 = vmatpush3.bf16.msra.mxu0 %v15784_v15  ;;  %16247 = vmatpush3.bf16.msra.mxu1 %v16244_v14  ;;  %v17522_v15 = vunpack.i.l.bf16 %v22850_v49  ;;  %v23019_v14 = vld [vmem:[%s24118_s3 + $0x4d8] sm:$0xff]  ;;  %v17532_v49 = vunpack.i.l.bf16 %v22892_v58  ;;  %v23036_v58 = vld [vmem:[%s24118_s3 + $0x4e0] sm:$0xff]  ;;  %v17537_v24 = vunpack.i.l.bf16 %v22927_v11 }
 0x462   :  { %16249 = vmatprep.subr.bf16.mxu1 %v16248_v52  ;;  %15253 = vmatprep.mubr.msk.f32.mxu1 %vm2839_vm10, %v22906_v44  ;;  %v22964_v0 = vpop.permute.xlu0 %17545 }
 0x463   :  { %14444 = vmatprep.mubr.msk.f32.mxu0 %vm2839_vm10, %v22736_v60  ;;  %15789 = vmatprep.subr.bf16.mxu0 %v15788_v27  ;;  %v22945_v60 = vld [vmem:[%s24118_s3 + $0x4a8] sm:$0xff]  ;;  %v15812_v29 = vpack.c.bf16 %v17533_v19, %v17532_v49  ;;  %v17508_v19 = vunpack.i.h.bf16 %v22811_v37  ;;  %v17507_v49 = vunpack.i.l.bf16 %v22811_v37  ;;  %v17517_v37 = vunpack.i.l.bf16 %v22848_v53 }
 0x464   :  { %14445 = vmatmul.mubr.msk.f32.gmra.mrb[32].mxu0 %vm2839_vm10, %v22747_v20  ;;  %15254 = vmatmul.mubr.msk.f32.gmra.mrb[38].mxu1 %vm2839_vm10, %v22919_v51  ;;  %v17497_v20 = vunpack.i.l.bf16 %v22774_v38  ;;  %v16256_v38 = vpack.c.bf16 %v17433_v33, %v17432_v45  ;;  %v17467_v33 = vunpack.i.l.bf16 %v22663_v7  ;;  %v17478_v45 = vunpack.i.h.bf16 %v22701_v28 }
 0x465   :  { %15791 = vmatpush3.bf16.msra.mxu0 %v15788_v27  ;;  %16251 = vmatpush3.bf16.msra.mxu1 %v16248_v52  ;;  %v17462_v52 = vunpack.i.l.bf16 %v22624_v57  ;;  %v15808_v27 = vpack.c.bf16 %v17523_v2, %v17522_v15  ;;  %v17477_v7 = vunpack.i.l.bf16 %v22701_v28  ;;  %v23156_v15 = vld [vmem:[%s24118_s3 + $0x530] sm:$0xff] }
 0x466   :  { %15793 = vmatprep.subr.bf16.mxu0 %v15792_v35  ;;  %16253 = vmatprep.subr.bf16.mxu1 %v16252_v22  ;;  %v15800_v56 = vpack.c.bf16 %v17498_v41, %v17497_v20  ;;  %v22998_v43 = vpop.permute.xlu0 %17555  ;;  %v23084_v20 = vld [vmem:[%s24118_s3 + $0x500] sm:$0xff]  ;;  %v16276_v28 = vpack.c.bf16 %v17468_v8, %v17467_v33  ;;  %v17528_v33 = vunpack.i.h.bf16 %v22890_v5 }
 0x467   :  { %15256 = vmatprep.mubr.msk.f32.mxu1 %vm2839_vm10, %v22940_v36  ;;  %14447 = vmatprep.mubr.msk.f32.mxu0 %vm2839_vm10, %v22762_v63  ;;  %v22966_v63 = vpop.permute.xlu1 %17550 }
 0x468   :  { %14448 = vmatmul.mubr.msk.f32.gmra.mrb[34].mxu0 %vm2839_vm10, %v22767_v40  ;;  %15257 = vmatmul.mubr.msk.f32.gmra.mrb[40].mxu1 %vm2839_vm10, %v22945_v60  ;;  %v17512_v40 = vunpack.i.l.bf16 %v22813_v13  ;;  %v16260_v13 = vpack.c.bf16 %v17438_v25, %v17437_v1  ;;  %v23102_v25 = vld [vmem:[%s24118_s3 + $0x510] sm:$0xff] }
 0x469   :  { %15795 = vmatpush3.bf16.msra.mxu0 %v15792_v35  ;;  %16255 = vmatpush3.bf16.msra.mxu1 %v16252_v22  ;;  %v17553_v35 = vunpack.i.h.bf16 %v22966_v63  ;;  %v17552_v22 = vunpack.i.l.bf16 %v22966_v63  ;;  %v17487_v63 = vunpack.i.l.bf16 %v22740_v9 }
 0x46a   :  { %16257 = vmatprep.subr.bf16.mxu1 %v16256_v38  ;;  %15259 = vmatprep.mubr.msk.f32.mxu1 %vm2839_vm10, %v22956_v62  ;;  %v15804_v10 = vpack.c.bf16 %v17513_v55, %v17512_v40  ;;  %v23038_v54 = vpop.permute.xlu0 %17565 }
 0x46b   :  { %14466 = vmatprep.mubr.msk.f32.mxu0 %vm2839_vm10, %v22787_v34  ;;  %15797 = vmatprep.subr.bf16.mxu0 %v15796_v31  ;;  %v22993_v34 = vld [vmem:[%s24118_s3 + $0x4c8] sm:$0xff]  ;;  %v15820_v1 = vpack.c.bf16 %v17553_v35, %v17552_v22 }
 0x46c   :  { %14467 = vmatmul.mubr.msk.f32.vlgmr.msra.gmra.mrb[28].mxu0 %vm2839_vm10, %v22793_v26  ;;  %15260 = vmatmul.mubr.msk.f32.gmra.mrb[42].mxu1 %vm2839_vm10, %v22971_v23  ;;  %v23000_v26 = vpop.permute.xlu1 %17560 }
 0x46d   :  { %15799 = vmatpush3.bf16.msra.mxu0 %v15796_v31  ;;  %16259 = vmatpush3.bf16.msra.mxu1 %v16256_v38  ;;  %v17488_v38 = vunpack.i.h.bf16 %v22740_v9  ;;  %v17563_v55 = vunpack.i.h.bf16 %v23000_v26  ;;  %v17562_v40 = vunpack.i.l.bf16 %v23000_v26  ;;  %v23119_v9 = vld [vmem:[%s24118_s3 + $0x518] sm:$0xff] }
 0x46e   :  { %16261 = vmatprep.subr.bf16.mxu1 %v16260_v13  ;;  %15278 = vmatprep.mubr.msk.f32.mxu1 %vm2839_vm10, %v22982_v18 }
 0x46f   :  { %14469 = vmatprep.mubr.msk.f32.mxu0 %vm2839_vm10, %v22809_v39  ;;  %15801 = vmatprep.subr.bf16.mxu0 %v15800_v56  ;;  %v16264_v39 = vpack.c.bf16 %v17443_v59, %v17442_v47  ;;  %v17503_v47 = vunpack.i.h.bf16 %v22772_v30  ;;  %v15824_v4 = vpack.c.bf16 %v17563_v55, %v17562_v40  ;;  %v16284_v26 = vpack.c.bf16 %v17488_v38, %v17487_v63  ;;  %v23252_v38 = vld [vmem:[%s24118_s3 + $0x570] sm:$0xff] }
 0x470   :  { %14470 = vmatmul.mubr.msk.f32.gmra.mrb[30].mxu0 %vm2839_vm10, %v22819_v12  ;;  %15279 = vmatmul.mubr.msk.f32.vlgmr.msra.gmra.mrb[36].mxu1 %vm2839_vm10, %v22993_v34  ;;  %v17463_v12 = vunpack.i.h.bf16 %v22624_v57  ;;  %v23045_v57 = vld [vmem:[%s24118_s3 + $0x4e8] sm:$0xff]  ;;  %v17548_v55 = vunpack.i.h.bf16 %v22964_v0  ;;  %v17547_v40 = vunpack.i.l.bf16 %v22964_v0 }
 0x471   :  { %15803 = vmatpush3.bf16.msra.mxu0 %v15800_v56  ;;  %16263 = vmatpush3.bf16.msra.mxu1 %v16260_v13  ;;  %v17502_v13 = vunpack.i.l.bf16 %v22772_v30 }
 0x472   :  { %16265 = vmatprep.subr.bf16.mxu1 %v16264_v39  ;;  %15281 = vmatprep.mubr.msk.f32.mxu1 %vm2839_vm10, %v23007_v42 }
 0x473   :  { %14472 = vmatprep.mubr.msk.f32.mxu0 %vm2839_vm10, %v22837_v61  ;;  %15805 = vmatprep.subr.bf16.mxu0 %v15804_v10  ;;  %v23040_v61 = vpop.permute.xlu1 %17570 }
 0x474   :  { %14473 = vmatmul.mubr.msk.f32.gmra.mrb[32].mxu0 %vm2839_vm10, %v22843_v16  ;;  %15282 = vmatmul.mubr.msk.f32.gmra.mrb[38].mxu1 %vm2839_vm10, %v23019_v14  ;;  %v17538_v16 = vunpack.i.h.bf16 %v22927_v11  ;;  %v16272_v11 = vpack.c.bf16 %v17463_v12, %v17462_v52  ;;  %v17572_v59 = vunpack.i.l.bf16 %v23040_v61  ;;  %v16288_v12 = vpack.c.bf16 %v17503_v47, %v17502_v13 }
 0x475   :  { %15807 = vmatpush3.bf16.msra.mxu0 %v15804_v10  ;;  %16267 = vmatpush3.bf16.msra.mxu1 %v16264_v39  ;;  %v23136_v10 = vld [vmem:[%s24118_s3 + $0x520] sm:$0xff]  ;;  %v17518_v52 = vunpack.i.h.bf16 %v22848_v53  ;;  %v16292_v53 = vpack.c.bf16 %v17508_v19, %v17507_v49  ;;  %v17558_v13 = vunpack.i.h.bf16 %v22998_v43 }
 0x476   :  { %15809 = vmatprep.subr.bf16.mxu0 %v15808_v27  ;;  %16269 = vmatprep.subr.bf16.mxu1 %v16268_v48  ;;  %v15816_v31 = vpack.c.bf16 %v17538_v16, %v17537_v24 }
 0x477   :  { %15284 = vmatprep.mubr.msk.f32.mxu1 %vm2839_vm10, %v23036_v58  ;;  %14475 = vmatprep.mubr.msk.f32.mxu0 %vm2839_vm10, %v22865_v50  ;;  %v23067_v50 = vld [vmem:[%s24118_s3 + $0x4f8] sm:$0xff]  ;;  %v23077_v41 = vpop.permute.xlu1 %17580 }
 0x478   :  { %14476 = vmatmul.mubr.msk.f32.gmra.mrb[34].mxu0 %vm2839_vm10, %v22871_v17  ;;  %15285 = vmatmul.mubr.msk.f32.gmra.mrb[40].mxu1 %vm2839_vm10, %v23045_v57  ;;  %v23073_v17 = vpop.permute.xlu0 %17575  ;;  %v17582_v46 = vunpack.i.l.bf16 %v23077_v41 }
 0x479   :  { %15811 = vmatpush3.bf16.msra.mxu0 %v15808_v27  ;;  %16271 = vmatpush3.bf16.msra.mxu1 %v16268_v48  ;;  %v23180_v48 = vld [vmem:[%s24118_s3 + $0x540] sm:$0xff] }
 0x47a   :  { %16273 = vmatprep.subr.bf16.mxu1 %v16272_v11  ;;  %15287 = vmatprep.mubr.msk.f32.mxu1 %vm2839_vm10, %v23056_v3 }
 0x47b   :  { %14494 = vmatprep.mubr.msk.f32.mxu0 %vm2839_vm10, %v22884_v21  ;;  %15813 = vmatprep.subr.bf16.mxu0 %v15812_v29  ;;  %v23093_v21 = vld [vmem:[%s24118_s3 + $0x508] sm:$0xff]  ;;  %v23114_v56 = vpop.permute.xlu1 %17590 }
 0x47c   :  { %14495 = vmatmul.mubr.msk.f32.vlgmr.msra.gmra.mrb[28].mxu0 %vm2839_vm10, %v22897_v32  ;;  %15288 = vmatmul.mubr.msk.f32.gmra.mrb[42].mxu1 %vm2839_vm10, %v23067_v50  ;;  %v16280_v32 = vpack.c.bf16 %v17478_v45, %v17477_v7  ;;  %v17593_v45 = vunpack.i.h.bf16 %v23114_v56  ;;  %v17592_v7 = vunpack.i.l.bf16 %v23114_v56 }
 0x47d   :  { %15815 = vmatpush3.bf16.msra.mxu0 %v15812_v29  ;;  %16275 = vmatpush3.bf16.msra.mxu1 %v16272_v11  ;;  %v23202_v29 = vld [vmem:[%s24118_s3 + $0x550] sm:$0xff]  ;;  %v17527_v11 = vunpack.i.l.bf16 %v22890_v5 }
 0x47e   :  { %16277 = vmatprep.subr.bf16.mxu1 %v16276_v28  ;;  %15306 = vmatprep.mubr.msk.f32.mxu1 %vm2839_vm10, %v23084_v20 }
 0x47f   :  { %14497 = vmatprep.mubr.msk.f32.mxu0 %vm2839_vm10, %v22906_v44  ;;  %15817 = vmatprep.subr.bf16.mxu0 %v15816_v31  ;;  %v23112_v44 = vpop.permute.xlu0 %17585  ;;  %v23147_v2 = vpop.permute.xlu1 %17600 }
 0x480   :  { %14498 = vmatmul.mubr.msk.f32.gmra.mrb[30].mxu0 %vm2839_vm10, %v22919_v51  ;;  %15307 = vmatmul.mubr.msk.f32.vlgmr.msra.gmra.mrb[36].mxu1 %vm2839_vm10, %v23093_v21  ;;  %v17573_v51 = vunpack.i.h.bf16 %v23040_v61  ;;  %v17587_v27 = vunpack.i.l.bf16 %v23112_v44 }
 0x481   :  { %15819 = vmatpush3.bf16.msra.mxu0 %v15816_v31  ;;  %16279 = vmatpush3.bf16.msra.mxu1 %v16276_v28  ;;  %v17542_v31 = vunpack.i.l.bf16 %v22925_v6  ;;  %v15840_v28 = vpack.c.bf16 %v17593_v45, %v17592_v7  ;;  %v23370_v7 = vld [vmem:[%s24118_s3 + $0x5c0] sm:$0xff] }
 0x482   :  { %16281 = vmatprep.subr.bf16.mxu1 %v16280_v32  ;;  %15309 = vmatprep.mubr.msk.f32.mxu1 %vm2839_vm10, %v23102_v25  ;;  %v15828_v39 = vpack.c.bf16 %v17573_v51, %v17572_v59  ;;  %v23267_v51 = vld [vmem:[%s24118_s3 + $0x578] sm:$0xff]  ;;  %v23278_v59 = vld [vmem:[%s24118_s3 + $0x580] sm:$0xff] }
 0x483   :  { %14500 = vmatprep.mubr.msk.f32.mxu0 %vm2839_vm10, %v22940_v36  ;;  %15821 = vmatprep.subr.bf16.mxu0 %v15820_v1  ;;  %v23141_v36 = vld [vmem:[%s24118_s3 + $0x528] sm:$0xff]  ;;  %v23143_v30 = vpop.permute.xlu0 %17595  ;;  %v23188_v24 = vpop.permute.xlu1 %17610 }
 0x484   :  { %14501 = vmatmul.mubr.msk.f32.gmra.mrb[32].mxu0 %vm2839_vm10, %v22945_v60  ;;  %15310 = vmatmul.mubr.msk.f32.gmra.mrb[38].mxu1 %vm2839_vm10, %v23119_v9  ;;  %v17583_v60 = vunpack.i.h.bf16 %v23077_v41  ;;  %v17598_v5 = vunpack.i.h.bf16 %v23143_v30  ;;  %v17597_v35 = vunpack.i.l.bf16 %v23143_v30  ;;  %v17543_v41 = vunpack.i.h.bf16 %v22925_v6 }
 0x485   :  { %15823 = vmatpush3.bf16.msra.mxu0 %v15820_v1  ;;  %16283 = vmatpush3.bf16.msra.mxu1 %v16280_v32  ;;  %v16300_v32 = vpack.c.bf16 %v17528_v33, %v17527_v11  ;;  %v23236_v1 = vld [vmem:[%s24118_s3 + $0x560] sm:$0xff]  ;;  %v17603_v6 = vunpack.i.h.bf16 %v23147_v2  ;;  %v17613_v0 = vunpack.i.h.bf16 %v23188_v24  ;;  %v17567_v30 = vunpack.i.l.bf16 %v23038_v54 }
 0x486   :  { %15825 = vmatprep.subr.bf16.mxu0 %v15824_v4  ;;  %16285 = vmatprep.subr.bf16.mxu1 %v16284_v26  ;;  %v15832_v61 = vpack.c.bf16 %v17583_v60, %v17582_v46  ;;  %v15844_v63 = vpack.c.bf16 %v17598_v5, %v17597_v35  ;;  %v24274_v35 = vld [vmem:[#allocation15_spill] sm:$0xff] }
 0x487   :  { %15312 = vmatprep.mubr.msk.f32.mxu1 %vm2839_vm10, %v23136_v10  ;;  %14503 = vmatprep.mubr.msk.f32.mxu0 %vm2839_vm10, %v22956_v62  ;;  %v23167_v62 = vld [vmem:[%s24118_s3 + $0x538] sm:$0xff]  ;;  %v23186_v16 = vpop.permute.xlu0 %17605 }
 0x488   :  { %14504 = vmatmul.mubr.msk.f32.gmra.mrb[34].mxu0 %vm2839_vm10, %v22971_v23  ;;  %15313 = vmatmul.mubr.msk.f32.gmra.mrb[40].mxu1 %vm2839_vm10, %v23141_v36  ;;  %v17588_v23 = vunpack.i.h.bf16 %v23112_v44  ;;  %v16304_v44 = vpack.c.bf16 %v17543_v41, %v17542_v31  ;;  %v23389_v31 = vld [vmem:[%s24118_s3 + $0x5d0] sm:$0xff] }
 0x489   :  { %15827 = vmatpush3.bf16.msra.mxu0 %v15824_v4  ;;  %16287 = vmatpush3.bf16.msra.mxu1 %v16284_v26  ;;  %v17557_v4 = vunpack.i.l.bf16 %v22998_v43  ;;  %v16308_v26 = vpack.c.bf16 %v17548_v55, %v17547_v40  ;;  %v17568_v43 = vunpack.i.h.bf16 %v23038_v54  ;;  %v23308_v54 = vld [vmem:[%s24118_s3 + $0x590] sm:$0xff]  ;;  %v23411_v55 = vld [vmem:[%s24118_s3 + $0x5e0] sm:$0xff]  ;;  %v24276_v40 = vld [vmem:[#allocation19_spill] sm:$0xff] }
 0x48a   :  { %16289 = vmatprep.subr.bf16.mxu1 %v16288_v12  ;;  %15315 = vmatprep.mubr.msk.f32.mxu1 %vm2839_vm10, %v23156_v15  ;;  %v15836_v8 = vpack.c.bf16 %v17588_v23, %v17587_v27  ;;  %v23330_v23 = vld [vmem:[%s24118_s3 + $0x5a0] sm:$0xff] }
 0x48b   :  { %14522 = vmatprep.mubr.msk.f32.mxu0 %vm2839_vm10, %v22982_v18  ;;  %15829 = vmatprep.subr.bf16.mxu0 %v15828_v39  ;;  %v23193_v18 = vld [vmem:[%s24118_s3 + $0x548] sm:$0xff]  ;;  %v23221_v22 = vpop.permute.xlu0 %17615  ;;  %v16312_v19 = vpack.c.bf16 %v17558_v13, %v17557_v4  ;;  %v16316_v49 = vpack.c.bf16 %v17568_v43, %v17567_v30  ;;  %v23435_v4 = vld [vmem:[%s24118_s3 + $0x5f0] sm:$0xff] }
 0x48c   :  { %14523 = vmatmul.mubr.msk.f32.vlgmr.msra.gmra.mrb[28].mxu0 %vm2839_vm10, %v22993_v34  ;;  %15316 = vmatmul.mubr.msk.f32.gmra.mrb[42].mxu1 %vm2839_vm10, %v23167_v62  ;;  %v16296_v34 = vpack.c.bf16 %v17518_v52, %v17517_v37 }
 0x48d   :  { %15831 = vmatpush3.bf16.msra.mxu0 %v15828_v39  ;;  %16291 = vmatpush3.bf16.msra.mxu1 %v16288_v12  ;;  %v17577_v12 = vunpack.i.l.bf16 %v23073_v17 }
 0x48e   :  { %16293 = vmatprep.subr.bf16.mxu1 %v16292_v53  ;;  %15334 = vmatprep.mubr.msk.f32.mxu1 %vm2839_vm10, %v23180_v48 }
 0x48f   :  { %14525 = vmatprep.mubr.msk.f32.mxu0 %vm2839_vm10, %v23007_v42  ;;  %15833 = vmatprep.subr.bf16.mxu0 %v15832_v61  ;;  %v23215_v42 = vld [vmem:[%s24118_s3 + $0x558] sm:$0xff]  ;;  %v23260_v56 = vpop.permute.xlu0 %17625 }
 0x490   :  { %14526 = vmatmul.mubr.msk.f32.gmra.mrb[30].mxu0 %vm2839_vm10, %v23019_v14  ;;  %15335 = vmatmul.mubr.msk.f32.vlgmr.msra.gmra.mrb[36].mxu1 %vm2839_vm10, %v23193_v18  ;;  %v23223_v14 = vpop.permute.xlu1 %17620 }
 0x491   :  { %15835 = vmatpush3.bf16.msra.mxu0 %v15832_v61  ;;  %16295 = vmatpush3.bf16.msra.mxu1 %v16292_v53  ;;  %v17622_v39 = vunpack.i.l.bf16 %v23223_v14 }
 0x492   :  { %16297 = vmatprep.subr.bf16.mxu1 %v16296_v34  ;;  %15337 = vmatprep.mubr.msk.f32.mxu1 %vm2839_vm10, %v23202_v29 }
 0x493   :  { %14528 = vmatprep.mubr.msk.f32.mxu0 %vm2839_vm10, %v23036_v58  ;;  %15837 = vmatprep.subr.bf16.mxu0 %v15836_v8  ;;  %v23241_v58 = vld [vmem:[%s24118_s3 + $0x568] sm:$0xff] }
 0x494   :  { %14529 = vmatmul.mubr.msk.f32.gmra.mrb[32].mxu0 %vm2839_vm10, %v23045_v57  ;;  %15338 = vmatmul.mubr.msk.f32.gmra.mrb[38].mxu1 %vm2839_vm10, %v23215_v42  ;;  %v17602_v57 = vunpack.i.l.bf16 %v23147_v2  ;;  %v17623_v2 = vunpack.i.h.bf16 %v23223_v14 }
 0x495   :  { %15839 = vmatpush3.bf16.msra.mxu0 %v15836_v8  ;;  %16299 = vmatpush3.bf16.msra.mxu1 %v16296_v34 }
 0x496   :  { %15841 = vmatprep.subr.bf16.mxu0 %v15840_v28  ;;  %16301 = vmatprep.subr.bf16.mxu1 %v16300_v32  ;;  %v15848_v47 = vpack.c.bf16 %v17603_v6, %v17602_v57 }
 0x497   :  { %15340 = vmatprep.mubr.msk.f32.mxu1 %vm2839_vm10, %v23236_v1  ;;  %14531 = vmatprep.mubr.msk.f32.mxu0 %vm2839_vm10, %v23056_v3  ;;  %v23262_v3 = vpop.permute.xlu1 %17630 }
 0x498   :  { %14532 = vmatmul.mubr.msk.f32.gmra.mrb[34].mxu0 %vm2839_vm10, %v23067_v50  ;;  %15341 = vmatmul.mubr.msk.f32.gmra.mrb[40].mxu1 %vm2839_vm10, %v23241_v58  ;;  %v17612_v50 = vunpack.i.l.bf16 %v23188_v24  ;;  %v17633_v52 = vunpack.i.h.bf16 %v23262_v3  ;;  %v17632_v37 = vunpack.i.l.bf16 %v23262_v3  ;;  %v23350_v24 = vld [vmem:[%s24118_s3 + $0x5b0] sm:$0xff] }
 0x499   :  { %15843 = vmatpush3.bf16.msra.mxu0 %v15840_v28  ;;  %16303 = vmatpush3.bf16.msra.mxu1 %v16300_v32  ;;  %v23397_v32 = vld [vmem:[%s24118_s3 + $0x5d8] sm:$0xff] }
 0x49a   :  { %16305 = vmatprep.subr.bf16.mxu1 %v16304_v44  ;;  %15343 = vmatprep.mubr.msk.f32.mxu1 %vm2839_vm10, %v23252_v38  ;;  %v15852_v46 = vpack.c.bf16 %v17613_v0, %v17612_v50  ;;  %v17607_v0 = vunpack.i.l.bf16 %v23186_v16 }
 0x49b   :  { %14550 = vmatprep.mubr.msk.f32.mxu0 %vm2839_vm10, %v23084_v20  ;;  %15845 = vmatprep.subr.bf16.mxu0 %v15844_v63  ;;  %v23289_v20 = vld [vmem:[%s24118_s3 + $0x588] sm:$0xff]  ;;  %v17641_v60 = vpop.permute.xlu1 %17640 }
 0x49c   :  { %14551 = vmatmul.mubr.msk.f32.vlgmr.msra.gmra.mrb[28].mxu0 %vm2839_vm10, %v23093_v21  ;;  %15344 = vmatmul.mubr.msk.f32.gmra.mrb[42].mxu1 %vm2839_vm10, %v23267_v51  ;;  %v23295_v21 = vpop.permute.xlu0 %17635  ;;  %v17643_v34 = vunpack.i.h.bf16 %v17641_v60  ;;  %v17642_v8 = vunpack.i.l.bf16 %v17641_v60 }
 0x49d   :  { %15847 = vmatpush3.bf16.msra.mxu0 %v15844_v63  ;;  %16307 = vmatpush3.bf16.msra.mxu1 %v16304_v44 }
 0x49e   :  { %16309 = vmatprep.subr.bf16.mxu1 %v16308_v26  ;;  %15362 = vmatprep.mubr.msk.f32.mxu1 %vm2839_vm10, %v23278_v59  ;;  %v15864_v5 = vpack.c.bf16 %v17643_v34, %v17642_v8  ;;  %v23518_v34 = vld [vmem:[%s24118_s3 + $0x630] sm:$0xff] }
 0x49f   :  { %14553 = vmatprep.mubr.msk.f32.mxu0 %vm2839_vm10, %v23102_v25  ;;  %15849 = vmatprep.subr.bf16.mxu0 %v15848_v47  ;;  %v23313_v25 = vld [vmem:[%s24118_s3 + $0x598] sm:$0xff]  ;;  %v17651_v61 = vpop.permute.xlu1 %17650 }
 0x4a0   :  { %14554 = vmatmul.mubr.msk.f32.gmra.mrb[30].mxu0 %vm2839_vm10, %v23119_v9  ;;  %15363 = vmatmul.mubr.msk.f32.vlgmr.msra.gmra.mrb[36].mxu1 %vm2839_vm10, %v23289_v20  ;;  %v17578_v9 = vunpack.i.h.bf16 %v23073_v17  ;;  %v23332_v27 = vpop.permute.xlu0 %17645  ;;  %v23337_v17 = vld [vmem:[%s24118_s3 + $0x5a8] sm:$0xff]  ;;  %v17653_v33 = vunpack.i.h.bf16 %v17651_v61  ;;  %v17652_v11 = vunpack.i.l.bf16 %v17651_v61 }
 0x4a1   :  { %15851 = vmatpush3.bf16.msra.mxu0 %v15848_v47  ;;  %16311 = vmatpush3.bf16.msra.mxu1 %v16308_v26  ;;  %v17617_v26 = vunpack.i.l.bf16 %v23221_v22 }
 0x4a2   :  { %16313 = vmatprep.subr.bf16.mxu1 %v16312_v19  ;;  %14556 = vmatprep.mubr.msk.f32.mxu0 %vm2839_vm10, %v23136_v10  ;;  %v15856_v10 = vpack.c.bf16 %v17623_v2, %v17622_v39  ;;  %v16320_v53 = vpack.c.bf16 %v17578_v9, %v17577_v12  ;;  %v17627_v9 = vunpack.i.l.bf16 %v23260_v56 }
 0x4a3   :  { %15365 = vmatprep.mubr.msk.f32.mxu1 %vm2839_vm10, %v23308_v54  ;;  %15853 = vmatprep.subr.bf16.mxu0 %v15852_v46  ;;  %v17661_v45 = vpop.permute.xlu1 %17660 }
 0x4a4   :  { %14557 = vmatmul.mubr.msk.f32.gmra.mrb[32].mxu0 %vm2839_vm10, %v23141_v36  ;;  %15366 = vmatmul.mubr.msk.f32.gmra.mrb[38].mxu1 %vm2839_vm10, %v23313_v25  ;;  %v15860_v36 = vpack.c.bf16 %v17633_v52, %v17632_v37  ;;  %v17663_v14 = vunpack.i.h.bf16 %v17661_v45  ;;  %v17662_v41 = vunpack.i.l.bf16 %v17661_v45  ;;  %v23478_v37 = vld [vmem:[%s24118_s3 + $0x610] sm:$0xff]  ;;  %v23545_v45 = vld [vmem:[%s24118_s3 + $0x648] sm:$0xff] }
 0x4a5   :  { %15855 = vmatpush3.bf16.msra.mxu0 %v15852_v46  ;;  %16315 = vmatpush3.bf16.msra.mxu1 %v16312_v19 }
 0x4a6   :  { %15857 = vmatprep.subr.bf16.mxu0 %v15856_v10  ;;  %16317 = vmatprep.subr.bf16.mxu1 %v16316_v49  ;;  %v15872_v63 = vpack.c.bf16 %v17663_v14, %v17662_v41  ;;  %v24280_v14 = vld [vmem:[#allocation20_spill] sm:$0xff] }
 0x4a7   :  { %14559 = vmatprep.mubr.msk.f32.mxu0 %vm2839_vm10, %v23156_v15  ;;  %15368 = vmatprep.mubr.msk.f32.mxu1 %vm2839_vm10, %v23330_v23  ;;  %v23355_v15 = vld [vmem:[%s24118_s3 + $0x5b8] sm:$0xff] }
 0x4a8   :  { %14560 = vmatmul.mubr.msk.f32.gmra.mrb[34].mxu0 %vm2839_vm10, %v23167_v62  ;;  %15369 = vmatmul.mubr.msk.f32.gmra.mrb[40].mxu1 %vm2839_vm10, %v23337_v17  ;;  %v23357_v62 = vpop.permute.xlu0 %17655 }
 0x4a9   :  { %15859 = vmatpush3.bf16.msra.mxu0 %v15856_v10  ;;  %16319 = vmatpush3.bf16.msra.mxu1 %v16316_v49  ;;  %v17658_v8 = vunpack.i.h.bf16 %v23357_v62 }
 0x4aa   :  { %15861 = vmatprep.subr.bf16.mxu0 %v15860_v36  ;;  %16321 = vmatprep.subr.bf16.mxu1 %v16320_v53 }
 0x4ab   :  { %14578 = vmatprep.mubr.msk.f32.mxu0 %vm2839_vm10, %v23180_v48  ;;  %15371 = vmatprep.mubr.msk.f32.mxu1 %vm2839_vm10, %v23350_v24  ;;  %v23375_v48 = vld [vmem:[%s24118_s3 + $0x5c8] sm:$0xff] }
 0x4ac   :  { %14579 = vmatmul.mubr.msk.f32.vlgmr.msra.gmra.mrb[28].mxu0 %vm2839_vm10, %v23193_v18  ;;  %15372 = vmatmul.mubr.msk.f32.gmra.mrb[42].mxu1 %vm2839_vm10, %v23355_v15  ;;  %v15868_v18 = vpack.c.bf16 %v17653_v33, %v17652_v11  ;;  %v23391_v28 = vpop.permute.xlu0 %17665  ;;  %v23539_v11 = vld [vmem:[%s24118_s3 + $0x640] sm:$0xff] }
 0x4ad   :  { %15863 = vmatpush3.bf16.msra.mxu0 %v15860_v36  ;;  %16323 = vmatpush3.bf16.msra.mxu1 %v16320_v53  ;;  %v23498_v36 = vld [vmem:[%s24118_s3 + $0x620] sm:$0xff] }
 0x4ae   :  { %16325 = vmatprep.subr.bf16.mxu1 %v24274_v35  ;;  %14581 = vmatprep.mubr.msk.f32.mxu0 %vm2839_vm10, %v23202_v29  ;;  %v17671_v29 = vpop.permute.xlu1 %17670 }
 0x4af   :  { %15390 = vmatprep.mubr.msk.f32.mxu1 %vm2839_vm10, %v23370_v7  ;;  %15865 = vmatprep.subr.bf16.mxu0 %v15864_v5  ;;  %v17673_v6 = vunpack.i.h.bf16 %v17671_v29  ;;  %v17672_v57 = vunpack.i.l.bf16 %v17671_v29 }
 0x4b0   :  { %14582 = vmatmul.mubr.msk.f32.gmra.mrb[30].mxu0 %vm2839_vm10, %v23215_v42  ;;  %15391 = vmatmul.mubr.msk.f32.vlgmr.msra.gmra.mrb[36].mxu1 %vm2839_vm10, %v23375_v48  ;;  %v24275_v42 = vld [vmem:[#allocation17_spill] sm:$0xff]  ;;  %v23421_v44 = vpop.permute.xlu0 %17675 }
 0x4b1   :  { %15867 = vmatpush3.bf16.msra.mxu0 %v15864_v5  ;;  %16327 = vmatpush3.bf16.msra.mxu1 %v24274_v35  ;;  %v15876_v13 = vpack.c.bf16 %v17673_v6, %v17672_v57  ;;  %v17667_v5 = vunpack.i.l.bf16 %v23391_v28  ;;  %v23561_v35 = vld [vmem:[%s24118_s3 + $0x650] sm:$0xff]  ;;  %v17677_v29 = vunpack.i.l.bf16 %v23421_v44  ;;  %v23583_v6 = vld [vmem:[%s24118_s3 + $0x660] sm:$0xff]  ;;  %v23589_v57 = vld [vmem:[%s24118_s3 + $0x668] sm:$0xff] }
 0x4b2   :  { %16329 = vmatprep.subr.bf16.mxu1 %v24275_v42  ;;  %14584 = vmatprep.mubr.msk.f32.mxu0 %vm2839_vm10, %v23236_v1  ;;  %v23417_v1 = vld [vmem:[%s24118_s3 + $0x5e8] sm:$0xff]  ;;  %v17681_v3 = vpop.permute.xlu1 %17680 }
 0x4b3   :  { %15393 = vmatprep.mubr.msk.f32.mxu1 %vm2839_vm10, %v23389_v31  ;;  %15869 = vmatprep.subr.bf16.mxu0 %v15868_v18  ;;  %v17683_v50 = vunpack.i.h.bf16 %v17681_v3  ;;  %v17682_v47 = vunpack.i.l.bf16 %v17681_v3  ;;  %v23603_v3 = vld [vmem:[%s24118_s3 + $0x670] sm:$0xff] }
 0x4b4   :  { %14585 = vmatmul.mubr.msk.f32.gmra.mrb[32].mxu0 %vm2839_vm10, %v23241_v58  ;;  %15394 = vmatmul.mubr.msk.f32.gmra.mrb[38].mxu1 %vm2839_vm10, %v23397_v32  ;;  %v17608_v58 = vunpack.i.h.bf16 %v23186_v16  ;;  %v23441_v16 = vld [vmem:[%s24118_s3 + $0x5f8] sm:$0xff]  ;;  %v17686_v43 = vpop.permute.xlu0 %17685 }
 0x4b5   :  { %15871 = vmatpush3.bf16.msra.mxu0 %v15868_v18  ;;  %16331 = vmatpush3.bf16.msra.mxu1 %v24275_v42  ;;  %v17688_v30 = vunpack.i.h.bf16 %v17686_v43  ;;  %v17687_v60 = vunpack.i.l.bf16 %v17686_v43  ;;  %v15880_v46 = vpack.c.bf16 %v17683_v50, %v17682_v47  ;;  %v23567_v18 = vld [vmem:[%s24118_s3 + $0x658] sm:$0xff] }
 0x4b6   :  { %15873 = vmatprep.subr.bf16.mxu0 %v15872_v63  ;;  %16333 = vmatprep.subr.bf16.mxu1 %v24276_v40  ;;  %v16340_v2 = vpack.c.bf16 %v17608_v58, %v17607_v0  ;;  %v17691_v39 = vpop.permute.xlu1 %17690  ;;  %v23609_v0 = vld [vmem:[%s24118_s3 + $0x678] sm:$0xff] }
 0x4b7   :  { %14587 = vmatprep.mubr.msk.f32.mxu0 %vm2839_vm10, %v23252_v38  ;;  %15396 = vmatprep.mubr.msk.f32.mxu1 %vm2839_vm10, %v23411_v55  ;;  %v24277_v38 = vld [vmem:[#allocation47_spill] sm:$0xff]  ;;  %v17693_v49 = vunpack.i.h.bf16 %v17691_v39  ;;  %v17692_v12 = vunpack.i.l.bf16 %v17691_v39  ;;  %v15884_v52 = vpack.c.bf16 %v17688_v30, %v17687_v60 }
 0x4b8   :  { %14588 = vmatmul.mubr.msk.f32.gmra.mrb[34].mxu0 %vm2839_vm10, %v23267_v51  ;;  %15397 = vmatmul.mubr.msk.f32.gmra.mrb[40].mxu1 %vm2839_vm10, %v23417_v1  ;;  %v17618_v51 = vunpack.i.h.bf16 %v23221_v22  ;;  %v23457_v22 = vld [vmem:[%s24118_s3 + $0x600] sm:$0xff]  ;;  %v17696_v41 = vpop.permute.xlu0 %17695 }
 0x4b9   :  { %15875 = vmatpush3.bf16.msra.mxu0 %v15872_v63  ;;  %16335 = vmatpush3.bf16.msra.mxu1 %v24276_v40  ;;  %v15888_v10 = vpack.c.bf16 %v17693_v49, %v17692_v12  ;;  %v17697_v42 = vunpack.i.l.bf16 %v17696_v41  ;;  %v24281_v63 = vld [vmem:[#allocation3_spill] sm:$0xff]  ;;  %v12820_v49 = vld [vmem:[%s24118_s3 + $0x6b0] sm:$0xff] }
 0x4ba   :  { %15877 = vmatprep.subr.bf16.mxu0 %v15876_v13  ;;  %16337 = vmatprep.subr.bf16.mxu1 %v24277_v38  ;;  %v16344_v19 = vpack.c.bf16 %v17618_v51, %v17617_v26  ;;  %v23627_v51 = vld [vmem:[%s24118_s3 + $0x688] sm:$0xff]  ;;  %v12816_v26 = vld [vmem:[%s24118_s3 + $0x690] sm:$0xff] }
 0x4bb   :  { %14606 = vmatprep.mubr.msk.f32.mxu0 %vm2839_vm10, %v23278_v59  ;;  %15399 = vmatprep.mubr.msk.f32.mxu1 %vm2839_vm10, %v23435_v4  ;;  %v23463_v59 = vld [vmem:[%s24118_s3 + $0x608] sm:$0xff] }
 0x4bc   :  { %14607 = vmatmul.mubr.msk.f32.vlgmr.msra.gmra.mrb[28].mxu0 %vm2839_vm10, %v23289_v20  ;;  %15400 = vmatmul.mubr.msk.f32.gmra.mrb[42].mxu1 %vm2839_vm10, %v23441_v16  ;;  %v17628_v20 = vunpack.i.h.bf16 %v23260_v56  ;;  %v23483_v56 = vld [vmem:[%s24118_s3 + $0x618] sm:$0xff]  ;;  %v17706_v50 = vpop.permute.xlu0 %17705 }
 0x4bd   :  { %15879 = vmatpush3.bf16.msra.mxu0 %v15876_v13  ;;  %16339 = vmatpush3.bf16.msra.mxu1 %v24277_v38  ;;  %v17708_v13 = vunpack.i.h.bf16 %v17706_v50 }
 0x4be   :  { %15881 = vmatprep.subr.bf16.mxu0 %v15880_v46  ;;  %16341 = vmatprep.subr.bf16.mxu1 %v16340_v2  ;;  %v16348_v61 = vpack.c.bf16 %v17628_v20, %v17627_v9 }
 0x4bf   :  { %14609 = vmatprep.mubr.msk.f32.mxu0 %vm2839_vm10, %v23308_v54  ;;  %15418 = vmatprep.mubr.msk.f32.mxu1 %vm2839_vm10, %v23457_v22  ;;  %v17638_v54 = vunpack.i.h.bf16 %v23295_v21 }
 0x4c0   :  { %14610 = vmatmul.mubr.msk.f32.gmra.mrb[30].mxu0 %vm2839_vm10, %v23313_v25  ;;  %15419 = vmatmul.mubr.msk.f32.vlgmr.msra.gmra.mrb[36].mxu1 %vm2839_vm10, %v23463_v59  ;;  %v17637_v25 = vunpack.i.l.bf16 %v23295_v21  ;;  %v17648_v21 = vunpack.i.h.bf16 %v23332_v27 }
 0x4c1   :  { %15883 = vmatpush3.bf16.msra.mxu0 %v15880_v46  ;;  %16343 = vmatpush3.bf16.msra.mxu1 %v16340_v2  ;;  %v17716_v46 = vpop.permute.xlu0 %17715  ;;  %v12817_v2 = vld [vmem:[%s24118_s3 + $0x698] sm:$0xff] }
 0x4c2   :  { %15885 = vmatprep.subr.bf16.mxu0 %v15884_v52  ;;  %16345 = vmatprep.subr.bf16.mxu1 %v16344_v19  ;;  %v16352_v53 = vpack.c.bf16 %v17638_v54, %v17637_v25  ;;  %v17717_v20 = vunpack.i.l.bf16 %v17716_v46  ;;  %v12821_v54 = vld [vmem:[%s24118_s3 + $0x6b8] sm:$0xff] }
 0x4c3   :  { %14612 = vmatprep.mubr.msk.f32.mxu0 %vm2839_vm10, %v23330_v23  ;;  %15421 = vmatprep.mubr.msk.f32.mxu1 %vm2839_vm10, %v23478_v37  ;;  %v23503_v23 = vld [vmem:[%s24118_s3 + $0x628] sm:$0xff] }
 0x4c4   :  { %14613 = vmatmul.mubr.msk.f32.gmra.mrb[32].mxu0 %vm2839_vm10, %v23337_v17  ;;  %15422 = vmatmul.mubr.msk.f32.gmra.mrb[38].mxu1 %vm2839_vm10, %v23483_v56  ;;  %v17647_v17 = vunpack.i.l.bf16 %v23332_v27  ;;  %v24278_v27 = vld [vmem:[#allocation34_spill] sm:$0xff] }
 0x4c5   :  { %15887 = vmatpush3.bf16.msra.mxu0 %v15884_v52  ;;  %16347 = vmatpush3.bf16.msra.mxu1 %v16344_v19  ;;  %v12819_v19 = vld [vmem:[%s24118_s3 + $0x6a8] sm:$0xff] }
 0x4c6   :  { %15889 = vmatprep.subr.bf16.mxu0 %v15888_v10  ;;  %16349 = vmatprep.subr.bf16.mxu1 %v16348_v61  ;;  %v16356_v33 = vpack.c.bf16 %v17648_v21, %v17647_v17 }
 0x4c7   :  { %14615 = vmatprep.mubr.msk.f32.mxu0 %vm2839_vm10, %v23350_v24  ;;  %15424 = vmatprep.mubr.msk.f32.mxu1 %vm2839_vm10, %v23498_v36  ;;  %v23523_v24 = vld [vmem:[%s24118_s3 + $0x638] sm:$0xff] }
 0x4c8   :  { %14616 = vmatmul.mubr.msk.f32.gmra.mrb[34].mxu0 %vm2839_vm10, %v23355_v15  ;;  %15425 = vmatmul.mubr.msk.f32.gmra.mrb[40].mxu1 %vm2839_vm10, %v23503_v23  ;;  %v17657_v15 = vunpack.i.l.bf16 %v23357_v62  ;;  %v24279_v62 = vld [vmem:[#allocation38_spill] sm:$0xff] }
 0x4c9   :  { %15891 = vmatpush3.bf16.msra.mxu0 %v15888_v10  ;;  %16351 = vmatpush3.bf16.msra.mxu1 %v16348_v61 }
 0x4ca   :  { %15893 = vmatprep.subr.bf16.mxu0 %v24278_v27  ;;  %16353 = vmatprep.subr.bf16.mxu1 %v16352_v53 }
 0x4cb   :  { %14634 = vmatprep.mubr.msk.f32.mxu0 %vm2839_vm10, %v23370_v7  ;;  %15427 = vmatprep.mubr.msk.f32.mxu1 %vm2839_vm10, %v23518_v34  ;;  %v17668_v7 = vunpack.i.h.bf16 %v23391_v28  ;;  %v17678_v28 = vunpack.i.h.bf16 %v23421_v44 }
 0x4cc   :  { %14635 = vmatmul.mubr.msk.f32.vlgmr.msra.gmra.mrb[28].mxu0 %vm2839_vm10, %v23375_v48  ;;  %15428 = vmatmul.mubr.msk.f32.gmra.mrb[42].mxu1 %vm2839_vm10, %v23523_v24  ;;  %v16360_v48 = vpack.c.bf16 %v17658_v8, %v17657_v15 }
 0x4cd   :  { %15895 = vmatpush3.bf16.msra.mxu0 %v24278_v27  ;;  %16355 = vmatpush3.bf16.msra.mxu1 %v16352_v53  ;;  %v16368_v44 = vpack.c.bf16 %v17678_v28, %v17677_v29 }
 0x4ce   :  { %15897 = vmatprep.subr.bf16.mxu0 %v24279_v62  ;;  %16357 = vmatprep.subr.bf16.mxu1 %v16356_v33 }
 0x4cf   :  { %14637 = vmatprep.mubr.msk.f32.mxu0 %vm2839_vm10, %v23389_v31  ;;  %15446 = vmatprep.mubr.msk.f32.mxu1 %vm2839_vm10, %v23539_v11  ;;  %v16364_v31 = vpack.c.bf16 %v17668_v7, %v17667_v5  ;;  %v11463_v7 = vld [vmem:[%s24119_s2] sm:$0xff]  ;;  %v11466_v5 = vld [vmem:[%s24119_s2 + $0x18] sm:$0xff] }
 0x4d0   :  { %14638 = vmatmul.mubr.msk.f32.gmra.mrb[30].mxu0 %vm2839_vm10, %v23397_v32  ;;  %15447 = vmatmul.mubr.msk.f32.vlgmr.msra.gmra.mrb[36].mxu1 %vm2839_vm10, %v23545_v45  ;;  %v17698_v32 = vunpack.i.h.bf16 %v17696_v41  ;;  %v11469_v41 = vld [vmem:[%s24119_s2 + $0x30] sm:$0xff] }
 0x4d1   :  { %15899 = vmatpush3.bf16.msra.mxu0 %v24279_v62  ;;  %16359 = vmatpush3.bf16.msra.mxu1 %v16356_v33  ;;  %v11464_v62 = vld [vmem:[%s24119_s2 + $0x8] sm:$0xff] }
 0x4d2   :  { %15901 = vmatprep.subr.bf16.mxu0 %v24280_v14  ;;  %16361 = vmatprep.subr.bf16.mxu1 %v16360_v48  ;;  %v15908_v58 = vpack.c.bf16 %v17698_v32, %v17697_v42 }
 0x4d3   :  { %14640 = vmatprep.mubr.msk.f32.mxu0 %vm2839_vm10, %v23411_v55  ;;  %15449 = vmatprep.mubr.msk.f32.mxu1 %vm2839_vm10, %v23561_v35  ;;  %v17701_v55 = vpop.permute.xlu1 %17700 }
 0x4d4   :  { %14641 = vmatmul.mubr.msk.f32.gmra.mrb[32].mxu0 %vm2839_vm10, %v23417_v1  ;;  %15450 = vmatmul.mubr.msk.f32.gmra.mrb[38].mxu1 %vm2839_vm10, %v23567_v18  ;;  %v17703_v1 = vunpack.i.h.bf16 %v17701_v55  ;;  %v17702_v40 = vunpack.i.l.bf16 %v17701_v55  ;;  %v11511_v55 = vld [vmem:[%s24120_s8] sm:$0xff] }
 0x4d5   :  { %15903 = vmatpush3.bf16.msra.mxu0 %v24280_v14  ;;  %16363 = vmatpush3.bf16.msra.mxu1 %v16360_v48  ;;  %v11465_v48 = vld [vmem:[%s24119_s2 + $0x10] sm:$0xff]  ;;  %v11470_v14 = vld [vmem:[%s24119_s2 + $0x38] sm:$0xff] }
 0x4d6   :  { %15905 = vmatprep.subr.bf16.mxu0 %v24281_v63  ;;  %16365 = vmatprep.subr.bf16.mxu1 %v16364_v31  ;;  %v15912_v47 = vpack.c.bf16 %v17703_v1, %v17702_v40  ;;  %v11512_v1 = vld [vmem:[%s24120_s8 + $0x8] sm:$0xff] }
 0x4d7   :  { %14643 = vmatprep.mubr.msk.f32.mxu0 %vm2839_vm10, %v23435_v4  ;;  %15452 = vmatprep.mubr.msk.f32.mxu1 %vm2839_vm10, %v23583_v6  ;;  %v17707_v4 = vunpack.i.l.bf16 %v17706_v50  ;;  %v17711_v38 = vpop.permute.xlu1 %17710  ;;  %v16372_v40 = vpack.c.bf16 %v11512_v1, %v11511_v55 }
 0x4d8   :  { %14644 = vmatmul.mubr.msk.f32.gmra.mrb[34].mxu0 %vm2839_vm10, %v23441_v16  ;;  %15453 = vmatmul.mubr.msk.f32.gmra.mrb[40].mxu1 %vm2839_vm10, %v23589_v57  ;;  %v23622_v16 = vld [vmem:[%s24118_s3 + $0x680] sm:$0xff]  ;;  %v17713_v43 = vunpack.i.h.bf16 %v17711_v38  ;;  %v17712_v30 = vunpack.i.l.bf16 %v17711_v38 }
 0x4d9   :  { %15907 = vmatpush3.bf16.msra.mxu0 %v24281_v63  ;;  %16367 = vmatpush3.bf16.msra.mxu1 %v16364_v31  ;;  %v15916_v60 = vpack.c.bf16 %v17708_v13, %v17707_v4 }
 0x4da   :  { %15909 = vmatprep.subr.bf16.mxu0 %v15908_v58  ;;  %16369 = vmatprep.subr.bf16.mxu1 %v16368_v44  ;;  %v15920_v39 = vpack.c.bf16 %v17713_v43, %v17712_v30 }
 0x4db   :  { %14662 = vmatprep.mubr.msk.f32.mxu0 %vm2839_vm10, %v23457_v22  ;;  %15455 = vmatprep.mubr.msk.f32.mxu1 %vm2839_vm10, %v23603_v3  ;;  %v12818_v22 = vld [vmem:[%s24118_s3 + $0x6a0] sm:$0xff]  ;;  %v17721_v9 = vpop.permute.xlu1 %17720 }
 0x4dc   :  { %14663 = vmatmul.mubr.msk.f32.vlgmr.msra.gmra.mrb[28].mxu0 %vm2839_vm10, %v23463_v59  ;;  %15456 = vmatmul.mubr.msk.f32.gmra.mrb[42].mxu1 %vm2839_vm10, %v23609_v0  ;;  %v17718_v59 = vunpack.i.h.bf16 %v17716_v46  ;;  %v17723_v12 = vunpack.i.h.bf16 %v17721_v9  ;;  %v17722_v52 = vunpack.i.l.bf16 %v17721_v9 }
 0x4dd   :  { %15911 = vmatpush3.bf16.msra.mxu0 %v15908_v58  ;;  %16371 = vmatpush3.bf16.msra.mxu1 %v16368_v44  ;;  %v11513_v58 = vld [vmem:[%s24120_s8 + $0x10] sm:$0xff]  ;;  %v11514_v44 = vld [vmem:[%s24120_s8 + $0x18] sm:$0xff] }
 0x4de   :  { %15913 = vmatprep.subr.bf16.mxu0 %v15912_v47  ;;  %14665 = vmatprep.mubr.msk.f32.mxu0 %vm2839_vm10, %v23478_v37  ;;  %v15924_v37 = vpack.c.bf16 %v17718_v59, %v17717_v20  ;;  %v15928_v25 = vpack.c.bf16 %v17723_v12, %v17722_v52 }
 0x4df   :  { %15474 = vmatprep.mubr.msk.f32.mxu1 %vm2839_vm10, %v23622_v16 }
 0x4e0   :  { %14666 = vmatmul.mubr.msk.f32.gmra.mrb[30].mxu0 %vm2839_vm10, %v23483_v56  ;;  %15475 = vmatmul.mubr.msk.f32.vlgmr.msra.gmra.mrb[36].mxu1 %vm2839_vm10, %v23627_v51  ;;  %v17726_v56 = vpop.permute.xlu0 %17725 }
 0x4e1   :  { %15915 = vmatpush3.bf16.msra.mxu0 %v15912_v47  ;;  %14668 = vmatprep.mubr.msk.f32.mxu0 %vm2839_vm10, %v23498_v36  ;;  %v17728_v10 = vunpack.i.h.bf16 %v17726_v56  ;;  %v17727_v61 = vunpack.i.l.bf16 %v17726_v56  ;;  %v17731_v36 = vpop.permute.xlu1 %17730 }
 0x4e2   :  { %15917 = vmatprep.subr.bf16.mxu0 %v15916_v60  ;;  %15477 = vmatprep.mubr.msk.f32.mxu1 %vm2839_vm10, %v12816_v26  ;;  %v17732_v21 = vunpack.i.l.bf16 %v17731_v36 }
 0x4e3   :  { %v15932_v17 = vpack.c.bf16 %v17728_v10, %v17727_v61 }
 0x4e4   :  { %14669 = vmatmul.mubr.msk.f32.gmra.mrb[32].mxu0 %vm2839_vm10, %v23503_v23  ;;  %15478 = vmatmul.mubr.msk.f32.gmra.mrb[38].mxu1 %vm2839_vm10, %v12817_v2  ;;  %v17733_v23 = vunpack.i.h.bf16 %v17731_v36 }
 0x4e5   :  { %15919 = vmatpush3.bf16.msra.mxu0 %v15916_v60  ;;  %14671 = vmatprep.mubr.msk.f32.mxu0 %vm2839_vm10, %v23518_v34 }
 0x4e6   :  { %15921 = vmatprep.subr.bf16.mxu0 %v15920_v39  ;;  %15480 = vmatprep.mubr.msk.f32.mxu1 %vm2839_vm10, %v12818_v22  ;;  %v15936_v53 = vpack.c.bf16 %v17733_v23, %v17732_v21 }
 0x4e8   :  { %14672 = vmatmul.mubr.msk.f32.gmra.mrb[34].mxu0 %vm2839_vm10, %v23523_v24  ;;  %15481 = vmatmul.mubr.msk.f32.gmra.mrb[40].mxu1 %vm2839_vm10, %v12819_v19 }
 0x4e9   :  { %15923 = vmatpush3.bf16.msra.mxu0 %v15920_v39  ;;  %14690 = vmatprep.mubr.msk.f32.mxu0 %vm2839_vm10, %v23539_v11 }
 0x4ea   :  { %15925 = vmatprep.subr.bf16.mxu0 %v15924_v37  ;;  %15483 = vmatprep.mubr.msk.f32.mxu1 %vm2839_vm10, %v12820_v49 }
 0x4ec   :  { %14691 = vmatmul.mubr.msk.f32.vlgmr.msra.gmra.mrb[28].mxu0 %vm2839_vm10, %v23545_v45  ;;  %15484 = vmatmul.mubr.msk.f32.gmra.mrb[42].mxu1 %vm2839_vm10, %v12821_v54 }
 0x4ed   :  { %15927 = vmatpush3.bf16.msra.mxu0 %v15924_v37  ;;  %14693 = vmatprep.mubr.msk.f32.mxu0 %vm2839_vm10, %v23561_v35  ;;  %v11468_v35 = vld [vmem:[%s24119_s2 + $0x28] sm:$0xff] }
 0x4ee   :  { %15929 = vmatprep.subr.bf16.mxu0 %v15928_v25 }
 0x4f0   :  { %14694 = vmatmul.mubr.msk.f32.gmra.mrb[30].mxu0 %vm2839_vm10, %v23567_v18  ;;  %v11467_v18 = vld [vmem:[%s24119_s2 + $0x20] sm:$0xff] }
 0x4f1   :  { %15931 = vmatpush3.bf16.msra.mxu0 %v15928_v25  ;;  %14696 = vmatprep.mubr.msk.f32.mxu0 %vm2839_vm10, %v23583_v6 }
 0x4f2   :  { %15933 = vmatprep.subr.bf16.mxu0 %v15932_v17 }
 0x4f4   :  { %14697 = vmatmul.mubr.msk.f32.gmra.mrb[32].mxu0 %vm2839_vm10, %v23589_v57 }
 0x4f5   :  { %15935 = vmatpush3.bf16.msra.mxu0 %v15932_v17  ;;  %14699 = vmatprep.mubr.msk.f32.mxu0 %vm2839_vm10, %v23603_v3  ;;  %v16376_v3 = vpack.c.bf16 %v11514_v44, %v11513_v58 }
 0x4f6   :  { %15937 = vmatprep.subr.bf16.mxu0 %v15936_v53 }
 0x4f8   :  { %14700 = vmatmul.mubr.msk.f32.gmra.mrb[34].mxu0 %vm2839_vm10, %v23609_v0  ;;  %v11515_v0 = vld [vmem:[%s24120_s8 + $0x20] sm:$0xff] }
 0x4f9   :  { %15939 = vmatpush3.bf16.msra.mxu0 %v15936_v53  ;;  %14718 = vmatprep.mubr.msk.f32.mxu0 %vm2839_vm10, %v23622_v16 }
 0x4fa   :  { %16373 = vmatprep.subr.bf16.mxu0 %v16372_v40 }
 0x4fc   :  { %14719 = vmatmul.mubr.msk.f32.vlgmr.msra.gmra.mrb[28].mxu0 %vm2839_vm10, %v23627_v51 }
 0x4fd   :  { %14721 = vmatprep.mubr.msk.f32.mxu0 %vm2839_vm10, %v12816_v26  ;;  %16375 = vmatpush3.bf16.msra.mxu0 %v16372_v40 }
 0x4fe   :  { %16377 = vmatprep.subr.bf16.mxu0 %v16376_v3 }
 0x500   :  { %14722 = vmatmul.mubr.msk.f32.gmra.mrb[30].mxu0 %vm2839_vm10, %v12817_v2 }
 0x501   :  { %14724 = vmatprep.mubr.msk.f32.mxu0 %vm2839_vm10, %v12818_v22  ;;  %16379 = vmatpush3.bf16.msra.mxu0 %v16376_v3 }
 0x502   :  { %15494 = vmatprep.subr.mxu0 %v11515_v0 }
 0x504   :  { %14725 = vmatmul.mubr.msk.f32.gmra.mrb[32].mxu0 %vm2839_vm10, %v12819_v19 }
 0x505   :  { %14727 = vmatprep.mubr.msk.f32.mxu0 %vm2839_vm10, %v12820_v49  ;;  %15495 = vmatpush3.msra.mxu0 %v11515_v0 }
 0x508   :  { %14728 = vmatmul.mubr.msk.f32.gmra.mrb[34].mxu0 %vm2839_vm10, %v12821_v54 }
 0x5b3   :  { %v15476_v34 = vpop.f32.mrb[36].mxu1 }
 0x5b4   :  { %v11249_v24 = vpop.f32.mrb[37].mxu1  ;;  %11306 = vrot.lane.b32.xlu1 %v15476_v34, %s17825_s21 }
 0x5b5   :  { %11304 = vrot.lane.b32.xlu0 %v11249_v24, %s17825_s21 }
 0x5b7   :  { %v15479_v27 = vpop.f32.mrb[38].mxu1 }
 0x5b8   :  { %v11259_v8 = vpop.f32.mrb[39].mxu1  ;;  %11310 = vrot.lane.b32.xlu1 %v15479_v27, %s17825_s21 }
 0x5b9   :  { %11308 = vrot.lane.b32.xlu0 %v11259_v8, %s17825_s21 }
 0x5bb   :  { %v15482_v15 = vpop.f32.mrb[40].mxu1 }
 0x5bc   :  { %v11269_v33 = vpop.f32.mrb[41].mxu1  ;;  %11314 = vrot.lane.b32.xlu1 %v15482_v15, %s17825_s21 }
 0x5bd   :  { %11312 = vrot.lane.b32.xlu0 %v11269_v33, %s17825_s21 }
 0x5bf   :  { %v15485_v11 = vpop.f32.mrb[42].mxu1 }
 0x5c0   :  { %v11279_v45 = vpop.f32.mrb[43].mxu1  ;;  %11318 = vrot.lane.b32.xlu1 %v15485_v11, %s17825_s21 }
 0x5c1   :  { %11316 = vrot.lane.b32.xlu0 %v11279_v45, %s17825_s21 }
 0x5c4   :  { %11481 = vrot.lane.b32.xlu1 %v11464_v62, %s17824_s18 }
 0x5c5   :  { %11479 = vrot.lane.b32.xlu0 %v11463_v7, %s17824_s18 }
 0x5c8   :  { %11485 = vrot.lane.b32.xlu1 %v11466_v5, %s17824_s18 }
 0x5c9   :  { %11483 = vrot.lane.b32.xlu0 %v11465_v48, %s17824_s18 }
 0x5cc   :  { %11489 = vrot.lane.b32.xlu1 %v11468_v35, %s17824_s18 }
 0x5cd   :  { %11487 = vrot.lane.b32.xlu0 %v11467_v18, %s17824_s18 }
 0x5cf   :  { %v14720_v31 = vpop.f32.mrb[28].mxu0 }
 0x5d0   :  { %v7253_v28 = vpop.f32.mrb[29].mxu0  ;;  %11493 = vrot.lane.b32.xlu1 %v11470_v14, %s17824_s18 }
 0x5d1   :  { %11491 = vrot.lane.b32.xlu0 %v11469_v41, %s17824_s18 }
 0x5d3   :  { %v14723_v29 = vpop.f32.mrb[30].mxu0 }
 0x5d4   :  { %v7263_v32 = vpop.f32.mrb[31].mxu0 }
 0x5d7   :  { %v14726_v42 = vpop.f32.mrb[32].mxu0 }
 0x5d8   :  { %v7273_v6 = vpop.f32.mrb[33].mxu0 }
 0x5db   :  { %v14729_v57 = vpop.f32.mrb[34].mxu0 }
 0x5dc   :  { %v7283_v63 = vpop.f32.mrb[35].mxu0 }
 0x626   :  { %v11307_v50 = vpop.permute.xlu1 %11306 }
 0x627   :  { %v11330_v47 = vsel %vm11328_vm11, %v14720_v31, %v11307_v50  ;;  %v11305_v13 = vpop.permute.xlu0 %11304 }
 0x628   :  { %v11341_v4 = vsel %vm11339_vm12, %v11330_v47, 0.0  ;;  %v11329_v16 = vsel %vm11328_vm11, %v7253_v28, %v11305_v13 }
 0x629   :  { %v11340_v38 = vsel %vm11339_vm12, %v11329_v16, 0.0 }
 0x62a   :  { %v11342_v51 = vadd.f32 %v11341_v4, %v11340_v38  ;;  %v11311_v26 = vpop.permute.xlu1 %11310 }
 0x62b   :  { %v11309_v43 = vpop.permute.xlu0 %11308  ;;  %v11332_v30 = vsel %vm11328_vm11, %v14723_v29, %v11311_v26 }
 0x62c   :  { %v11331_v60 = vsel %vm11328_vm11, %v7263_v32, %v11309_v43  ;;  %v11345_v39 = vsel %vm11339_vm12, %v11332_v30, 0.0 }
 0x62d   :  { %v11343_v46 = vsel %vm11339_vm12, %v11331_v60, 0.0 }
 0x62e   :  { %v11344_v2 = vadd.f32 %v11343_v46, %v11342_v51  ;;  %v11315_v22 = vpop.permute.xlu1 %11314 }
 0x62f   :  { %v11313_v59 = vpop.permute.xlu0 %11312  ;;  %v11334_v20 = vsel %vm11328_vm11, %v14726_v42, %v11315_v22 }
 0x630   :  { %v11333_v19 = vsel %vm11328_vm11, %v7273_v6, %v11313_v59  ;;  %v11346_v9 = vadd.f32 %v11345_v39, %v11344_v2  ;;  %v11349_v37 = vsel %vm11339_vm12, %v11334_v20, 0.0  ;;  %v13066_v59 = vld [vmem:[%s24121_s6] ss:$0 sm:$0xff] }
 0x631   :  { %v11347_v49 = vsel %vm11339_vm12, %v11333_v19, 0.0 }
 0x632   :  { %v11348_v12 = vadd.f32 %v11347_v49, %v11346_v9  ;;  %v11319_v52 = vpop.permute.xlu1 %11318 }
 0x633   :  { %v11317_v56 = vpop.permute.xlu0 %11316  ;;  %v11336_v54 = vsel %vm11328_vm11, %v14729_v57, %v11319_v52 }
 0x634   :  { %v11335_v25 = vsel %vm11328_vm11, %v7283_v63, %v11317_v56  ;;  %v11350_v10 = vadd.f32 %v11349_v37, %v11348_v12  ;;  %v11353_v23 = vsel %vm11339_vm12, %v11336_v54, 0.0  ;;  %v13067_v12 = vld [vmem:[%s24122_s7] ss:$0 sm:$0xff] }
 0x635   :  { %v11351_v61 = vsel %vm11339_vm12, %v11335_v25, 0.0 }
 0x636   :  { %v11352_v36 = vadd.f32 %v11351_v61, %v11350_v10  ;;  %v11482_v52 = vpop.permute.xlu1 %11481 }
 0x637   :  { %v11480_v22 = vpop.permute.xlu0 %11479 }
 0x638   :  { %v11354_v21 = vadd.f32 %v11353_v23, %v11352_v36 }
 0x63a   :  { %v11355_v17 = vrot.slane %v11354_v21, 4 }
 0x63c   :  { %v11356_v53 = vadd.f32 %v11355_v17, %v11354_v21 }
 0x63e   :  { %v11357_v34 = vrot.slane %v11356_v53, 2 }
 0x640   :  { %v11358_v24 = vadd.f32 %v11357_v34, %v11356_v53 }
 0x642   :  { %v11359_v27 = vrot.slane %v11358_v24, 1 }
 0x644   :  { %v11360_v8 = vadd.f32 %v11359_v27, %v11358_v24 }
 0x646   :  { %v11362_v15 = vmul.f32 0.015625, %v11360_v8  ;;  %v11484_v8 = vpop.permute.xlu0 %11483 }
 0x648   :  { %v11363_v33 = vsub.f32 %v11329_v16, %v11362_v15  ;;  %v11364_v11 = vsub.f32 %v11330_v47, %v11362_v15  ;;  %v11365_v45 = vsub.f32 %v11331_v60, %v11362_v15  ;;  %v11366_v62 = vsub.f32 %v11332_v30, %v11362_v15 }
 0x649   :  { %v11367_v7 = vsub.f32 %v11333_v19, %v11362_v15  ;;  %v11368_v5 = vsub.f32 %v11334_v20, %v11362_v15  ;;  %v11369_v48 = vsub.f32 %v11335_v25, %v11362_v15  ;;  %v11370_v35 = vsub.f32 %v11336_v54, %v11362_v15 }
 0x64a   :  { %v11371_v18 = vmul.f32 %v11363_v33, %v11363_v33  ;;  %v11372_v14 = vmul.f32 %v11364_v11, %v11364_v11  ;;  %v11373_v41 = vmul.f32 %v11365_v45, %v11365_v45  ;;  %v11374_v31 = vmul.f32 %v11366_v62, %v11366_v62 }
 0x64b   :  { %v11375_v42 = vmul.f32 %v11367_v7, %v11367_v7  ;;  %v11376_v63 = vmul.f32 %v11368_v5, %v11368_v5  ;;  %v11377_v40 = vmul.f32 %v11369_v48, %v11369_v48  ;;  %v11378_v3 = vmul.f32 %v11370_v35, %v11370_v35 }
 0x64c   :  { %v11379_v28 = vsel %vm11339_vm12, %v11371_v18, 0.0  ;;  %v11380_v29 = vsel %vm11339_vm12, %v11372_v14, 0.0  ;;  %v11382_v6 = vsel %vm11339_vm12, %v11373_v41, 0.0  ;;  %v11384_v55 = vsel %vm11339_vm12, %v11374_v31, 0.0 }
 0x64d   :  { %v11381_v32 = vadd.f32 %v11380_v29, %v11379_v28  ;;  %v11386_v58 = vsel %vm11339_vm12, %v11375_v42, 0.0  ;;  %v11388_v0 = vsel %vm11339_vm12, %v11376_v63, 0.0  ;;  %v11390_v47 = vsel %vm11339_vm12, %v11377_v40, 0.0 }
 0x64e   :  { %v11392_v4 = vsel %vm11339_vm12, %v11378_v3, 0.0 }
 0x64f   :  { %v11383_v57 = vadd.f32 %v11382_v6, %v11381_v32  ;;  %v11488_v32 = vpop.permute.xlu0 %11487 }
 0x651   :  { %v11385_v1 = vadd.f32 %v11384_v55, %v11383_v57 }
 0x653   :  { %v11387_v44 = vadd.f32 %v11386_v58, %v11385_v1 }
 0x655   :  { %v11389_v50 = vadd.f32 %v11388_v0, %v11387_v44 }
 0x657   :  { %v11391_v13 = vadd.f32 %v11390_v47, %v11389_v50  ;;  %v11492_v47 = vpop.permute.xlu0 %11491 }
 0x659   :  { %v11393_v16 = vadd.f32 %v11392_v4, %v11391_v13 }
 0x65b   :  { %v11394_v38 = vrot.slane %v11393_v16, 4 }
 0x65d   :  { %v11395_v51 = vadd.f32 %v11394_v38, %v11393_v16 }
 0x65f   :  { %v11396_v26 = vrot.slane %v11395_v51, 2 }
 0x661   :  { %v11397_v43 = vadd.f32 %v11396_v26, %v11395_v51 }
 0x663   :  { %v11398_v30 = vrot.slane %v11397_v43, 1 }
 0x665   :  { %v11399_v60 = vadd.f32 %v11398_v30, %v11397_v43 }
 0x667   :  { %v11400_v46 = vmul.f32 0.015625, %v11399_v60 }
 0x669   :  { %v11401_v2 = vadd.f32 1e-05, %v11400_v46 }
 0x66b   :  { %17738 = vrsqrt.f32 %v11401_v2 }
 0x675   :  { %v17739_v39 = vpop.eup %17738 }
 0x676   :  { %v11409_v20 = vmul.f32 %v17739_v39, %v11369_v48  ;;  %v11404_v19 = vmul.f32 %v17739_v39, %v11364_v11  ;;  %v11403_v9 = vmul.f32 %v17739_v39, %v11363_v33  ;;  %v11406_v49 = vmul.f32 %v17739_v39, %v11366_v62 }
 0x677   :  { %v11405_v37 = vmul.f32 %v17739_v39, %v11365_v45  ;;  %v11408_v56 = vmul.f32 %v17739_v39, %v11368_v5  ;;  %v11407_v54 = vmul.f32 %v17739_v39, %v11367_v7  ;;  %v11410_v25 = vmul.f32 %v17739_v39, %v11370_v35  ;;  %v11486_v7 = vpop.permute.xlu1 %11485 }
 0x678   :  { %v11418_v10 = vmul.f32 %v13066_v59, %v11404_v19  ;;  %v11417_v61 = vmul.f32 %v13066_v59, %v11403_v9  ;;  %v11420_v36 = vmul.f32 %v13066_v59, %v11406_v49  ;;  %v11423_v53 = vmul.f32 %v13066_v59, %v11409_v20 }
 0x679   :  { %v11419_v23 = vmul.f32 %v13066_v59, %v11405_v37  ;;  %v11422_v21 = vmul.f32 %v13066_v59, %v11408_v56  ;;  %v11421_v17 = vmul.f32 %v13066_v59, %v11407_v54  ;;  %v11424_v11 = vmul.f32 %v13066_v59, %v11410_v25 }
 0x67a   :  { %v11432_v34 = vadd.f32 %v13067_v12, %v11418_v10  ;;  %v11431_v24 = vadd.f32 %v13067_v12, %v11417_v61  ;;  %v11434_v27 = vadd.f32 %v13067_v12, %v11420_v36  ;;  %v11437_v41 = vadd.f32 %v13067_v12, %v11423_v53 }
 0x67b   :  { %v11433_v15 = vadd.f32 %v13067_v12, %v11419_v23  ;;  %v11435_v33 = vadd.f32 %v13067_v12, %v11421_v17  ;;  %v11436_v35 = vadd.f32 %v13067_v12, %v11422_v21  ;;  %v11438_v42 = vadd.f32 %v13067_v12, %v11424_v11  ;;  %v11490_v40 = vpop.permute.xlu1 %11489 }
 0x67c   :  { %vm11440_vm14 = vcmp.ge.f32.partialorder %v11432_v34, 0.0  ;;  %v11448_v45 = vmul.f32 0.01, %v11432_v34  ;;  %vm11439_vm15 = vcmp.ge.f32.partialorder %v11431_v24, 0.0  ;;  %v11447_v62 = vmul.f32 0.01, %v11431_v24 }
 0x67d   :  { %v11450_v5 = vmul.f32 0.01, %v11434_v27  ;;  %vm11441_vm1 = vcmp.ge.f32.partialorder %v11433_v15, 0.0  ;;  %v11449_v48 = vmul.f32 0.01, %v11433_v15  ;;  %vm11442_vm2 = vcmp.ge.f32.partialorder %v11434_v27, 0.0 }
 0x67e   :  { %v23780_v18 = vsel %vm11440_vm14, %v11432_v34, %v11448_v45  ;;  %v23782_v14 = vsel %vm11439_vm15, %v11431_v24, %v11447_v62  ;;  %vm11443_vm3 = vcmp.ge.f32.partialorder %v11435_v33, 0.0  ;;  %v11452_v63 = vmul.f32 0.01, %v11436_v35 }
 0x67f   :  { %v11504_v31 = vsel %vm11339_vm12, %v23780_v18, %v11482_v52  ;;  %v11503_v28 = vsel %vm11339_vm12, %v23782_v14, %v11480_v22  ;;  %v23788_v29 = vsel %vm11441_vm1, %v11433_v15, %v11449_v48  ;;  %v23791_v6 = vsel %vm11442_vm2, %v11434_v27, %v11450_v5  ;;  %v11494_v16 = vpop.permute.xlu1 %11493 }
 0x680   :  { %15496 = vmatprep.mubr.msk.f32.mxu0 %vm11516_vm13, %v11503_v28  ;;  %v11505_v57 = vsel %vm11339_vm12, %v23788_v29, %v11484_v8  ;;  %v11451_v55 = vmul.f32 0.01, %v11435_v33  ;;  %vm11444_vm4 = vcmp.ge.f32.partialorder %v11436_v35, 0.0  ;;  %v11453_v1 = vmul.f32 0.01, %v11437_v41 }
 0x681   :  { %15497 = vmatmul.mubr.msk.f32.vlgmr.msra.gmra.mrb[36].mxu0 %vm11516_vm13, %v11504_v31  ;;  %vm11445_vm5 = vcmp.ge.f32.partialorder %v11437_v41, 0.0  ;;  %v11506_v44 = vsel %vm11339_vm12, %v23791_v6, %v11486_v7  ;;  %v23801_v3 = vsel %vm11444_vm4, %v11436_v35, %v11452_v63  ;;  %v11454_v50 = vmul.f32 0.01, %v11438_v42 }
 0x682   :  { %15499 = vmatprep.mubr.msk.f32.mxu0 %vm11516_vm13, %v11505_v57  ;;  %v23797_v58 = vsel %vm11443_vm3, %v11435_v33, %v11451_v55  ;;  %vm11446_vm6 = vcmp.ge.f32.partialorder %v11438_v42, 0.0  ;;  %v23806_v13 = vsel %vm11445_vm5, %v11437_v41, %v11453_v1  ;;  %v11508_v4 = vsel %vm11339_vm12, %v23801_v3, %v11490_v40 }
 0x683   :  { %v11507_v0 = vsel %vm11339_vm12, %v23797_v58, %v11488_v32  ;;  %v23811_v38 = vsel %vm11446_vm6, %v11438_v42, %v11454_v50  ;;  %v11509_v51 = vsel %vm11339_vm12, %v23806_v13, %v11492_v47  ;;  %vm11902_vm15 = vcmask 23552  }
 0x684   :  { %v11510_v26 = vsel %vm11339_vm12, %v23811_v38, %v11494_v16 }
 0x685   :  { %15500 = vmatmul.mubr.msk.f32.gmra.mrb[38].mxu0 %vm11516_vm13, %v11506_v44 }
 0x686   :  { %15502 = vmatprep.mubr.msk.f32.mxu0 %vm11516_vm13, %v11507_v0 }
 0x689   :  { %15503 = vmatmul.mubr.msk.f32.gmra.mrb[40].mxu0 %vm11516_vm13, %v11508_v4 }
 0x68a   :  { %15505 = vmatprep.mubr.msk.f32.mxu0 %vm11516_vm13, %v11509_v51 }
 0x68d   :  { %15506 = vmatmul.mubr.msk.f32.gmra.mrb[42].mxu0 %vm11516_vm13, %v11510_v26 }
 0x754   :  { %v15498_v43 = vpop.f32.mrb[36].mxu0 }
 0x755   :  { %v11650_v30 = vsel %vm11648_vm7, %v15498_v43, 0.0  ;;  %v11607_v60 = vpop.f32.mrb[37].mxu0 }
 0x756   :  { %v11649_v46 = vsel %vm11648_vm7, %v11607_v60, 0.0 }
 0x757   :  { %v11651_v2 = vadd.f32 %v11650_v30, %v11649_v46 }
 0x758   :  { %v15501_v22 = vpop.f32.mrb[38].mxu0 }
 0x759   :  { %v11617_v39 = vpop.f32.mrb[39].mxu0  ;;  %v11654_v19 = vsel %vm11648_vm7, %v15501_v22, 0.0 }
 0x75a   :  { %v11652_v59 = vsel %vm11648_vm7, %v11617_v39, 0.0 }
 0x75b   :  { %v11653_v20 = vadd.f32 %v11652_v59, %v11651_v2 }
 0x75c   :  { %v15504_v9 = vpop.f32.mrb[40].mxu0 }
 0x75d   :  { %v11627_v49 = vpop.f32.mrb[41].mxu0  ;;  %v11655_v12 = vadd.f32 %v11654_v19, %v11653_v20  ;;  %v11658_v56 = vsel %vm11648_vm7, %v15504_v9, 0.0 }
 0x75e   :  { %v11656_v52 = vsel %vm11648_vm7, %v11627_v49, 0.0 }
 0x75f   :  { %v11657_v37 = vadd.f32 %v11656_v52, %v11655_v12 }
 0x760   :  { %v15507_v54 = vpop.f32.mrb[42].mxu0 }
 0x761   :  { %v11637_v25 = vpop.f32.mrb[43].mxu0  ;;  %v11659_v10 = vadd.f32 %v11658_v56, %v11657_v37  ;;  %v11662_v23 = vsel %vm11648_vm7, %v15507_v54, 0.0  ;;  %v13076_v37 = vld [vmem:[%s24123_s9] ss:$0 sm:$0xff]  ;;  %s17827_s9 = smov 126  }
 0x762   :  { %v11660_v61 = vsel %vm11648_vm7, %v11637_v25, 0.0 }
 0x763   :  { %v11661_v36 = vadd.f32 %v11660_v61, %v11659_v10  ;;  %v13077_v61 = vld [vmem:[%s24124_s10] ss:$0 sm:$0xff]  ;;  %s17828_s10 = smov 125  }
 0x765   :  { %v11663_v21 = vadd.f32 %v11662_v23, %v11661_v36 }
 0x767   :  { %v11664_v17 = vrot.slane %v11663_v21, 4 }
 0x769   :  { %v11665_v53 = vadd.f32 %v11664_v17, %v11663_v21 }
 0x76b   :  { %v11666_v34 = vrot.slane %v11665_v53, 2 }
 0x76d   :  { %v11667_v24 = vadd.f32 %v11666_v34, %v11665_v53 }
 0x76f   :  { %v11668_v27 = vrot.slane %v11667_v24, 1 }
 0x771   :  { %v11669_v8 = vadd.f32 %v11668_v27, %v11667_v24 }
 0x773   :  { %v11670_v15 = vmul.f32 0.015625, %v11669_v8 }
 0x775   :  { %v11671_v33 = vsub.f32 %v11607_v60, %v11670_v15  ;;  %v11672_v11 = vsub.f32 %v15498_v43, %v11670_v15  ;;  %v11673_v45 = vsub.f32 %v11617_v39, %v11670_v15  ;;  %v11674_v62 = vsub.f32 %v15501_v22, %v11670_v15 }
 0x776   :  { %v11675_v7 = vsub.f32 %v11627_v49, %v11670_v15  ;;  %v11676_v5 = vsub.f32 %v15504_v9, %v11670_v15  ;;  %v11677_v48 = vsub.f32 %v11637_v25, %v11670_v15  ;;  %v11678_v35 = vsub.f32 %v15507_v54, %v11670_v15 }
 0x777   :  { %v11679_v41 = vmul.f32 %v11671_v33, %v11671_v33  ;;  %v11680_v31 = vmul.f32 %v11672_v11, %v11672_v11  ;;  %v11681_v28 = vmul.f32 %v11673_v45, %v11673_v45  ;;  %v11682_v32 = vmul.f32 %v11674_v62, %v11674_v62 }
 0x778   :  { %v11683_v55 = vmul.f32 %v11675_v7, %v11675_v7  ;;  %v11684_v44 = vmul.f32 %v11676_v5, %v11676_v5  ;;  %v11685_v47 = vmul.f32 %v11677_v48, %v11677_v48  ;;  %v11686_v51 = vmul.f32 %v11678_v35, %v11678_v35 }
 0x779   :  { %v11687_v42 = vsel %vm11648_vm7, %v11679_v41, 0.0  ;;  %v11688_v57 = vsel %vm11648_vm7, %v11680_v31, 0.0  ;;  %v11690_v1 = vsel %vm11648_vm7, %v11681_v28, 0.0  ;;  %v11692_v0 = vsel %vm11648_vm7, %v11682_v32, 0.0 }
 0x77a   :  { %v11689_v63 = vadd.f32 %v11688_v57, %v11687_v42  ;;  %v11694_v4 = vsel %vm11648_vm7, %v11683_v55, 0.0  ;;  %v11696_v26 = vsel %vm11648_vm7, %v11684_v44, 0.0  ;;  %v11698_v30 = vsel %vm11648_vm7, %v11685_v47, 0.0 }
 0x77b   :  { %v11700_v46 = vsel %vm11648_vm7, %v11686_v51, 0.0 }
 0x77c   :  { %v11691_v40 = vadd.f32 %v11690_v1, %v11689_v63 }
 0x77e   :  { %v11693_v50 = vadd.f32 %v11692_v0, %v11691_v40 }
 0x780   :  { %v11695_v16 = vadd.f32 %v11694_v4, %v11693_v50 }
 0x782   :  { %v11697_v43 = vadd.f32 %v11696_v26, %v11695_v16 }
 0x784   :  { %v11699_v60 = vadd.f32 %v11698_v30, %v11697_v43 }
 0x786   :  { %v11701_v2 = vadd.f32 %v11700_v46, %v11699_v60 }
 0x788   :  { %v11702_v22 = vrot.slane %v11701_v2, 4 }
 0x78a   :  { %v11703_v39 = vadd.f32 %v11702_v22, %v11701_v2 }
 0x78c   :  { %v11704_v59 = vrot.slane %v11703_v39, 2 }
 0x78e   :  { %v11705_v20 = vadd.f32 %v11704_v59, %v11703_v39  ;;  %v23880_v59 = vld [vmem:[%s24125_s11] ss:$0 sm:$0xff] }
 0x790   :  { %v11706_v19 = vrot.slane %v11705_v20, 1 }
 0x792   :  { %v11707_v9 = vadd.f32 %v11706_v19, %v11705_v20 }
 0x794   :  { %v11708_v49 = vmul.f32 0.015625, %v11707_v9 }
 0x796   :  { %v11709_v12 = vadd.f32 1e-05, %v11708_v49 }
 0x798   :  { %17740 = vrsqrt.f32 %v11709_v12 }
 0x7a2   :  { %v17741_v52 = vpop.eup %17740 }
 0x7a3   :  { %v11717_v56 = vmul.f32 %v17741_v52, %v11677_v48  ;;  %v11712_v54 = vmul.f32 %v17741_v52, %v11672_v11  ;;  %v11711_v25 = vmul.f32 %v17741_v52, %v11671_v33  ;;  %v11713_v10 = vmul.f32 %v17741_v52, %v11673_v45 }
 0x7a4   :  { %v11714_v36 = vmul.f32 %v17741_v52, %v11674_v62  ;;  %v11715_v23 = vmul.f32 %v17741_v52, %v11675_v7  ;;  %v11716_v21 = vmul.f32 %v17741_v52, %v11676_v5  ;;  %v11718_v17 = vmul.f32 %v17741_v52, %v11678_v35 }
 0x7a5   :  { %v11726_v53 = vmul.f32 %v13076_v37, %v11712_v54  ;;  %v11725_v34 = vmul.f32 %v13076_v37, %v11711_v25  ;;  %v11727_v8 = vmul.f32 %v13076_v37, %v11713_v10  ;;  %v11731_v5 = vmul.f32 %v13076_v37, %v11717_v56 }
 0x7a6   :  { %v11728_v33 = vmul.f32 %v13076_v37, %v11714_v36  ;;  %v11729_v45 = vmul.f32 %v13076_v37, %v11715_v23  ;;  %v11730_v7 = vmul.f32 %v13076_v37, %v11716_v21  ;;  %v11732_v41 = vmul.f32 %v13076_v37, %v11718_v17 }
 0x7a7   :  { %v11740_v24 = vadd.f32 %v13077_v61, %v11726_v53  ;;  %v11739_v27 = vadd.f32 %v13077_v61, %v11725_v34  ;;  %v11741_v15 = vadd.f32 %v13077_v61, %v11727_v8  ;;  %v23846_v35 = vadd.f32 %v13077_v61, %v11731_v5 }
 0x7a8   :  { %v11742_v11 = vadd.f32 %v13077_v61, %v11728_v33  ;;  %v11743_v62 = vadd.f32 %v13077_v61, %v11729_v45  ;;  %v23842_v48 = vadd.f32 %v13077_v61, %v11730_v7  ;;  %v23850_v31 = vadd.f32 %v13077_v61, %v11732_v41 }
 0x7a9   :  { %11757 = vrot.lane.b32.xlu1 %v11740_v24, %s17826_s4  ;;  %11755 = vrot.lane.b32.xlu0 %v11739_v27, %s17826_s4 }
 0x7ad   :  { %11781 = vrot.lane.b32.xlu1 %v11740_v24, %s17827_s9  ;;  %11779 = vrot.lane.b32.xlu0 %v11739_v27, %s17827_s9 }
 0x7b1   :  { %11783 = vrot.lane.b32.xlu1 %v11741_v15, %s17827_s9  ;;  %11759 = vrot.lane.b32.xlu0 %v11741_v15, %s17826_s4 }
 0x7b5   :  { %11785 = vrot.lane.b32.xlu1 %v11742_v11, %s17827_s9  ;;  %11761 = vrot.lane.b32.xlu0 %v11742_v11, %s17826_s4 }
 0x7b9   :  { %11787 = vrot.lane.b32.xlu1 %v11743_v62, %s17827_s9  ;;  %11763 = vrot.lane.b32.xlu0 %v11743_v62, %s17826_s4 }
 0x7bd   :  { %11789 = vrot.lane.b32.xlu1 %v23842_v48, %s17827_s9  ;;  %11765 = vrot.lane.b32.xlu0 %v23842_v48, %s17826_s4 }
 0x7c1   :  { %11791 = vrot.lane.b32.xlu1 %v23846_v35, %s17827_s9  ;;  %11767 = vrot.lane.b32.xlu0 %v23846_v35, %s17826_s4 }
 0x7c5   :  { %11793 = vrot.lane.b32.xlu1 %v23850_v31, %s17827_s9  ;;  %11769 = vrot.lane.b32.xlu0 %v23850_v31, %s17826_s4 }
 0x7c9   :  { %11847 = vrot.lane.b32.xlu1 %v11740_v24, %s17828_s10  ;;  %11845 = vrot.lane.b32.xlu0 %v11739_v27, %s17828_s10 }
 0x7cd   :  { %11851 = vrot.lane.b32.xlu1 %v11742_v11, %s17828_s10  ;;  %11849 = vrot.lane.b32.xlu0 %v11741_v15, %s17828_s10 }
 0x7d1   :  { %11855 = vrot.lane.b32.xlu1 %v23842_v48, %s17828_s10  ;;  %11853 = vrot.lane.b32.xlu0 %v11743_v62, %s17828_s10 }
 0x7d5   :  { %11859 = vrot.lane.b32.xlu1 %v23850_v31, %s17828_s10  ;;  %11857 = vrot.lane.b32.xlu0 %v23846_v35, %s17828_s10 }
 0x81b   :  { %v11758_v28 = vpop.permute.xlu1 %11757  ;;  %v11756_v32 = vpop.permute.xlu0 %11755 }
 0x81c   :  { %v11805_v1 = vsel %vm11803_vm8, %v11740_v24, %v11758_v28  ;;  %v11804_v40 = vsel %vm11803_vm8, %v11739_v27, %v11756_v32 }
 0x81f   :  { %v11782_v42 = vpop.permute.xlu1 %11781  ;;  %v11780_v57 = vpop.permute.xlu0 %11779 }
 0x820   :  { %v23858_v63 = vsel %vm11803_vm8, %v11758_v28, %v11782_v42  ;;  %v23861_v55 = vsel %vm11803_vm8, %v11756_v32, %v11780_v57  ;;  %v11814_v44 = vsel %vm11812_vm9, %v11805_v1, %v11782_v42  ;;  %v11813_v0 = vsel %vm11812_vm9, %v11804_v40, %v11780_v57 }
 0x821   :  { %v11830_v26 = vmul.f32 0.01, %v11814_v44  ;;  %v11829_v43 = vmul.f32 0.01, %v11813_v0  ;;  %vm11822_vm10 = vcmp.ge.f32.partialorder %v11814_v44, 0.0  ;;  %vm11821_vm11 = vcmp.ge.f32.partialorder %v11813_v0, 0.0 }
 0x823   :  { %v11784_v50 = vpop.permute.xlu1 %11783  ;;  %v11760_v47 = vpop.permute.xlu0 %11759  ;;  %v11838_v20 = vsel %vm11822_vm10, %v11814_v44, %v11830_v26  ;;  %v11837_v19 = vsel %vm11821_vm11, %v11813_v0, %v11829_v43 }
 0x824   :  { %v11806_v4 = vsel %vm11803_vm8, %v11741_v15, %v11760_v47  ;;  %v23869_v16 = vsel %vm11803_vm8, %v11760_v47, %v11784_v50  ;;  %v23887_v54 = vmul.f32 %v23880_v59, %v11838_v20  ;;  %v23890_v25 = vmul.f32 %v23880_v59, %v11837_v19 }
 0x825   :  { %v11815_v51 = vsel %vm11812_vm9, %v11806_v4, %v11784_v50 }
 0x826   :  { %v11831_v46 = vmul.f32 0.01, %v11815_v51  ;;  %vm11823_vm12 = vcmp.ge.f32.partialorder %v11815_v51, 0.0  ;;  %v11904_v27 = vsel %vm11902_vm15, %v23887_v54, 0.0  ;;  %v11903_v8 = vsel %vm11902_vm15, %v23890_v25, 0.0 }
 0x827   :  { %v11786_v30 = vpop.permute.xlu1 %11785  ;;  %v11762_v60 = vpop.permute.xlu0 %11761 }
 0x828   :  { %v11807_v2 = vsel %vm11803_vm8, %v11742_v11, %v11762_v60  ;;  %v23874_v22 = vsel %vm11803_vm8, %v11762_v60, %v11786_v30  ;;  %v11839_v52 = vsel %vm11823_vm12, %v11815_v51, %v11831_v46 }
 0x829   :  { %v11816_v39 = vsel %vm11812_vm9, %v11807_v2, %v11786_v30  ;;  %v23894_v23 = vmul.f32 %v23880_v59, %v11839_v52 }
 0x82a   :  { %v11832_v9 = vmul.f32 0.01, %v11816_v39  ;;  %vm11824_vm14 = vcmp.ge.f32.partialorder %v11816_v39, 0.0 }
 0x82b   :  { %v11788_v49 = vpop.permute.xlu1 %11787  ;;  %v11764_v12 = vpop.permute.xlu0 %11763  ;;  %v11906_v45 = vsel %vm11902_vm15, %v23894_v23, 0.0 }
 0x82c   :  { %v11808_v37 = vsel %vm11803_vm8, %v11743_v62, %v11764_v12  ;;  %v23884_v56 = vsel %vm11803_vm8, %v11764_v12, %v11788_v49  ;;  %v11840_v61 = vsel %vm11824_vm14, %v11816_v39, %v11832_v9  ;;  %vm12369_vm14 = vcmask 195584  }
 0x82d   :  { %v11817_v10 = vsel %vm11812_vm9, %v11808_v37, %v11788_v49  ;;  %v11895_v15 = vmul.f32 %v23880_v59, %v11840_v61 }
 0x82e   :  { %vm11825_vm1 = vcmp.ge.f32.partialorder %v11817_v10, 0.0  ;;  %v11833_v36 = vmul.f32 0.01, %v11817_v10 }
 0x82f   :  { %v11790_v21 = vpop.permute.xlu1 %11789  ;;  %v11766_v17 = vpop.permute.xlu0 %11765  ;;  %v11908_v42 = vsel %vm11902_vm15, %v11895_v15, 0.0 }
 0x830   :  { %v11841_v53 = vsel %vm11825_vm1, %v11817_v10, %v11833_v36  ;;  %v11809_v34 = vsel %vm11803_vm8, %v23842_v48, %v11766_v17  ;;  %v11874_v24 = vsel %vm11803_vm8, %v11766_v17, %v11790_v21  ;;  %v11905_v48 = vadd.f32 %v11904_v27, %v11903_v8 }
 0x831   :  { %v11818_v33 = vsel %vm11812_vm9, %v11809_v34, %v11790_v21  ;;  %v11896_v62 = vmul.f32 %v23880_v59, %v11841_v53 }
 0x832   :  { %vm11826_vm2 = vcmp.ge.f32.partialorder %v11818_v33, 0.0  ;;  %v11834_v11 = vmul.f32 0.01, %v11818_v33  ;;  %v11907_v40 = vadd.f32 %v11906_v45, %v11905_v48 }
 0x833   :  { %v11792_v7 = vpop.permute.xlu1 %11791  ;;  %v11768_v5 = vpop.permute.xlu0 %11767  ;;  %v11910_v0 = vsel %vm11902_vm15, %v11896_v62, 0.0 }
 0x834   :  { %v11842_v41 = vsel %vm11826_vm2, %v11818_v33, %v11834_v11  ;;  %v11810_v28 = vsel %vm11803_vm8, %v23846_v35, %v11768_v5  ;;  %v11875_v32 = vsel %vm11803_vm8, %v11768_v5, %v11792_v7  ;;  %v11909_v4 = vadd.f32 %v11908_v42, %v11907_v40 }
 0x835   :  { %v11897_v57 = vmul.f32 %v23880_v59, %v11842_v41  ;;  %v11819_v1 = vsel %vm11812_vm9, %v11810_v28, %v11792_v7 }
 0x836   :  { %vm11827_vm3 = vcmp.ge.f32.partialorder %v11819_v1, 0.0  ;;  %v11835_v44 = vmul.f32 0.01, %v11819_v1  ;;  %v11911_v46 = vadd.f32 %v11910_v0, %v11909_v4 }
 0x837   :  { %v11794_v50 = vpop.permute.xlu1 %11793  ;;  %v11770_v47 = vpop.permute.xlu0 %11769  ;;  %v11912_v43 = vsel %vm11902_vm15, %v11897_v57, 0.0 }
 0x838   :  { %v11843_v51 = vsel %vm11827_vm3, %v11819_v1, %v11835_v44  ;;  %v11811_v35 = vsel %vm11803_vm8, %v23850_v31, %v11770_v47  ;;  %v11876_v26 = vsel %vm11803_vm8, %v11770_v47, %v11794_v50  ;;  %v11913_v9 = vadd.f32 %v11912_v43, %v11911_v46 }
 0x839   :  { %v11898_v30 = vmul.f32 %v23880_v59, %v11843_v51  ;;  %v11820_v60 = vsel %vm11812_vm9, %v11811_v35, %v11794_v50 }
 0x83a   :  { %vm11828_vm4 = vcmp.ge.f32.partialorder %v11820_v60, 0.0  ;;  %v11836_v2 = vmul.f32 0.01, %v11820_v60 }
 0x83b   :  { %v11914_v39 = vsel %vm11902_vm15, %v11898_v30, 0.0  ;;  %v11848_v20 = vpop.permute.xlu1 %11847  ;;  %v11846_v19 = vpop.permute.xlu0 %11845 }
 0x83c   :  { %v11844_v49 = vsel %vm11828_vm4, %v11820_v60, %v11836_v2  ;;  %v23924_v31 = vsel %vm11812_vm9, %v23858_v63, %v11848_v20  ;;  %v23928_v12 = vsel %vm11812_vm9, %v23861_v55, %v11846_v19  ;;  %v11915_v37 = vadd.f32 %v11914_v39, %v11913_v9 }
 0x83d   :  { %v11899_v52 = vmul.f32 %v23880_v59, %v11844_v49 }
 0x83f   :  { %v11916_v10 = vsel %vm11902_vm15, %v11899_v52, 0.0  ;;  %v11852_v61 = vpop.permute.xlu1 %11851  ;;  %v11850_v36 = vpop.permute.xlu0 %11849 }
 0x840   :  { %v11917_v21 = vadd.f32 %v11916_v10, %v11915_v37  ;;  %v23934_v17 = vsel %vm11812_vm9, %v23874_v22, %v11852_v61  ;;  %v23938_v63 = vsel %vm11812_vm9, %v23869_v16, %v11850_v36 }
 0x842   :  { %v11918_v53 = vrot.slane %v11917_v21, 4 }
 0x843   :  { %v11856_v34 = vpop.permute.xlu1 %11855  ;;  %v11854_v55 = vpop.permute.xlu0 %11853 }
 0x844   :  { %v11919_v27 = vadd.f32 %v11918_v53, %v11917_v21  ;;  %v23941_v59 = vsel %vm11812_vm9, %v11874_v24, %v11856_v34  ;;  %v23945_v8 = vsel %vm11812_vm9, %v23884_v56, %v11854_v55 }
 0x846   :  { %v11920_v33 = vrot.slane %v11919_v27, 2 }
 0x847   :  { %v11860_v11 = vpop.permute.xlu1 %11859  ;;  %v11858_v45 = vpop.permute.xlu0 %11857 }
 0x848   :  { %v11921_v22 = vadd.f32 %v11920_v33, %v11919_v27  ;;  %v23948_v7 = vsel %vm11812_vm9, %v11876_v26, %v11860_v11  ;;  %v23951_v16 = vsel %vm11812_vm9, %v11875_v32, %v11858_v45  ;;  %v13079_v27 = vld [vmem:[%s24126_s12] ss:$0 sm:$0xff]  ;;  %s17829_s12 = smov 1  }
 0x84a   :  { %v11922_v5 = vrot.slane %v11921_v22, 1 }
 0x84c   :  { %v11923_v48 = vadd.f32 %v11922_v5, %v11921_v22  ;;  %v13080_v5 = vld [vmem:[%s24127_s13] ss:$0 sm:$0xff]  ;;  %s17830_s13 = smov 2  }
 0x84e   :  { %v11924_v41 = vmul.f32 0.015625, %v11923_v48 }
 0x850   :  { %v11925_v24 = vsub.f32 %v23890_v25, %v11924_v41  ;;  %v11928_v28 = vsub.f32 %v11895_v15, %v11924_v41  ;;  %v11926_v42 = vsub.f32 %v23887_v54, %v11924_v41  ;;  %v11927_v56 = vsub.f32 %v23894_v23, %v11924_v41 }
 0x851   :  { %v11929_v40 = vsub.f32 %v11896_v62, %v11924_v41  ;;  %v11930_v47 = vsub.f32 %v11897_v57, %v11924_v41  ;;  %v11931_v35 = vsub.f32 %v11898_v30, %v11924_v41  ;;  %v11932_v43 = vsub.f32 %v11899_v52, %v11924_v41 }
 0x852   :  { %v11933_v1 = vmul.f32 %v11925_v24, %v11925_v24  ;;  %v11934_v44 = vmul.f32 %v11926_v42, %v11926_v42  ;;  %v11935_v0 = vmul.f32 %v11927_v56, %v11927_v56  ;;  %v11936_v4 = vmul.f32 %v11928_v28, %v11928_v28 }
 0x853   :  { %v11937_v26 = vmul.f32 %v11929_v40, %v11929_v40  ;;  %v11938_v54 = vmul.f32 %v11930_v47, %v11930_v47  ;;  %v11939_v62 = vmul.f32 %v11931_v35, %v11931_v35  ;;  %v11940_v39 = vmul.f32 %v11932_v43, %v11932_v43 }
 0x854   :  { %v11941_v50 = vsel %vm11902_vm15, %v11933_v1, 0.0  ;;  %v11942_v32 = vsel %vm11902_vm15, %v11934_v44, 0.0  ;;  %v11944_v25 = vsel %vm11902_vm15, %v11935_v0, 0.0  ;;  %v11946_v23 = vsel %vm11902_vm15, %v11936_v4, 0.0 }
 0x855   :  { %v11943_v51 = vadd.f32 %v11942_v32, %v11941_v50  ;;  %v11948_v46 = vsel %vm11902_vm15, %v11937_v26, 0.0  ;;  %v11950_v57 = vsel %vm11902_vm15, %v11938_v54, 0.0  ;;  %v11952_v19 = vsel %vm11902_vm15, %v11939_v62, 0.0 }
 0x856   :  { %v11954_v9 = vsel %vm11902_vm15, %v11940_v39, 0.0 }
 0x857   :  { %v11945_v15 = vadd.f32 %v11944_v25, %v11943_v51 }
 0x859   :  { %v11947_v60 = vadd.f32 %v11946_v23, %v11945_v15 }
 0x85b   :  { %v11949_v2 = vadd.f32 %v11948_v46, %v11947_v60 }
 0x85d   :  { %v11951_v20 = vadd.f32 %v11950_v57, %v11949_v2 }
 0x85f   :  { %v11953_v30 = vadd.f32 %v11952_v19, %v11951_v20 }
 0x861   :  { %v11955_v49 = vadd.f32 %v11954_v9, %v11953_v30 }
 0x863   :  { %v11956_v37 = vrot.slane %v11955_v49, 4 }
 0x865   :  { %v11957_v52 = vadd.f32 %v11956_v37, %v11955_v49 }
 0x867   :  { %v11958_v10 = vrot.slane %v11957_v52, 2 }
 0x869   :  { %v11959_v61 = vadd.f32 %v11958_v10, %v11957_v52 }
 0x86b   :  { %v11960_v36 = vrot.slane %v11959_v61, 1 }
 0x86d   :  { %v11961_v21 = vadd.f32 %v11960_v36, %v11959_v61  ;;  %v17831_v61 = vmov 2  }
 0x86e   :  { %17735 = vset.pattern.permute.xlu1 %v17831_v61  ;;  %17734 = vset.pattern.permute.xlu0 %v17831_v61 }
 0x86f   :  { %v11962_v53 = vmul.f32 0.015625, %v11961_v21 }
 0x871   :  { %v11963_v34 = vadd.f32 1e-05, %v11962_v53 }
 0x873   :  { %17742 = vrsqrt.f32 %v11963_v34 }
 0x87d   :  { %v17743_v55 = vpop.eup %17742 }
 0x87e   :  { %v11966_v33 = vmul.f32 %v17743_v55, %v11926_v42  ;;  %v11965_v11 = vmul.f32 %v17743_v55, %v11925_v24  ;;  %v11968_v45 = vmul.f32 %v17743_v55, %v11928_v28  ;;  %v11967_v22 = vmul.f32 %v17743_v55, %v11927_v56 }
 0x87f   :  { %v11970_v48 = vmul.f32 %v17743_v55, %v11930_v47  ;;  %v11969_v41 = vmul.f32 %v17743_v55, %v11929_v40  ;;  %v11972_v1 = vmul.f32 %v17743_v55, %v11932_v43  ;;  %v11971_v44 = vmul.f32 %v17743_v55, %v11931_v35 }
 0x880   :  { %v11980_v0 = vmul.f32 %v13079_v27, %v11966_v33  ;;  %v11979_v50 = vmul.f32 %v13079_v27, %v11965_v11  ;;  %v11982_v4 = vmul.f32 %v13079_v27, %v11968_v45  ;;  %v11981_v32 = vmul.f32 %v13079_v27, %v11967_v22 }
 0x881   :  { %v11984_v51 = vmul.f32 %v13079_v27, %v11970_v48  ;;  %v11983_v26 = vmul.f32 %v13079_v27, %v11969_v41  ;;  %v11986_v28 = vmul.f32 %v13079_v27, %v11972_v1  ;;  %v11985_v56 = vmul.f32 %v13079_v27, %v11971_v44 }
 0x882   :  { %v11994_v25 = vadd.f32 %v13080_v5, %v11980_v0  ;;  %v11993_v15 = vadd.f32 %v13080_v5, %v11979_v50  ;;  %v11996_v42 = vadd.f32 %v13080_v5, %v11982_v4  ;;  %v11995_v24 = vadd.f32 %v13080_v5, %v11981_v32 }
 0x883   :  { %v11998_v47 = vadd.f32 %v13080_v5, %v11984_v51  ;;  %v11997_v40 = vadd.f32 %v13080_v5, %v11983_v26  ;;  %v12000_v46 = vadd.f32 %v13080_v5, %v11986_v28  ;;  %v11999_v2 = vadd.f32 %v13080_v5, %v11985_v56 }
 0x884   :  { %v12002_v54 = vadd.f32 %v11994_v25, %v23924_v31  ;;  %v12001_v23 = vadd.f32 %v11993_v15, %v23928_v12  ;;  %v12004_v35 = vadd.f32 %v11996_v42, %v23934_v17  ;;  %v12003_v43 = vadd.f32 %v11995_v24, %v23938_v63 }
 0x885   :  { %v12006_v39 = vadd.f32 %v11998_v47, %v23941_v59  ;;  %v12005_v57 = vadd.f32 %v11997_v40, %v23945_v8  ;;  %v12008_v17 = vadd.f32 %v12000_v46, %v23948_v7  ;;  %v12007_v63 = vadd.f32 %v11999_v2, %v23951_v16 }
 0x886   :  { %v12018_v60 = vmul.f32 0.01, %v12002_v54  ;;  %v12017_v62 = vmul.f32 0.01, %v12001_v23  ;;  %vm12010_vm5 = vcmp.ge.f32.partialorder %v12002_v54, 0.0  ;;  %vm12009_vm6 = vcmp.ge.f32.partialorder %v12001_v23, 0.0 }
 0x887   :  { %v12020_v20 = vmul.f32 0.01, %v12004_v35  ;;  %v12019_v31 = vmul.f32 0.01, %v12003_v43  ;;  %vm12012_vm7 = vcmp.ge.f32.partialorder %v12004_v35, 0.0  ;;  %vm12011_vm8 = vcmp.ge.f32.partialorder %v12003_v43, 0.0 }
 0x888   :  { %v23976_v19 = vsel %vm12010_vm5, %v12002_v54, %v12018_v60  ;;  %v23978_v12 = vsel %vm12009_vm6, %v12001_v23, %v12017_v62  ;;  %v12022_v59 = vmul.f32 0.01, %v12006_v39  ;;  %v12021_v8 = vmul.f32 0.01, %v12005_v57 }
 0x889   :  { %12043 = vrot.lane.b32.xlu1 %v23976_v19, %s17829_s12  ;;  %12041 = vrot.lane.b32.xlu0 %v23978_v12, %s17829_s12  ;;  %v23984_v30 = vsel %vm12012_vm7, %v12004_v35, %v12020_v20  ;;  %v23986_v9 = vsel %vm12011_vm8, %v12003_v43, %v12019_v31  ;;  %vm12014_vm9 = vcmp.ge.f32.partialorder %v12006_v39, 0.0  ;;  %vm12013_vm10 = vcmp.ge.f32.partialorder %v12005_v57, 0.0 }
 0x88a   :  { %v12024_v49 = vmul.f32 0.01, %v12008_v17  ;;  %v12023_v37 = vmul.f32 0.01, %v12007_v63  ;;  %v23990_v52 = vsel %vm12014_vm9, %v12006_v39, %v12022_v59  ;;  %v23992_v10 = vsel %vm12013_vm10, %v12005_v57, %v12021_v8 }
 0x88b   :  { %vm12016_vm11 = vcmp.ge.f32.partialorder %v12008_v17, 0.0  ;;  %vm12015_vm12 = vcmp.ge.f32.partialorder %v12007_v63, 0.0 }
 0x88c   :  { %v23996_v7 = vsel %vm12016_vm11, %v12008_v17, %v12024_v49  ;;  %v23998_v16 = vsel %vm12015_vm12, %v12007_v63, %v12023_v37 }
 0x88d   :  { %12047 = vrot.lane.b32.xlu1 %v23984_v30, %s17829_s12  ;;  %12045 = vrot.lane.b32.xlu0 %v23986_v9, %s17829_s12 }
 0x891   :  { %12051 = vrot.lane.b32.xlu1 %v23990_v52, %s17829_s12  ;;  %12049 = vrot.lane.b32.xlu0 %v23992_v10, %s17829_s12 }
 0x895   :  { %12055 = vrot.lane.b32.xlu1 %v23996_v7, %s17829_s12  ;;  %12053 = vrot.lane.b32.xlu0 %v23998_v16, %s17829_s12 }
 0x899   :  { %12123 = vrot.lane.b32.xlu1 %v23976_v19, %s17830_s13  ;;  %12121 = vrot.lane.b32.xlu0 %v23978_v12, %s17830_s13 }
 0x89d   :  { %12127 = vrot.lane.b32.xlu1 %v23984_v30, %s17830_s13  ;;  %12125 = vrot.lane.b32.xlu0 %v23986_v9, %s17830_s13 }
 0x8a1   :  { %12131 = vrot.lane.b32.xlu1 %v23990_v52, %s17830_s13  ;;  %12129 = vrot.lane.b32.xlu0 %v23992_v10, %s17830_s13 }
 0x8a5   :  { %12135 = vrot.lane.b32.xlu1 %v23996_v7, %s17830_s13  ;;  %12133 = vrot.lane.b32.xlu0 %v23998_v16, %s17830_s13 }
 0x8fb   :  { %v12044_v36 = vpop.permute.xlu1 %12043  ;;  %v12042_v21 = vpop.permute.xlu0 %12041 }
 0x8fc   :  { %v12066_v53 = vadd.f32 %v12044_v36, %v23976_v19  ;;  %v12065_v34 = vadd.f32 %v12042_v21, %v23978_v12 }
 0x8fe   :  { %v13082_v55 = vmul.f32 -1.442695, %v12066_v53  ;;  %v13081_v27 = vmul.f32 -1.442695, %v12065_v34 }
 0x8ff   :  { %v12048_v33 = vpop.permute.xlu1 %12047  ;;  %v12046_v11 = vpop.permute.xlu0 %12045 }
 0x900   :  { %17744 = vpow2.f32 %v13082_v55  ;;  %v12068_v45 = vadd.f32 %v12048_v33, %v23984_v30  ;;  %v12067_v22 = vadd.f32 %v12046_v11, %v23986_v9 }
 0x901   :  { %17746 = vpow2.f32 %v13081_v27 }
 0x902   :  { %v13084_v5 = vmul.f32 -1.442695, %v12068_v45  ;;  %v13083_v48 = vmul.f32 -1.442695, %v12067_v22 }
 0x903   :  { %v12052_v41 = vpop.permute.xlu1 %12051  ;;  %v12050_v1 = vpop.permute.xlu0 %12049 }
 0x904   :  { %17748 = vpow2.f32 %v13084_v5  ;;  %v12070_v44 = vadd.f32 %v12052_v41, %v23990_v52  ;;  %v12069_v0 = vadd.f32 %v12050_v1, %v23992_v10 }
 0x905   :  { %17750 = vpow2.f32 %v13083_v48 }
 0x906   :  { %v13086_v50 = vmul.f32 -1.442695, %v12070_v44  ;;  %v13085_v4 = vmul.f32 -1.442695, %v12069_v0 }
 0x907   :  { %v12056_v32 = vpop.permute.xlu1 %12055  ;;  %v12054_v51 = vpop.permute.xlu0 %12053 }
 0x908   :  { %17752 = vpow2.f32 %v13086_v50  ;;  %v12072_v26 = vadd.f32 %v12056_v32, %v23996_v7  ;;  %v12071_v25 = vadd.f32 %v12054_v51, %v23998_v16 }
 0x909   :  { %17754 = vpow2.f32 %v13085_v4 }
 0x90a   :  { %v17745_v15 = vpop.eup %17744  ;;  %v13088_v42 = vmul.f32 -1.442695, %v12072_v26  ;;  %v13087_v56 = vmul.f32 -1.442695, %v12071_v25 }
 0x90b   :  { %v17747_v24 = vpop.eup %17746  ;;  %v12098_v28 = vadd.f32 1.0, %v17745_v15  ;;  %v12124_v54 = vpop.permute.xlu1 %12123 }
 0x90c   :  { %v12122_v23 = vpop.permute.xlu0 %12121  ;;  %v12097_v47 = vadd.f32 1.0, %v17747_v24  ;;  %17756 = vpow2.f32 %v13088_v42  ;;  %v12146_v40 = vadd.f32 %v12124_v54, %v23976_v19 }
 0x90d   :  { %v12145_v35 = vadd.f32 %v12122_v23, %v23978_v12  ;;  %17758 = vrcp.f32 %v12098_v28 }
 0x90e   :  { %v17749_v43 = vpop.eup %17748  ;;  %17760 = vrcp.f32 %v12097_v47  ;;  %v13090_v60 = vmul.f32 -1.442695, %v12146_v40 }
 0x90f   :  { %v17751_v62 = vpop.eup %17750  ;;  %v12100_v46 = vadd.f32 1.0, %v17749_v43  ;;  %17762 = vpow2.f32 %v13087_v56  ;;  %v13089_v2 = vmul.f32 -1.442695, %v12145_v35  ;;  %v12128_v39 = vpop.permute.xlu1 %12127 }
 0x910   :  { %v12126_v57 = vpop.permute.xlu0 %12125  ;;  %v12099_v20 = vadd.f32 1.0, %v17751_v62  ;;  %17764 = vpow2.f32 %v13090_v60  ;;  %v12148_v31 = vadd.f32 %v12128_v39, %v23984_v30 }
 0x911   :  { %v12147_v17 = vadd.f32 %v12126_v57, %v23986_v9  ;;  %17766 = vrcp.f32 %v12100_v46 }
 0x912   :  { %v17753_v19 = vpop.eup %17752  ;;  %17768 = vrcp.f32 %v12099_v20  ;;  %v13092_v12 = vmul.f32 -1.442695, %v12148_v31 }
 0x913   :  { %v17755_v63 = vpop.eup %17754  ;;  %v12102_v59 = vadd.f32 1.0, %v17753_v19  ;;  %17770 = vpow2.f32 %v13089_v2  ;;  %v13091_v8 = vmul.f32 -1.442695, %v12147_v17  ;;  %v12132_v49 = vpop.permute.xlu1 %12131 }
 0x914   :  { %v12130_v37 = vpop.permute.xlu0 %12129  ;;  %v12101_v61 = vadd.f32 1.0, %v17755_v63  ;;  %17772 = vpow2.f32 %v13092_v12  ;;  %v12150_v36 = vadd.f32 %v12132_v49, %v23990_v52 }
 0x915   :  { %v12149_v21 = vadd.f32 %v12130_v37, %v23992_v10  ;;  %17774 = vrcp.f32 %v12102_v59 }
 0x916   :  { %v17757_v30 = vpop.eup %17756  ;;  %17776 = vrcp.f32 %v12101_v61  ;;  %v13094_v9 = vmul.f32 -1.442695, %v12150_v36 }
 0x917   :  { %v13093_v53 = vmul.f32 -1.442695, %v12149_v21  ;;  %v17759_v34 = vpop.eup %17758  ;;  %v12104_v55 = vadd.f32 1.0, %v17757_v30  ;;  %17778 = vpow2.f32 %v13091_v8  ;;  %v12136_v27 = vpop.permute.xlu1 %12135 }
 0x918   :  { %v12134_v33 = vpop.permute.xlu0 %12133  ;;  %v17761_v11 = vpop.eup %17760  ;;  %17780 = vpow2.f32 %v13094_v9  ;;  %v12152_v45 = vadd.f32 %v12136_v27, %v23996_v7  ;;  %12208 = vperm.xlu1 %17735, %v17759_v34  }
 0x919   :  { %v12151_v22 = vadd.f32 %v12134_v33, %v23998_v16  ;;  %v17763_v52 = vpop.eup %17762  ;;  %17782 = vrcp.f32 %v12104_v55  ;;  %12203 = vperm.xlu0 %17734, %v17761_v11  }
 0x91a   :  { %v17765_v10 = vpop.eup %17764  ;;  %v12103_v5 = vadd.f32 1.0, %v17763_v52  ;;  %17784 = vpow2.f32 %v13093_v53  ;;  %v13096_v48 = vmul.f32 -1.442695, %v12152_v45 }
 0x91b   :  { %v17767_v41 = vpop.eup %17766  ;;  %v12178_v1 = vadd.f32 1.0, %v17765_v10  ;;  %v13095_v44 = vmul.f32 -1.442695, %v12151_v22 }
 0x91c   :  { %v17769_v0 = vpop.eup %17768  ;;  %17786 = vrcp.f32 %v12103_v5 }
 0x91d   :  { %v17771_v50 = vpop.eup %17770  ;;  %17788 = vrcp.f32 %v12178_v1  ;;  %12218 = vperm.xlu0 %17734, %v17767_v41   ;;  %12213 = vperm.xlu1 %17735, %v17769_v0  }
 0x91e   :  { %v17773_v7 = vpop.eup %17772  ;;  %v12177_v4 = vadd.f32 1.0, %v17771_v50  ;;  %17790 = vpow2.f32 %v13096_v48 }
 0x91f   :  { %v17775_v16 = vpop.eup %17774  ;;  %v12180_v32 = vadd.f32 1.0, %v17773_v7  ;;  %17792 = vpow2.f32 %v13095_v44 }
 0x920   :  { %v17777_v51 = vpop.eup %17776  ;;  %17794 = vrcp.f32 %v12177_v4 }
 0x921   :  { %v17779_v26 = vpop.eup %17778  ;;  %17796 = vrcp.f32 %v12180_v32  ;;  %12228 = vperm.xlu0 %17734, %v17775_v16   ;;  %12223 = vperm.xlu1 %17735, %v17777_v51  }
 0x922   :  { %v17781_v25 = vpop.eup %17780  ;;  %v12179_v15 = vadd.f32 1.0, %v17779_v26  ;;  %v17811_v26 = vld [vmem:[%s24119_s2] sm:$0xff] }
 0x923   :  { %v17783_v42 = vpop.eup %17782  ;;  %v12182_v24 = vadd.f32 1.0, %v17781_v25 }
 0x924   :  { %v17785_v28 = vpop.eup %17784  ;;  %17798 = vrcp.f32 %v12179_v15 }
 0x925   :  { %17800 = vrcp.f32 %v12182_v24  ;;  %v12181_v56 = vadd.f32 1.0, %v17785_v28  ;;  %12238 = vperm.xlu0 %17734, %v17783_v42   ;;  %v17812_v24 = vld [vmem:[%s24119_s2 + $0x18] sm:$0xff] }
 0x926   :  { %v17787_v54 = vpop.eup %17786 }
 0x927   :  { %v17789_v23 = vpop.eup %17788  ;;  %17802 = vrcp.f32 %v12181_v56  ;;  %12233 = vperm.xlu1 %17735, %v17787_v54  }
 0x928   :  { %v17791_v47 = vpop.eup %17790 }
 0x929   :  { %v17793_v40 = vpop.eup %17792  ;;  %v12184_v35 = vadd.f32 1.0, %v17791_v47  ;;  %12256 = vperm.xlu0 %17734, %v17789_v23   ;;  %v17813_v23 = vld [vmem:[%s24119_s2 + $0x10] sm:$0xff] }
 0x92a   :  { %v17795_v43 = vpop.eup %17794  ;;  %v12183_v60 = vadd.f32 1.0, %v17793_v40 }
 0x92b   :  { %v17797_v62 = vpop.eup %17796  ;;  %17804 = vrcp.f32 %v12184_v35  ;;  %12251 = vperm.xlu1 %17735, %v17795_v43   ;;  %v17814_v43 = vld [vmem:[%s24119_s2 + $0x28] sm:$0xff] }
 0x92c   :  { %17806 = vrcp.f32 %v12183_v60 }
 0x92d   :  { %12266 = vperm.xlu0 %17734, %v17797_v62  }
 0x92e   :  { %v17799_v46 = vpop.eup %17798 }
 0x92f   :  { %v17801_v2 = vpop.eup %17800  ;;  %12261 = vperm.xlu1 %17735, %v17799_v46  }
 0x931   :  { %v17803_v39 = vpop.eup %17802  ;;  %12276 = vperm.xlu0 %17734, %v17801_v2   ;;  %v17815_v2 = vld [vmem:[%s24119_s2 + $0x20] sm:$0xff] }
 0x933   :  { %12271 = vperm.xlu1 %17735, %v17803_v39  }
 0x935   :  { %v17805_v57 = vpop.eup %17804 }
 0x936   :  { %v17807_v20 = vpop.eup %17806  ;;  %12286 = vperm.xlu0 %17734, %v17805_v57  }
 0x937   :  { %12281 = vperm.xlu1 %17735, %v17807_v20  }
 0x997   :  { %v12209_v31 = vpop.permute.xlu1 %12208 }
 0x998   :  { %v12242_v17 = vmul.f32 %v12209_v31, %v23780_v18  ;;  %v12204_v19 = vpop.permute.xlu0 %12203  ;;  %v17816_v31 = vld [vmem:[%s24119_s2 + $0x38] sm:$0xff] }
 0x999   :  { %v12241_v12 = vmul.f32 %v12204_v19, %v23782_v14 }
 0x99a   :  { %12307 = vrot.lane.b32.xlu0 %v12242_v17, %s17832_s20 }
 0x99b   :  { %12305 = vrot.lane.b32.xlu1 %v12241_v12, %s17832_s20  ;;  %v17817_v12 = vld [vmem:[%s24119_s2 + $0x30] sm:$0xff] }
 0x99c   :  { %v12214_v63 = vpop.permute.xlu1 %12213  ;;  %v12219_v59 = vpop.permute.xlu0 %12218 }
 0x99d   :  { %v12243_v8 = vmul.f32 %v12214_v63, %v23788_v29  ;;  %v12244_v49 = vmul.f32 %v12219_v59, %v23791_v6 }
 0x99f   :  { %12309 = vrot.lane.b32.xlu1 %v12243_v8, %s17832_s20  ;;  %12311 = vrot.lane.b32.xlu0 %v12244_v49, %s17832_s20 }
 0x9a0   :  { %v12224_v37 = vpop.permute.xlu1 %12223  ;;  %v12229_v61 = vpop.permute.xlu0 %12228 }
 0x9a1   :  { %v12245_v36 = vmul.f32 %v12224_v37, %v23797_v58  ;;  %v12246_v21 = vmul.f32 %v12229_v61, %v23801_v3 }
 0x9a3   :  { %12313 = vrot.lane.b32.xlu1 %v12245_v36, %s17832_s20  ;;  %12315 = vrot.lane.b32.xlu0 %v12246_v21, %s17832_s20 }
 0x9a4   :  { %v12239_v30 = vpop.permute.xlu0 %12238 }
 0x9a5   :  { %v12248_v9 = vmul.f32 %v12239_v30, %v23811_v38 }
 0x9a6   :  { %v12234_v53 = vpop.permute.xlu1 %12233 }
 0x9a7   :  { %v12247_v34 = vmul.f32 %v12234_v53, %v23806_v13  ;;  %12319 = vrot.lane.b32.xlu0 %v12248_v9, %s17832_s20 }
 0x9a8   :  { %v12257_v55 = vpop.permute.xlu0 %12256 }
 0x9a9   :  { %12317 = vrot.lane.b32.xlu1 %v12247_v34, %s17832_s20  ;;  %v12290_v27 = vmul.f32 %v12257_v55, %v23780_v18 }
 0x9aa   :  { %v12252_v33 = vpop.permute.xlu1 %12251 }
 0x9ab   :  { %v12289_v11 = vmul.f32 %v12252_v33, %v23782_v14  ;;  %12339 = vrot.lane.b32.xlu0 %v12290_v27, %s17833_s17 }
 0x9ac   :  { %v12267_v45 = vpop.permute.xlu0 %12266 }
 0x9ad   :  { %12337 = vrot.lane.b32.xlu1 %v12289_v11, %s17833_s17  ;;  %v12292_v22 = vmul.f32 %v12267_v45, %v23791_v6 }
 0x9ae   :  { %v12262_v52 = vpop.permute.xlu1 %12261 }
 0x9af   :  { %v12291_v10 = vmul.f32 %v12262_v52, %v23788_v29  ;;  %12343 = vrot.lane.b32.xlu0 %v12292_v22, %s17833_s17 }
 0x9b0   :  { %v12277_v5 = vpop.permute.xlu0 %12276 }
 0x9b1   :  { %12341 = vrot.lane.b32.xlu1 %v12291_v10, %s17833_s17  ;;  %v12294_v48 = vmul.f32 %v12277_v5, %v23801_v3 }
 0x9b2   :  { %v12272_v41 = vpop.permute.xlu1 %12271 }
 0x9b3   :  { %v12293_v18 = vmul.f32 %v12272_v41, %v23797_v58  ;;  %12347 = vrot.lane.b32.xlu0 %v12294_v48, %s17833_s17  ;;  %v17810_v58 = vld [vmem:[%s24119_s2 + $0x8] sm:$0xff] }
 0x9b5   :  { %12345 = vrot.lane.b32.xlu1 %v12293_v18, %s17833_s17  ;;  %v12287_v14 = vpop.permute.xlu0 %12286 }
 0x9b6   :  { %v12282_v1 = vpop.permute.xlu1 %12281  ;;  %v12296_v44 = vmul.f32 %v12287_v14, %v23811_v38 }
 0x9b7   :  { %v12295_v0 = vmul.f32 %v12282_v1, %v23806_v13 }
 0x9b8   :  { %12351 = vrot.lane.b32.xlu0 %v12296_v44, %s17833_s17 }
 0x9b9   :  { %12349 = vrot.lane.b32.xlu1 %v12295_v0, %s17833_s17 }
 0xa0c   :  { %v12308_v6 = vpop.permute.xlu0 %12307 }
 0xa0d   :  { %v12306_v29 = vpop.permute.xlu1 %12305  ;;  %v12362_v51 = vsel %vm111_vm0, %v17810_v58, %v12308_v6 }
 0xa0e   :  { %v12361_v25 = vsel %vm111_vm0, %v17811_v26, %v12306_v29 }
 0xa11   :  { %v12310_v50 = vpop.permute.xlu1 %12309  ;;  %v12312_v7 = vpop.permute.xlu0 %12311 }
 0xa12   :  { %v12364_v28 = vsel %vm111_vm0, %v17812_v24, %v12312_v7  ;;  %v12363_v47 = vsel %vm111_vm0, %v17813_v23, %v12310_v50 }
 0xa15   :  { %v12314_v4 = vpop.permute.xlu1 %12313  ;;  %v12316_v16 = vpop.permute.xlu0 %12315 }
 0xa16   :  { %v12366_v60 = vsel %vm111_vm0, %v17814_v43, %v12316_v16  ;;  %v12365_v39 = vsel %vm111_vm0, %v17815_v2, %v12314_v4 }
 0xa19   :  { %v12320_v3 = vpop.permute.xlu0 %12319 }
 0xa1a   :  { %v12368_v17 = vsel %vm111_vm0, %v17816_v31, %v12320_v3 }
 0xa1b   :  { %v12318_v32 = vpop.permute.xlu1 %12317 }
 0xa1c   :  { %v12367_v63 = vsel %vm111_vm0, %v17817_v12, %v12318_v32 }
 0xa1d   :  { %v12340_v38 = vpop.permute.xlu0 %12339 }
 0xa1e   :  { %v12371_v13 = vsel %vm12369_vm14, %v12362_v51, %v12340_v38 }
 0xa1f   :  { %v12338_v15 = vpop.permute.xlu1 %12337  ;;  %12379 = vst.msk [vmem:[%s24128_s14 + $0x8] sm:$0xff] %vm11516_vm13, %v12371_v13 }
 0xa20   :  { %v12370_v42 = vsel %vm12369_vm14, %v12361_v25, %v12338_v15 }
 0xa21   :  { %12378 = vst.msk [vmem:[%s24128_s14] sm:$0xff] %vm11516_vm13, %v12370_v42  ;;  %v12344_v56 = vpop.permute.xlu0 %12343 }
 0xa22   :  { %v12373_v54 = vsel %vm12369_vm14, %v12364_v28, %v12344_v56 }
 0xa23   :  { %v12342_v40 = vpop.permute.xlu1 %12341  ;;  %12381 = vst.msk [vmem:[%s24128_s14 + $0x18] sm:$0xff] %vm11516_vm13, %v12373_v54 }
 0xa24   :  { %v12372_v35 = vsel %vm12369_vm14, %v12363_v47, %v12342_v40 }
 0xa25   :  { %12380 = vst.msk [vmem:[%s24128_s14 + $0x10] sm:$0xff] %vm11516_vm13, %v12372_v35  ;;  %v12348_v62 = vpop.permute.xlu0 %12347 }
 0xa26   :  { %v12375_v46 = vsel %vm12369_vm14, %v12366_v60, %v12348_v62 }
 0xa27   :  { %v12346_v57 = vpop.permute.xlu1 %12345  ;;  %12383 = vst.msk [vmem:[%s24128_s14 + $0x28] sm:$0xff] %vm11516_vm13, %v12375_v46 }
 0xa28   :  { %v12374_v20 = vsel %vm12369_vm14, %v12365_v39, %v12346_v57 }
 0xa29   :  { %12382 = vst.msk [vmem:[%s24128_s14 + $0x20] sm:$0xff] %vm11516_vm13, %v12374_v20 }
 0xa2a   :  { %v12352_v19 = vpop.permute.xlu0 %12351 }
 0xa2b   :  { %v12350_v59 = vpop.permute.xlu1 %12349  ;;  %v12377_v8 = vsel %vm12369_vm14, %v12368_v17, %v12352_v19 }
 0xa2c   :  { %v12376_v49 = vsel %vm12369_vm14, %v12367_v63, %v12350_v59  ;;  %12385 = vst.msk [vmem:[%s24128_s14 + $0x38] sm:$0xff] %vm11516_vm13, %v12377_v8 }
 0xa2d   :  { %12384 = vst.msk [vmem:[%s24128_s14 + $0x30] sm:$0xff] %vm11516_vm13, %v12376_v49 }

</bundles_post_ra>
